<compile_context>
chip_gen: v6e
topology: v6e:2x2x1
jax: 0.10.0
libtpu: 0.0.40
codegen_flags: <defaults>
</compile_context>

<pallas_src>
import math

import jax
import jax.numpy as jnp
from jax import lax
from jax.experimental import pallas as pl
from jax.experimental.pallas import tpu as pltpu

BN_EPS = 1e-5
_BN_INV_STD = 1.0 / math.sqrt(1.0 + BN_EPS)  # eval-mode BN, running_mean=0, running_var=1


# ----------------------------- fused kernel -----------------------------

def _make_diffpool_kernel(layout, c1, c2):
    """Whole-model forward (2 pooling levels + readout) for TB graphs per grid step."""

    def kernel(x_ref, adj_ref, m_ref, wf_ref, w64_ref, pk_ref, out_ref, loss_ref):

        def mm(h, w):
            # (tb, n, fin) @ (fin, fout).  Flatten to (tb*n, fin) when the node dim is
            # sublane-tile aligned (free reshape, better MXU row occupancy); otherwise
            # unrolled per-graph 2-D dots (only the tiny C2-node level hits this).
            tb, n, fin = h.shape
            if n % 8 == 0:
                return jnp.dot(h.reshape(tb * n, fin), w,
                               preferred_element_type=jnp.float32
                               ).reshape(tb, n, w.shape[-1])
            return jnp.stack(
                [jnp.dot(h[g], w, preferred_element_type=jnp.float32)
                 for g in range(tb)], axis=0)

        def sage_bn(h, adj, deg_inv, mask, ce):
            # DenseSAGEConv -> (mask) -> ReLU -> eval-mode BatchNorm.
            wref = wf_ref if ce["slab"] == "wf" else w64_ref
            w_rel, w_root = wref[ce["rel"]], wref[ce["root"]]
            pk = pk_ref[ce["pack"]:ce["pack"] + 3]          # rows: [bias, gamma/std, beta]
            agg = jnp.einsum("bij,bjf->bif", adj, h,
                             preferred_element_type=jnp.float32) * deg_inv
            out = mm(agg, w_rel) + mm(h, w_root) + pk[0:1]
            if mask is not None:
                out = out * mask
            out = jnp.maximum(out, 0.0)
            # TODO(synk): BatchNorm1d uses eval-mode running stats (0/1), not batch stats.
            return pk[1:2] * out + pk[2:3]

        def run_gnn(h, adj, deg_inv, mask, g):
            for ce in g["convs"]:
                h = sage_bn(h, adj, deg_inv, mask, ce)
            if g["lin"] is not None:
                lw = w64_ref[g["lin"]["w"]]
                lb = pk_ref[g["lin"]["b"]:g["lin"]["b"] + 1]
                h = jnp.maximum(mm(h, lw) + lb, 0.0)
            return h

        def diff_pool(z, adj, s_pad, mask, c):
            # dense_diff_pool, reordered: A@S first, trace as a VPU reduce, entropy
            # from softmax intermediates (one log per row).
            tb = z.shape[0]
            t = s_pad[:, :, :c]                               # drop zero-padded channels
            t = t - jnp.max(t, axis=-1, keepdims=True)
            e = jnp.exp(t)
            denom = jnp.sum(e, axis=-1, keepdims=True)
            p = e / denom                                     # exact softmax
            ent_row = jnp.log(denom) - jnp.sum(p * t, axis=-1, keepdims=True)
            if mask is not None:
                z = z * mask
                p = p * mask
                ent_row = ent_row * mask
            ent = jnp.sum(ent_row)
            a_s = jnp.einsum("bij,bjc->bic", adj, p,
                             preferred_element_type=jnp.float32)        # A @ S
            # ||A - S S^T||^2 = sum(A^2) - 2 tr(S^T A S) + ||S^T S||^2
            ssq = jnp.sum(adj * adj) - 2.0 * jnp.sum(p * a_s)
            tdot = (((0,), (0,)), ((), ()))                              # a^T @ b (2-D)
            xs, adjs = [], []
            for g in range(tb):
                pg = p[g]
                xs.append(lax.dot_general(pg, z[g], tdot,
                                          preferred_element_type=jnp.float32))     # (C,H)
                adjs.append(lax.dot_general(pg, a_s[g], tdot,
                                            preferred_element_type=jnp.float32))   # (C,C)
                gram = lax.dot_general(pg, pg, tdot,
                                       preferred_element_type=jnp.float32)
                ssq = ssq + jnp.sum(gram * gram)
            return jnp.stack(xs, 0), jnp.stack(adjs, 0), ssq, ent

        x = x_ref[...]        # (TB, N, F)
        adj = adj_ref[...]    # (TB, N, N)
        m = m_ref[...]        # (TB, N, 1)

        # ---- level 1 ----
        di = 1.0 / jnp.maximum(jnp.sum(adj, axis=-1, keepdims=True), 1.0)
        s1 = run_gnn(x, adj, di, m, layout["gnn1_pool"])
        z1 = run_gnn(x, adj, di, m, layout["gnn1_embed"])
        x1, adj1, ssq1, ent1 = diff_pool(z1, adj, s1, m, c1)

        # ---- level 2 (no mask) ----
        di = 1.0 / jnp.maximum(jnp.sum(adj1, axis=-1, keepdims=True), 1.0)
        s2 = run_gnn(x1, adj1, di, None, layout["gnn2_pool"])
        z2 = run_gnn(x1, adj1, di, None, layout["gnn2_embed"])
        x2, adj2, ssq2, ent2 = diff_pool(z2, adj1, s2, None, c2)

        # ---- level 3 + readout ----
        di = 1.0 / jnp.maximum(jnp.sum(adj2, axis=-1, keepdims=True), 1.0)
        h3 = run_gnn(x2, adj2, di, None, layout["gnn3_embed"])
        hm = jnp.mean(h3, axis=1)                                       # (TB, H)
        lin1, lin2 = layout["lin1"], layout["lin2"]
        r = jnp.maximum(
            jnp.dot(hm, w64_ref[lin1["w"]], preferred_element_type=jnp.float32)
            + pk_ref[lin1["b"]:lin1["b"] + 1], 0.0)
        out = (jnp.dot(r, w64_ref[lin2["w"]], preferred_element_type=jnp.float32)
               + pk_ref[lin2["b"]:lin2["b"] + 1])
        out_ref[0] = out

        # packed per-step loss partials: [ssq1, ent1, ssq2, ent2]
        lane = lax.broadcasted_iota(jnp.int32, (1, 4), 1)
        loss_ref[0] = (jnp.where(lane == 0, ssq1, 0.0)
                       + jnp.where(lane == 1, ent1, 0.0)
                       + jnp.where(lane == 2, ssq2, 0.0)
                       + jnp.where(lane == 3, ent2, 0.0))

    return kernel


# ----------------------------- pallas_call wrapper -----------------------------

def _pick_graphs_per_step(batch, nodes):
    divisors = [d for d in range(1, batch + 1) if batch % d == 0]
    ok = [d for d in divisors if d == 1 or d * nodes <= 256]
    multi = [d for d in ok if batch // d >= 2]        # keep >=2 grid steps (v7x 2 TCs)
    return max(multi) if multi else max(ok)


def diffpool_forward(slabs, layout, x, adj, mask, c1, c2, graphs_per_step=None):
    B, N, F = x.shape
    H = slabs["w64"].shape[-1]
    tb = graphs_per_step or _pick_graphs_per_step(B, N)
    assert B % tb == 0, (B, tb)
    steps = B // tb
    m = mask.astype(jnp.float32)[..., None]            # (B, N, 1)

    out, losses = pl.pallas_call(
        _make_diffpool_kernel(layout, c1, c2),
        out_shape=(jax.ShapeDtypeStruct((steps, tb, H), jnp.float32),
                   jax.ShapeDtypeStruct((steps, 1, 4), jnp.float32)),
        grid=(steps,),
        in_specs=[
            pl.BlockSpec((tb, N, F), lambda b: (b, 0, 0)),
            pl.BlockSpec((tb, N, N), lambda b: (b, 0, 0)),
            pl.BlockSpec((tb, N, 1), lambda b: (b, 0, 0)),
            pl.BlockSpec(slabs["wf"].shape, lambda b: (0, 0, 0)),     # param slabs: fetched once
            pl.BlockSpec(slabs["w64"].shape, lambda b: (0, 0, 0)),
            pl.BlockSpec(slabs["packs"].shape, lambda b: (0, 0)),
        ],
        out_specs=(pl.BlockSpec((1, tb, H), lambda b: (b, 0, 0)),
                   pl.BlockSpec((1, 1, 4), lambda b: (b, 0, 0))),
        compiler_params=pltpu.CompilerParams(dimension_semantics=("parallel",)),
    )(x, adj, m, slabs["wf"], slabs["w64"], slabs["packs"])

    out = out.reshape(B, H)
    ssq1 = jnp.maximum(jnp.sum(losses[:, 0, 0]), 0.0)
    ent1 = jnp.sum(losses[:, 0, 1])
    ssq2 = jnp.maximum(jnp.sum(losses[:, 0, 2]), 0.0)
    ent2 = jnp.sum(losses[:, 0, 3])
    # ||adj - S S^T||_F / adj.numel()   and   mean entropy over (B, nodes)
    link_loss = jnp.sqrt(ssq1) / (B * N * N) + jnp.sqrt(ssq2) / (B * c1 * c1)
    ent_loss = ent1 / (B * N) + ent2 / (B * c1)
    return out, link_loss, ent_loss


# ----------------------------- parameters: init + slab packing -----------------------------

def _init_linear(key, fin, fout):
    k1, k2 = jax.random.split(key)
    bound = 1.0 / math.sqrt(fin)
    w = jax.random.uniform(k1, (fin, fout), jnp.float32, -bound, bound)
    b = jax.random.uniform(k2, (fout,), jnp.float32, -bound, bound)
    return w, b


def _init_conv(key, fin, fout):
    k1, k2 = jax.random.split(key)
    w_rel, b_rel = _init_linear(k1, fin, fout)
    w_root, b_root = _init_linear(k2, fin, fout)
    return {"w_rel": w_rel, "w_root": w_root, "bias": b_rel + b_root,
            "gamma": jnp.ones((fout,), jnp.float32),
            "beta": jnp.zeros((fout,), jnp.float32)}


def _init_gnn(key, fin, hidden, fout, lin=True):
    ks = jax.random.split(key, 4)
    g = {"convs": [_init_conv(ks[0], fin, hidden),
                   _init_conv(ks[1], hidden, hidden),
                   _init_conv(ks[2], hidden, fout)]}
    if lin:
        w, b = _init_linear(ks[3], fout, fout)
        g["lin"] = {"w": w, "b": b}
    else:
        g["lin"] = None
    return g


def init_diffpool_params(key, num_features, max_nodes, hidden=64):
    c1 = math.ceil(0.25 * max_nodes)
    c2 = math.ceil(0.25 * c1)
    ks = jax.random.split(key, 7)
    params = {
        "gnn1_pool": _init_gnn(ks[0], num_features, hidden, c1, lin=True),
        "gnn1_embed": _init_gnn(ks[1], num_features, hidden, hidden, lin=True),
        "gnn2_pool": _init_gnn(ks[2], hidden, hidden, c2, lin=True),
        "gnn2_embed": _init_gnn(ks[3], hidden, hidden, hidden, lin=False),
        "gnn3_embed": _init_gnn(ks[4], hidden, hidden, hidden, lin=False),
        "lin1": dict(zip(("w", "b"), _init_linear(ks[5], hidden, hidden))),
        "lin2": dict(zip(("w", "b"), _init_linear(ks[6], hidden, hidden))),
    }
    return params, c1, c2


def pack_diffpool_params(params, hidden=64):
    """Pack all parameters into 3 slabs + a static index layout.

    Narrow heads (pooling conv3 / lin with fout=C < hidden) are zero-padded to width
    `hidden`; their padded channels stay exactly 0 through ReLU/BN and are sliced off
    inside the kernel right before the cluster softmax, so the math is unchanged.
    """
    H = hidden
    wf_list, w64_list, pk_rows = [], [], []

    def pad2(a):
        return jnp.zeros((H, H), jnp.float32).at[:a.shape[0], :a.shape[1]].set(a)

    def padrow(v):
        return jnp.zeros((H,), jnp.float32).at[:v.shape[0]].set(v)

    def add_w64(a):
        w64_list.append(pad2(a))
        return len(w64_list) - 1

    def add_rows(rows):
        start = len(pk_rows)
        pk_rows.extend(padrow(r) for r in rows)
        return start

    def pack_conv(conv, first):
        if first:
            wf_list.append(conv["w_rel"])
            wf_list.append(conv["w_root"])
            slab, rel, root = "wf", len(wf_list) - 2, len(wf_list) - 1
        else:
            slab, rel, root = "w64", add_w64(conv["w_rel"]), add_w64(conv["w_root"])
        prow = add_rows([conv["bias"], conv["gamma"] * _BN_INV_STD, conv["beta"]])
        return {"slab": slab, "rel": rel, "root": root, "pack": prow}

    def pack_lin(lin):
        if lin is None:
            return None
        return {"w": add_w64(lin["w"]), "b": add_rows([lin["b"]])}

    def pack_gnn(g, first=False):
        return {"convs": [pack_conv(c, first and i == 0)
                          for i, c in enumerate(g["convs"])],
                "lin": pack_lin(g["lin"])}

    layout = {
        "gnn1_pool": pack_gnn(params["gnn1_pool"], first=True),
        "gnn1_embed": pack_gnn(params["gnn1_embed"], first=True),
        "gnn2_pool": pack_gnn(params["gnn2_pool"]),
        "gnn2_embed": pack_gnn(params["gnn2_embed"]),
        "gnn3_embed": pack_gnn(params["gnn3_embed"]),
        "lin1": pack_lin(params["lin1"]),
        "lin2": pack_lin(params["lin2"]),
    }
    slabs = {"wf": jnp.stack(wf_list, axis=0),       # (4, F, H)   first-layer conv weights
             "w64": jnp.stack(w64_list, axis=0),     # (K, H, H)   all other weights (padded)
             "packs": jnp.stack(pk_rows, axis=0)}    # (M, H)      biases / BN packs (padded)
    return slabs, layout


# ----------------------------- main -----------------------------

if __name__ == "__main__":
    B, N, F = 4, 32, 32          # batch, max_nodes, num_features
    HIDDEN = 64
    key = jax.random.PRNGKey(0)
    kp, kx, ka = jax.random.split(key, 3)

    params, C1, C2 = init_diffpool_params(kp, num_features=F, max_nodes=N, hidden=HIDDEN)
    slabs, layout = pack_diffpool_params(params, hidden=HIDDEN)

    x = jax.random.normal(kx, (B, N, F), jnp.float32)
    lengths = jnp.array([N, 24, 17, 9], jnp.int32)
    mask = jnp.arange(N)[None, :] < lengths[:, None]          # (B, N) bool
    mf = mask.astype(jnp.float32)

    r = jax.random.uniform(ka, (B, N, N))
    adj = (r < 0.3).astype(jnp.float32)
    adj = jnp.maximum(adj, jnp.transpose(adj, (0, 2, 1)))     # symmetric
    adj = jnp.maximum(adj, jnp.eye(N, dtype=jnp.float32)[None])   # self loops
    adj = adj * mf[:, :, None] * mf[:, None, :]               # zero padded rows/cols
    x = x * mf[:, :, None]

    @jax.jit
    def fwd(slabs_, x_, adj_, mask_):
        return diffpool_forward(slabs_, layout, x_, adj_, mask_, C1, C2)

    out, link_loss, ent_loss = fwd(slabs, x, adj, mask)
    jax.block_until_ready((out, link_loss, ent_loss))
    assert out.shape == (B, HIDDEN)
    assert bool(jnp.isfinite(link_loss)) and bool(jnp.isfinite(ent_loss))
    print("KERNEL_OK")
</pallas_src>

<mosaic_0001>
module attributes {stable_mosaic.version = 11 : i64} {
  func.func @kernel(%arg0: i32, %arg1: memref<2x32x32xf32, #tpu.memory_space<vmem>>, %arg2: memref<2x32x32xf32, #tpu.memory_space<vmem>>, %arg3: memref<2x32x1xf32, #tpu.memory_space<vmem>>, %arg4: memref<4x32x64xf32, #tpu.memory_space<vmem>>, %arg5: memref<31x64x64xf32, #tpu.memory_space<vmem>>, %arg6: memref<50x64xf32, #tpu.memory_space<vmem>>, %arg7: memref<1x2x64xf32, #tpu.memory_space<vmem>>, %arg8: memref<1x1x4xf32, #tpu.memory_space<vmem>>) attributes {dimension_semantics = [#tpu.dimension_semantics<parallel>], iteration_bounds = array<i64: 2>, scalar_prefetch = 0 : i64, scratch_operands = 0 : i64, tpu.core_type = #tpu.core_type<tc>, window_params = [{transform_indices = @transform_0, window_bounds = array<i64: 2, 32, 32>}, {transform_indices = @transform_1, window_bounds = array<i64: 2, 32, 32>}, {transform_indices = @transform_2, window_bounds = array<i64: 2, 32, 1>}, {pipeline_mode = #tpu.pipeline_mode<synchronous>, transform_indices = @transform_3, window_bounds = array<i64: 4, 32, 64>}, {pipeline_mode = #tpu.pipeline_mode<synchronous>, transform_indices = @transform_4, window_bounds = array<i64: 31, 64, 64>}, {pipeline_mode = #tpu.pipeline_mode<synchronous>, transform_indices = @transform_5, window_bounds = array<i64: 50, 64>}, {transform_indices = @transform_6, window_bounds = array<i64: 1, 2, 64>}, {transform_indices = @transform_7, window_bounds = array<i64: 1, 1, 4>}]} {
    %c0 = arith.constant 0 : index
    %c0_0 = arith.constant 0 : index
    %c0_1 = arith.constant 0 : index
    %0 = vector.load %arg1[%c0, %c0_0, %c0_1] : memref<2x32x32xf32, #tpu.memory_space<vmem>>, vector<2x32x32xf32>
    %c0_2 = arith.constant 0 : index
    %c0_3 = arith.constant 0 : index
    %c0_4 = arith.constant 0 : index
    %1 = vector.load %arg2[%c0_2, %c0_3, %c0_4] : memref<2x32x32xf32, #tpu.memory_space<vmem>>, vector<2x32x32xf32>
    %c0_5 = arith.constant 0 : index
    %c0_6 = arith.constant 0 : index
    %c0_7 = arith.constant 0 : index
    %2 = vector.load %arg3[%c0_5, %c0_6, %c0_7] : memref<2x32x1xf32, #tpu.memory_space<vmem>>, vector<2x32x1xf32>
    %cst = arith.constant dense<0.000000e+00> : vector<2x32xf32>
    %3 = vector.multi_reduction <add>, %1, %cst [2] : vector<2x32x32xf32> to vector<2x32xf32>
    %4 = vector.shape_cast %3 : vector<2x32xf32> to vector<2x32x1xf32>
    %cst_8 = arith.constant 1.000000e+00 : f32
    %5 = vector.broadcast %cst_8 : f32 to vector<2x32x1xf32>
    %6 = arith.maximumf %4, %5 : vector<2x32x1xf32>
    %cst_9 = arith.constant 1.000000e+00 : f32
    %7 = vector.broadcast %cst_9 : f32 to vector<2x32x1xf32>
    %8 = arith.divf %7, %6 : vector<2x32x1xf32>
    %c0_10 = arith.constant 0 : index
    %c0_11 = arith.constant 0 : index
    %c0_12 = arith.constant 0 : index
    %9 = vector.load %arg4[%c0_10, %c0_11, %c0_12] : memref<4x32x64xf32, #tpu.memory_space<vmem>>, vector<1x32x64xf32>
    %10 = vector.shape_cast %9 : vector<1x32x64xf32> to vector<32x64xf32>
    %c1 = arith.constant 1 : index
    %c0_13 = arith.constant 0 : index
    %c0_14 = arith.constant 0 : index
    %11 = vector.load %arg4[%c1, %c0_13, %c0_14] : memref<4x32x64xf32, #tpu.memory_space<vmem>>, vector<1x32x64xf32>
    %12 = vector.shape_cast %11 : vector<1x32x64xf32> to vector<32x64xf32>
    %c0_15 = arith.constant 0 : index
    %c0_16 = arith.constant 0 : index
    %13 = vector.load %arg6[%c0_15, %c0_16] : memref<50x64xf32, #tpu.memory_space<vmem>>, vector<3x64xf32>
    "tpu.trace_start"() <{level = 10 : i32, message = "bij,bjf->bif"}> : () -> ()
    %cst_17 = arith.constant dense<0.000000e+00> : vector<2x32x32xf32>
    %14 = tpu.matmul %1, %0, %cst_17 {dimension_numbers = #tpu.dot_dimension_numbers<[2], [1], [1], [2], [0, 0, 0, 1, 1, 2], [0], [0]>} : vector<2x32x32xf32>, vector<2x32x32xf32>, vector<2x32x32xf32> -> vector<2x32x32xf32>
    "tpu.trace_stop"() : () -> ()
    %15 = vector.broadcast %8 : vector<2x32x1xf32> to vector<2x32x32xf32>
    %16 = arith.mulf %14, %15 : vector<2x32x32xf32>
    %17 = vector.shape_cast %16 : vector<2x32x32xf32> to vector<64x32xf32>
    %cst_18 = arith.constant dense<0.000000e+00> : vector<64x64xf32>
    %18 = tpu.matmul %17, %10, %cst_18 {dimension_numbers = #tpu.dot_dimension_numbers<[1], [0], [0], [1], [0, 0, 1, 1], [], []>} : vector<64x32xf32>, vector<32x64xf32>, vector<64x64xf32> -> vector<64x64xf32>
    %19 = vector.shape_cast %18 : vector<64x64xf32> to vector<2x32x64xf32>
    %20 = vector.shape_cast %0 : vector<2x32x32xf32> to vector<64x32xf32>
    %cst_19 = arith.constant dense<0.000000e+00> : vector<64x64xf32>
    %21 = tpu.matmul %20, %12, %cst_19 {dimension_numbers = #tpu.dot_dimension_numbers<[1], [0], [0], [1], [0, 0, 1, 1], [], []>} : vector<64x32xf32>, vector<32x64xf32>, vector<64x64xf32> -> vector<64x64xf32>
    %22 = vector.shape_cast %21 : vector<64x64xf32> to vector<2x32x64xf32>
    %23 = arith.addf %19, %22 : vector<2x32x64xf32>
    %24 = vector.extract_strided_slice %13 {offsets = [0, 0], sizes = [1, 64], strides = [1, 1]} : vector<3x64xf32> to vector<1x64xf32>
    %25 = vector.shape_cast %24 : vector<1x64xf32> to vector<1x1x64xf32>
    %26 = vector.broadcast %25 : vector<1x1x64xf32> to vector<2x32x64xf32>
    %27 = arith.addf %23, %26 : vector<2x32x64xf32>
    %28 = vector.broadcast %2 : vector<2x32x1xf32> to vector<2x32x64xf32>
    %29 = arith.mulf %27, %28 : vector<2x32x64xf32>
    %cst_20 = arith.constant 0.000000e+00 : f32
    %30 = vector.broadcast %cst_20 : f32 to vector<2x32x64xf32>
    %31 = arith.maximumf %29, %30 : vector<2x32x64xf32>
    %32 = vector.extract_strided_slice %13 {offsets = [1, 0], sizes = [1, 64], strides = [1, 1]} : vector<3x64xf32> to vector<1x64xf32>
    %33 = vector.shape_cast %32 : vector<1x64xf32> to vector<1x1x64xf32>
    %34 = vector.broadcast %33 : vector<1x1x64xf32> to vector<2x32x64xf32>
    %35 = arith.mulf %34, %31 : vector<2x32x64xf32>
    %36 = vector.extract_strided_slice %13 {offsets = [2, 0], sizes = [1, 64], strides = [1, 1]} : vector<3x64xf32> to vector<1x64xf32>
    %37 = vector.shape_cast %36 : vector<1x64xf32> to vector<1x1x64xf32>
    %38 = vector.broadcast %37 : vector<1x1x64xf32> to vector<2x32x64xf32>
    %39 = arith.addf %35, %38 : vector<2x32x64xf32>
    %c0_21 = arith.constant 0 : index
    %c0_22 = arith.constant 0 : index
    %c0_23 = arith.constant 0 : index
    %40 = vector.load %arg5[%c0_21, %c0_22, %c0_23] : memref<31x64x64xf32, #tpu.memory_space<vmem>>, vector<1x64x64xf32>
    %41 = vector.shape_cast %40 : vector<1x64x64xf32> to vector<64x64xf32>
    %c1_24 = arith.constant 1 : index
    %c0_25 = arith.constant 0 : index
    %c0_26 = arith.constant 0 : index
    %42 = vector.load %arg5[%c1_24, %c0_25, %c0_26] : memref<31x64x64xf32, #tpu.memory_space<vmem>>, vector<1x64x64xf32>
    %43 = vector.shape_cast %42 : vector<1x64x64xf32> to vector<64x64xf32>
    %c3 = arith.constant 3 : index
    %c0_27 = arith.constant 0 : index
    %44 = vector.load %arg6[%c3, %c0_27] : memref<50x64xf32, #tpu.memory_space<vmem>>, vector<3x64xf32>
    "tpu.trace_start"() <{level = 10 : i32, message = "bij,bjf->bif"}> : () -> ()
    %cst_28 = arith.constant dense<0.000000e+00> : vector<2x32x64xf32>
    %45 = tpu.matmul %1, %39, %cst_28 {dimension_numbers = #tpu.dot_dimension_numbers<[2], [1], [1], [2], [0, 0, 0, 1, 1, 2], [0], [0]>} : vector<2x32x32xf32>, vector<2x32x64xf32>, vector<2x32x64xf32> -> vector<2x32x64xf32>
    "tpu.trace_stop"() : () -> ()
    %46 = vector.broadcast %8 : vector<2x32x1xf32> to vector<2x32x64xf32>
    %47 = arith.mulf %45, %46 : vector<2x32x64xf32>
    %48 = vector.shape_cast %47 : vector<2x32x64xf32> to vector<64x64xf32>
    %cst_29 = arith.constant dense<0.000000e+00> : vector<64x64xf32>
    %49 = tpu.matmul %48, %41, %cst_29 {dimension_numbers = #tpu.dot_dimension_numbers<[1], [0], [0], [1], [0, 0, 1, 1], [], []>} : vector<64x64xf32>, vector<64x64xf32>, vector<64x64xf32> -> vector<64x64xf32>
    %50 = vector.shape_cast %49 : vector<64x64xf32> to vector<2x32x64xf32>
    %51 = vector.shape_cast %39 : vector<2x32x64xf32> to vector<64x64xf32>
    %cst_30 = arith.constant dense<0.000000e+00> : vector<64x64xf32>
    %52 = tpu.matmul %51, %43, %cst_30 {dimension_numbers = #tpu.dot_dimension_numbers<[1], [0], [0], [1], [0, 0, 1, 1], [], []>} : vector<64x64xf32>, vector<64x64xf32>, vector<64x64xf32> -> vector<64x64xf32>
    %53 = vector.shape_cast %52 : vector<64x64xf32> to vector<2x32x64xf32>
    %54 = arith.addf %50, %53 : vector<2x32x64xf32>
    %55 = vector.extract_strided_slice %44 {offsets = [0, 0], sizes = [1, 64], strides = [1, 1]} : vector<3x64xf32> to vector<1x64xf32>
    %56 = vector.shape_cast %55 : vector<1x64xf32> to vector<1x1x64xf32>
    %57 = vector.broadcast %56 : vector<1x1x64xf32> to vector<2x32x64xf32>
    %58 = arith.addf %54, %57 : vector<2x32x64xf32>
    %59 = vector.broadcast %2 : vector<2x32x1xf32> to vector<2x32x64xf32>
    %60 = arith.mulf %58, %59 : vector<2x32x64xf32>
    %cst_31 = arith.constant 0.000000e+00 : f32
    %61 = vector.broadcast %cst_31 : f32 to vector<2x32x64xf32>
    %62 = arith.maximumf %60, %61 : vector<2x32x64xf32>
    %63 = vector.extract_strided_slice %44 {offsets = [1, 0], sizes = [1, 64], strides = [1, 1]} : vector<3x64xf32> to vector<1x64xf32>
    %64 = vector.shape_cast %63 : vector<1x64xf32> to vector<1x1x64xf32>
    %65 = vector.broadcast %64 : vector<1x1x64xf32> to vector<2x32x64xf32>
    %66 = arith.mulf %65, %62 : vector<2x32x64xf32>
    %67 = vector.extract_strided_slice %44 {offsets = [2, 0], sizes = [1, 64], strides = [1, 1]} : vector<3x64xf32> to vector<1x64xf32>
    %68 = vector.shape_cast %67 : vector<1x64xf32> to vector<1x1x64xf32>
    %69 = vector.broadcast %68 : vector<1x1x64xf32> to vector<2x32x64xf32>
    %70 = arith.addf %66, %69 : vector<2x32x64xf32>
    %c2 = arith.constant 2 : index
    %c0_32 = arith.constant 0 : index
    %c0_33 = arith.constant 0 : index
    %71 = vector.load %arg5[%c2, %c0_32, %c0_33] : memref<31x64x64xf32, #tpu.memory_space<vmem>>, vector<1x64x64xf32>
    %72 = vector.shape_cast %71 : vector<1x64x64xf32> to vector<64x64xf32>
    %c3_34 = arith.constant 3 : index
    %c0_35 = arith.constant 0 : index
    %c0_36 = arith.constant 0 : index
    %73 = vector.load %arg5[%c3_34, %c0_35, %c0_36] : memref<31x64x64xf32, #tpu.memory_space<vmem>>, vector<1x64x64xf32>
    %74 = vector.shape_cast %73 : vector<1x64x64xf32> to vector<64x64xf32>
    %c6 = arith.constant 6 : index
    %c0_37 = arith.constant 0 : index
    %75 = vector.load %arg6[%c6, %c0_37] : memref<50x64xf32, #tpu.memory_space<vmem>>, vector<3x64xf32>
    "tpu.trace_start"() <{level = 10 : i32, message = "bij,bjf->bif"}> : () -> ()
    %cst_38 = arith.constant dense<0.000000e+00> : vector<2x32x64xf32>
    %76 = tpu.matmul %1, %70, %cst_38 {dimension_numbers = #tpu.dot_dimension_numbers<[2], [1], [1], [2], [0, 0, 0, 1, 1, 2], [0], [0]>} : vector<2x32x32xf32>, vector<2x32x64xf32>, vector<2x32x64xf32> -> vector<2x32x64xf32>
    "tpu.trace_stop"() : () -> ()
    %77 = vector.broadcast %8 : vector<2x32x1xf32> to vector<2x32x64xf32>
    %78 = arith.mulf %76, %77 : vector<2x32x64xf32>
    %79 = vector.shape_cast %78 : vector<2x32x64xf32> to vector<64x64xf32>
    %cst_39 = arith.constant dense<0.000000e+00> : vector<64x64xf32>
    %80 = tpu.matmul %79, %72, %cst_39 {dimension_numbers = #tpu.dot_dimension_numbers<[1], [0], [0], [1], [0, 0, 1, 1], [], []>} : vector<64x64xf32>, vector<64x64xf32>, vector<64x64xf32> -> vector<64x64xf32>
    %81 = vector.shape_cast %80 : vector<64x64xf32> to vector<2x32x64xf32>
    %82 = vector.shape_cast %70 : vector<2x32x64xf32> to vector<64x64xf32>
    %cst_40 = arith.constant dense<0.000000e+00> : vector<64x64xf32>
    %83 = tpu.matmul %82, %74, %cst_40 {dimension_numbers = #tpu.dot_dimension_numbers<[1], [0], [0], [1], [0, 0, 1, 1], [], []>} : vector<64x64xf32>, vector<64x64xf32>, vector<64x64xf32> -> vector<64x64xf32>
    %84 = vector.shape_cast %83 : vector<64x64xf32> to vector<2x32x64xf32>
    %85 = arith.addf %81, %84 : vector<2x32x64xf32>
    %86 = vector.extract_strided_slice %75 {offsets = [0, 0], sizes = [1, 64], strides = [1, 1]} : vector<3x64xf32> to vector<1x64xf32>
    %87 = vector.shape_cast %86 : vector<1x64xf32> to vector<1x1x64xf32>
    %88 = vector.broadcast %87 : vector<1x1x64xf32> to vector<2x32x64xf32>
    %89 = arith.addf %85, %88 : vector<2x32x64xf32>
    %90 = vector.broadcast %2 : vector<2x32x1xf32> to vector<2x32x64xf32>
    %91 = arith.mulf %89, %90 : vector<2x32x64xf32>
    %cst_41 = arith.constant 0.000000e+00 : f32
    %92 = vector.broadcast %cst_41 : f32 to vector<2x32x64xf32>
    %93 = arith.maximumf %91, %92 : vector<2x32x64xf32>
    %94 = vector.extract_strided_slice %75 {offsets = [1, 0], sizes = [1, 64], strides = [1, 1]} : vector<3x64xf32> to vector<1x64xf32>
    %95 = vector.shape_cast %94 : vector<1x64xf32> to vector<1x1x64xf32>
    %96 = vector.broadcast %95 : vector<1x1x64xf32> to vector<2x32x64xf32>
    %97 = arith.mulf %96, %93 : vector<2x32x64xf32>
    %98 = vector.extract_strided_slice %75 {offsets = [2, 0], sizes = [1, 64], strides = [1, 1]} : vector<3x64xf32> to vector<1x64xf32>
    %99 = vector.shape_cast %98 : vector<1x64xf32> to vector<1x1x64xf32>
    %100 = vector.broadcast %99 : vector<1x1x64xf32> to vector<2x32x64xf32>
    %101 = arith.addf %97, %100 : vector<2x32x64xf32>
    %c4 = arith.constant 4 : index
    %c0_42 = arith.constant 0 : index
    %c0_43 = arith.constant 0 : index
    %102 = vector.load %arg5[%c4, %c0_42, %c0_43] : memref<31x64x64xf32, #tpu.memory_space<vmem>>, vector<1x64x64xf32>
    %103 = vector.shape_cast %102 : vector<1x64x64xf32> to vector<64x64xf32>
    %c9 = arith.constant 9 : index
    %c0_44 = arith.constant 0 : index
    %104 = vector.load %arg6[%c9, %c0_44] : memref<50x64xf32, #tpu.memory_space<vmem>>, vector<1x64xf32>
    %105 = vector.shape_cast %101 : vector<2x32x64xf32> to vector<64x64xf32>
    %cst_45 = arith.constant dense<0.000000e+00> : vector<64x64xf32>
    %106 = tpu.matmul %105, %103, %cst_45 {dimension_numbers = #tpu.dot_dimension_numbers<[1], [0], [0], [1], [0, 0, 1, 1], [], []>} : vector<64x64xf32>, vector<64x64xf32>, vector<64x64xf32> -> vector<64x64xf32>
    %107 = vector.shape_cast %106 : vector<64x64xf32> to vector<2x32x64xf32>
    %108 = vector.shape_cast %104 : vector<1x64xf32> to vector<1x1x64xf32>
    %109 = vector.broadcast %108 : vector<1x1x64xf32> to vector<2x32x64xf32>
    %110 = arith.addf %107, %109 : vector<2x32x64xf32>
    %cst_46 = arith.constant 0.000000e+00 : f32
    %111 = vector.broadcast %cst_46 : f32 to vector<2x32x64xf32>
    %112 = arith.maximumf %110, %111 : vector<2x32x64xf32>
    %c2_47 = arith.constant 2 : index
    %c0_48 = arith.constant 0 : index
    %c0_49 = arith.constant 0 : index
    %113 = vector.load %arg4[%c2_47, %c0_48, %c0_49] : memref<4x32x64xf32, #tpu.memory_space<vmem>>, vector<1x32x64xf32>
    %114 = vector.shape_cast %113 : vector<1x32x64xf32> to vector<32x64xf32>
    %c3_50 = arith.constant 3 : index
    %c0_51 = arith.constant 0 : index
    %c0_52 = arith.constant 0 : index
    %115 = vector.load %arg4[%c3_50, %c0_51, %c0_52] : memref<4x32x64xf32, #tpu.memory_space<vmem>>, vector<1x32x64xf32>
    %116 = vector.shape_cast %115 : vector<1x32x64xf32> to vector<32x64xf32>
    %c10 = arith.constant 10 : index
    %c0_53 = arith.constant 0 : index
    %117 = vector.load %arg6[%c10, %c0_53] : memref<50x64xf32, #tpu.memory_space<vmem>>, vector<3x64xf32>
    "tpu.trace_start"() <{level = 10 : i32, message = "bij,bjf->bif"}> : () -> ()
    %cst_54 = arith.constant dense<0.000000e+00> : vector<2x32x32xf32>
    %118 = tpu.matmul %1, %0, %cst_54 {dimension_numbers = #tpu.dot_dimension_numbers<[2], [1], [1], [2], [0, 0, 0, 1, 1, 2], [0], [0]>} : vector<2x32x32xf32>, vector<2x32x32xf32>, vector<2x32x32xf32> -> vector<2x32x32xf32>
    "tpu.trace_stop"() : () -> ()
    %119 = vector.broadcast %8 : vector<2x32x1xf32> to vector<2x32x32xf32>
    %120 = arith.mulf %118, %119 : vector<2x32x32xf32>
    %121 = vector.shape_cast %120 : vector<2x32x32xf32> to vector<64x32xf32>
    %cst_55 = arith.constant dense<0.000000e+00> : vector<64x64xf32>
    %122 = tpu.matmul %121, %114, %cst_55 {dimension_numbers = #tpu.dot_dimension_numbers<[1], [0], [0], [1], [0, 0, 1, 1], [], []>} : vector<64x32xf32>, vector<32x64xf32>, vector<64x64xf32> -> vector<64x64xf32>
    %123 = vector.shape_cast %122 : vector<64x64xf32> to vector<2x32x64xf32>
    %124 = vector.shape_cast %0 : vector<2x32x32xf32> to vector<64x32xf32>
    %cst_56 = arith.constant dense<0.000000e+00> : vector<64x64xf32>
    %125 = tpu.matmul %124, %116, %cst_56 {dimension_numbers = #tpu.dot_dimension_numbers<[1], [0], [0], [1], [0, 0, 1, 1], [], []>} : vector<64x32xf32>, vector<32x64xf32>, vector<64x64xf32> -> vector<64x64xf32>
    %126 = vector.shape_cast %125 : vector<64x64xf32> to vector<2x32x64xf32>
    %127 = arith.addf %123, %126 : vector<2x32x64xf32>
    %128 = vector.extract_strided_slice %117 {offsets = [0, 0], sizes = [1, 64], strides = [1, 1]} : vector<3x64xf32> to vector<1x64xf32>
    %129 = vector.shape_cast %128 : vector<1x64xf32> to vector<1x1x64xf32>
    %130 = vector.broadcast %129 : vector<1x1x64xf32> to vector<2x32x64xf32>
    %131 = arith.addf %127, %130 : vector<2x32x64xf32>
    %132 = vector.broadcast %2 : vector<2x32x1xf32> to vector<2x32x64xf32>
    %133 = arith.mulf %131, %132 : vector<2x32x64xf32>
    %cst_57 = arith.constant 0.000000e+00 : f32
    %134 = vector.broadcast %cst_57 : f32 to vector<2x32x64xf32>
    %135 = arith.maximumf %133, %134 : vector<2x32x64xf32>
    %136 = vector.extract_strided_slice %117 {offsets = [1, 0], sizes = [1, 64], strides = [1, 1]} : vector<3x64xf32> to vector<1x64xf32>
    %137 = vector.shape_cast %136 : vector<1x64xf32> to vector<1x1x64xf32>
    %138 = vector.broadcast %137 : vector<1x1x64xf32> to vector<2x32x64xf32>
    %139 = arith.mulf %138, %135 : vector<2x32x64xf32>
    %140 = vector.extract_strided_slice %117 {offsets = [2, 0], sizes = [1, 64], strides = [1, 1]} : vector<3x64xf32> to vector<1x64xf32>
    %141 = vector.shape_cast %140 : vector<1x64xf32> to vector<1x1x64xf32>
    %142 = vector.broadcast %141 : vector<1x1x64xf32> to vector<2x32x64xf32>
    %143 = arith.addf %139, %142 : vector<2x32x64xf32>
    %c5 = arith.constant 5 : index
    %c0_58 = arith.constant 0 : index
    %c0_59 = arith.constant 0 : index
    %144 = vector.load %arg5[%c5, %c0_58, %c0_59] : memref<31x64x64xf32, #tpu.memory_space<vmem>>, vector<1x64x64xf32>
    %145 = vector.shape_cast %144 : vector<1x64x64xf32> to vector<64x64xf32>
    %c6_60 = arith.constant 6 : index
    %c0_61 = arith.constant 0 : index
    %c0_62 = arith.constant 0 : index
    %146 = vector.load %arg5[%c6_60, %c0_61, %c0_62] : memref<31x64x64xf32, #tpu.memory_space<vmem>>, vector<1x64x64xf32>
    %147 = vector.shape_cast %146 : vector<1x64x64xf32> to vector<64x64xf32>
    %c13 = arith.constant 13 : index
    %c0_63 = arith.constant 0 : index
    %148 = vector.load %arg6[%c13, %c0_63] : memref<50x64xf32, #tpu.memory_space<vmem>>, vector<3x64xf32>
    "tpu.trace_start"() <{level = 10 : i32, message = "bij,bjf->bif"}> : () -> ()
    %cst_64 = arith.constant dense<0.000000e+00> : vector<2x32x64xf32>
    %149 = tpu.matmul %1, %143, %cst_64 {dimension_numbers = #tpu.dot_dimension_numbers<[2], [1], [1], [2], [0, 0, 0, 1, 1, 2], [0], [0]>} : vector<2x32x32xf32>, vector<2x32x64xf32>, vector<2x32x64xf32> -> vector<2x32x64xf32>
    "tpu.trace_stop"() : () -> ()
    %150 = vector.broadcast %8 : vector<2x32x1xf32> to vector<2x32x64xf32>
    %151 = arith.mulf %149, %150 : vector<2x32x64xf32>
    %152 = vector.shape_cast %151 : vector<2x32x64xf32> to vector<64x64xf32>
    %cst_65 = arith.constant dense<0.000000e+00> : vector<64x64xf32>
    %153 = tpu.matmul %152, %145, %cst_65 {dimension_numbers = #tpu.dot_dimension_numbers<[1], [0], [0], [1], [0, 0, 1, 1], [], []>} : vector<64x64xf32>, vector<64x64xf32>, vector<64x64xf32> -> vector<64x64xf32>
    %154 = vector.shape_cast %153 : vector<64x64xf32> to vector<2x32x64xf32>
    %155 = vector.shape_cast %143 : vector<2x32x64xf32> to vector<64x64xf32>
    %cst_66 = arith.constant dense<0.000000e+00> : vector<64x64xf32>
    %156 = tpu.matmul %155, %147, %cst_66 {dimension_numbers = #tpu.dot_dimension_numbers<[1], [0], [0], [1], [0, 0, 1, 1], [], []>} : vector<64x64xf32>, vector<64x64xf32>, vector<64x64xf32> -> vector<64x64xf32>
    %157 = vector.shape_cast %156 : vector<64x64xf32> to vector<2x32x64xf32>
    %158 = arith.addf %154, %157 : vector<2x32x64xf32>
    %159 = vector.extract_strided_slice %148 {offsets = [0, 0], sizes = [1, 64], strides = [1, 1]} : vector<3x64xf32> to vector<1x64xf32>
    %160 = vector.shape_cast %159 : vector<1x64xf32> to vector<1x1x64xf32>
    %161 = vector.broadcast %160 : vector<1x1x64xf32> to vector<2x32x64xf32>
    %162 = arith.addf %158, %161 : vector<2x32x64xf32>
    %163 = vector.broadcast %2 : vector<2x32x1xf32> to vector<2x32x64xf32>
    %164 = arith.mulf %162, %163 : vector<2x32x64xf32>
    %cst_67 = arith.constant 0.000000e+00 : f32
    %165 = vector.broadcast %cst_67 : f32 to vector<2x32x64xf32>
    %166 = arith.maximumf %164, %165 : vector<2x32x64xf32>
    %167 = vector.extract_strided_slice %148 {offsets = [1, 0], sizes = [1, 64], strides = [1, 1]} : vector<3x64xf32> to vector<1x64xf32>
    %168 = vector.shape_cast %167 : vector<1x64xf32> to vector<1x1x64xf32>
    %169 = vector.broadcast %168 : vector<1x1x64xf32> to vector<2x32x64xf32>
    %170 = arith.mulf %169, %166 : vector<2x32x64xf32>
    %171 = vector.extract_strided_slice %148 {offsets = [2, 0], sizes = [1, 64], strides = [1, 1]} : vector<3x64xf32> to vector<1x64xf32>
    %172 = vector.shape_cast %171 : vector<1x64xf32> to vector<1x1x64xf32>
    %173 = vector.broadcast %172 : vector<1x1x64xf32> to vector<2x32x64xf32>
    %174 = arith.addf %170, %173 : vector<2x32x64xf32>
    %c7 = arith.constant 7 : index
    %c0_68 = arith.constant 0 : index
    %c0_69 = arith.constant 0 : index
    %175 = vector.load %arg5[%c7, %c0_68, %c0_69] : memref<31x64x64xf32, #tpu.memory_space<vmem>>, vector<1x64x64xf32>
    %176 = vector.shape_cast %175 : vector<1x64x64xf32> to vector<64x64xf32>
    %c8 = arith.constant 8 : index
    %c0_70 = arith.constant 0 : index
    %c0_71 = arith.constant 0 : index
    %177 = vector.load %arg5[%c8, %c0_70, %c0_71] : memref<31x64x64xf32, #tpu.memory_space<vmem>>, vector<1x64x64xf32>
    %178 = vector.shape_cast %177 : vector<1x64x64xf32> to vector<64x64xf32>
    %c16 = arith.constant 16 : index
    %c0_72 = arith.constant 0 : index
    %179 = vector.load %arg6[%c16, %c0_72] : memref<50x64xf32, #tpu.memory_space<vmem>>, vector<3x64xf32>
    "tpu.trace_start"() <{level = 10 : i32, message = "bij,bjf->bif"}> : () -> ()
    %cst_73 = arith.constant dense<0.000000e+00> : vector<2x32x64xf32>
    %180 = tpu.matmul %1, %174, %cst_73 {dimension_numbers = #tpu.dot_dimension_numbers<[2], [1], [1], [2], [0, 0, 0, 1, 1, 2], [0], [0]>} : vector<2x32x32xf32>, vector<2x32x64xf32>, vector<2x32x64xf32> -> vector<2x32x64xf32>
    "tpu.trace_stop"() : () -> ()
    %181 = vector.broadcast %8 : vector<2x32x1xf32> to vector<2x32x64xf32>
    %182 = arith.mulf %180, %181 : vector<2x32x64xf32>
    %183 = vector.shape_cast %182 : vector<2x32x64xf32> to vector<64x64xf32>
    %cst_74 = arith.constant dense<0.000000e+00> : vector<64x64xf32>
    %184 = tpu.matmul %183, %176, %cst_74 {dimension_numbers = #tpu.dot_dimension_numbers<[1], [0], [0], [1], [0, 0, 1, 1], [], []>} : vector<64x64xf32>, vector<64x64xf32>, vector<64x64xf32> -> vector<64x64xf32>
    %185 = vector.shape_cast %184 : vector<64x64xf32> to vector<2x32x64xf32>
    %186 = vector.shape_cast %174 : vector<2x32x64xf32> to vector<64x64xf32>
    %cst_75 = arith.constant dense<0.000000e+00> : vector<64x64xf32>
    %187 = tpu.matmul %186, %178, %cst_75 {dimension_numbers = #tpu.dot_dimension_numbers<[1], [0], [0], [1], [0, 0, 1, 1], [], []>} : vector<64x64xf32>, vector<64x64xf32>, vector<64x64xf32> -> vector<64x64xf32>
    %188 = vector.shape_cast %187 : vector<64x64xf32> to vector<2x32x64xf32>
    %189 = arith.addf %185, %188 : vector<2x32x64xf32>
    %190 = vector.extract_strided_slice %179 {offsets = [0, 0], sizes = [1, 64], strides = [1, 1]} : vector<3x64xf32> to vector<1x64xf32>
    %191 = vector.shape_cast %190 : vector<1x64xf32> to vector<1x1x64xf32>
    %192 = vector.broadcast %191 : vector<1x1x64xf32> to vector<2x32x64xf32>
    %193 = arith.addf %189, %192 : vector<2x32x64xf32>
    %194 = vector.broadcast %2 : vector<2x32x1xf32> to vector<2x32x64xf32>
    %195 = arith.mulf %193, %194 : vector<2x32x64xf32>
    %cst_76 = arith.constant 0.000000e+00 : f32
    %196 = vector.broadcast %cst_76 : f32 to vector<2x32x64xf32>
    %197 = arith.maximumf %195, %196 : vector<2x32x64xf32>
    %198 = vector.extract_strided_slice %179 {offsets = [1, 0], sizes = [1, 64], strides = [1, 1]} : vector<3x64xf32> to vector<1x64xf32>
    %199 = vector.shape_cast %198 : vector<1x64xf32> to vector<1x1x64xf32>
    %200 = vector.broadcast %199 : vector<1x1x64xf32> to vector<2x32x64xf32>
    %201 = arith.mulf %200, %197 : vector<2x32x64xf32>
    %202 = vector.extract_strided_slice %179 {offsets = [2, 0], sizes = [1, 64], strides = [1, 1]} : vector<3x64xf32> to vector<1x64xf32>
    %203 = vector.shape_cast %202 : vector<1x64xf32> to vector<1x1x64xf32>
    %204 = vector.broadcast %203 : vector<1x1x64xf32> to vector<2x32x64xf32>
    %205 = arith.addf %201, %204 : vector<2x32x64xf32>
    %c9_77 = arith.constant 9 : index
    %c0_78 = arith.constant 0 : index
    %c0_79 = arith.constant 0 : index
    %206 = vector.load %arg5[%c9_77, %c0_78, %c0_79] : memref<31x64x64xf32, #tpu.memory_space<vmem>>, vector<1x64x64xf32>
    %207 = vector.shape_cast %206 : vector<1x64x64xf32> to vector<64x64xf32>
    %c19 = arith.constant 19 : index
    %c0_80 = arith.constant 0 : index
    %208 = vector.load %arg6[%c19, %c0_80] : memref<50x64xf32, #tpu.memory_space<vmem>>, vector<1x64xf32>
    %209 = vector.shape_cast %205 : vector<2x32x64xf32> to vector<64x64xf32>
    %cst_81 = arith.constant dense<0.000000e+00> : vector<64x64xf32>
    %210 = tpu.matmul %209, %207, %cst_81 {dimension_numbers = #tpu.dot_dimension_numbers<[1], [0], [0], [1], [0, 0, 1, 1], [], []>} : vector<64x64xf32>, vector<64x64xf32>, vector<64x64xf32> -> vector<64x64xf32>
    %211 = vector.shape_cast %210 : vector<64x64xf32> to vector<2x32x64xf32>
    %212 = vector.shape_cast %208 : vector<1x64xf32> to vector<1x1x64xf32>
    %213 = vector.broadcast %212 : vector<1x1x64xf32> to vector<2x32x64xf32>
    %214 = arith.addf %211, %213 : vector<2x32x64xf32>
    %cst_82 = arith.constant 0.000000e+00 : f32
    %215 = vector.broadcast %cst_82 : f32 to vector<2x32x64xf32>
    %216 = arith.maximumf %214, %215 : vector<2x32x64xf32>
    %217 = vector.extract_strided_slice %112 {offsets = [0, 0, 0], sizes = [2, 32, 8], strides = [1, 1, 1]} : vector<2x32x64xf32> to vector<2x32x8xf32>
    %cst_83 = arith.constant dense<0xFF800000> : vector<2x32xf32>
    %218 = vector.multi_reduction <maximumf>, %217, %cst_83 [2] : vector<2x32x8xf32> to vector<2x32xf32>
    %219 = vector.shape_cast %218 : vector<2x32xf32> to vector<2x32x1xf32>
    %220 = vector.broadcast %219 : vector<2x32x1xf32> to vector<2x32x8xf32>
    %221 = arith.subf %217, %220 : vector<2x32x8xf32>
    %222 = math.exp %221 : vector<2x32x8xf32>
    %cst_84 = arith.constant dense<0.000000e+00> : vector<2x32xf32>
    %223 = vector.multi_reduction <add>, %222, %cst_84 [2] : vector<2x32x8xf32> to vector<2x32xf32>
    %224 = vector.shape_cast %223 : vector<2x32xf32> to vector<2x32x1xf32>
    %225 = vector.broadcast %224 : vector<2x32x1xf32> to vector<2x32x8xf32>
    %226 = arith.divf %222, %225 : vector<2x32x8xf32>
    %227 = math.log %224 : vector<2x32x1xf32>
    %228 = arith.mulf %226, %221 : vector<2x32x8xf32>
    %cst_85 = arith.constant dense<0.000000e+00> : vector<2x32xf32>
    %229 = vector.multi_reduction <add>, %228, %cst_85 [2] : vector<2x32x8xf32> to vector<2x32xf32>
    %230 = vector.shape_cast %229 : vector<2x32xf32> to vector<2x32x1xf32>
    %231 = arith.subf %227, %230 : vector<2x32x1xf32>
    %232 = vector.broadcast %2 : vector<2x32x1xf32> to vector<2x32x64xf32>
    %233 = arith.mulf %216, %232 : vector<2x32x64xf32>
    %234 = vector.broadcast %2 : vector<2x32x1xf32> to vector<2x32x8xf32>
    %235 = arith.mulf %226, %234 : vector<2x32x8xf32>
    %236 = arith.mulf %231, %2 : vector<2x32x1xf32>
    %237 = vector.shape_cast %236 : vector<2x32x1xf32> to vector<1x2x32x1xf32>
    %cst_86 = arith.constant dense<0.000000e+00> : vector<1xf32>
    %238 = vector.multi_reduction <add>, %237, %cst_86 [1, 2, 3] : vector<1x2x32x1xf32> to vector<1xf32>
    %239 = vector.shape_cast %238 : vector<1xf32> to vector<1x1x1x1xf32>
    %240 = vector.extract %239[0, 0, 0, 0] : f32 from vector<1x1x1x1xf32>
    "tpu.trace_start"() <{level = 10 : i32, message = "bij,bjc->bic"}> : () -> ()
    %cst_87 = arith.constant dense<0.000000e+00> : vector<2x32x8xf32>
    %241 = tpu.matmul %1, %235, %cst_87 {dimension_numbers = #tpu.dot_dimension_numbers<[2], [1], [1], [2], [0, 0, 0, 1, 1, 2], [0], [0]>} : vector<2x32x32xf32>, vector<2x32x8xf32>, vector<2x32x8xf32> -> vector<2x32x8xf32>
    "tpu.trace_stop"() : () -> ()
    %242 = arith.mulf %1, %1 : vector<2x32x32xf32>
    %243 = vector.shape_cast %242 : vector<2x32x32xf32> to vector<1x2x32x32xf32>
    %cst_88 = arith.constant dense<0.000000e+00> : vector<1xf32>
    %244 = vector.multi_reduction <add>, %243, %cst_88 [1, 2, 3] : vector<1x2x32x32xf32> to vector<1xf32>
    %245 = vector.shape_cast %244 : vector<1xf32> to vector<1x1x1x1xf32>
    %246 = vector.extract %245[0, 0, 0, 0] : f32 from vector<1x1x1x1xf32>
    %247 = arith.mulf %235, %241 : vector<2x32x8xf32>
    %248 = vector.shape_cast %247 : vector<2x32x8xf32> to vector<1x2x32x8xf32>
    %cst_89 = arith.constant dense<0.000000e+00> : vector<1xf32>
    %249 = vector.multi_reduction <add>, %248, %cst_89 [1, 2, 3] : vector<1x2x32x8xf32> to vector<1xf32>
    %250 = vector.shape_cast %249 : vector<1xf32> to vector<1x1x1x1xf32>
    %251 = vector.extract %250[0, 0, 0, 0] : f32 from vector<1x1x1x1xf32>
    %cst_90 = arith.constant 2.000000e+00 : f32
    %252 = arith.mulf %cst_90, %251 : f32
    %253 = arith.subf %246, %252 : f32
    %254 = vector.extract_strided_slice %235 {offsets = [0, 0, 0], sizes = [1, 32, 8], strides = [1, 1, 1]} : vector<2x32x8xf32> to vector<1x32x8xf32>
    %255 = vector.shape_cast %254 : vector<1x32x8xf32> to vector<32x8xf32>
    %256 = vector.extract_strided_slice %233 {offsets = [0, 0, 0], sizes = [1, 32, 64], strides = [1, 1, 1]} : vector<2x32x64xf32> to vector<1x32x64xf32>
    %257 = vector.shape_cast %256 : vector<1x32x64xf32> to vector<32x64xf32>
    %cst_91 = arith.constant dense<0.000000e+00> : vector<8x64xf32>
    %258 = tpu.matmul %255, %257, %cst_91 {dimension_numbers = #tpu.dot_dimension_numbers<[0], [0], [1], [1], [0, 1, 1, 1], [], []>} : vector<32x8xf32>, vector<32x64xf32>, vector<8x64xf32> -> vector<8x64xf32>
    %259 = vector.extract_strided_slice %241 {offsets = [0, 0, 0], sizes = [1, 32, 8], strides = [1, 1, 1]} : vector<2x32x8xf32> to vector<1x32x8xf32>
    %260 = vector.shape_cast %259 : vector<1x32x8xf32> to vector<32x8xf32>
    %cst_92 = arith.constant dense<0.000000e+00> : vector<8x8xf32>
    %261 = tpu.matmul %255, %260, %cst_92 {dimension_numbers = #tpu.dot_dimension_numbers<[0], [0], [1], [1], [0, 1, 1, 1], [], []>} : vector<32x8xf32>, vector<32x8xf32>, vector<8x8xf32> -> vector<8x8xf32>
    %cst_93 = arith.constant dense<0.000000e+00> : vector<8x8xf32>
    %262 = tpu.matmul %255, %255, %cst_93 {dimension_numbers = #tpu.dot_dimension_numbers<[0], [0], [1], [1], [0, 1, 1, 1], [], []>} : vector<32x8xf32>, vector<32x8xf32>, vector<8x8xf32> -> vector<8x8xf32>
    %263 = arith.mulf %262, %262 : vector<8x8xf32>
    %264 = vector.shape_cast %263 : vector<8x8xf32> to vector<1x8x8xf32>
    %cst_94 = arith.constant dense<0.000000e+00> : vector<1xf32>
    %265 = vector.multi_reduction <add>, %264, %cst_94 [1, 2] : vector<1x8x8xf32> to vector<1xf32>
    %266 = vector.shape_cast %265 : vector<1xf32> to vector<1x1x1xf32>
    %267 = vector.extract %266[0, 0, 0] : f32 from vector<1x1x1xf32>
    %268 = arith.addf %253, %267 : f32
    %269 = vector.extract_strided_slice %235 {offsets = [1, 0, 0], sizes = [1, 32, 8], strides = [1, 1, 1]} : vector<2x32x8xf32> to vector<1x32x8xf32>
    %270 = vector.shape_cast %269 : vector<1x32x8xf32> to vector<32x8xf32>
    %271 = vector.extract_strided_slice %233 {offsets = [1, 0, 0], sizes = [1, 32, 64], strides = [1, 1, 1]} : vector<2x32x64xf32> to vector<1x32x64xf32>
    %272 = vector.shape_cast %271 : vector<1x32x64xf32> to vector<32x64xf32>
    %cst_95 = arith.constant dense<0.000000e+00> : vector<8x64xf32>
    %273 = tpu.matmul %270, %272, %cst_95 {dimension_numbers = #tpu.dot_dimension_numbers<[0], [0], [1], [1], [0, 1, 1, 1], [], []>} : vector<32x8xf32>, vector<32x64xf32>, vector<8x64xf32> -> vector<8x64xf32>
    %274 = vector.extract_strided_slice %241 {offsets = [1, 0, 0], sizes = [1, 32, 8], strides = [1, 1, 1]} : vector<2x32x8xf32> to vector<1x32x8xf32>
    %275 = vector.shape_cast %274 : vector<1x32x8xf32> to vector<32x8xf32>
    %cst_96 = arith.constant dense<0.000000e+00> : vector<8x8xf32>
    %276 = tpu.matmul %270, %275, %cst_96 {dimension_numbers = #tpu.dot_dimension_numbers<[0], [0], [1], [1], [0, 1, 1, 1], [], []>} : vector<32x8xf32>, vector<32x8xf32>, vector<8x8xf32> -> vector<8x8xf32>
    %cst_97 = arith.constant dense<0.000000e+00> : vector<8x8xf32>
    %277 = tpu.matmul %270, %270, %cst_97 {dimension_numbers = #tpu.dot_dimension_numbers<[0], [0], [1], [1], [0, 1, 1, 1], [], []>} : vector<32x8xf32>, vector<32x8xf32>, vector<8x8xf32> -> vector<8x8xf32>
    %278 = arith.mulf %277, %277 : vector<8x8xf32>
    %279 = vector.shape_cast %278 : vector<8x8xf32> to vector<1x8x8xf32>
    %cst_98 = arith.constant dense<0.000000e+00> : vector<1xf32>
    %280 = vector.multi_reduction <add>, %279, %cst_98 [1, 2] : vector<1x8x8xf32> to vector<1xf32>
    %281 = vector.shape_cast %280 : vector<1xf32> to vector<1x1x1xf32>
    %282 = vector.extract %281[0, 0, 0] : f32 from vector<1x1x1xf32>
    %283 = arith.addf %268, %282 : f32
    %284 = vector.shape_cast %258 : vector<8x64xf32> to vector<1x8x64xf32>
    %285 = vector.shape_cast %273 : vector<8x64xf32> to vector<1x8x64xf32>
    %286 = tpu.concatenate %284, %285 in 0 : vector<1x8x64xf32>, vector<1x8x64xf32> -> vector<2x8x64xf32>
    %287 = vector.shape_cast %261 : vector<8x8xf32> to vector<1x8x8xf32>
    %288 = vector.shape_cast %276 : vector<8x8xf32> to vector<1x8x8xf32>
    %289 = tpu.concatenate %287, %288 in 0 : vector<1x8x8xf32>, vector<1x8x8xf32> -> vector<2x8x8xf32>
    %cst_99 = arith.constant dense<0.000000e+00> : vector<2x8xf32>
    %290 = vector.multi_reduction <add>, %289, %cst_99 [2] : vector<2x8x8xf32> to vector<2x8xf32>
    %291 = vector.shape_cast %290 : vector<2x8xf32> to vector<2x8x1xf32>
    %cst_100 = arith.constant 1.000000e+00 : f32
    %292 = vector.broadcast %cst_100 : f32 to vector<2x8x1xf32>
    %293 = arith.maximumf %291, %292 : vector<2x8x1xf32>
    %cst_101 = arith.constant 1.000000e+00 : f32
    %294 = vector.broadcast %cst_101 : f32 to vector<2x8x1xf32>
    %295 = arith.divf %294, %293 : vector<2x8x1xf32>
    %c10_102 = arith.constant 10 : index
    %c0_103 = arith.constant 0 : index
    %c0_104 = arith.constant 0 : index
    %296 = vector.load %arg5[%c10_102, %c0_103, %c0_104] : memref<31x64x64xf32, #tpu.memory_space<vmem>>, vector<1x64x64xf32>
    %297 = vector.shape_cast %296 : vector<1x64x64xf32> to vector<64x64xf32>
    %c11 = arith.constant 11 : index
    %c0_105 = arith.constant 0 : index
    %c0_106 = arith.constant 0 : index
    %298 = vector.load %arg5[%c11, %c0_105, %c0_106] : memref<31x64x64xf32, #tpu.memory_space<vmem>>, vector<1x64x64xf32>
    %299 = vector.shape_cast %298 : vector<1x64x64xf32> to vector<64x64xf32>
    %c20 = arith.constant 20 : index
    %c0_107 = arith.constant 0 : index
    %300 = vector.load %arg6[%c20, %c0_107] : memref<50x64xf32, #tpu.memory_space<vmem>>, vector<3x64xf32>
    "tpu.trace_start"() <{level = 10 : i32, message = "bij,bjf->bif"}> : () -> ()
    %cst_108 = arith.constant dense<0.000000e+00> : vector<2x8x64xf32>
    %301 = tpu.matmul %289, %286, %cst_108 {dimension_numbers = #tpu.dot_dimension_numbers<[2], [1], [1], [2], [0, 0, 0, 1, 1, 2], [0], [0]>} : vector<2x8x8xf32>, vector<2x8x64xf32>, vector<2x8x64xf32> -> vector<2x8x64xf32>
    "tpu.trace_stop"() : () -> ()
    %302 = vector.broadcast %295 : vector<2x8x1xf32> to vector<2x8x64xf32>
    %303 = arith.mulf %301, %302 : vector<2x8x64xf32>
    %304 = vector.shape_cast %303 : vector<2x8x64xf32> to vector<16x64xf32>
    %cst_109 = arith.constant dense<0.000000e+00> : vector<16x64xf32>
    %305 = tpu.matmul %304, %297, %cst_109 {dimension_numbers = #tpu.dot_dimension_numbers<[1], [0], [0], [1], [0, 0, 1, 1], [], []>} : vector<16x64xf32>, vector<64x64xf32>, vector<16x64xf32> -> vector<16x64xf32>
    %306 = vector.shape_cast %305 : vector<16x64xf32> to vector<2x8x64xf32>
    %307 = vector.shape_cast %286 : vector<2x8x64xf32> to vector<16x64xf32>
    %cst_110 = arith.constant dense<0.000000e+00> : vector<16x64xf32>
    %308 = tpu.matmul %307, %299, %cst_110 {dimension_numbers = #tpu.dot_dimension_numbers<[1], [0], [0], [1], [0, 0, 1, 1], [], []>} : vector<16x64xf32>, vector<64x64xf32>, vector<16x64xf32> -> vector<16x64xf32>
    %309 = vector.shape_cast %308 : vector<16x64xf32> to vector<2x8x64xf32>
    %310 = arith.addf %306, %309 : vector<2x8x64xf32>
    %311 = vector.extract_strided_slice %300 {offsets = [0, 0], sizes = [1, 64], strides = [1, 1]} : vector<3x64xf32> to vector<1x64xf32>
    %312 = vector.shape_cast %311 : vector<1x64xf32> to vector<1x1x64xf32>
    %313 = vector.broadcast %312 : vector<1x1x64xf32> to vector<2x8x64xf32>
    %314 = arith.addf %310, %313 : vector<2x8x64xf32>
    %cst_111 = arith.constant 0.000000e+00 : f32
    %315 = vector.broadcast %cst_111 : f32 to vector<2x8x64xf32>
    %316 = arith.maximumf %314, %315 : vector<2x8x64xf32>
    %317 = vector.extract_strided_slice %300 {offsets = [1, 0], sizes = [1, 64], strides = [1, 1]} : vector<3x64xf32> to vector<1x64xf32>
    %318 = vector.shape_cast %317 : vector<1x64xf32> to vector<1x1x64xf32>
    %319 = vector.broadcast %318 : vector<1x1x64xf32> to vector<2x8x64xf32>
    %320 = arith.mulf %319, %316 : vector<2x8x64xf32>
    %321 = vector.extract_strided_slice %300 {offsets = [2, 0], sizes = [1, 64], strides = [1, 1]} : vector<3x64xf32> to vector<1x64xf32>
    %322 = vector.shape_cast %321 : vector<1x64xf32> to vector<1x1x64xf32>
    %323 = vector.broadcast %322 : vector<1x1x64xf32> to vector<2x8x64xf32>
    %324 = arith.addf %320, %323 : vector<2x8x64xf32>
    %c12 = arith.constant 12 : index
    %c0_112 = arith.constant 0 : index
    %c0_113 = arith.constant 0 : index
    %325 = vector.load %arg5[%c12, %c0_112, %c0_113] : memref<31x64x64xf32, #tpu.memory_space<vmem>>, vector<1x64x64xf32>
    %326 = vector.shape_cast %325 : vector<1x64x64xf32> to vector<64x64xf32>
    %c13_114 = arith.constant 13 : index
    %c0_115 = arith.constant 0 : index
    %c0_116 = arith.constant 0 : index
    %327 = vector.load %arg5[%c13_114, %c0_115, %c0_116] : memref<31x64x64xf32, #tpu.memory_space<vmem>>, vector<1x64x64xf32>
    %328 = vector.shape_cast %327 : vector<1x64x64xf32> to vector<64x64xf32>
    %c23 = arith.constant 23 : index
    %c0_117 = arith.constant 0 : index
    %329 = vector.load %arg6[%c23, %c0_117] : memref<50x64xf32, #tpu.memory_space<vmem>>, vector<3x64xf32>
    "tpu.trace_start"() <{level = 10 : i32, message = "bij,bjf->bif"}> : () -> ()
    %cst_118 = arith.constant dense<0.000000e+00> : vector<2x8x64xf32>
    %330 = tpu.matmul %289, %324, %cst_118 {dimension_numbers = #tpu.dot_dimension_numbers<[2], [1], [1], [2], [0, 0, 0, 1, 1, 2], [0], [0]>} : vector<2x8x8xf32>, vector<2x8x64xf32>, vector<2x8x64xf32> -> vector<2x8x64xf32>
    "tpu.trace_stop"() : () -> ()
    %331 = vector.broadcast %295 : vector<2x8x1xf32> to vector<2x8x64xf32>
    %332 = arith.mulf %330, %331 : vector<2x8x64xf32>
    %333 = vector.shape_cast %332 : vector<2x8x64xf32> to vector<16x64xf32>
    %cst_119 = arith.constant dense<0.000000e+00> : vector<16x64xf32>
    %334 = tpu.matmul %333, %326, %cst_119 {dimension_numbers = #tpu.dot_dimension_numbers<[1], [0], [0], [1], [0, 0, 1, 1], [], []>} : vector<16x64xf32>, vector<64x64xf32>, vector<16x64xf32> -> vector<16x64xf32>
    %335 = vector.shape_cast %334 : vector<16x64xf32> to vector<2x8x64xf32>
    %336 = vector.shape_cast %324 : vector<2x8x64xf32> to vector<16x64xf32>
    %cst_120 = arith.constant dense<0.000000e+00> : vector<16x64xf32>
    %337 = tpu.matmul %336, %328, %cst_120 {dimension_numbers = #tpu.dot_dimension_numbers<[1], [0], [0], [1], [0, 0, 1, 1], [], []>} : vector<16x64xf32>, vector<64x64xf32>, vector<16x64xf32> -> vector<16x64xf32>
    %338 = vector.shape_cast %337 : vector<16x64xf32> to vector<2x8x64xf32>
    %339 = arith.addf %335, %338 : vector<2x8x64xf32>
    %340 = vector.extract_strided_slice %329 {offsets = [0, 0], sizes = [1, 64], strides = [1, 1]} : vector<3x64xf32> to vector<1x64xf32>
    %341 = vector.shape_cast %340 : vector<1x64xf32> to vector<1x1x64xf32>
    %342 = vector.broadcast %341 : vector<1x1x64xf32> to vector<2x8x64xf32>
    %343 = arith.addf %339, %342 : vector<2x8x64xf32>
    %cst_121 = arith.constant 0.000000e+00 : f32
    %344 = vector.broadcast %cst_121 : f32 to vector<2x8x64xf32>
    %345 = arith.maximumf %343, %344 : vector<2x8x64xf32>
    %346 = vector.extract_strided_slice %329 {offsets = [1, 0], sizes = [1, 64], strides = [1, 1]} : vector<3x64xf32> to vector<1x64xf32>
    %347 = vector.shape_cast %346 : vector<1x64xf32> to vector<1x1x64xf32>
    %348 = vector.broadcast %347 : vector<1x1x64xf32> to vector<2x8x64xf32>
    %349 = arith.mulf %348, %345 : vector<2x8x64xf32>
    %350 = vector.extract_strided_slice %329 {offsets = [2, 0], sizes = [1, 64], strides = [1, 1]} : vector<3x64xf32> to vector<1x64xf32>
    %351 = vector.shape_cast %350 : vector<1x64xf32> to vector<1x1x64xf32>
    %352 = vector.broadcast %351 : vector<1x1x64xf32> to vector<2x8x64xf32>
    %353 = arith.addf %349, %352 : vector<2x8x64xf32>
    %c14 = arith.constant 14 : index
    %c0_122 = arith.constant 0 : index
    %c0_123 = arith.constant 0 : index
    %354 = vector.load %arg5[%c14, %c0_122, %c0_123] : memref<31x64x64xf32, #tpu.memory_space<vmem>>, vector<1x64x64xf32>
    %355 = vector.shape_cast %354 : vector<1x64x64xf32> to vector<64x64xf32>
    %c15 = arith.constant 15 : index
    %c0_124 = arith.constant 0 : index
    %c0_125 = arith.constant 0 : index
    %356 = vector.load %arg5[%c15, %c0_124, %c0_125] : memref<31x64x64xf32, #tpu.memory_space<vmem>>, vector<1x64x64xf32>
    %357 = vector.shape_cast %356 : vector<1x64x64xf32> to vector<64x64xf32>
    %c26 = arith.constant 26 : index
    %c0_126 = arith.constant 0 : index
    %358 = vector.load %arg6[%c26, %c0_126] : memref<50x64xf32, #tpu.memory_space<vmem>>, vector<3x64xf32>
    "tpu.trace_start"() <{level = 10 : i32, message = "bij,bjf->bif"}> : () -> ()
    %cst_127 = arith.constant dense<0.000000e+00> : vector<2x8x64xf32>
    %359 = tpu.matmul %289, %353, %cst_127 {dimension_numbers = #tpu.dot_dimension_numbers<[2], [1], [1], [2], [0, 0, 0, 1, 1, 2], [0], [0]>} : vector<2x8x8xf32>, vector<2x8x64xf32>, vector<2x8x64xf32> -> vector<2x8x64xf32>
    "tpu.trace_stop"() : () -> ()
    %360 = vector.broadcast %295 : vector<2x8x1xf32> to vector<2x8x64xf32>
    %361 = arith.mulf %359, %360 : vector<2x8x64xf32>
    %362 = vector.shape_cast %361 : vector<2x8x64xf32> to vector<16x64xf32>
    %cst_128 = arith.constant dense<0.000000e+00> : vector<16x64xf32>
    %363 = tpu.matmul %362, %355, %cst_128 {dimension_numbers = #tpu.dot_dimension_numbers<[1], [0], [0], [1], [0, 0, 1, 1], [], []>} : vector<16x64xf32>, vector<64x64xf32>, vector<16x64xf32> -> vector<16x64xf32>
    %364 = vector.shape_cast %363 : vector<16x64xf32> to vector<2x8x64xf32>
    %365 = vector.shape_cast %353 : vector<2x8x64xf32> to vector<16x64xf32>
    %cst_129 = arith.constant dense<0.000000e+00> : vector<16x64xf32>
    %366 = tpu.matmul %365, %357, %cst_129 {dimension_numbers = #tpu.dot_dimension_numbers<[1], [0], [0], [1], [0, 0, 1, 1], [], []>} : vector<16x64xf32>, vector<64x64xf32>, vector<16x64xf32> -> vector<16x64xf32>
    %367 = vector.shape_cast %366 : vector<16x64xf32> to vector<2x8x64xf32>
    %368 = arith.addf %364, %367 : vector<2x8x64xf32>
    %369 = vector.extract_strided_slice %358 {offsets = [0, 0], sizes = [1, 64], strides = [1, 1]} : vector<3x64xf32> to vector<1x64xf32>
    %370 = vector.shape_cast %369 : vector<1x64xf32> to vector<1x1x64xf32>
    %371 = vector.broadcast %370 : vector<1x1x64xf32> to vector<2x8x64xf32>
    %372 = arith.addf %368, %371 : vector<2x8x64xf32>
    %cst_130 = arith.constant 0.000000e+00 : f32
    %373 = vector.broadcast %cst_130 : f32 to vector<2x8x64xf32>
    %374 = arith.maximumf %372, %373 : vector<2x8x64xf32>
    %375 = vector.extract_strided_slice %358 {offsets = [1, 0], sizes = [1, 64], strides = [1, 1]} : vector<3x64xf32> to vector<1x64xf32>
    %376 = vector.shape_cast %375 : vector<1x64xf32> to vector<1x1x64xf32>
    %377 = vector.broadcast %376 : vector<1x1x64xf32> to vector<2x8x64xf32>
    %378 = arith.mulf %377, %374 : vector<2x8x64xf32>
    %379 = vector.extract_strided_slice %358 {offsets = [2, 0], sizes = [1, 64], strides = [1, 1]} : vector<3x64xf32> to vector<1x64xf32>
    %380 = vector.shape_cast %379 : vector<1x64xf32> to vector<1x1x64xf32>
    %381 = vector.broadcast %380 : vector<1x1x64xf32> to vector<2x8x64xf32>
    %382 = arith.addf %378, %381 : vector<2x8x64xf32>
    %c16_131 = arith.constant 16 : index
    %c0_132 = arith.constant 0 : index
    %c0_133 = arith.constant 0 : index
    %383 = vector.load %arg5[%c16_131, %c0_132, %c0_133] : memref<31x64x64xf32, #tpu.memory_space<vmem>>, vector<1x64x64xf32>
    %384 = vector.shape_cast %383 : vector<1x64x64xf32> to vector<64x64xf32>
    %c29 = arith.constant 29 : index
    %c0_134 = arith.constant 0 : index
    %385 = vector.load %arg6[%c29, %c0_134] : memref<50x64xf32, #tpu.memory_space<vmem>>, vector<1x64xf32>
    %386 = vector.shape_cast %382 : vector<2x8x64xf32> to vector<16x64xf32>
    %cst_135 = arith.constant dense<0.000000e+00> : vector<16x64xf32>
    %387 = tpu.matmul %386, %384, %cst_135 {dimension_numbers = #tpu.dot_dimension_numbers<[1], [0], [0], [1], [0, 0, 1, 1], [], []>} : vector<16x64xf32>, vector<64x64xf32>, vector<16x64xf32> -> vector<16x64xf32>
    %388 = vector.shape_cast %387 : vector<16x64xf32> to vector<2x8x64xf32>
    %389 = vector.shape_cast %385 : vector<1x64xf32> to vector<1x1x64xf32>
    %390 = vector.broadcast %389 : vector<1x1x64xf32> to vector<2x8x64xf32>
    %391 = arith.addf %388, %390 : vector<2x8x64xf32>
    %cst_136 = arith.constant 0.000000e+00 : f32
    %392 = vector.broadcast %cst_136 : f32 to vector<2x8x64xf32>
    %393 = arith.maximumf %391, %392 : vector<2x8x64xf32>
    %c17 = arith.constant 17 : index
    %c0_137 = arith.constant 0 : index
    %c0_138 = arith.constant 0 : index
    %394 = vector.load %arg5[%c17, %c0_137, %c0_138] : memref<31x64x64xf32, #tpu.memory_space<vmem>>, vector<1x64x64xf32>
    %395 = vector.shape_cast %394 : vector<1x64x64xf32> to vector<64x64xf32>
    %c18 = arith.constant 18 : index
    %c0_139 = arith.constant 0 : index
    %c0_140 = arith.constant 0 : index
    %396 = vector.load %arg5[%c18, %c0_139, %c0_140] : memref<31x64x64xf32, #tpu.memory_space<vmem>>, vector<1x64x64xf32>
    %397 = vector.shape_cast %396 : vector<1x64x64xf32> to vector<64x64xf32>
    %c30 = arith.constant 30 : index
    %c0_141 = arith.constant 0 : index
    %398 = vector.load %arg6[%c30, %c0_141] : memref<50x64xf32, #tpu.memory_space<vmem>>, vector<3x64xf32>
    "tpu.trace_start"() <{level = 10 : i32, message = "bij,bjf->bif"}> : () -> ()
    %cst_142 = arith.constant dense<0.000000e+00> : vector<2x8x64xf32>
    %399 = tpu.matmul %289, %286, %cst_142 {dimension_numbers = #tpu.dot_dimension_numbers<[2], [1], [1], [2], [0, 0, 0, 1, 1, 2], [0], [0]>} : vector<2x8x8xf32>, vector<2x8x64xf32>, vector<2x8x64xf32> -> vector<2x8x64xf32>
    "tpu.trace_stop"() : () -> ()
    %400 = vector.broadcast %295 : vector<2x8x1xf32> to vector<2x8x64xf32>
    %401 = arith.mulf %399, %400 : vector<2x8x64xf32>
    %402 = vector.shape_cast %401 : vector<2x8x64xf32> to vector<16x64xf32>
    %cst_143 = arith.constant dense<0.000000e+00> : vector<16x64xf32>
    %403 = tpu.matmul %402, %395, %cst_143 {dimension_numbers = #tpu.dot_dimension_numbers<[1], [0], [0], [1], [0, 0, 1, 1], [], []>} : vector<16x64xf32>, vector<64x64xf32>, vector<16x64xf32> -> vector<16x64xf32>
    %404 = vector.shape_cast %403 : vector<16x64xf32> to vector<2x8x64xf32>
    %405 = vector.shape_cast %286 : vector<2x8x64xf32> to vector<16x64xf32>
    %cst_144 = arith.constant dense<0.000000e+00> : vector<16x64xf32>
    %406 = tpu.matmul %405, %397, %cst_144 {dimension_numbers = #tpu.dot_dimension_numbers<[1], [0], [0], [1], [0, 0, 1, 1], [], []>} : vector<16x64xf32>, vector<64x64xf32>, vector<16x64xf32> -> vector<16x64xf32>
    %407 = vector.shape_cast %406 : vector<16x64xf32> to vector<2x8x64xf32>
    %408 = arith.addf %404, %407 : vector<2x8x64xf32>
    %409 = vector.extract_strided_slice %398 {offsets = [0, 0], sizes = [1, 64], strides = [1, 1]} : vector<3x64xf32> to vector<1x64xf32>
    %410 = vector.shape_cast %409 : vector<1x64xf32> to vector<1x1x64xf32>
    %411 = vector.broadcast %410 : vector<1x1x64xf32> to vector<2x8x64xf32>
    %412 = arith.addf %408, %411 : vector<2x8x64xf32>
    %cst_145 = arith.constant 0.000000e+00 : f32
    %413 = vector.broadcast %cst_145 : f32 to vector<2x8x64xf32>
    %414 = arith.maximumf %412, %413 : vector<2x8x64xf32>
    %415 = vector.extract_strided_slice %398 {offsets = [1, 0], sizes = [1, 64], strides = [1, 1]} : vector<3x64xf32> to vector<1x64xf32>
    %416 = vector.shape_cast %415 : vector<1x64xf32> to vector<1x1x64xf32>
    %417 = vector.broadcast %416 : vector<1x1x64xf32> to vector<2x8x64xf32>
    %418 = arith.mulf %417, %414 : vector<2x8x64xf32>
    %419 = vector.extract_strided_slice %398 {offsets = [2, 0], sizes = [1, 64], strides = [1, 1]} : vector<3x64xf32> to vector<1x64xf32>
    %420 = vector.shape_cast %419 : vector<1x64xf32> to vector<1x1x64xf32>
    %421 = vector.broadcast %420 : vector<1x1x64xf32> to vector<2x8x64xf32>
    %422 = arith.addf %418, %421 : vector<2x8x64xf32>
    %c19_146 = arith.constant 19 : index
    %c0_147 = arith.constant 0 : index
    %c0_148 = arith.constant 0 : index
    %423 = vector.load %arg5[%c19_146, %c0_147, %c0_148] : memref<31x64x64xf32, #tpu.memory_space<vmem>>, vector<1x64x64xf32>
    %424 = vector.shape_cast %423 : vector<1x64x64xf32> to vector<64x64xf32>
    %c20_149 = arith.constant 20 : index
    %c0_150 = arith.constant 0 : index
    %c0_151 = arith.constant 0 : index
    %425 = vector.load %arg5[%c20_149, %c0_150, %c0_151] : memref<31x64x64xf32, #tpu.memory_space<vmem>>, vector<1x64x64xf32>
    %426 = vector.shape_cast %425 : vector<1x64x64xf32> to vector<64x64xf32>
    %c33 = arith.constant 33 : index
    %c0_152 = arith.constant 0 : index
    %427 = vector.load %arg6[%c33, %c0_152] : memref<50x64xf32, #tpu.memory_space<vmem>>, vector<3x64xf32>
    "tpu.trace_start"() <{level = 10 : i32, message = "bij,bjf->bif"}> : () -> ()
    %cst_153 = arith.constant dense<0.000000e+00> : vector<2x8x64xf32>
    %428 = tpu.matmul %289, %422, %cst_153 {dimension_numbers = #tpu.dot_dimension_numbers<[2], [1], [1], [2], [0, 0, 0, 1, 1, 2], [0], [0]>} : vector<2x8x8xf32>, vector<2x8x64xf32>, vector<2x8x64xf32> -> vector<2x8x64xf32>
    "tpu.trace_stop"() : () -> ()
    %429 = vector.broadcast %295 : vector<2x8x1xf32> to vector<2x8x64xf32>
    %430 = arith.mulf %428, %429 : vector<2x8x64xf32>
    %431 = vector.shape_cast %430 : vector<2x8x64xf32> to vector<16x64xf32>
    %cst_154 = arith.constant dense<0.000000e+00> : vector<16x64xf32>
    %432 = tpu.matmul %431, %424, %cst_154 {dimension_numbers = #tpu.dot_dimension_numbers<[1], [0], [0], [1], [0, 0, 1, 1], [], []>} : vector<16x64xf32>, vector<64x64xf32>, vector<16x64xf32> -> vector<16x64xf32>
    %433 = vector.shape_cast %432 : vector<16x64xf32> to vector<2x8x64xf32>
    %434 = vector.shape_cast %422 : vector<2x8x64xf32> to vector<16x64xf32>
    %cst_155 = arith.constant dense<0.000000e+00> : vector<16x64xf32>
    %435 = tpu.matmul %434, %426, %cst_155 {dimension_numbers = #tpu.dot_dimension_numbers<[1], [0], [0], [1], [0, 0, 1, 1], [], []>} : vector<16x64xf32>, vector<64x64xf32>, vector<16x64xf32> -> vector<16x64xf32>
    %436 = vector.shape_cast %435 : vector<16x64xf32> to vector<2x8x64xf32>
    %437 = arith.addf %433, %436 : vector<2x8x64xf32>
    %438 = vector.extract_strided_slice %427 {offsets = [0, 0], sizes = [1, 64], strides = [1, 1]} : vector<3x64xf32> to vector<1x64xf32>
    %439 = vector.shape_cast %438 : vector<1x64xf32> to vector<1x1x64xf32>
    %440 = vector.broadcast %439 : vector<1x1x64xf32> to vector<2x8x64xf32>
    %441 = arith.addf %437, %440 : vector<2x8x64xf32>
    %cst_156 = arith.constant 0.000000e+00 : f32
    %442 = vector.broadcast %cst_156 : f32 to vector<2x8x64xf32>
    %443 = arith.maximumf %441, %442 : vector<2x8x64xf32>
    %444 = vector.extract_strided_slice %427 {offsets = [1, 0], sizes = [1, 64], strides = [1, 1]} : vector<3x64xf32> to vector<1x64xf32>
    %445 = vector.shape_cast %444 : vector<1x64xf32> to vector<1x1x64xf32>
    %446 = vector.broadcast %445 : vector<1x1x64xf32> to vector<2x8x64xf32>
    %447 = arith.mulf %446, %443 : vector<2x8x64xf32>
    %448 = vector.extract_strided_slice %427 {offsets = [2, 0], sizes = [1, 64], strides = [1, 1]} : vector<3x64xf32> to vector<1x64xf32>
    %449 = vector.shape_cast %448 : vector<1x64xf32> to vector<1x1x64xf32>
    %450 = vector.broadcast %449 : vector<1x1x64xf32> to vector<2x8x64xf32>
    %451 = arith.addf %447, %450 : vector<2x8x64xf32>
    %c21 = arith.constant 21 : index
    %c0_157 = arith.constant 0 : index
    %c0_158 = arith.constant 0 : index
    %452 = vector.load %arg5[%c21, %c0_157, %c0_158] : memref<31x64x64xf32, #tpu.memory_space<vmem>>, vector<1x64x64xf32>
    %453 = vector.shape_cast %452 : vector<1x64x64xf32> to vector<64x64xf32>
    %c22 = arith.constant 22 : index
    %c0_159 = arith.constant 0 : index
    %c0_160 = arith.constant 0 : index
    %454 = vector.load %arg5[%c22, %c0_159, %c0_160] : memref<31x64x64xf32, #tpu.memory_space<vmem>>, vector<1x64x64xf32>
    %455 = vector.shape_cast %454 : vector<1x64x64xf32> to vector<64x64xf32>
    %c36 = arith.constant 36 : index
    %c0_161 = arith.constant 0 : index
    %456 = vector.load %arg6[%c36, %c0_161] : memref<50x64xf32, #tpu.memory_space<vmem>>, vector<3x64xf32>
    "tpu.trace_start"() <{level = 10 : i32, message = "bij,bjf->bif"}> : () -> ()
    %cst_162 = arith.constant dense<0.000000e+00> : vector<2x8x64xf32>
    %457 = tpu.matmul %289, %451, %cst_162 {dimension_numbers = #tpu.dot_dimension_numbers<[2], [1], [1], [2], [0, 0, 0, 1, 1, 2], [0], [0]>} : vector<2x8x8xf32>, vector<2x8x64xf32>, vector<2x8x64xf32> -> vector<2x8x64xf32>
    "tpu.trace_stop"() : () -> ()
    %458 = vector.broadcast %295 : vector<2x8x1xf32> to vector<2x8x64xf32>
    %459 = arith.mulf %457, %458 : vector<2x8x64xf32>
    %460 = vector.shape_cast %459 : vector<2x8x64xf32> to vector<16x64xf32>
    %cst_163 = arith.constant dense<0.000000e+00> : vector<16x64xf32>
    %461 = tpu.matmul %460, %453, %cst_163 {dimension_numbers = #tpu.dot_dimension_numbers<[1], [0], [0], [1], [0, 0, 1, 1], [], []>} : vector<16x64xf32>, vector<64x64xf32>, vector<16x64xf32> -> vector<16x64xf32>
    %462 = vector.shape_cast %461 : vector<16x64xf32> to vector<2x8x64xf32>
    %463 = vector.shape_cast %451 : vector<2x8x64xf32> to vector<16x64xf32>
    %cst_164 = arith.constant dense<0.000000e+00> : vector<16x64xf32>
    %464 = tpu.matmul %463, %455, %cst_164 {dimension_numbers = #tpu.dot_dimension_numbers<[1], [0], [0], [1], [0, 0, 1, 1], [], []>} : vector<16x64xf32>, vector<64x64xf32>, vector<16x64xf32> -> vector<16x64xf32>
    %465 = vector.shape_cast %464 : vector<16x64xf32> to vector<2x8x64xf32>
    %466 = arith.addf %462, %465 : vector<2x8x64xf32>
    %467 = vector.extract_strided_slice %456 {offsets = [0, 0], sizes = [1, 64], strides = [1, 1]} : vector<3x64xf32> to vector<1x64xf32>
    %468 = vector.shape_cast %467 : vector<1x64xf32> to vector<1x1x64xf32>
    %469 = vector.broadcast %468 : vector<1x1x64xf32> to vector<2x8x64xf32>
    %470 = arith.addf %466, %469 : vector<2x8x64xf32>
    %cst_165 = arith.constant 0.000000e+00 : f32
    %471 = vector.broadcast %cst_165 : f32 to vector<2x8x64xf32>
    %472 = arith.maximumf %470, %471 : vector<2x8x64xf32>
    %473 = vector.extract_strided_slice %456 {offsets = [1, 0], sizes = [1, 64], strides = [1, 1]} : vector<3x64xf32> to vector<1x64xf32>
    %474 = vector.shape_cast %473 : vector<1x64xf32> to vector<1x1x64xf32>
    %475 = vector.broadcast %474 : vector<1x1x64xf32> to vector<2x8x64xf32>
    %476 = arith.mulf %475, %472 : vector<2x8x64xf32>
    %477 = vector.extract_strided_slice %456 {offsets = [2, 0], sizes = [1, 64], strides = [1, 1]} : vector<3x64xf32> to vector<1x64xf32>
    %478 = vector.shape_cast %477 : vector<1x64xf32> to vector<1x1x64xf32>
    %479 = vector.broadcast %478 : vector<1x1x64xf32> to vector<2x8x64xf32>
    %480 = arith.addf %476, %479 : vector<2x8x64xf32>
    %481 = vector.extract_strided_slice %393 {offsets = [0, 0, 0], sizes = [2, 8, 2], strides = [1, 1, 1]} : vector<2x8x64xf32> to vector<2x8x2xf32>
    %cst_166 = arith.constant dense<0xFF800000> : vector<2x8xf32>
    %482 = vector.multi_reduction <maximumf>, %481, %cst_166 [2] : vector<2x8x2xf32> to vector<2x8xf32>
    %483 = vector.shape_cast %482 : vector<2x8xf32> to vector<2x8x1xf32>
    %484 = vector.broadcast %483 : vector<2x8x1xf32> to vector<2x8x2xf32>
    %485 = arith.subf %481, %484 : vector<2x8x2xf32>
    %486 = math.exp %485 : vector<2x8x2xf32>
    %cst_167 = arith.constant dense<0.000000e+00> : vector<2x8xf32>
    %487 = vector.multi_reduction <add>, %486, %cst_167 [2] : vector<2x8x2xf32> to vector<2x8xf32>
    %488 = vector.shape_cast %487 : vector<2x8xf32> to vector<2x8x1xf32>
    %489 = vector.broadcast %488 : vector<2x8x1xf32> to vector<2x8x2xf32>
    %490 = arith.divf %486, %489 : vector<2x8x2xf32>
    %491 = math.log %488 : vector<2x8x1xf32>
    %492 = arith.mulf %490, %485 : vector<2x8x2xf32>
    %cst_168 = arith.constant dense<0.000000e+00> : vector<2x8xf32>
    %493 = vector.multi_reduction <add>, %492, %cst_168 [2] : vector<2x8x2xf32> to vector<2x8xf32>
    %494 = vector.shape_cast %493 : vector<2x8xf32> to vector<2x8x1xf32>
    %495 = arith.subf %491, %494 : vector<2x8x1xf32>
    %496 = vector.shape_cast %495 : vector<2x8x1xf32> to vector<1x2x8x1xf32>
    %cst_169 = arith.constant dense<0.000000e+00> : vector<1xf32>
    %497 = vector.multi_reduction <add>, %496, %cst_169 [1, 2, 3] : vector<1x2x8x1xf32> to vector<1xf32>
    %498 = vector.shape_cast %497 : vector<1xf32> to vector<1x1x1x1xf32>
    %499 = vector.extract %498[0, 0, 0, 0] : f32 from vector<1x1x1x1xf32>
    "tpu.trace_start"() <{level = 10 : i32, message = "bij,bjc->bic"}> : () -> ()
    %cst_170 = arith.constant dense<0.000000e+00> : vector<2x8x2xf32>
    %500 = tpu.matmul %289, %490, %cst_170 {dimension_numbers = #tpu.dot_dimension_numbers<[2], [1], [1], [2], [0, 0, 0, 1, 1, 2], [0], [0]>} : vector<2x8x8xf32>, vector<2x8x2xf32>, vector<2x8x2xf32> -> vector<2x8x2xf32>
    "tpu.trace_stop"() : () -> ()
    %501 = arith.mulf %289, %289 : vector<2x8x8xf32>
    %502 = vector.shape_cast %501 : vector<2x8x8xf32> to vector<1x2x8x8xf32>
    %cst_171 = arith.constant dense<0.000000e+00> : vector<1xf32>
    %503 = vector.multi_reduction <add>, %502, %cst_171 [1, 2, 3] : vector<1x2x8x8xf32> to vector<1xf32>
    %504 = vector.shape_cast %503 : vector<1xf32> to vector<1x1x1x1xf32>
    %505 = vector.extract %504[0, 0, 0, 0] : f32 from vector<1x1x1x1xf32>
    %506 = arith.mulf %490, %500 : vector<2x8x2xf32>
    %507 = vector.shape_cast %506 : vector<2x8x2xf32> to vector<1x2x8x2xf32>
    %cst_172 = arith.constant dense<0.000000e+00> : vector<1xf32>
    %508 = vector.multi_reduction <add>, %507, %cst_172 [1, 2, 3] : vector<1x2x8x2xf32> to vector<1xf32>
    %509 = vector.shape_cast %508 : vector<1xf32> to vector<1x1x1x1xf32>
    %510 = vector.extract %509[0, 0, 0, 0] : f32 from vector<1x1x1x1xf32>
    %cst_173 = arith.constant 2.000000e+00 : f32
    %511 = arith.mulf %cst_173, %510 : f32
    %512 = arith.subf %505, %511 : f32
    %513 = vector.extract_strided_slice %490 {offsets = [0, 0, 0], sizes = [1, 8, 2], strides = [1, 1, 1]} : vector<2x8x2xf32> to vector<1x8x2xf32>
    %514 = vector.shape_cast %513 : vector<1x8x2xf32> to vector<8x2xf32>
    %515 = vector.extract_strided_slice %480 {offsets = [0, 0, 0], sizes = [1, 8, 64], strides = [1, 1, 1]} : vector<2x8x64xf32> to vector<1x8x64xf32>
    %516 = vector.shape_cast %515 : vector<1x8x64xf32> to vector<8x64xf32>
    %cst_174 = arith.constant dense<0.000000e+00> : vector<2x64xf32>
    %517 = tpu.matmul %514, %516, %cst_174 {dimension_numbers = #tpu.dot_dimension_numbers<[0], [0], [1], [1], [0, 1, 1, 1], [], []>} : vector<8x2xf32>, vector<8x64xf32>, vector<2x64xf32> -> vector<2x64xf32>
    %518 = vector.extract_strided_slice %500 {offsets = [0, 0, 0], sizes = [1, 8, 2], strides = [1, 1, 1]} : vector<2x8x2xf32> to vector<1x8x2xf32>
    %519 = vector.shape_cast %518 : vector<1x8x2xf32> to vector<8x2xf32>
    %cst_175 = arith.constant dense<0.000000e+00> : vector<2x2xf32>
    %520 = tpu.matmul %514, %519, %cst_175 {dimension_numbers = #tpu.dot_dimension_numbers<[0], [0], [1], [1], [0, 1, 1, 1], [], []>} : vector<8x2xf32>, vector<8x2xf32>, vector<2x2xf32> -> vector<2x2xf32>
    %cst_176 = arith.constant dense<0.000000e+00> : vector<2x2xf32>
    %521 = tpu.matmul %514, %514, %cst_176 {dimension_numbers = #tpu.dot_dimension_numbers<[0], [0], [1], [1], [0, 1, 1, 1], [], []>} : vector<8x2xf32>, vector<8x2xf32>, vector<2x2xf32> -> vector<2x2xf32>
    %522 = arith.mulf %521, %521 : vector<2x2xf32>
    %523 = vector.shape_cast %522 : vector<2x2xf32> to vector<1x2x2xf32>
    %cst_177 = arith.constant dense<0.000000e+00> : vector<1xf32>
    %524 = vector.multi_reduction <add>, %523, %cst_177 [1, 2] : vector<1x2x2xf32> to vector<1xf32>
    %525 = vector.shape_cast %524 : vector<1xf32> to vector<1x1x1xf32>
    %526 = vector.extract %525[0, 0, 0] : f32 from vector<1x1x1xf32>
    %527 = arith.addf %512, %526 : f32
    %528 = vector.extract_strided_slice %490 {offsets = [1, 0, 0], sizes = [1, 8, 2], strides = [1, 1, 1]} : vector<2x8x2xf32> to vector<1x8x2xf32>
    %529 = vector.shape_cast %528 : vector<1x8x2xf32> to vector<8x2xf32>
    %530 = vector.extract_strided_slice %480 {offsets = [1, 0, 0], sizes = [1, 8, 64], strides = [1, 1, 1]} : vector<2x8x64xf32> to vector<1x8x64xf32>
    %531 = vector.shape_cast %530 : vector<1x8x64xf32> to vector<8x64xf32>
    %cst_178 = arith.constant dense<0.000000e+00> : vector<2x64xf32>
    %532 = tpu.matmul %529, %531, %cst_178 {dimension_numbers = #tpu.dot_dimension_numbers<[0], [0], [1], [1], [0, 1, 1, 1], [], []>} : vector<8x2xf32>, vector<8x64xf32>, vector<2x64xf32> -> vector<2x64xf32>
    %533 = vector.extract_strided_slice %500 {offsets = [1, 0, 0], sizes = [1, 8, 2], strides = [1, 1, 1]} : vector<2x8x2xf32> to vector<1x8x2xf32>
    %534 = vector.shape_cast %533 : vector<1x8x2xf32> to vector<8x2xf32>
    %cst_179 = arith.constant dense<0.000000e+00> : vector<2x2xf32>
    %535 = tpu.matmul %529, %534, %cst_179 {dimension_numbers = #tpu.dot_dimension_numbers<[0], [0], [1], [1], [0, 1, 1, 1], [], []>} : vector<8x2xf32>, vector<8x2xf32>, vector<2x2xf32> -> vector<2x2xf32>
    %cst_180 = arith.constant dense<0.000000e+00> : vector<2x2xf32>
    %536 = tpu.matmul %529, %529, %cst_180 {dimension_numbers = #tpu.dot_dimension_numbers<[0], [0], [1], [1], [0, 1, 1, 1], [], []>} : vector<8x2xf32>, vector<8x2xf32>, vector<2x2xf32> -> vector<2x2xf32>
    %537 = arith.mulf %536, %536 : vector<2x2xf32>
    %538 = vector.shape_cast %537 : vector<2x2xf32> to vector<1x2x2xf32>
    %cst_181 = arith.constant dense<0.000000e+00> : vector<1xf32>
    %539 = vector.multi_reduction <add>, %538, %cst_181 [1, 2] : vector<1x2x2xf32> to vector<1xf32>
    %540 = vector.shape_cast %539 : vector<1xf32> to vector<1x1x1xf32>
    %541 = vector.extract %540[0, 0, 0] : f32 from vector<1x1x1xf32>
    %542 = arith.addf %527, %541 : f32
    %543 = vector.shape_cast %517 : vector<2x64xf32> to vector<1x2x64xf32>
    %544 = vector.shape_cast %532 : vector<2x64xf32> to vector<1x2x64xf32>
    %545 = tpu.concatenate %543, %544 in 0 : vector<1x2x64xf32>, vector<1x2x64xf32> -> vector<2x2x64xf32>
    %546 = vector.shape_cast %520 : vector<2x2xf32> to vector<1x2x2xf32>
    %547 = vector.shape_cast %535 : vector<2x2xf32> to vector<1x2x2xf32>
    %548 = tpu.concatenate %546, %547 in 0 : vector<1x2x2xf32>, vector<1x2x2xf32> -> vector<2x2x2xf32>
    %cst_182 = arith.constant dense<0.000000e+00> : vector<2x2xf32>
    %549 = vector.multi_reduction <add>, %548, %cst_182 [2] : vector<2x2x2xf32> to vector<2x2xf32>
    %550 = vector.shape_cast %549 : vector<2x2xf32> to vector<2x2x1xf32>
    %cst_183 = arith.constant 1.000000e+00 : f32
    %551 = vector.broadcast %cst_183 : f32 to vector<2x2x1xf32>
    %552 = arith.maximumf %550, %551 : vector<2x2x1xf32>
    %cst_184 = arith.constant 1.000000e+00 : f32
    %553 = vector.broadcast %cst_184 : f32 to vector<2x2x1xf32>
    %554 = arith.divf %553, %552 : vector<2x2x1xf32>
    %c23_185 = arith.constant 23 : index
    %c0_186 = arith.constant 0 : index
    %c0_187 = arith.constant 0 : index
    %555 = vector.load %arg5[%c23_185, %c0_186, %c0_187] : memref<31x64x64xf32, #tpu.memory_space<vmem>>, vector<1x64x64xf32>
    %556 = vector.shape_cast %555 : vector<1x64x64xf32> to vector<64x64xf32>
    %c24 = arith.constant 24 : index
    %c0_188 = arith.constant 0 : index
    %c0_189 = arith.constant 0 : index
    %557 = vector.load %arg5[%c24, %c0_188, %c0_189] : memref<31x64x64xf32, #tpu.memory_space<vmem>>, vector<1x64x64xf32>
    %558 = vector.shape_cast %557 : vector<1x64x64xf32> to vector<64x64xf32>
    %c39 = arith.constant 39 : index
    %c0_190 = arith.constant 0 : index
    %559 = vector.load %arg6[%c39, %c0_190] : memref<50x64xf32, #tpu.memory_space<vmem>>, vector<3x64xf32>
    "tpu.trace_start"() <{level = 10 : i32, message = "bij,bjf->bif"}> : () -> ()
    %cst_191 = arith.constant dense<0.000000e+00> : vector<2x2x64xf32>
    %560 = tpu.matmul %548, %545, %cst_191 {dimension_numbers = #tpu.dot_dimension_numbers<[2], [1], [1], [2], [0, 0, 0, 1, 1, 2], [0], [0]>} : vector<2x2x2xf32>, vector<2x2x64xf32>, vector<2x2x64xf32> -> vector<2x2x64xf32>
    "tpu.trace_stop"() : () -> ()
    %561 = vector.broadcast %554 : vector<2x2x1xf32> to vector<2x2x64xf32>
    %562 = arith.mulf %560, %561 : vector<2x2x64xf32>
    %563 = vector.extract_strided_slice %562 {offsets = [0, 0, 0], sizes = [1, 2, 64], strides = [1, 1, 1]} : vector<2x2x64xf32> to vector<1x2x64xf32>
    %564 = vector.shape_cast %563 : vector<1x2x64xf32> to vector<2x64xf32>
    %cst_192 = arith.constant dense<0.000000e+00> : vector<2x64xf32>
    %565 = tpu.matmul %564, %556, %cst_192 {dimension_numbers = #tpu.dot_dimension_numbers<[1], [0], [0], [1], [0, 0, 1, 1], [], []>} : vector<2x64xf32>, vector<64x64xf32>, vector<2x64xf32> -> vector<2x64xf32>
    %566 = vector.extract_strided_slice %562 {offsets = [1, 0, 0], sizes = [1, 2, 64], strides = [1, 1, 1]} : vector<2x2x64xf32> to vector<1x2x64xf32>
    %567 = vector.shape_cast %566 : vector<1x2x64xf32> to vector<2x64xf32>
    %cst_193 = arith.constant dense<0.000000e+00> : vector<2x64xf32>
    %568 = tpu.matmul %567, %556, %cst_193 {dimension_numbers = #tpu.dot_dimension_numbers<[1], [0], [0], [1], [0, 0, 1, 1], [], []>} : vector<2x64xf32>, vector<64x64xf32>, vector<2x64xf32> -> vector<2x64xf32>
    %569 = vector.shape_cast %565 : vector<2x64xf32> to vector<1x2x64xf32>
    %570 = vector.shape_cast %568 : vector<2x64xf32> to vector<1x2x64xf32>
    %571 = tpu.concatenate %569, %570 in 0 : vector<1x2x64xf32>, vector<1x2x64xf32> -> vector<2x2x64xf32>
    %572 = vector.extract_strided_slice %545 {offsets = [0, 0, 0], sizes = [1, 2, 64], strides = [1, 1, 1]} : vector<2x2x64xf32> to vector<1x2x64xf32>
    %573 = vector.shape_cast %572 : vector<1x2x64xf32> to vector<2x64xf32>
    %cst_194 = arith.constant dense<0.000000e+00> : vector<2x64xf32>
    %574 = tpu.matmul %573, %558, %cst_194 {dimension_numbers = #tpu.dot_dimension_numbers<[1], [0], [0], [1], [0, 0, 1, 1], [], []>} : vector<2x64xf32>, vector<64x64xf32>, vector<2x64xf32> -> vector<2x64xf32>
    %575 = vector.extract_strided_slice %545 {offsets = [1, 0, 0], sizes = [1, 2, 64], strides = [1, 1, 1]} : vector<2x2x64xf32> to vector<1x2x64xf32>
    %576 = vector.shape_cast %575 : vector<1x2x64xf32> to vector<2x64xf32>
    %cst_195 = arith.constant dense<0.000000e+00> : vector<2x64xf32>
    %577 = tpu.matmul %576, %558, %cst_195 {dimension_numbers = #tpu.dot_dimension_numbers<[1], [0], [0], [1], [0, 0, 1, 1], [], []>} : vector<2x64xf32>, vector<64x64xf32>, vector<2x64xf32> -> vector<2x64xf32>
    %578 = vector.shape_cast %574 : vector<2x64xf32> to vector<1x2x64xf32>
    %579 = vector.shape_cast %577 : vector<2x64xf32> to vector<1x2x64xf32>
    %580 = tpu.concatenate %578, %579 in 0 : vector<1x2x64xf32>, vector<1x2x64xf32> -> vector<2x2x64xf32>
    %581 = arith.addf %571, %580 : vector<2x2x64xf32>
    %582 = vector.extract_strided_slice %559 {offsets = [0, 0], sizes = [1, 64], strides = [1, 1]} : vector<3x64xf32> to vector<1x64xf32>
    %583 = vector.shape_cast %582 : vector<1x64xf32> to vector<1x1x64xf32>
    %584 = vector.broadcast %583 : vector<1x1x64xf32> to vector<2x2x64xf32>
    %585 = arith.addf %581, %584 : vector<2x2x64xf32>
    %cst_196 = arith.constant 0.000000e+00 : f32
    %586 = vector.broadcast %cst_196 : f32 to vector<2x2x64xf32>
    %587 = arith.maximumf %585, %586 : vector<2x2x64xf32>
    %588 = vector.extract_strided_slice %559 {offsets = [1, 0], sizes = [1, 64], strides = [1, 1]} : vector<3x64xf32> to vector<1x64xf32>
    %589 = vector.shape_cast %588 : vector<1x64xf32> to vector<1x1x64xf32>
    %590 = vector.broadcast %589 : vector<1x1x64xf32> to vector<2x2x64xf32>
    %591 = arith.mulf %590, %587 : vector<2x2x64xf32>
    %592 = vector.extract_strided_slice %559 {offsets = [2, 0], sizes = [1, 64], strides = [1, 1]} : vector<3x64xf32> to vector<1x64xf32>
    %593 = vector.shape_cast %592 : vector<1x64xf32> to vector<1x1x64xf32>
    %594 = vector.broadcast %593 : vector<1x1x64xf32> to vector<2x2x64xf32>
    %595 = arith.addf %591, %594 : vector<2x2x64xf32>
    %c25 = arith.constant 25 : index
    %c0_197 = arith.constant 0 : index
    %c0_198 = arith.constant 0 : index
    %596 = vector.load %arg5[%c25, %c0_197, %c0_198] : memref<31x64x64xf32, #tpu.memory_space<vmem>>, vector<1x64x64xf32>
    %597 = vector.shape_cast %596 : vector<1x64x64xf32> to vector<64x64xf32>
    %c26_199 = arith.constant 26 : index
    %c0_200 = arith.constant 0 : index
    %c0_201 = arith.constant 0 : index
    %598 = vector.load %arg5[%c26_199, %c0_200, %c0_201] : memref<31x64x64xf32, #tpu.memory_space<vmem>>, vector<1x64x64xf32>
    %599 = vector.shape_cast %598 : vector<1x64x64xf32> to vector<64x64xf32>
    %c42 = arith.constant 42 : index
    %c0_202 = arith.constant 0 : index
    %600 = vector.load %arg6[%c42, %c0_202] : memref<50x64xf32, #tpu.memory_space<vmem>>, vector<3x64xf32>
    "tpu.trace_start"() <{level = 10 : i32, message = "bij,bjf->bif"}> : () -> ()
    %cst_203 = arith.constant dense<0.000000e+00> : vector<2x2x64xf32>
    %601 = tpu.matmul %548, %595, %cst_203 {dimension_numbers = #tpu.dot_dimension_numbers<[2], [1], [1], [2], [0, 0, 0, 1, 1, 2], [0], [0]>} : vector<2x2x2xf32>, vector<2x2x64xf32>, vector<2x2x64xf32> -> vector<2x2x64xf32>
    "tpu.trace_stop"() : () -> ()
    %602 = vector.broadcast %554 : vector<2x2x1xf32> to vector<2x2x64xf32>
    %603 = arith.mulf %601, %602 : vector<2x2x64xf32>
    %604 = vector.extract_strided_slice %603 {offsets = [0, 0, 0], sizes = [1, 2, 64], strides = [1, 1, 1]} : vector<2x2x64xf32> to vector<1x2x64xf32>
    %605 = vector.shape_cast %604 : vector<1x2x64xf32> to vector<2x64xf32>
    %cst_204 = arith.constant dense<0.000000e+00> : vector<2x64xf32>
    %606 = tpu.matmul %605, %597, %cst_204 {dimension_numbers = #tpu.dot_dimension_numbers<[1], [0], [0], [1], [0, 0, 1, 1], [], []>} : vector<2x64xf32>, vector<64x64xf32>, vector<2x64xf32> -> vector<2x64xf32>
    %607 = vector.extract_strided_slice %603 {offsets = [1, 0, 0], sizes = [1, 2, 64], strides = [1, 1, 1]} : vector<2x2x64xf32> to vector<1x2x64xf32>
    %608 = vector.shape_cast %607 : vector<1x2x64xf32> to vector<2x64xf32>
    %cst_205 = arith.constant dense<0.000000e+00> : vector<2x64xf32>
    %609 = tpu.matmul %608, %597, %cst_205 {dimension_numbers = #tpu.dot_dimension_numbers<[1], [0], [0], [1], [0, 0, 1, 1], [], []>} : vector<2x64xf32>, vector<64x64xf32>, vector<2x64xf32> -> vector<2x64xf32>
    %610 = vector.shape_cast %606 : vector<2x64xf32> to vector<1x2x64xf32>
    %611 = vector.shape_cast %609 : vector<2x64xf32> to vector<1x2x64xf32>
    %612 = tpu.concatenate %610, %611 in 0 : vector<1x2x64xf32>, vector<1x2x64xf32> -> vector<2x2x64xf32>
    %613 = vector.extract_strided_slice %595 {offsets = [0, 0, 0], sizes = [1, 2, 64], strides = [1, 1, 1]} : vector<2x2x64xf32> to vector<1x2x64xf32>
    %614 = vector.shape_cast %613 : vector<1x2x64xf32> to vector<2x64xf32>
    %cst_206 = arith.constant dense<0.000000e+00> : vector<2x64xf32>
    %615 = tpu.matmul %614, %599, %cst_206 {dimension_numbers = #tpu.dot_dimension_numbers<[1], [0], [0], [1], [0, 0, 1, 1], [], []>} : vector<2x64xf32>, vector<64x64xf32>, vector<2x64xf32> -> vector<2x64xf32>
    %616 = vector.extract_strided_slice %595 {offsets = [1, 0, 0], sizes = [1, 2, 64], strides = [1, 1, 1]} : vector<2x2x64xf32> to vector<1x2x64xf32>
    %617 = vector.shape_cast %616 : vector<1x2x64xf32> to vector<2x64xf32>
    %cst_207 = arith.constant dense<0.000000e+00> : vector<2x64xf32>
    %618 = tpu.matmul %617, %599, %cst_207 {dimension_numbers = #tpu.dot_dimension_numbers<[1], [0], [0], [1], [0, 0, 1, 1], [], []>} : vector<2x64xf32>, vector<64x64xf32>, vector<2x64xf32> -> vector<2x64xf32>
    %619 = vector.shape_cast %615 : vector<2x64xf32> to vector<1x2x64xf32>
    %620 = vector.shape_cast %618 : vector<2x64xf32> to vector<1x2x64xf32>
    %621 = tpu.concatenate %619, %620 in 0 : vector<1x2x64xf32>, vector<1x2x64xf32> -> vector<2x2x64xf32>
    %622 = arith.addf %612, %621 : vector<2x2x64xf32>
    %623 = vector.extract_strided_slice %600 {offsets = [0, 0], sizes = [1, 64], strides = [1, 1]} : vector<3x64xf32> to vector<1x64xf32>
    %624 = vector.shape_cast %623 : vector<1x64xf32> to vector<1x1x64xf32>
    %625 = vector.broadcast %624 : vector<1x1x64xf32> to vector<2x2x64xf32>
    %626 = arith.addf %622, %625 : vector<2x2x64xf32>
    %cst_208 = arith.constant 0.000000e+00 : f32
    %627 = vector.broadcast %cst_208 : f32 to vector<2x2x64xf32>
    %628 = arith.maximumf %626, %627 : vector<2x2x64xf32>
    %629 = vector.extract_strided_slice %600 {offsets = [1, 0], sizes = [1, 64], strides = [1, 1]} : vector<3x64xf32> to vector<1x64xf32>
    %630 = vector.shape_cast %629 : vector<1x64xf32> to vector<1x1x64xf32>
    %631 = vector.broadcast %630 : vector<1x1x64xf32> to vector<2x2x64xf32>
    %632 = arith.mulf %631, %628 : vector<2x2x64xf32>
    %633 = vector.extract_strided_slice %600 {offsets = [2, 0], sizes = [1, 64], strides = [1, 1]} : vector<3x64xf32> to vector<1x64xf32>
    %634 = vector.shape_cast %633 : vector<1x64xf32> to vector<1x1x64xf32>
    %635 = vector.broadcast %634 : vector<1x1x64xf32> to vector<2x2x64xf32>
    %636 = arith.addf %632, %635 : vector<2x2x64xf32>
    %c27 = arith.constant 27 : index
    %c0_209 = arith.constant 0 : index
    %c0_210 = arith.constant 0 : index
    %637 = vector.load %arg5[%c27, %c0_209, %c0_210] : memref<31x64x64xf32, #tpu.memory_space<vmem>>, vector<1x64x64xf32>
    %638 = vector.shape_cast %637 : vector<1x64x64xf32> to vector<64x64xf32>
    %c28 = arith.constant 28 : index
    %c0_211 = arith.constant 0 : index
    %c0_212 = arith.constant 0 : index
    %639 = vector.load %arg5[%c28, %c0_211, %c0_212] : memref<31x64x64xf32, #tpu.memory_space<vmem>>, vector<1x64x64xf32>
    %640 = vector.shape_cast %639 : vector<1x64x64xf32> to vector<64x64xf32>
    %c45 = arith.constant 45 : index
    %c0_213 = arith.constant 0 : index
    %641 = vector.load %arg6[%c45, %c0_213] : memref<50x64xf32, #tpu.memory_space<vmem>>, vector<3x64xf32>
    "tpu.trace_start"() <{level = 10 : i32, message = "bij,bjf->bif"}> : () -> ()
    %cst_214 = arith.constant dense<0.000000e+00> : vector<2x2x64xf32>
    %642 = tpu.matmul %548, %636, %cst_214 {dimension_numbers = #tpu.dot_dimension_numbers<[2], [1], [1], [2], [0, 0, 0, 1, 1, 2], [0], [0]>} : vector<2x2x2xf32>, vector<2x2x64xf32>, vector<2x2x64xf32> -> vector<2x2x64xf32>
    "tpu.trace_stop"() : () -> ()
    %643 = vector.broadcast %554 : vector<2x2x1xf32> to vector<2x2x64xf32>
    %644 = arith.mulf %642, %643 : vector<2x2x64xf32>
    %645 = vector.extract_strided_slice %644 {offsets = [0, 0, 0], sizes = [1, 2, 64], strides = [1, 1, 1]} : vector<2x2x64xf32> to vector<1x2x64xf32>
    %646 = vector.shape_cast %645 : vector<1x2x64xf32> to vector<2x64xf32>
    %cst_215 = arith.constant dense<0.000000e+00> : vector<2x64xf32>
    %647 = tpu.matmul %646, %638, %cst_215 {dimension_numbers = #tpu.dot_dimension_numbers<[1], [0], [0], [1], [0, 0, 1, 1], [], []>} : vector<2x64xf32>, vector<64x64xf32>, vector<2x64xf32> -> vector<2x64xf32>
    %648 = vector.extract_strided_slice %644 {offsets = [1, 0, 0], sizes = [1, 2, 64], strides = [1, 1, 1]} : vector<2x2x64xf32> to vector<1x2x64xf32>
    %649 = vector.shape_cast %648 : vector<1x2x64xf32> to vector<2x64xf32>
    %cst_216 = arith.constant dense<0.000000e+00> : vector<2x64xf32>
    %650 = tpu.matmul %649, %638, %cst_216 {dimension_numbers = #tpu.dot_dimension_numbers<[1], [0], [0], [1], [0, 0, 1, 1], [], []>} : vector<2x64xf32>, vector<64x64xf32>, vector<2x64xf32> -> vector<2x64xf32>
    %651 = vector.shape_cast %647 : vector<2x64xf32> to vector<1x2x64xf32>
    %652 = vector.shape_cast %650 : vector<2x64xf32> to vector<1x2x64xf32>
    %653 = tpu.concatenate %651, %652 in 0 : vector<1x2x64xf32>, vector<1x2x64xf32> -> vector<2x2x64xf32>
    %654 = vector.extract_strided_slice %636 {offsets = [0, 0, 0], sizes = [1, 2, 64], strides = [1, 1, 1]} : vector<2x2x64xf32> to vector<1x2x64xf32>
    %655 = vector.shape_cast %654 : vector<1x2x64xf32> to vector<2x64xf32>
    %cst_217 = arith.constant dense<0.000000e+00> : vector<2x64xf32>
    %656 = tpu.matmul %655, %640, %cst_217 {dimension_numbers = #tpu.dot_dimension_numbers<[1], [0], [0], [1], [0, 0, 1, 1], [], []>} : vector<2x64xf32>, vector<64x64xf32>, vector<2x64xf32> -> vector<2x64xf32>
    %657 = vector.extract_strided_slice %636 {offsets = [1, 0, 0], sizes = [1, 2, 64], strides = [1, 1, 1]} : vector<2x2x64xf32> to vector<1x2x64xf32>
    %658 = vector.shape_cast %657 : vector<1x2x64xf32> to vector<2x64xf32>
    %cst_218 = arith.constant dense<0.000000e+00> : vector<2x64xf32>
    %659 = tpu.matmul %658, %640, %cst_218 {dimension_numbers = #tpu.dot_dimension_numbers<[1], [0], [0], [1], [0, 0, 1, 1], [], []>} : vector<2x64xf32>, vector<64x64xf32>, vector<2x64xf32> -> vector<2x64xf32>
    %660 = vector.shape_cast %656 : vector<2x64xf32> to vector<1x2x64xf32>
    %661 = vector.shape_cast %659 : vector<2x64xf32> to vector<1x2x64xf32>
    %662 = tpu.concatenate %660, %661 in 0 : vector<1x2x64xf32>, vector<1x2x64xf32> -> vector<2x2x64xf32>
    %663 = arith.addf %653, %662 : vector<2x2x64xf32>
    %664 = vector.extract_strided_slice %641 {offsets = [0, 0], sizes = [1, 64], strides = [1, 1]} : vector<3x64xf32> to vector<1x64xf32>
    %665 = vector.shape_cast %664 : vector<1x64xf32> to vector<1x1x64xf32>
    %666 = vector.broadcast %665 : vector<1x1x64xf32> to vector<2x2x64xf32>
    %667 = arith.addf %663, %666 : vector<2x2x64xf32>
    %cst_219 = arith.constant 0.000000e+00 : f32
    %668 = vector.broadcast %cst_219 : f32 to vector<2x2x64xf32>
    %669 = arith.maximumf %667, %668 : vector<2x2x64xf32>
    %670 = vector.extract_strided_slice %641 {offsets = [1, 0], sizes = [1, 64], strides = [1, 1]} : vector<3x64xf32> to vector<1x64xf32>
    %671 = vector.shape_cast %670 : vector<1x64xf32> to vector<1x1x64xf32>
    %672 = vector.broadcast %671 : vector<1x1x64xf32> to vector<2x2x64xf32>
    %673 = arith.mulf %672, %669 : vector<2x2x64xf32>
    %674 = vector.extract_strided_slice %641 {offsets = [2, 0], sizes = [1, 64], strides = [1, 1]} : vector<3x64xf32> to vector<1x64xf32>
    %675 = vector.shape_cast %674 : vector<1x64xf32> to vector<1x1x64xf32>
    %676 = vector.broadcast %675 : vector<1x1x64xf32> to vector<2x2x64xf32>
    %677 = arith.addf %673, %676 : vector<2x2x64xf32>
    %cst_220 = arith.constant dense<0.000000e+00> : vector<2x64xf32>
    %678 = vector.multi_reduction <add>, %677, %cst_220 [1] : vector<2x2x64xf32> to vector<2x64xf32>
    %cst_221 = arith.constant 2.000000e+00 : f32
    %679 = vector.broadcast %cst_221 : f32 to vector<2x64xf32>
    %680 = arith.divf %678, %679 : vector<2x64xf32>
    %c29_222 = arith.constant 29 : index
    %c0_223 = arith.constant 0 : index
    %c0_224 = arith.constant 0 : index
    %681 = vector.load %arg5[%c29_222, %c0_223, %c0_224] : memref<31x64x64xf32, #tpu.memory_space<vmem>>, vector<1x64x64xf32>
    %682 = vector.shape_cast %681 : vector<1x64x64xf32> to vector<64x64xf32>
    %cst_225 = arith.constant dense<0.000000e+00> : vector<2x64xf32>
    %683 = tpu.matmul %680, %682, %cst_225 {dimension_numbers = #tpu.dot_dimension_numbers<[1], [0], [0], [1], [0, 0, 1, 1], [], []>} : vector<2x64xf32>, vector<64x64xf32>, vector<2x64xf32> -> vector<2x64xf32>
    %c48 = arith.constant 48 : index
    %c0_226 = arith.constant 0 : index
    %684 = vector.load %arg6[%c48, %c0_226] : memref<50x64xf32, #tpu.memory_space<vmem>>, vector<1x64xf32>
    %685 = vector.broadcast %684 : vector<1x64xf32> to vector<2x64xf32>
    %686 = arith.addf %683, %685 : vector<2x64xf32>
    %cst_227 = arith.constant 0.000000e+00 : f32
    %687 = vector.broadcast %cst_227 : f32 to vector<2x64xf32>
    %688 = arith.maximumf %686, %687 : vector<2x64xf32>
    %c30_228 = arith.constant 30 : index
    %c0_229 = arith.constant 0 : index
    %c0_230 = arith.constant 0 : index
    %689 = vector.load %arg5[%c30_228, %c0_229, %c0_230] : memref<31x64x64xf32, #tpu.memory_space<vmem>>, vector<1x64x64xf32>
    %690 = vector.shape_cast %689 : vector<1x64x64xf32> to vector<64x64xf32>
    %cst_231 = arith.constant dense<0.000000e+00> : vector<2x64xf32>
    %691 = tpu.matmul %688, %690, %cst_231 {dimension_numbers = #tpu.dot_dimension_numbers<[1], [0], [0], [1], [0, 0, 1, 1], [], []>} : vector<2x64xf32>, vector<64x64xf32>, vector<2x64xf32> -> vector<2x64xf32>
    %c49 = arith.constant 49 : index
    %c0_232 = arith.constant 0 : index
    %692 = vector.load %arg6[%c49, %c0_232] : memref<50x64xf32, #tpu.memory_space<vmem>>, vector<1x64xf32>
    %693 = vector.broadcast %692 : vector<1x64xf32> to vector<2x64xf32>
    %694 = arith.addf %691, %693 : vector<2x64xf32>
    %c0_233 = arith.constant 0 : index
    %c0_234 = arith.constant 0 : index
    %c0_235 = arith.constant 0 : index
    %695 = vector.load %arg7[%c0_233, %c0_234, %c0_235] : memref<1x2x64xf32, #tpu.memory_space<vmem>>, vector<1x2x64xf32>
    %696 = vector.shape_cast %695 : vector<1x2x64xf32> to vector<2x64xf32>
    %697 = vector.shape_cast %694 : vector<2x64xf32> to vector<1x2x64xf32>
    tpu.vector_store %arg7[%c0_233, %c0_234, %c0_235], %697 {strides = array<i32>} : memref<1x2x64xf32, #tpu.memory_space<vmem>>, vector<1x2x64xf32>,
    %698 = tpu.iota {dimensions = array<i32: 1>} : vector<1x4xi32>
    %c0_i32 = arith.constant 0 : i32
    %699 = vector.broadcast %c0_i32 : i32 to vector<1x4xi32>
    %700 = arith.cmpi eq, %698, %699 : vector<1x4xi32>
    %cst_236 = arith.constant 0.000000e+00 : f32
    %701 = vector.broadcast %283 : f32 to vector<1x4xf32>
    %702 = vector.broadcast %cst_236 : f32 to vector<1x4xf32>
    %703 = arith.select %700, %701, %702 : vector<1x4xi1>, vector<1x4xf32>
    %c1_i32 = arith.constant 1 : i32
    %704 = vector.broadcast %c1_i32 : i32 to vector<1x4xi32>
    %705 = arith.cmpi eq, %698, %704 : vector<1x4xi32>
    %cst_237 = arith.constant 0.000000e+00 : f32
    %706 = vector.broadcast %240 : f32 to vector<1x4xf32>
    %707 = vector.broadcast %cst_237 : f32 to vector<1x4xf32>
    %708 = arith.select %705, %706, %707 : vector<1x4xi1>, vector<1x4xf32>
    %709 = arith.addf %703, %708 : vector<1x4xf32>
    %c2_i32 = arith.constant 2 : i32
    %710 = vector.broadcast %c2_i32 : i32 to vector<1x4xi32>
    %711 = arith.cmpi eq, %698, %710 : vector<1x4xi32>
    %cst_238 = arith.constant 0.000000e+00 : f32
    %712 = vector.broadcast %542 : f32 to vector<1x4xf32>
    %713 = vector.broadcast %cst_238 : f32 to vector<1x4xf32>
    %714 = arith.select %711, %712, %713 : vector<1x4xi1>, vector<1x4xf32>
    %715 = arith.addf %709, %714 : vector<1x4xf32>
    %c3_i32 = arith.constant 3 : i32
    %716 = vector.broadcast %c3_i32 : i32 to vector<1x4xi32>
    %717 = arith.cmpi eq, %698, %716 : vector<1x4xi32>
    %cst_239 = arith.constant 0.000000e+00 : f32
    %718 = vector.broadcast %499 : f32 to vector<1x4xf32>
    %719 = vector.broadcast %cst_239 : f32 to vector<1x4xf32>
    %720 = arith.select %717, %718, %719 : vector<1x4xi1>, vector<1x4xf32>
    %721 = arith.addf %715, %720 : vector<1x4xf32>
    %c0_240 = arith.constant 0 : index
    %c0_241 = arith.constant 0 : index
    %c0_242 = arith.constant 0 : index
    %722 = vector.load %arg8[%c0_240, %c0_241, %c0_242] : memref<1x1x4xf32, #tpu.memory_space<vmem>>, vector<1x1x4xf32>
    %723 = vector.shape_cast %722 : vector<1x1x4xf32> to vector<1x4xf32>
    %724 = vector.shape_cast %721 : vector<1x4xf32> to vector<1x1x4xf32>
    tpu.vector_store %arg8[%c0_240, %c0_241, %c0_242], %724 {strides = array<i32>} : memref<1x1x4xf32, #tpu.memory_space<vmem>>, vector<1x1x4xf32>,
    return
  }
  func.func @transform_0(%arg0: i32) -> (i32, i32, i32) {
    %c0_i32 = arith.constant 0 : i32
    %c0_i32_0 = arith.constant 0 : i32
    %c0_i32_1 = arith.constant 0 : i32
    return %arg0, %c0_i32, %c0_i32_0 : i32, i32, i32
  }
  func.func @transform_1(%arg0: i32) -> (i32, i32, i32) {
    %c0_i32 = arith.constant 0 : i32
    %c0_i32_0 = arith.constant 0 : i32
    %c0_i32_1 = arith.constant 0 : i32
    return %arg0, %c0_i32, %c0_i32_0 : i32, i32, i32
  }
  func.func @transform_2(%arg0: i32) -> (i32, i32, i32) {
    %c0_i32 = arith.constant 0 : i32
    %c0_i32_0 = arith.constant 0 : i32
    %c0_i32_1 = arith.constant 0 : i32
    return %arg0, %c0_i32, %c0_i32_0 : i32, i32, i32
  }
  func.func @transform_3(%arg0: i32) -> (i32, i32, i32) {
    %c0_i32 = arith.constant 0 : i32
    %c0_i32_0 = arith.constant 0 : i32
    %c0_i32_1 = arith.constant 0 : i32
    %c0_i32_2 = arith.constant 0 : i32
    return %c0_i32, %c0_i32_0, %c0_i32_1 : i32, i32, i32
  }
  func.func @transform_4(%arg0: i32) -> (i32, i32, i32) {
    %c0_i32 = arith.constant 0 : i32
    %c0_i32_0 = arith.constant 0 : i32
    %c0_i32_1 = arith.constant 0 : i32
    %c0_i32_2 = arith.constant 0 : i32
    return %c0_i32, %c0_i32_0, %c0_i32_1 : i32, i32, i32
  }
  func.func @transform_5(%arg0: i32) -> (i32, i32) {
    %c0_i32 = arith.constant 0 : i32
    %c0_i32_0 = arith.constant 0 : i32
    %c0_i32_1 = arith.constant 0 : i32
    return %c0_i32, %c0_i32_0 : i32, i32
  }
  func.func @transform_6(%arg0: i32) -> (i32, i32, i32) {
    %c0_i32 = arith.constant 0 : i32
    %c0_i32_0 = arith.constant 0 : i32
    %c0_i32_1 = arith.constant 0 : i32
    return %arg0, %c0_i32, %c0_i32_0 : i32, i32, i32
  }
  func.func @transform_7(%arg0: i32) -> (i32, i32, i32) {
    %c0_i32 = arith.constant 0 : i32
    %c0_i32_0 = arith.constant 0 : i32
    %c0_i32_1 = arith.constant 0 : i32
    return %arg0, %c0_i32, %c0_i32_0 : i32, i32, i32
  }
}

</mosaic_0001>

<bundles_post_ra>
// kernel: fwd.1
= control target key start
LH: loop header
LB: loop body
LE: loop exit
PB: predicated region body
PF: predicated region fallthrough
CT: control target
= control target key end

     0   :  { %s13524_s0 = inlined_call_operand.vmem [shape: f32[4,32,32], index: 0, kind: input, shape index: {}]   ;;  %s13525_s1 = inlined_call_operand.hbm [shape: f32[4,32,32], index: 1, kind: input, shape index: {}]   ;;  %s13526_s2 = inlined_call_operand.vmem [shape: f32[4,32,1], index: 2, kind: input, shape index: {}]   ;;  %s13527_s3 = inlined_call_operand.hbm [shape: f32[4,32,64], index: 3, kind: input, shape index: {}]   ;;  %s13528_s4 = inlined_call_operand.hbm [shape: f32[31,64,64], index: 4, kind: input, shape index: {}]   ;;  %s13529_s5 = inlined_call_operand.hbm [shape: f32[50,64], index: 5, kind: input, shape index: {}]   ;;  %s13530_s6 = inlined_call_operand.hbm [shape: f32[2,2,64], index: 6, kind: output, shape index: {0}]   ;;  %s13531_s7 = inlined_call_operand.vmem [shape: f32[2,1,4], index: 7, kind: output, shape index: {1}]  }
   0x1   :  { %13561 = sst [smem:[#allocation37_spill]] %s13524_s0 }
   0x2   :  { %13562 = sst [smem:[#allocation38_spill]] %s13527_s3 }
   0x3   :  { %13 = vsyncpa [#allocation3], 0 }
   0x4   :  { %15 = vsyncpa [#allocation3 + $0x1], 0 }
   0x5   :  { %16 = vsyncpa [#allocation6], 0 }
   0x6   :  { %17 = vsyncpa [#allocation9], 0 }
   0x7   :  { %18 = vsyncpa [#allocation4], 0 }
   0x8   :  { %20 = vsyncpa [#allocation4 + $0x1], 0  ;;  %s11835_s24 = smov 0   ;;  %s11837_s25 = smov 0  }
   0x9   :  { %s11839_s26 = smov 0   ;;  %s11841_s27 = smov 0  }
   0xa LB: > { %s11856_s28 = sadd.s32 4294967295, %s11783_s27   ;;  %s9249_s29 = sadd.s32 4294967294, %s11783_s27   ;;  %s11783_s27 = sphi %s11841_s27, %s13630_s27   ;;  %s11779_s26 = sphi %s11839_s26, %s13629_s26   ;;  %s11775_s25 = sphi %s11837_s25, %s13628_s25   ;;  %s11771_s24 = sphi %s11835_s24, %s13627_s24  }
   0xb   : > { %p72_p0 = scmp.ne.s32.totalorder %s11775_s25, %s11771_s24  ;;  %p13532_p1 = scmp.eq.s32.totalorder %s11856_s28, 0 }
   0xc   : > { %p185_p2 = scmp.eq.s32.totalorder %s11856_s28, 1  ;;  %p191_p3 = scmp.eq.s32.totalorder %s9249_s29, 1 }
   0xd   : > { %p11865_p4 = por %p13532_p1, %p72_p0  ;;  %p9250_p5 = scmp.ge.s32.totalorder %s11783_s27, 1 }
   0xe   : > { %p11870_p6 = por %p191_p3, %p72_p0  ;;  %p224_p7 = scmp.lt.s32.totalorder %s11783_s27, 3 }
   0xf   : > { %s13563_s30 = scalar_select %p11865_p4, 1, 0 }
  0x10   : > { %s13564_s8 = scalar_select %p11870_p6, 1, 0 }
  0x11   : > { %p11875_p8 = pnand %p9250_p5, %p224_p7  ;;  %s11785_s10 = smov [#allocation5]  }
  0x12   : > { %s236_s11 = sshll.u32 %s11785_s10, 4  ;;  %s11786_s13 = smov [#allocation7]   ;;  %s237_s11 = int_to_ptr.vmem [resolvable:$true] %s236_s11 }
  0x13   : > { %s13565_s9 = scalar_select %p11875_p8, 1, 0 }
  0x14   : > { %p11421_p9 = pneg %p11875_p8  ;;  %s249_s14 = sshll.u32 %s11786_s13, 4  ;;  %s250_s14 = int_to_ptr.vmem [resolvable:$true] %s249_s14 }
  0x15   : > { %s11787_s15 = smov [#allocation8]   ;;  %s11616_s17 = scalar_lea.vmem %s237_s11, 2048 }
  0x16   : > { %p11884_p11 = pnand %p11421_p9, %p13532_p1  ;;  %s262_s16 = sshll.u32 %s11787_s15, 4  ;;  %s263_s16 = int_to_ptr.vmem [resolvable:$true] %s262_s16 }
  0x17   : > { %p11617_p13 = scmp.ne.s32.totalorder %s237_s11, %s11616_s17  ;;  %p11624_p5 = scmp.lt.s32.totalorder %s237_s11, %s237_s11 }
  0x18   : > { %p11607_p12 = pneg %p11884_p11  ;;  %p11625_p7 = scmp.lt.s32.totalorder %s11616_s17, %s11616_s17 }
  0x1a   : > { %p11619_p0 = pnand %p11617_p13, %p11607_p12  ;;  %p11626_p9 = por %p11625_p7, %p11624_p5 }
  0x1c   : > { %p11620_p3 = pneg %p11619_p0 }
  0x1e   : > { %p11627_p10 = pnand %p11626_p9, %p11620_p3 }
  0x20   : > { %11630 = shalt.err (!%p11627_p10)
}
  0x21   : > { %s13533_s18 = smov 128   ;;  %s13534_s19 = smov 8  }
  0x22   : > { %s13567_s3 = sld [smem:[#allocation38_spill]]  ;;  %s11642_s22 = scalar_lea.vmem %s250_s14, 31744 }
  0x23   : > { %p11643_p13 = scmp.ne.s32.totalorder %s250_s14, %s11642_s22  ;;  %p11650_p3 = scmp.lt.s32.totalorder %s250_s14, %s250_s14 }
  0x24   : > { %p11651_p10 = scmp.lt.s32.totalorder %s11642_s22, %s11642_s22 }
  0x25   : > { %p11645_p0 = pnand %p11643_p13, %p11607_p12 }
  0x26   : > { %p11652_p7 = por %p11651_p10, %p11650_p3 }
  0x27   : > { %p11646_p5 = pneg %p11645_p0 }
  0x28   : > { %11424 = dma.hbm_to_vmem [thread:$0]  (!%p11884_p11), %s13567_s3, 2048, %s237_s11, [#allocation6], %s13533_s18, %s13533_s18, %s13534_s19  }
  0x29   : > { %p11653_p9 = pnand %p11652_p7, %p11646_p5 }
  0x2b   : > { %11656 = shalt.err (!%p11653_p9)
}
  0x2c   : > { %11427 = dma.hbm_to_vmem [thread:$0]  (!%p11884_p11), %s13528_s4, 31744, %s250_s14, [#allocation6], %s13533_s18, %s13533_s18, %s13534_s19  }
  0x2d   : > { %s11668_s10 = scalar_lea.vmem %s263_s16, 896  ;;  %p11676_p3 = scmp.lt.s32.totalorder %s263_s16, %s263_s16 }
  0x2e   : > { %p11669_p1 = scmp.ne.s32.totalorder %s263_s16, %s11668_s10  ;;  %p11677_p5 = scmp.lt.s32.totalorder %s11668_s10, %s11668_s10 }
  0x30   : > { %p11671_p13 = pnand %p11669_p1, %p11607_p12  ;;  %p11678_p10 = por %p11677_p5, %p11676_p3 }
  0x32   : > { %p11672_p0 = pneg %p11671_p13 }
  0x34   : > { %p11679_p7 = pnand %p11678_p10, %p11672_p0 }
  0x36   : > { %11682 = shalt.err (!%p11679_p7)
}
  0x37   : > { %11430 = dma.hbm_to_vmem [thread:$0]  (!%p11884_p11), %s13529_s5, 896, %s263_s16, [#allocation9], %s13533_s18, %s13533_s18, %s13534_s19  }
  0x38   : > { %s11924_s14 = sadd.s32 1, %s11783_s27   ;;  %s59_s15 = sadd.s32 1, %s11779_s26 }
  0x39   : > { %s56_s12 = ssub.s32 %s11783_s27, %s11924_s14  ;;  %p66_p12 = scmp.ne.s32.totalorder %s11779_s26, %s11775_s25 }
  0x3a   : > { %p57_p1 = scmp.eq.s32.totalorder %s56_s12, 0  ;;  %p67_p9 = scmp.eq.s32.totalorder %s11783_s27, 0 }
  0x3b   : > { %p11442_p13 = scmp.lt.s32.totalorder %s11783_s27, 2  ;;  %p11938_p3 = por %p185_p2, %p66_p12 }
  0x3c   : > { %s11934_s17 = scalar_select %p57_p1, %s11779_s26, %s59_s15  }
  0x3d   : > { %p68_p0 = por %p67_p9, %p66_p12  ;;  %s286_s21 = sand.u32 1, %s11779_s26  }
  0x3e   : > { %s13568_s20 = scalar_select %p11938_p3, 1, 0 }
  0x3f   : > { %s9517_s22 = sshll.u32 %s11783_s27, 10  ;;  %s9255_s16 = sshll.u32 %s286_s21, 6 }
  0x40   : > { %s11947_s10 = scalar_lea.hbm %s13525_s1, %s9517_s22  ;;  %s290_s11 = scalar_lea.vmem [#allocation2], %s9255_s16 }
  0x41   : > { %s298_s13 = sshll.u32 %s290_s11, 4  ;;  %p11949_p11 = pnand %p11442_p13, %p68_p0  ;;  %s11953_s13 = int_to_ptr.vmem [resolvable:$true] %s298_s13 }
  0x42   : > { %s11955_s15 = scalar_lea.sflag [#allocation3], %s286_s21  ;;  %s11683_s18 = scalar_lea.hbm %s11947_s10, 1024 }
  0x43   : > { %p11684_p2 = scmp.ne.s32.totalorder %s11947_s10, %s11683_s18  ;;  %p11685_p5 = pneg %p11949_p11 }
  0x44   : > { %s11688_s16 = scalar_lea.hbm %s13525_s1, 2048  ;;  %p11689_p1 = scmp.lt.s32.totalorder %s11947_s10, %s13525_s1 }
  0x45   : > { %p11686_p10 = pnand %p11685_p5, %p11684_p2  ;;  %p11690_p12 = scmp.lt.s32.totalorder %s11688_s16, %s11683_s18 }
  0x47   : > { %p11687_p7 = pneg %p11686_p10  ;;  %p11691_p9 = por %p11690_p12, %p11689_p1 }
  0x49   : > { %p11692_p13 = pnand %p11691_p9, %p11687_p7 }
  0x4b   : > { %11695 = shalt.err (!%p11692_p13)
}
  0x4c   : > { %s11696_s21 = scalar_lea.vmem %s11953_s13, 1024  ;;  %s11790_s19 = smov [#allocation2]  }
  0x4d   : > { %p11697_p0 = scmp.ne.s32.totalorder %s11953_s13, %s11696_s21  ;;  %s11701_s3 = sshll.u32 %s11790_s19, 4  ;;  %s11702_s3 = int_to_ptr.vmem [resolvable:$false] %s11701_s3 }
  0x4e   : > { %s11703_s22 = scalar_lea.vmem %s11702_s3, 2048  ;;  %p11704_p10 = scmp.lt.s32.totalorder %s11953_s13, %s11702_s3 }
  0x4f   : > { %p11699_p6 = pnand %p11697_p0, %p11685_p5  ;;  %p11705_p3 = scmp.lt.s32.totalorder %s11703_s22, %s11696_s21 }
  0x51   : > { %p11700_p2 = pneg %p11699_p6  ;;  %p11706_p4 = por %p11705_p3, %p11704_p10 }
  0x53   : > { %p11707_p8 = pnand %p11706_p4, %p11700_p2 }
  0x55   : > { %11710 = shalt.err (!%p11707_p8)
}
  0x56   : > { %s13570_s18 = smov 8   ;;  %s13571_s23 = smov 128  }
  0x57   : > { %11434 = dma.hbm_to_vmem [thread:$0]  (!%p11949_p11), %s11947_s10, 1024, %s11953_s13, %s11955_s15, %s13571_s23, %s13571_s23, %s13570_s18  }
  0x58   : > { %p13572_p6 = scmp.ne.s32.totalorder %s13565_s9, 0 }
  0x5a   : > { %320 = sbr.rel (%p13572_p6) target bundleno = 6937 (0x1b19), region = 44 }
  0x5f   : > { %s11982_s19 = sand.u32 1, %s11775_s25   ;;  %p13573_p4 = scmp.ne.s32.totalorder %s13563_s30, 0 }
  0x60   : > { %s9260_s3 = sshll.u32 %s11982_s19, 6  ;;  %s323_s16 = scalar_lea.sflag [#allocation3], %s11982_s19 }
  0x61   : > { %s11986_s29 = scalar_lea.vmem [#allocation2], %s9260_s3 }
  0x62   : > { %11754 = dma.done.wait (%p13573_p4), %s323_s16, 1024  }
  0x63   : > { %11756 = vsyncadd (%p13573_p4), %s323_s16, 4294966272  ;;  %p13574_p8 = scmp.eq.s32.totalorder %s11856_s28, 0 }
  0x65   : > { %11758 = dma.done.wait (%p13574_p8), [#allocation6], 33792   ;;  %p13575_p3 = pmov %p13574_p8 }
  0x67   : > { %11760 = vsyncadd (%p13575_p3), [#allocation6], 4294933504  ;;  %p13576_p11 = pmov %p13575_p3 }
  0x68   : > { %p13577_p5 = pmov %p13575_p3 }
  0x69   : > { %11762 = dma.done.wait (%p13576_p11), [#allocation9], 896  }
  0x6a   : > { %11764 = vsyncadd (%p13577_p5), [#allocation9], 4294966400  ;;  %s9265_s9 = sshll.u32 %s11856_s28, 1  ;;  %s13578_s0 = sld [smem:[#allocation37_spill]]  ;;  %vm426_vm0 = vcmask 261120   ;;  %v12022_v3 = vld [vmem:[%s11986_s29] sm:$0xff] }
  0x6b   : > { %p385_p7 = scmp.lt.s32.totalorder %s9265_s9, 3  ;;  %10166 = vmatprep.mubr.msk.f32.mxu0 %vm426_vm0, %v12022_v3  ;;  %v12045_v8 = vld [vmem:[%s11986_s29 + $0x8] sm:$0xff]  ;;  %v12053_v10 = vld [vmem:[%s11986_s29 + $0x10] sm:$0xff]  ;;  %v12057_v11 = vld [vmem:[%s11986_s29 + $0x20] sm:$0xff]  ;;  %v427_v12 = vsel %vm426_vm0, %v12022_v3, 0.0  ;;  %v11791_v32 = vmov 0  }
  0x6c   : > { %v12065_v13 = vld [vmem:[%s11986_s29 + $0x28] sm:$0xff]  ;;  %v433_v14 = vsel %vm426_vm0, %v12053_v10, 0.0  ;;  %v12072_v15 = vld [vmem:[%s11986_s29 + $0x18] sm:$0xff]  ;;  %v12076_v16 = vld [vmem:[%s11986_s29 + $0x30] sm:$0xff]  ;;  %10180 = vmatprep.mubr.msk.f32.mxu1 %vm426_vm0, %v12057_v11  ;;  %428 = vadd.xlane.f32.xlu0 %v427_v12  ;;  %v430_v17 = vsel %vm426_vm0, %v12045_v8, 0.0  ;;  %v439_v20 = vsel %vm426_vm0, %v12057_v11, 0.0 }
  0x6d   : > { %s13632_s9 = smov (!%p385_p7, %s9265_s9), 3  ;;  %434 = vadd.xlane.f32.xlu1 %v433_v14  ;;  %v12089_v18 = vld [vmem:[%s11986_s29 + $0x38] sm:$0xff]  ;;  %v436_v19 = vsel %vm426_vm0, %v12072_v15, 0.0  ;;  %v442_v21 = vsel %vm426_vm0, %v12065_v13, 0.0  ;;  %v445_v22 = vsel %vm426_vm0, %v12076_v16, 0.0  ;;  %v482_v26 = vld [vmem:[#allocation5 + $0x30] sm:$0xff]  ;;  %11487 = vset.pattern.permute.xlu0 %v11791_v32 }
  0x6e   : > { %s9518_s30 = sshll.u32 %s13632_s9, 5  ;;  %v448_v23 = vsel %vm426_vm0, %v12089_v18, 0.0  ;;  %v483_v24 = vld [vmem:[#allocation5 + $0x38] sm:$0xff]  ;;  %v477_v27 = vld [vmem:[#allocation5 + $0x10] sm:$0xff]  ;;  %v481_v28 = vld [vmem:[#allocation5 + $0x28] sm:$0xff]  ;;  %11488 = vset.pattern.permute.xlu1 %v11791_v32  ;;  %vm1241_vm1 = vcmask 523264  }
  0x6f   : > { %v478_v25 = vld [vmem:[#allocation5 + $0x18] sm:$0xff]  ;;  %v476_v29 = vld [vmem:[#allocation5 + $0x8] sm:$0xff]  ;;  %v480_v30 = vld [vmem:[#allocation5 + $0x20] sm:$0xff]  ;;  %s12125_s21 = scalar_lea.vmem %s13526_s2, %s9518_s30  ;;  %vm3704_vm2 = vcmask 64512   ;;  %vm11793_vm3 = vmmov 0   ;;  %vm6681_vm4 = vcmask 15360  }
  0x70   : > { %s12009_s12 = scalar_lea.vmem %s13578_s0, %s9518_s30  ;;  %431 = vadd.xlane.f32.xlu0 %v430_v17  ;;  %v475_v31 = vld [vmem:[#allocation5] sm:$0xff]  ;;  %v420_v33 = vld [vmem:[%s12125_s21 + $0x10] sm:$0xff]  ;;  %v419_v34 = vld [vmem:[%s12125_s21 + $0x8] sm:$0xff]  ;;  %vm7146_vm5 = vcmask 9216   ;;  %vm7449_vm6 = vcmask 1041408   ;;  %vm3873_vm7 = vcmask 7168  }
  0x71   : > { %v12012_v0 = vld [vmem:[%s12009_s12 + $0x18] sm:$0xff]  ;;  %v12015_v1 = vld [vmem:[%s12009_s12 + $0x10] sm:$0xff]  ;;  %v12026_v4 = vld [vmem:[%s12009_s12 + $0x8] sm:$0xff]  ;;  %437 = vadd.xlane.f32.xlu1 %v436_v19  ;;  %p399_p1 = scmp.lt.s32.totalorder %s11856_s28, 1  ;;  %vm9085_vm12 = vcmask 24576   ;;  %vm8871_vm13 = vcmask 517120  }
  0x72   : > { %10158 = vmatprep.subr.mxu0 %v12012_v0  ;;  %v12019_v2 = vld [vmem:[%s12009_s12 + $0x38] sm:$0xff]  ;;  %v12030_v5 = vld [vmem:[%s12009_s12 + $0x30] sm:$0xff]  ;;  %v402_v6 = vld [vmem:[%s12009_s12] sm:$0xff]  ;;  %vm8905_vm14 = vcmask 1041409   ;;  %p13624_p9 = scmp.ne.s32.totalorder %s13568_s20, 0 }
  0x73   : > { %10159 = vmatpush3.msra.mxu0 %v12012_v0  ;;  %10172 = vmatprep.subr.mxu1 %v12019_v2  ;;  %v12039_v7 = vld [vmem:[%s12009_s12 + $0x28] sm:$0xff]  ;;  %v12049_v9 = vld [vmem:[%s12009_s12 + $0x20] sm:$0xff]  ;;  %v421_v35 = vld [vmem:[%s12125_s21 + $0x18] sm:$0xff] }
  0x74   : > { %10160 = vmatprep.subr.mxu0 %v12015_v1  ;;  %10173 = vmatpush3.msra.mxu1 %v12019_v2  ;;  %v418_v36 = vld [vmem:[%s12125_s21] sm:$0xff]  ;;  %v425_v37 = vld [vmem:[%s12125_s21 + $0x38] sm:$0xff]  ;;  %v424_v38 = vld [vmem:[%s12125_s21 + $0x30] sm:$0xff] }
  0x75   : > { %10161 = vmatpush3.msra.mxu0 %v12015_v1  ;;  %10174 = vmatprep.subr.mxu1 %v12030_v5  ;;  %v423_v39 = vld [vmem:[%s12125_s21 + $0x28] sm:$0xff]  ;;  %v422_v40 = vld [vmem:[%s12125_s21 + $0x20] sm:$0xff] }
  0x76   : > { %10162 = vmatprep.subr.mxu0 %v12026_v4  ;;  %10175 = vmatpush3.msra.mxu1 %v12030_v5 }
  0x77   : > { %10163 = vmatpush3.msra.mxu0 %v12026_v4  ;;  %10176 = vmatprep.subr.mxu1 %v12039_v7 }
  0x78   : > { %10164 = vmatprep.subr.mxu0 %v402_v6  ;;  %10177 = vmatpush3.msra.mxu1 %v12039_v7 }
  0x79   : > { %10165 = vmatpush3.msra.mxu0 %v402_v6  ;;  %10178 = vmatprep.subr.mxu1 %v12049_v9 }
  0x7a   : > { %10167 = vmatmul.mubr.msk.f32.vlgmr.msra.gmra.mxu0 %vm426_vm0, %v12045_v8  ;;  %10179 = vmatpush3.msra.mxu1 %v12049_v9 }
  0x7b   : > { %10169 = vmatprep.mubr.msk.f32.mxu0 %vm426_vm0, %v12053_v10  ;;  %10181 = vmatmul.mubr.msk.f32.vlgmr.msra.gmra.mxu1 %vm426_vm0, %v12065_v13 }
  0x7c   : > { %10183 = vmatprep.mubr.msk.f32.mxu1 %vm426_vm0, %v12076_v16  ;;  %440 = vadd.xlane.f32.xlu0 %v439_v20 }
  0x7d   : > { %443 = vadd.xlane.f32.xlu1 %v442_v21  ;;  %10206 = vmatprep.subr.mxu1 %v483_v24 }
  0x7e   : > { %10170 = vmatmul.mubr.msk.f32.gmra.mxu0 %vm426_vm0, %v12072_v15  ;;  %10186 = vmatprep.subr.mxu0 %v478_v25 }
  0x7f   : > { %10184 = vmatmul.mubr.msk.f32.gmra.mxu1 %vm426_vm0, %v12089_v18  ;;  %10187 = vmatpush3.msra.mxu0 %v478_v25 }
  0x80   : > { %10214 = vmatprep.mubr.msk.f32.mxu1 %vm426_vm0, %v402_v6  ;;  %446 = vadd.xlane.f32.xlu0 %v445_v22 }
  0x81   : > { %449 = vadd.xlane.f32.xlu1 %v448_v23  ;;  %10207 = vmatpush3.msra.mxu1 %v483_v24 }
  0x82   : > { %10208 = vmatprep.subr.mxu1 %v482_v26  ;;  %10188 = vmatprep.subr.mxu0 %v477_v27 }
  0x83   : > { %10209 = vmatpush3.msra.mxu1 %v482_v26  ;;  %10189 = vmatpush3.msra.mxu0 %v477_v27 }
  0x84   : > { %10210 = vmatprep.subr.mxu1 %v481_v28  ;;  %10190 = vmatprep.subr.mxu0 %v476_v29 }
  0x85   : > { %10211 = vmatpush3.msra.mxu1 %v481_v28  ;;  %10191 = vmatpush3.msra.mxu0 %v476_v29  ;;  %v13538_v28 = vlaneseq }
  0x86   : > { %10212 = vmatprep.subr.mxu1 %v480_v30  ;;  %10192 = vmatprep.subr.mxu0 %v475_v31 }
  0x87   : > { %10213 = vmatpush3.msra.mxu1 %v480_v30  ;;  %10193 = vmatpush3.msra.mxu0 %v475_v31  ;;  %v954_v31 = vshrl.u32 %v13538_v28, 7  ;;  %v3036_v28 = vld [vmem:[#allocation7 + $0x1e8] sm:$0xff] }
  0x88   : > { %10215 = vmatmul.mubr.msk.f32.vlgmr.msra.gmra.mxu1 %vm426_vm0, %v12026_v4 }
  0x89   : > { %10217 = vmatprep.mubr.msk.f32.mxu1 %vm426_vm0, %v12015_v1 }
  0x8c   : > { %10218 = vmatmul.mubr.msk.f32.gmra.mxu1 %vm426_vm0, %v12012_v0 }
  0x8d   : > { %10220 = vmatprep.mubr.msk.f32.mxu1 %vm426_vm0, %v12049_v9 }
  0x90   : > { %10221 = vmatmul.mubr.msk.f32.gmra.mxu1 %vm426_vm0, %v12039_v7 }
  0x91   : > { %10223 = vmatprep.mubr.msk.f32.mxu1 %vm426_vm0, %v12030_v5 }
  0x92   : > { %977 = vperm.xlu1 %11488, %v420_v33   ;;  %v12200_v33 = vsub.s32 0, %v954_v31 }
  0x94   : > { %10224 = vmatmul.mubr.msk.f32.gmra.mxu1 %vm426_vm0, %v12019_v2 }
  0x95   : > { %10248 = vmatprep.mubr.msk.f32.mxu1 %vm426_vm0, %v12057_v11 }
  0x96   : > { %982 = vperm.xlu0 %11487, %v421_v35   ;;  %972 = vperm.xlu1 %11488, %v419_v34   ;;  %v484_v35 = vld [vmem:[#allocation8] sm:$0x7] }
  0x9a   : > { %967 = vperm.xlu1 %11488, %v418_v36  }
  0x9e   : > { %1002 = vperm.xlu1 %11488, %v425_v37  }
  0xa2   : > { %997 = vperm.xlu1 %11488, %v424_v38   ;;  %v956_v38 = vrot.slane %v484_v35, %v12200_v33 }
  0xa6   : > { %992 = vperm.xlu1 %11488, %v423_v39  }
  0xaa   : > { %987 = vperm.xlu1 %11488, %v422_v40  }
  0xf5   : > { %v429_v41 = vpop.xlane.xlu0 %428 }
  0xf6   : > { %v435_v42 = vpop.xlane.xlu1 %434  ;;  %v451_v47 = vmax.f32 %v429_v41, 1.0 }
  0xf7   : > { %v453_v52 = vmax.f32 %v435_v42, 1.0 }
  0xf9   : > { %v432_v43 = vpop.xlane.xlu0 %431 }
  0xfa   : > { %v438_v44 = vpop.xlane.xlu1 %437  ;;  %v452_v46 = vmax.f32 %v432_v43, 1.0 }
  0xfb   : > { %v454_v50 = vmax.f32 %v438_v44, 1.0 }
  0xfc   : > { %11489 = vrcp.f32 %v452_v46 }
  0xfd   : > { %11491 = vrcp.f32 %v451_v47 }
 0x105   : > { %v441_v45 = vpop.xlane.xlu0 %440 }
 0x106   : > { %v444_v48 = vpop.xlane.xlu1 %443  ;;  %v455_v49 = vmax.f32 %v441_v45, 1.0 }
 0x107   : > { %v456_v54 = vmax.f32 %v444_v48, 1.0 }
 0x108   : > { %11493 = vrcp.f32 %v455_v49 }
 0x109   : > { %v447_v51 = vpop.xlane.xlu0 %446  ;;  %11495 = vrcp.f32 %v454_v50  ;;  %v12135_v58 = vpop.eup %11489 }
 0x10a   : > { %v457_v53 = vmax.f32 %v447_v51, 1.0  ;;  %11497 = vrcp.f32 %v453_v52  ;;  %v450_v55 = vpop.xlane.xlu1 %449  ;;  %v12137_v59 = vpop.eup %11491 }
 0x10b   : > { %v458_v56 = vmax.f32 %v450_v55, 1.0  ;;  %v12210_v55 = vsub.s32 1, %v954_v31 }
 0x10c   : > { %11499 = vrcp.f32 %v457_v53 }
 0x10d   : > { %11501 = vrcp.f32 %v456_v54 }
 0x10e   : > { %11503 = vrcp.f32 %v458_v56  ;;  %v12193_v25 = vpop.permute.xlu1 %977 }
 0x111   : > { %v12207_v47 = vpop.permute.xlu0 %982 }
 0x112   : > { %v12195_v26 = vpop.permute.xlu1 %972 }
 0x115   : > { %v12142_v63 = vpop.eup %11493 }
 0x116   : > { %v12147_v2 = vpop.eup %11495  ;;  %v12197_v30 = vpop.permute.xlu1 %967 }
 0x117   : > { %v12151_v5 = vpop.eup %11497 }
 0x119   : > { %v12161_v14 = vpop.eup %11499 }
 0x11a   : > { %v12166_v19 = vpop.eup %11501  ;;  %v12202_v34 = vpop.permute.xlu1 %1002 }
 0x11b   : > { %v12180_v23 = vpop.eup %11503 }
 0x11e   : > { %v12205_v42 = vpop.permute.xlu1 %997 }
 0x122   : > { %v12212_v56 = vpop.permute.xlu1 %992 }
 0x13a   : > { %v10168_v57 = vpop.f32.mrf.mxu0 }
 0x13b   : > { %v10182_v62 = vpop.f32.mrf.mxu1  ;;  %v12145_v0 = vmul.f32 %v12135_v58, %v10168_v57 }
 0x13c   : > { %v563_v60 = vpop.f32.mrf.mxu0  ;;  %v12178_v22 = vmul.f32 %v12166_v19, %v10182_v62 }
 0x13d   : > { %v12140_v61 = vmul.f32 %v12137_v59, %v563_v60  ;;  %v660_v4 = vpop.f32.mrf.mxu1 }
 0x13e   : > { %v10171_v1 = vpop.f32.mrf.mxu0  ;;  %v12159_v9 = vmul.f32 %v12142_v63, %v660_v4 }
 0x13f   : > { %10194 = vmatprep.mubr.msk.f32.mxu0 %vm426_vm0, %v12140_v61  ;;  %v10185_v12 = vpop.f32.mrf.mxu1  ;;  %v12164_v17 = vmul.f32 %v12147_v2, %v10171_v1 }
 0x140   : > { %v573_v6 = vpop.f32.mrf.mxu0  ;;  %10195 = vmatmul.mubr.msk.f32.vlgmr.msra.gmra.mxu0 %vm426_vm0, %v12145_v0  ;;  %v12187_v24 = vmul.f32 %v12180_v23, %v10185_v12  ;;  %v12216_v12 = vsub.s32 2, %v954_v31 }
 0x141   : > { %v12156_v7 = vmul.f32 %v12151_v5, %v573_v6  ;;  %v670_v20 = vpop.f32.mrf.mxu1 }
 0x142   : > { %v12175_v21 = vmul.f32 %v12161_v14, %v670_v20 }
 0x143   : > { %10197 = vmatprep.mubr.msk.f32.mxu0 %vm426_vm0, %v12156_v7 }
 0x144   : > { %10198 = vmatmul.mubr.msk.f32.gmra.mxu0 %vm426_vm0, %v12164_v17 }
 0x145   : > { %10200 = vmatprep.mubr.msk.f32.mxu0 %vm426_vm0, %v12159_v9 }
 0x148   : > { %10201 = vmatmul.mubr.msk.f32.gmra.mxu0 %vm426_vm0, %v12178_v22  ;;  %v10216_v27 = vpop.f32.mrf.mxu1 }
 0x149   : > { %10203 = vmatprep.mubr.msk.f32.mxu0 %vm426_vm0, %v12175_v21 }
 0x14a   : > { %v906_v29 = vpop.f32.mrf.mxu1 }
 0x14c   : > { %10204 = vmatmul.mubr.msk.f32.gmra.mxu0 %vm426_vm0, %v12187_v24  ;;  %v10219_v32 = vpop.f32.mrf.mxu1 }
 0x14d   : > { %10234 = vmatprep.mubr.msk.f32.mxu0 %vm426_vm0, %v12022_v3 }
 0x14e   : > { %v916_v36 = vpop.f32.mrf.mxu1 }
 0x150   : > { %v10222_v41 = vpop.f32.mrf.mxu1 }
 0x152   : > { %v926_v50 = vpop.f32.mrf.mxu1 }
 0x154   : > { %v10225_v6 = vpop.f32.mrf.mxu1 }
 0x200   : > { %v10196_v37 = vpop.f32.mrf.mxu0 }
 0x201   : > { %v946_v39 = vadd.f32 %v10216_v27, %v10196_v37 }
 0x202   : > { %v777_v40 = vpop.f32.mrf.mxu0 }
 0x203   : > { %v945_v43 = vadd.f32 %v906_v29, %v777_v40  ;;  %v958_v44 = vadd.f32 %v956_v38, %v946_v39  ;;  %v1024_v39 = vrot.slane %v484_v35, %v12210_v55 }
 0x204   : > { %v10199_v45 = vpop.f32.mrf.mxu0 }
 0x205   : > { %v948_v46 = vadd.f32 %v10219_v32, %v10199_v45  ;;  %v957_v48 = vadd.f32 %v956_v38, %v945_v43  ;;  %v1006_v53 = vmul.f32 %v12195_v26, %v958_v44  ;;  %v936_v45 = vpop.f32.mrf.mxu1 }
 0x206   : > { %v787_v49 = vpop.f32.mrf.mxu0 }
 0x207   : > { %v960_v51 = vadd.f32 %v956_v38, %v948_v46  ;;  %v947_v52 = vadd.f32 %v916_v36, %v787_v49  ;;  %v1005_v1 = vmul.f32 %v12197_v30, %v957_v48  ;;  %v1014_v36 = vmax.f32 %v1006_v53, 0.0 }
 0x208   : > { %v10202_v54 = vpop.f32.mrf.mxu0  ;;  %v1036_v49 = vrot.slane %v484_v35, %v12216_v12 }
 0x209   : > { %v959_v57 = vadd.f32 %v956_v38, %v947_v52  ;;  %v950_v60 = vadd.f32 %v10222_v41, %v10202_v54  ;;  %v1008_v62 = vmul.f32 %v12207_v47, %v960_v51  ;;  %v1013_v44 = vmax.f32 %v1005_v1, 0.0  ;;  %v12222_v54 = vpop.permute.xlu1 %987 }
 0x20a   : > { %v797_v4 = vpop.f32.mrf.mxu0 }
 0x20b   : > { %v1007_v20 = vmul.f32 %v12193_v25, %v959_v57  ;;  %v962_v27 = vadd.f32 %v956_v38, %v950_v60  ;;  %v949_v29 = vadd.f32 %v926_v50, %v797_v4  ;;  %v1016_v32 = vmax.f32 %v1008_v62, 0.0 }
 0x20c   : > { %v10205_v37 = vpop.f32.mrf.mxu0  ;;  %v1026_v57 = vmul.f32 %v1024_v39, %v1014_v36  ;;  %v1025_v35 = vmul.f32 %v1024_v39, %v1013_v44 }
 0x20d   : > { %v1015_v40 = vmax.f32 %v1007_v20, 0.0  ;;  %v961_v43 = vadd.f32 %v956_v38, %v949_v29  ;;  %v952_v41 = vadd.f32 %v10225_v6, %v10205_v37  ;;  %v1028_v48 = vmul.f32 %v1024_v39, %v1016_v32 }
 0x20e   : > { %v807_v46 = vpop.f32.mrf.mxu0  ;;  %v1010_v31 = vmul.f32 %v12212_v56, %v962_v27  ;;  %v12234_v29 = vadd.f32 %v1036_v49, %v1026_v57  ;;  %v1037_v37 = vadd.f32 %v1036_v49, %v1025_v35  ;;  %v1058_v57 = vld [vmem:[#allocation7 + $0x60] sm:$0xff]  ;;  %v1056_v35 = vld [vmem:[#allocation7 + $0x50] sm:$0xff] }
 0x20f   : > { %v964_v51 = vadd.f32 %v956_v38, %v952_v41  ;;  %v951_v52 = vadd.f32 %v936_v45, %v807_v46  ;;  %v12224_v50 = vadd.f32 %v1036_v49, %v1028_v48  ;;  %v1027_v53 = vmul.f32 %v1024_v39, %v1015_v40  ;;  %v1052_v46 = vld [vmem:[#allocation7 + $0x38] sm:$0xff] }
 0x210   : > { %v1009_v60 = vmul.f32 %v12222_v54, %v961_v43  ;;  %v1018_v6 = vmax.f32 %v1010_v31, 0.0  ;;  %v1051_v31 = vld [vmem:[#allocation7 + $0x30] sm:$0xff] }
 0x211   : > { %v1012_v62 = vmul.f32 %v12202_v34, %v964_v51  ;;  %v963_v1 = vadd.f32 %v956_v38, %v951_v52  ;;  %10226 = vmatprep.subr.mxu0 %v12224_v50  ;;  %v12229_v4 = vadd.f32 %v1036_v49, %v1027_v53  ;;  %v1060_v52 = vld [vmem:[#allocation7 + $0x70] sm:$0xff]  ;;  %v1050_v53 = vld [vmem:[#allocation7 + $0x28] sm:$0xff] }
 0x212   : > { %10227 = vmatpush3.msra.mxu0 %v12224_v50  ;;  %v1017_v32 = vmax.f32 %v1009_v60, 0.0  ;;  %v1030_v41 = vmul.f32 %v1024_v39, %v1018_v6  ;;  %v1049_v60 = vld [vmem:[#allocation7 + $0x20] sm:$0xff]  ;;  %v1055_v6 = vld [vmem:[#allocation7 + $0x48] sm:$0xff] }
 0x213   : > { %v1020_v20 = vmax.f32 %v1012_v62, 0.0  ;;  %v1011_v27 = vmul.f32 %v12205_v42, %v963_v1  ;;  %10228 = vmatprep.subr.mxu0 %v12229_v4  ;;  %v1057_v62 = vld [vmem:[#allocation7 + $0x58] sm:$0xff] }
 0x214   : > { %10229 = vmatpush3.msra.mxu0 %v12229_v4  ;;  %v1029_v45 = vmul.f32 %v1024_v39, %v1017_v32  ;;  %v1042_v48 = vadd.f32 %v1036_v49, %v1030_v41  ;;  %v1048_v1 = vld [vmem:[#allocation7 + $0x18] sm:$0xff] }
 0x215   : > { %v1019_v36 = vmax.f32 %v1011_v27, 0.0  ;;  %v1032_v38 = vmul.f32 %v1024_v39, %v1020_v20  ;;  %10230 = vmatprep.subr.mxu0 %v12234_v29  ;;  %v1054_v20 = vld [vmem:[#allocation7 + $0x40] sm:$0xff]  ;;  %v1047_v27 = vld [vmem:[#allocation7 + $0x10] sm:$0xff] }
 0x216   : > { %10231 = vmatpush3.msra.mxu0 %v12234_v29  ;;  %v1041_v51 = vadd.f32 %v1036_v49, %v1029_v45 }
 0x217   : > { %v12239_v40 = vadd.f32 %v1036_v49, %v1032_v38  ;;  %v1031_v43 = vmul.f32 %v1024_v39, %v1019_v36  ;;  %10232 = vmatprep.subr.mxu0 %v1037_v37  ;;  %v1061_v39 = vld [vmem:[#allocation7 + $0x78] sm:$0xff] }
 0x218   : > { %10233 = vmatpush3.msra.mxu0 %v1037_v37 }
 0x219   : > { %10240 = vmatprep.subr.mxu1 %v12239_v40  ;;  %v12242_v44 = vadd.f32 %v1036_v49, %v1031_v43  ;;  %10235 = vmatmul.mubr.msk.f32.vlgmr.msra.gmra.mxu0 %vm426_vm0, %v12045_v8  ;;  %v1059_v49 = vld [vmem:[#allocation7 + $0x68] sm:$0xff] }
 0x21a   : > { %10241 = vmatpush3.msra.mxu1 %v12239_v40  ;;  %10237 = vmatprep.mubr.msk.f32.mxu0 %vm426_vm0, %v12053_v10 }
 0x21b   : > { %10242 = vmatprep.subr.mxu1 %v12242_v44  ;;  %10254 = vmatprep.subr.mxu0 %v1052_v46 }
 0x21c   : > { %10243 = vmatpush3.msra.mxu1 %v12242_v44  ;;  %10255 = vmatpush3.msra.mxu0 %v1052_v46 }
 0x21d   : > { %10244 = vmatprep.subr.mxu1 %v1042_v48  ;;  %10238 = vmatmul.mubr.msk.f32.gmra.mxu0 %vm426_vm0, %v12072_v15 }
 0x21e   : > { %10245 = vmatpush3.msra.mxu1 %v1042_v48  ;;  %10256 = vmatprep.subr.mxu0 %v1051_v31 }
 0x21f   : > { %10246 = vmatprep.subr.mxu1 %v1041_v51  ;;  %10257 = vmatpush3.msra.mxu0 %v1051_v31 }
 0x220   : > { %10247 = vmatpush3.msra.mxu1 %v1041_v51  ;;  %10258 = vmatprep.subr.mxu0 %v1050_v53 }
 0x221   : > { %10249 = vmatmul.mubr.msk.f32.vlgmr.msra.gmra.mxu1 %vm426_vm0, %v12065_v13  ;;  %10282 = vmatprep.subr.mxu1 %v1061_v39 }
 0x222   : > { %10283 = vmatpush3.msra.mxu1 %v1061_v39  ;;  %10251 = vmatprep.mubr.msk.f32.mxu1 %vm426_vm0, %v12076_v16 }
 0x223   : > { %10284 = vmatprep.subr.mxu1 %v1060_v52  ;;  %10259 = vmatpush3.msra.mxu0 %v1050_v53 }
 0x224   : > { %10285 = vmatpush3.msra.mxu1 %v1060_v52  ;;  %10260 = vmatprep.subr.mxu0 %v1049_v60 }
 0x225   : > { %10252 = vmatmul.mubr.msk.f32.gmra.mxu1 %vm426_vm0, %v12089_v18  ;;  %10286 = vmatprep.subr.mxu1 %v1059_v49 }
 0x226   : > { %10287 = vmatpush3.msra.mxu1 %v1059_v49  ;;  %10298 = vmatprep.mubr.msk.f32.mxu1 %vm1241_vm1, %v1037_v37 }
 0x227   : > { %10288 = vmatprep.subr.mxu1 %v1058_v57  ;;  %10261 = vmatpush3.msra.mxu0 %v1049_v60 }
 0x228   : > { %10289 = vmatpush3.msra.mxu1 %v1058_v57  ;;  %10262 = vmatprep.subr.mxu0 %v1048_v1  ;;  %v1062_v57 = vld [vmem:[#allocation8 + $0x3] sm:$0x7] }
 0x229   : > { %10290 = vmatprep.subr.mxu1 %v1057_v62  ;;  %10263 = vmatpush3.msra.mxu0 %v1048_v1  ;;  %v1511_v1 = vrot.slane %v1062_v57, %v12200_v33 }
 0x22a   : > { %10291 = vmatpush3.msra.mxu1 %v1057_v62  ;;  %10264 = vmatprep.subr.mxu0 %v1047_v27 }
 0x22b   : > { %10292 = vmatprep.subr.mxu1 %v1056_v35  ;;  %10265 = vmatpush3.msra.mxu0 %v1047_v27 }
 0x22c   : > { %10293 = vmatpush3.msra.mxu1 %v1056_v35 }
 0x22d   : > { %10294 = vmatprep.subr.mxu1 %v1055_v6 }
 0x22e   : > { %10295 = vmatpush3.msra.mxu1 %v1055_v6 }
 0x22f   : > { %10296 = vmatprep.subr.mxu1 %v1054_v20 }
 0x230   : > { %10297 = vmatpush3.msra.mxu1 %v1054_v20 }
 0x231   : > { %10299 = vmatmul.mubr.msk.f32.vlgmr.msra.gmra.mxu1 %vm1241_vm1, %v12234_v29 }
 0x232   : > { %10301 = vmatprep.mubr.msk.f32.mxu1 %vm1241_vm1, %v12229_v4  ;;  %v1046_v4 = vld [vmem:[#allocation7 + $0x8] sm:$0xff] }
 0x233   : > { %10266 = vmatprep.subr.mxu0 %v1046_v4 }
 0x234   : > { %10267 = vmatpush3.msra.mxu0 %v1046_v4 }
 0x235   : > { %10302 = vmatmul.mubr.msk.f32.gmra.mxu1 %vm1241_vm1, %v12224_v50  ;;  %v1045_v50 = vld [vmem:[#allocation7] sm:$0xff] }
 0x236   : > { %10304 = vmatprep.mubr.msk.f32.mxu1 %vm1241_vm1, %v1041_v51  ;;  %10268 = vmatprep.subr.mxu0 %v1045_v50 }
 0x237   : > { %10269 = vmatpush3.msra.mxu0 %v1045_v50 }
 0x239   : > { %10305 = vmatmul.mubr.msk.f32.gmra.mxu1 %vm1241_vm1, %v1042_v48 }
 0x23a   : > { %10307 = vmatprep.mubr.msk.f32.mxu1 %vm1241_vm1, %v12242_v44 }
 0x23d   : > { %10308 = vmatmul.mubr.msk.f32.gmra.mxu1 %vm1241_vm1, %v12239_v40 }
 0x23e   : > { %10332 = vmatprep.mubr.msk.f32.mxu1 %vm426_vm0, %v12057_v11 }
 0x2d9   : > { %v10236_v29 = vpop.f32.mrf.mxu0 }
 0x2da   : > { %v1234_v38 = vmul.f32 %v12135_v58, %v10236_v29 }
 0x2db   : > { %v1129_v32 = vpop.f32.mrf.mxu0 }
 0x2dc   : > { %v1233_v36 = vmul.f32 %v12137_v59, %v1129_v32 }
 0x2dd   : > { %v10239_v37 = vpop.f32.mrf.mxu0 }
 0x2de   : > { %10270 = vmatprep.mubr.msk.f32.mxu0 %vm1241_vm1, %v1233_v36  ;;  %v1236_v41 = vmul.f32 %v12147_v2, %v10239_v37 }
 0x2df   : > { %v1139_v40 = vpop.f32.mrf.mxu0  ;;  %10271 = vmatmul.mubr.msk.f32.vlgmr.msra.gmra.mxu0 %vm1241_vm1, %v1234_v38 }
 0x2e0   : > { %v1235_v11 = vmul.f32 %v12151_v5, %v1139_v40 }
 0x2e1   : > { %v10250_v43 = vpop.f32.mrf.mxu1 }
 0x2e2   : > { %10273 = vmatprep.mubr.msk.f32.mxu0 %vm1241_vm1, %v1235_v11  ;;  %v1238_v48 = vmul.f32 %v12166_v19, %v10250_v43 }
 0x2e3   : > { %v1214_v44 = vpop.f32.mrf.mxu1  ;;  %10274 = vmatmul.mubr.msk.f32.gmra.mxu0 %vm1241_vm1, %v1236_v41 }
 0x2e4   : > { %v1237_v45 = vmul.f32 %v12142_v63, %v1214_v44 }
 0x2e5   : > { %v10253_v46 = vpop.f32.mrf.mxu1 }
 0x2e6   : > { %10276 = vmatprep.mubr.msk.f32.mxu0 %vm1241_vm1, %v1237_v45  ;;  %v1240_v39 = vmul.f32 %v12180_v23, %v10253_v46 }
 0x2e7   : > { %v1224_v31 = vpop.f32.mrf.mxu1  ;;  %10277 = vmatmul.mubr.msk.f32.gmra.mxu0 %vm1241_vm1, %v1238_v48 }
 0x2e8   : > { %v1239_v51 = vmul.f32 %v12161_v14, %v1224_v31 }
 0x2ea   : > { %10279 = vmatprep.mubr.msk.f32.mxu0 %vm1241_vm1, %v1239_v51 }
 0x2eb   : > { %10280 = vmatmul.mubr.msk.f32.gmra.mxu0 %vm1241_vm1, %v1240_v39 }
 0x2ec   : > { %10318 = vmatprep.mubr.msk.f32.mxu0 %vm426_vm0, %v12022_v3 }
 0x2f1   : > { %v10300_v52 = vpop.f32.mrf.mxu1 }
 0x2f3   : > { %v1461_v53 = vpop.f32.mrf.mxu1 }
 0x2f5   : > { %v10303_v49 = vpop.f32.mrf.mxu1 }
 0x2f7   : > { %v1471_v60 = vpop.f32.mrf.mxu1 }
 0x2f9   : > { %v10306_v6 = vpop.f32.mrf.mxu1 }
 0x2fb   : > { %v1481_v32 = vpop.f32.mrf.mxu1 }
 0x2fd   : > { %v10309_v46 = vpop.f32.mrf.mxu1 }
 0x39f   : > { %v10272_v62 = vpop.f32.mrf.mxu0 }
 0x3a0   : > { %v1501_v35 = vadd.f32 %v10300_v52, %v10272_v62 }
 0x3a1   : > { %v1332_v20 = vpop.f32.mrf.mxu0 }
 0x3a2   : > { %v1500_v27 = vadd.f32 %v1461_v53, %v1332_v20  ;;  %v1513_v4 = vadd.f32 %v1511_v1, %v1501_v35 }
 0x3a3   : > { %v10275_v50 = vpop.f32.mrf.mxu0 }
 0x3a4   : > { %v1503_v29 = vadd.f32 %v10303_v49, %v10275_v50  ;;  %v1512_v36 = vadd.f32 %v1511_v1, %v1500_v27  ;;  %v1521_v11 = vmul.f32 %v1513_v4, %v12195_v26  ;;  %v1491_v4 = vpop.f32.mrf.mxu1 }
 0x3a5   : > { %v1342_v38 = vpop.f32.mrf.mxu0 }
 0x3a6   : > { %v1515_v37 = vadd.f32 %v1511_v1, %v1503_v29  ;;  %v1502_v40 = vadd.f32 %v1471_v60, %v1342_v38  ;;  %v1520_v48 = vmul.f32 %v1512_v36, %v12197_v30  ;;  %v1529_v49 = vmax.f32 %v1521_v11, 0.0 }
 0x3a7   : > { %v10278_v43 = vpop.f32.mrf.mxu0  ;;  %v1539_v60 = vrot.slane %v1062_v57, %v12210_v55  ;;  %v1551_v38 = vrot.slane %v1062_v57, %v12216_v12 }
 0x3a8   : > { %v1523_v41 = vmul.f32 %v1515_v37, %v12207_v47  ;;  %v1514_v44 = vadd.f32 %v1511_v1, %v1502_v40  ;;  %v1505_v45 = vadd.f32 %v10306_v6, %v10278_v43  ;;  %v1528_v50 = vmax.f32 %v1520_v48, 0.0 }
 0x3a9   : > { %v1352_v31 = vpop.f32.mrf.mxu0  ;;  %v1541_v11 = vmul.f32 %v1539_v60, %v1529_v49 }
 0x3aa   : > { %v1531_v51 = vmax.f32 %v1523_v41, 0.0  ;;  %v1522_v39 = vmul.f32 %v1514_v44, %v12193_v25  ;;  %v1517_v52 = vadd.f32 %v1511_v1, %v1505_v45  ;;  %v1504_v53 = vadd.f32 %v1481_v32, %v1352_v31 }
 0x3ab   : > { %v10281_v62 = vpop.f32.mrf.mxu0  ;;  %v1540_v48 = vmul.f32 %v1539_v60, %v1528_v50  ;;  %v1568_v50 = vld [vmem:[#allocation7 + $0xb8] sm:$0xff] }
 0x3ac   : > { %v1530_v35 = vmax.f32 %v1522_v39, 0.0  ;;  %v1516_v20 = vadd.f32 %v1511_v1, %v1504_v53  ;;  %v1507_v27 = vadd.f32 %v10309_v46, %v10281_v62  ;;  %v1543_v6 = vmul.f32 %v1539_v60, %v1531_v51 }
 0x3ad   : > { %v1362_v29 = vpop.f32.mrf.mxu0  ;;  %v1525_v36 = vmul.f32 %v1517_v52, %v12212_v56  ;;  %v12310_v39 = vadd.f32 %v1551_v38, %v1541_v11  ;;  %v1552_v49 = vadd.f32 %v1551_v38, %v1540_v48  ;;  %v1570_v11 = vld [vmem:[#allocation7 + $0xc0] sm:$0xff] }
 0x3ae   : > { %v1519_v37 = vadd.f32 %v1511_v1, %v1507_v27  ;;  %v1506_v40 = vadd.f32 %v1491_v4, %v1362_v29  ;;  %v12300_v43 = vadd.f32 %v1551_v38, %v1543_v6  ;;  %v1542_v32 = vmul.f32 %v1539_v60, %v1530_v35  ;;  %v1567_v6 = vld [vmem:[#allocation7 + $0xb0] sm:$0xff] }
 0x3af   : > { %v1524_v41 = vmul.f32 %v1516_v20, %v12222_v54  ;;  %v1533_v31 = vmax.f32 %v1525_v36, 0.0  ;;  %v1566_v36 = vld [vmem:[#allocation7 + $0xa8] sm:$0xff] }
 0x3b0   : > { %v1527_v44 = vmul.f32 %v1519_v37, %v12202_v34  ;;  %v1518_v45 = vadd.f32 %v1511_v1, %v1506_v40  ;;  %10310 = vmatprep.subr.mxu0 %v12300_v43  ;;  %v12305_v46 = vadd.f32 %v1551_v38, %v1542_v32  ;;  %v1565_v37 = vld [vmem:[#allocation7 + $0xa0] sm:$0xff]  ;;  %v1564_v40 = vld [vmem:[#allocation7 + $0x98] sm:$0xff]  ;;  %v1571_v32 = vld [vmem:[#allocation7 + $0xc8] sm:$0xff] }
 0x3b1   : > { %10311 = vmatpush3.msra.mxu0 %v12300_v43  ;;  %v1532_v52 = vmax.f32 %v1524_v41, 0.0  ;;  %v1545_v20 = vmul.f32 %v1539_v60, %v1533_v31  ;;  %v2237_v41 = vld [vmem:[#allocation5 + $0x50] sm:$0xff] }
 0x3b2   : > { %v1535_v57 = vmax.f32 %v1527_v44, 0.0  ;;  %v1526_v51 = vmul.f32 %v1518_v45, %v12205_v42  ;;  %10312 = vmatprep.subr.mxu0 %v12305_v46  ;;  %v2236_v44 = vld [vmem:[#allocation5 + $0x48] sm:$0xff]  ;;  %v2235_v45 = vld [vmem:[#allocation5 + $0x40] sm:$0xff] }
 0x3b3   : > { %10313 = vmatpush3.msra.mxu0 %v12305_v46  ;;  %v1544_v4 = vmul.f32 %v1539_v60, %v1532_v52  ;;  %v12326_v29 = vadd.f32 %v1551_v38, %v1545_v20  ;;  %v2080_v20 = vld [vmem:[#allocation7 + $0x120] sm:$0xff] }
 0x3b4   : > { %v1534_v53 = vmax.f32 %v1526_v51, 0.0  ;;  %v1547_v1 = vmul.f32 %v1539_v60, %v1535_v57  ;;  %10314 = vmatprep.subr.mxu0 %v12310_v39 }
 0x3b5   : > { %10315 = vmatpush3.msra.mxu0 %v12310_v39 }
 0x3b6   : > { %v12315_v62 = vadd.f32 %v1551_v38, %v1547_v1  ;;  %v1546_v35 = vmul.f32 %v1539_v60, %v1534_v53  ;;  %10316 = vmatprep.subr.mxu0 %v1552_v49  ;;  %v1556_v60 = vadd.f32 %v1551_v38, %v1544_v4  ;;  %v2078_v4 = vld [vmem:[#allocation7 + $0x110] sm:$0xff] }
 0x3b7   : > { %10317 = vmatpush3.msra.mxu0 %v1552_v49 }
 0x3b8   : > { %10324 = vmatprep.subr.mxu1 %v12315_v62  ;;  %v12318_v27 = vadd.f32 %v1551_v38, %v1546_v35  ;;  %10319 = vmatmul.mubr.msk.f32.vlgmr.msra.gmra.mxu0 %vm426_vm0, %v12045_v8  ;;  %v1577_v8 = vld [vmem:[#allocation7 + $0xf8] sm:$0xff]  ;;  %v1575_v38 = vld [vmem:[#allocation7 + $0xe8] sm:$0xff] }
 0x3b9   : > { %10325 = vmatpush3.msra.mxu1 %v12315_v62  ;;  %10321 = vmatprep.mubr.msk.f32.mxu0 %vm426_vm0, %v12053_v10  ;;  %v1576_v10 = vld [vmem:[#allocation7 + $0xf0] sm:$0xff]  ;;  %v2081_v35 = vld [vmem:[#allocation7 + $0x128] sm:$0xff] }
 0x3ba   : > { %10326 = vmatprep.subr.mxu1 %v12318_v27  ;;  %10338 = vmatprep.subr.mxu0 %v1568_v50 }
 0x3bb   : > { %10327 = vmatpush3.msra.mxu1 %v12318_v27  ;;  %10339 = vmatpush3.msra.mxu0 %v1568_v50  ;;  %v2077_v50 = vld [vmem:[#allocation7 + $0x108] sm:$0xff] }
 0x3bc   : > { %10328 = vmatprep.subr.mxu1 %v12326_v29  ;;  %10322 = vmatmul.mubr.msk.f32.gmra.mxu0 %vm426_vm0, %v12072_v15  ;;  %v1574_v15 = vld [vmem:[#allocation7 + $0xe0] sm:$0xff] }
 0x3bd   : > { %10329 = vmatpush3.msra.mxu1 %v12326_v29  ;;  %10340 = vmatprep.subr.mxu0 %v1567_v6 }
 0x3be   : > { %10330 = vmatprep.subr.mxu1 %v1556_v60  ;;  %10341 = vmatpush3.msra.mxu0 %v1567_v6  ;;  %v2243_v6 = vld [vmem:[#allocation5 + $0x78] sm:$0xff] }
 0x3bf   : > { %10331 = vmatpush3.msra.mxu1 %v1556_v60  ;;  %10342 = vmatprep.subr.mxu0 %v1566_v36 }
 0x3c0   : > { %10333 = vmatmul.mubr.msk.f32.vlgmr.msra.gmra.mxu1 %vm426_vm0, %v12065_v13  ;;  %10366 = vmatprep.subr.mxu1 %v1577_v8  ;;  %v1573_v13 = vld [vmem:[#allocation7 + $0xd8] sm:$0xff] }
 0x3c1   : > { %10367 = vmatpush3.msra.mxu1 %v1577_v8  ;;  %10335 = vmatprep.mubr.msk.f32.mxu1 %vm426_vm0, %v12076_v16  ;;  %v1572_v16 = vld [vmem:[#allocation7 + $0xd0] sm:$0xff] }
 0x3c2   : > { %10368 = vmatprep.subr.mxu1 %v1576_v10  ;;  %10343 = vmatpush3.msra.mxu0 %v1566_v36  ;;  %v1578_v36 = vld [vmem:[#allocation8 + $0x6] sm:$0x7] }
 0x3c3   : > { %10369 = vmatpush3.msra.mxu1 %v1576_v10  ;;  %10344 = vmatprep.subr.mxu0 %v1565_v37 }
 0x3c4   : > { %10336 = vmatmul.mubr.msk.f32.gmra.mxu1 %vm426_vm0, %v12089_v18  ;;  %10370 = vmatprep.subr.mxu1 %v1575_v38  ;;  %v2238_v18 = vld [vmem:[#allocation5 + $0x58] sm:$0xff] }
 0x3c5   : > { %10371 = vmatpush3.msra.mxu1 %v1575_v38  ;;  %10382 = vmatprep.mubr.msk.f32.mxu1 %vm1241_vm1, %v1552_v49  ;;  %v2083_v49 = vld [vmem:[#allocation7 + $0x138] sm:$0xff] }
 0x3c6   : > { %10372 = vmatprep.subr.mxu1 %v1574_v15  ;;  %10345 = vmatpush3.msra.mxu0 %v1565_v37 }
 0x3c7   : > { %10373 = vmatpush3.msra.mxu1 %v1574_v15  ;;  %10346 = vmatprep.subr.mxu0 %v1564_v40  ;;  %v2026_v15 = vrot.slane %v1578_v36, %v12200_v33 }
 0x3c8   : > { %10374 = vmatprep.subr.mxu1 %v1573_v13  ;;  %10347 = vmatpush3.msra.mxu0 %v1564_v40 }
 0x3c9   : > { %10375 = vmatpush3.msra.mxu1 %v1573_v13 }
 0x3ca   : > { %10376 = vmatprep.subr.mxu1 %v1572_v16 }
 0x3cb   : > { %10377 = vmatpush3.msra.mxu1 %v1572_v16 }
 0x3cc   : > { %10378 = vmatprep.subr.mxu1 %v1571_v32 }
 0x3cd   : > { %10379 = vmatpush3.msra.mxu1 %v1571_v32 }
 0x3ce   : > { %10380 = vmatprep.subr.mxu1 %v1570_v11 }
 0x3cf   : > { %10381 = vmatpush3.msra.mxu1 %v1570_v11 }
 0x3d0   : > { %10383 = vmatmul.mubr.msk.f32.vlgmr.msra.gmra.mxu1 %vm1241_vm1, %v12310_v39  ;;  %10422 = vmatprep.subr.mxu1 %v2238_v18 }
 0x3d1   : > { %10385 = vmatprep.mubr.msk.f32.mxu1 %vm1241_vm1, %v12305_v46  ;;  %10423 = vmatpush3.msra.mxu1 %v2238_v18 }
 0x3d2   : > { %10424 = vmatprep.subr.mxu1 %v2237_v41 }
 0x3d3   : > { %10425 = vmatpush3.msra.mxu1 %v2237_v41 }
 0x3d4   : > { %10386 = vmatmul.mubr.msk.f32.gmra.mxu1 %vm1241_vm1, %v12300_v43  ;;  %10426 = vmatprep.subr.mxu1 %v2236_v44 }
 0x3d5   : > { %10388 = vmatprep.mubr.msk.f32.mxu1 %vm1241_vm1, %v1556_v60  ;;  %10427 = vmatpush3.msra.mxu1 %v2236_v44 }
 0x3d6   : > { %10428 = vmatprep.subr.mxu1 %v2235_v45 }
 0x3d7   : > { %10429 = vmatpush3.msra.mxu1 %v2235_v45 }
 0x3d8   : > { %10389 = vmatmul.mubr.msk.f32.gmra.mxu1 %vm1241_vm1, %v12326_v29  ;;  %v2076_v29 = vld [vmem:[#allocation7 + $0x100] sm:$0xff] }
 0x3d9   : > { %10391 = vmatprep.mubr.msk.f32.mxu1 %vm1241_vm1, %v12318_v27  ;;  %v2079_v27 = vld [vmem:[#allocation7 + $0x118] sm:$0xff] }
 0x3dc   : > { %10392 = vmatmul.mubr.msk.f32.gmra.mxu1 %vm1241_vm1, %v12315_v62  ;;  %v2082_v62 = vld [vmem:[#allocation7 + $0x130] sm:$0xff] }
 0x3dd   : > { %10430 = vmatprep.mubr.msk.f32.mxu1 %vm426_vm0, %v12140_v61  ;;  %v1563_v61 = vld [vmem:[#allocation7 + $0x90] sm:$0xff] }
 0x3de   : > { %10348 = vmatprep.subr.mxu0 %v1563_v61 }
 0x3df   : > { %10349 = vmatpush3.msra.mxu0 %v1563_v61 }
 0x3e0   : > { %10431 = vmatmul.mubr.msk.f32.vlgmr.msra.gmra.mxu1 %vm426_vm0, %v12145_v0  ;;  %v1562_v0 = vld [vmem:[#allocation7 + $0x88] sm:$0xff] }
 0x3e1   : > { %10433 = vmatprep.mubr.msk.f32.mxu1 %vm426_vm0, %v12156_v7  ;;  %10350 = vmatprep.subr.mxu0 %v1562_v0  ;;  %v1561_v7 = vld [vmem:[#allocation7 + $0x80] sm:$0xff] }
 0x3e2   : > { %10351 = vmatpush3.msra.mxu0 %v1562_v0  ;;  %v2054_v0 = vrot.slane %v1578_v36, %v12210_v55 }
 0x3e3   : > { %10352 = vmatprep.subr.mxu0 %v1561_v7 }
 0x3e4   : > { %10434 = vmatmul.mubr.msk.f32.gmra.mxu1 %vm426_vm0, %v12164_v17  ;;  %10353 = vmatpush3.msra.mxu0 %v1561_v7 }
 0x3e5   : > { %10436 = vmatprep.mubr.msk.f32.mxu1 %vm426_vm0, %v12159_v9  ;;  %10394 = vmatprep.subr.mxu0 %v2083_v49 }
 0x3e8   : > { %10437 = vmatmul.mubr.msk.f32.gmra.mxu1 %vm426_vm0, %v12178_v22 }
 0x3e9   : > { %10439 = vmatprep.mubr.msk.f32.mxu1 %vm426_vm0, %v12175_v21 }
 0x3ec   : > { %10440 = vmatmul.mubr.msk.f32.gmra.mxu1 %vm426_vm0, %v12187_v24 }
 0x3ed   : > { %10470 = vmatprep.mubr.msk.f32.mxu1 %vm426_vm0, %v12022_v3 }
 0x478   : > { %v10320_v9 = vpop.f32.mrf.mxu0 }
 0x479   : > { %v1750_v21 = vmul.f32 %v12135_v58, %v10320_v9 }
 0x47a   : > { %v1645_v17 = vpop.f32.mrf.mxu0 }
 0x47b   : > { %v1749_v22 = vmul.f32 %v12137_v59, %v1645_v17 }
 0x47c   : > { %v10323_v43 = vpop.f32.mrf.mxu0 }
 0x47d   : > { %10354 = vmatprep.mubr.msk.f32.mxu0 %vm1241_vm1, %v1749_v22  ;;  %v1752_v48 = vmul.f32 %v12147_v2, %v10323_v43 }
 0x47e   : > { %v1655_v24 = vpop.f32.mrf.mxu0  ;;  %10355 = vmatmul.mubr.msk.f32.vlgmr.msra.gmra.mxu0 %vm1241_vm1, %v1750_v21 }
 0x47f   : > { %v1751_v3 = vmul.f32 %v12151_v5, %v1655_v24  ;;  %10395 = vmatpush3.msra.mxu0 %v2083_v49 }
 0x480   : > { %v10334_v46 = vpop.f32.mrf.mxu1  ;;  %10396 = vmatprep.subr.mxu0 %v2082_v62 }
 0x481   : > { %10357 = vmatprep.mubr.msk.f32.mxu0 %vm1241_vm1, %v1751_v3  ;;  %v1754_v39 = vmul.f32 %v12166_v19, %v10334_v46  ;;  %10397 = vmatpush3.msra.mxu0 %v2082_v62 }
 0x482   : > { %v1730_v31 = vpop.f32.mrf.mxu1  ;;  %10358 = vmatmul.mubr.msk.f32.gmra.mxu0 %vm1241_vm1, %v1752_v48  ;;  %10398 = vmatprep.subr.mxu0 %v2081_v35 }
 0x483   : > { %v1753_v57 = vmul.f32 %v12142_v63, %v1730_v31  ;;  %10399 = vmatpush3.msra.mxu0 %v2081_v35 }
 0x484   : > { %v10337_v51 = vpop.f32.mrf.mxu1  ;;  %10400 = vmatprep.subr.mxu0 %v2080_v20 }
 0x485   : > { %10360 = vmatprep.mubr.msk.f32.mxu0 %vm1241_vm1, %v1753_v57  ;;  %v1756_v1 = vmul.f32 %v12180_v23, %v10337_v51  ;;  %10401 = vmatpush3.msra.mxu0 %v2080_v20  ;;  %v2066_v57 = vrot.slane %v1578_v36, %v12216_v12 }
 0x486   : > { %v1740_v52 = vpop.f32.mrf.mxu1  ;;  %10361 = vmatmul.mubr.msk.f32.gmra.mxu0 %vm1241_vm1, %v1754_v39  ;;  %10402 = vmatprep.subr.mxu0 %v2079_v27 }
 0x487   : > { %v1755_v53 = vmul.f32 %v12161_v14, %v1740_v52  ;;  %10403 = vmatpush3.msra.mxu0 %v2079_v27 }
 0x488   : > { %10404 = vmatprep.subr.mxu0 %v2078_v4 }
 0x489   : > { %10363 = vmatprep.mubr.msk.f32.mxu0 %vm1241_vm1, %v1755_v53  ;;  %10405 = vmatpush3.msra.mxu0 %v2078_v4 }
 0x48a   : > { %10364 = vmatmul.mubr.msk.f32.gmra.mxu0 %vm1241_vm1, %v1756_v1  ;;  %10406 = vmatprep.subr.mxu0 %v2077_v50 }
 0x48b   : > { %10407 = vmatpush3.msra.mxu0 %v2077_v50 }
 0x48c   : > { %10408 = vmatprep.subr.mxu0 %v2076_v29 }
 0x48d   : > { %10409 = vmatpush3.msra.mxu0 %v2076_v29 }
 0x48e   : > { %10442 = vmatprep.subr.mxu0 %v2243_v6 }
 0x490   : > { %v10384_v60 = vpop.f32.mrf.mxu1 }
 0x492   : > { %v1976_v8 = vpop.f32.mrf.mxu1 }
 0x494   : > { %v10387_v10 = vpop.f32.mrf.mxu1 }
 0x496   : > { %v1986_v38 = vpop.f32.mrf.mxu1 }
 0x498   : > { %v10390_v40 = vpop.f32.mrf.mxu1 }
 0x49a   : > { %v1996_v61 = vpop.f32.mrf.mxu1 }
 0x49c   : > { %v10393_v48 = vpop.f32.mrf.mxu1 }
 0x49e   : > { %v2006_v50 = vpop.f32.mrf.mxu1 }
 0x53e   : > { %v10356_v37 = vpop.f32.mrf.mxu0 }
 0x53f   : > { %v2016_v13 = vadd.f32 %v10384_v60, %v10356_v37 }
 0x540   : > { %v1847_v16 = vpop.f32.mrf.mxu0 }
 0x541   : > { %v2028_v32 = vadd.f32 %v2026_v15, %v2016_v13  ;;  %v2015_v11 = vadd.f32 %v1976_v8, %v1847_v16 }
 0x542   : > { %v10359_v18 = vpop.f32.mrf.mxu0 }
 0x543   : > { %v2036_v41 = vmul.f32 %v2028_v32, %v12195_v26  ;;  %v2027_v44 = vadd.f32 %v2026_v15, %v2015_v11  ;;  %v2018_v45 = vadd.f32 %v10387_v10, %v10359_v18 }
 0x544   : > { %v1857_v7 = vpop.f32.mrf.mxu0 }
 0x545   : > { %v2044_v9 = vmax.f32 %v2036_v41, 0.0  ;;  %v2035_v17 = vmul.f32 %v2027_v44, %v12197_v30  ;;  %v2030_v22 = vadd.f32 %v2026_v15, %v2018_v45  ;;  %v2017_v21 = vadd.f32 %v1986_v38, %v1857_v7  ;;  %v2241_v44 = vld [vmem:[#allocation5 + $0x68] sm:$0xff] }
 0x546   : > { %v10362_v43 = vpop.f32.mrf.mxu0 }
 0x547   : > { %v2043_v24 = vmax.f32 %v2035_v17, 0.0  ;;  %v2038_v3 = vmul.f32 %v2030_v22, %v12207_v47  ;;  %v2029_v46 = vadd.f32 %v2026_v15, %v2017_v21  ;;  %v2056_v31 = vmul.f32 %v2054_v0, %v2044_v9  ;;  %v2240_v22 = vld [vmem:[#allocation5 + $0x60] sm:$0xff] }
 0x548   : > { %v2020_v51 = vadd.f32 %v10390_v40, %v10362_v43  ;;  %v1867_v39 = vpop.f32.mrf.mxu0  ;;  %v2242_v40 = vld [vmem:[#allocation5 + $0x70] sm:$0xff] }
 0x549   : > { %v2055_v52 = vmul.f32 %v2054_v0, %v2043_v24  ;;  %v2046_v53 = vmax.f32 %v2038_v3, 0.0  ;;  %v2037_v1 = vmul.f32 %v2029_v46, %v12193_v25  ;;  %v2019_v62 = vadd.f32 %v1996_v61, %v1867_v39  ;;  %v11576_v39 = vld [vmem:[%s12009_s12 + $0x18] sm:$0xff] }
 0x54a   : > { %v2032_v49 = vadd.f32 %v2026_v15, %v2020_v51  ;;  %v10365_v35 = vpop.f32.mrf.mxu0  ;;  %v2068_v29 = vadd.f32 %v2066_v57, %v2056_v31  ;;  %v11573_v31 = vld [vmem:[%s12009_s12] sm:$0xff]  ;;  %v11575_v51 = vld [vmem:[%s12009_s12 + $0x10] sm:$0xff] }
 0x54b   : > { %v2045_v20 = vmax.f32 %v2037_v1, 0.0  ;;  %v2022_v27 = vadd.f32 %v10393_v48, %v10365_v35  ;;  %v2067_v4 = vadd.f32 %v2066_v57, %v2055_v52  ;;  %v2058_v60 = vmul.f32 %v2054_v0, %v2046_v53  ;;  %v11577_v52 = vld [vmem:[%s12009_s12 + $0x20] sm:$0xff]  ;;  %v11578_v53 = vld [vmem:[%s12009_s12 + $0x28] sm:$0xff]  ;;  %v11580_v1 = vld [vmem:[%s12009_s12 + $0x38] sm:$0xff]  ;;  %v10432_v35 = vpop.f32.mrf.mxu1 }
 0x54c   : > { %v2040_v8 = vmul.f32 %v2032_v49, %v12212_v56  ;;  %v2031_v10 = vadd.f32 %v2026_v15, %v2019_v62  ;;  %v1877_v38 = vpop.f32.mrf.mxu0 }
 0x54d   : > { %v2057_v36 = vmul.f32 %v2054_v0, %v2045_v20  ;;  %v2034_v37 = vadd.f32 %v2026_v15, %v2022_v27  ;;  %v2021_v13 = vadd.f32 %v2006_v50, %v1877_v38  ;;  %10410 = vmatprep.mubr.msk.f32.mxu0 %vm1241_vm1, %v2067_v4  ;;  %v2070_v61 = vadd.f32 %v2066_v57, %v2058_v60  ;;  %v9351_v20 = vld [vmem:[#allocation8 + $0x9] ss:$0 sm:$0xff]  ;;  %v2311_v60 = vpop.f32.mrf.mxu1 }
 0x54e   : > { %v2048_v16 = vmax.f32 %v2040_v8, 0.0  ;;  %v2039_v32 = vmul.f32 %v2031_v10, %v12222_v54  ;;  %10411 = vmatmul.mubr.msk.f32.vlgmr.msra.gmra.mxu0 %vm1241_vm1, %v2068_v29 }
 0x54f   : > { %v2042_v11 = vmul.f32 %v2034_v37, %v12202_v34  ;;  %v2033_v18 = vadd.f32 %v2026_v15, %v2021_v13  ;;  %v2069_v41 = vadd.f32 %v2066_v57, %v2057_v36  ;;  %10443 = vmatpush3.msra.mxu0 %v2243_v6 }
 0x550   : > { %v2047_v45 = vmax.f32 %v2039_v32, 0.0  ;;  %10444 = vmatprep.subr.mxu0 %v2242_v40  ;;  %v2060_v7 = vmul.f32 %v2054_v0, %v2048_v16  ;;  %v10435_v16 = vpop.f32.mrf.mxu1 }
 0x551   : > { %v2050_v9 = vmax.f32 %v2042_v11, 0.0  ;;  %v2041_v17 = vmul.f32 %v2033_v18, %v12205_v42  ;;  %10413 = vmatprep.mubr.msk.f32.mxu0 %vm1241_vm1, %v2069_v41  ;;  %10445 = vmatpush3.msra.mxu0 %v2242_v40 }
 0x552   : > { %v2059_v21 = vmul.f32 %v2054_v0, %v2047_v45  ;;  %10414 = vmatmul.mubr.msk.f32.gmra.mxu0 %vm1241_vm1, %v2070_v61  ;;  %10446 = vmatprep.subr.mxu0 %v2241_v44  ;;  %v2072_v3 = vadd.f32 %v2066_v57, %v2060_v7  ;;  %v2244_v61 = vld [vmem:[#allocation8 + $0xa] sm:$0x7]  ;;  %v2321_v7 = vpop.f32.mrf.mxu1 }
 0x553   : > { %v2049_v15 = vmax.f32 %v2041_v17, 0.0  ;;  %10447 = vmatpush3.msra.mxu0 %v2241_v44  ;;  %v2062_v43 = vmul.f32 %v2054_v0, %v2050_v9 }
 0x554   : > { %v2071_v6 = vadd.f32 %v2066_v57, %v2059_v21  ;;  %10448 = vmatprep.subr.mxu0 %v2240_v22 }
 0x555   : > { %v2061_v24 = vmul.f32 %v2054_v0, %v2049_v15  ;;  %10449 = vmatpush3.msra.mxu0 %v2240_v22  ;;  %v2074_v48 = vadd.f32 %v2066_v57, %v2062_v43  ;;  %v11574_v0 = vld [vmem:[%s12009_s12 + $0x8] sm:$0xff] }
 0x556   : > { %10416 = vmatprep.mubr.msk.f32.mxu0 %vm1241_vm1, %v2071_v6 }
 0x557   : > { %10417 = vmatmul.mubr.msk.f32.gmra.mxu0 %vm1241_vm1, %v2072_v3  ;;  %v2073_v46 = vadd.f32 %v2066_v57, %v2061_v24  ;;  %v11579_v57 = vld [vmem:[%s12009_s12 + $0x30] sm:$0xff]  ;;  %v2466_v24 = vrot.slane %v2244_v61, %v12200_v33 }
 0x559   : > { %10419 = vmatprep.mubr.msk.f32.mxu0 %vm1241_vm1, %v2073_v46 }
 0x55b   : > { %10420 = vmatmul.mubr.msk.f32.gmra.mxu0 %vm1241_vm1, %v2074_v48  ;;  %v10438_v48 = vpop.f32.mrf.mxu1 }
 0x55c   : > { %10450 = vmatprep.mubr.msk.f32.mxu0 %vm426_vm0, %v11573_v31 }
 0x55f   : > { %10451 = vmatmul.mubr.msk.f32.vlgmr.msra.gmra.mxu0 %vm426_vm0, %v11574_v0 }
 0x560   : > { %10453 = vmatprep.mubr.msk.f32.mxu0 %vm426_vm0, %v11575_v51 }
 0x563   : > { %10454 = vmatmul.mubr.msk.f32.gmra.mxu0 %vm426_vm0, %v11576_v39 }
 0x564   : > { %10456 = vmatprep.mubr.msk.f32.mxu0 %vm426_vm0, %v11577_v52 }
 0x567   : > { %10457 = vmatmul.mubr.msk.f32.gmra.mxu0 %vm426_vm0, %v11578_v53 }
 0x568   : > { %10459 = vmatprep.mubr.msk.f32.mxu0 %vm426_vm0, %v11579_v57 }
 0x56b   : > { %10460 = vmatmul.mubr.msk.f32.gmra.mxu0 %vm426_vm0, %v11580_v1 }
 0x60e   : > { %v10412_v49 = vpop.f32.mrf.mxu0 }
 0x60f   : > { %v12426_v8 = vadd.f32 %v10412_v49, %v9351_v20 }
 0x610   : > { %v2175_v62 = vpop.f32.mrf.mxu0 }
 0x611   : > { %v12422_v4 = vadd.f32 %v9351_v20, %v2175_v62  ;;  %v2227_v32 = vmax.f32 %v12426_v8, 0.0  ;;  %v2331_v62 = vpop.f32.mrf.mxu1 }
 0x612   : > { %v10415_v27 = vpop.f32.mrf.mxu0 }
 0x613   : > { %v12424_v50 = vadd.f32 %v10415_v27, %v9351_v20  ;;  %v2226_v36 = vmax.f32 %v12422_v4, 0.0  ;;  %v3708_v22 = vsel %vm3704_vm2, %v2227_v32, -inf }
 0x614   : > { %v2185_v29 = vpop.f32.mrf.mxu0 }
 0x615   : > { %v2229_v10 = vmax.f32 %v12424_v50, 0.0  ;;  %v12429_v38 = vadd.f32 %v9351_v20, %v2185_v29  ;;  %v3705_v44 = vsel %vm3704_vm2, %v2226_v36, -inf }
 0x617   : > { %v2228_v37 = vmax.f32 %v12429_v38, 0.0  ;;  %v10418_v13 = vpop.f32.mrf.mxu0  ;;  %v3714_v40 = vsel %vm3704_vm2, %v2229_v10, -inf }
 0x618   : > { %3715 = vmax.xlane.f32.xlu1 %v3714_v40  ;;  %v12445_v9 = vadd.f32 %v10418_v13, %v9351_v20 }
 0x619   : > { %v2195_v11 = vpop.f32.mrf.mxu0  ;;  %v3711_v18 = vsel %vm3704_vm2, %v2228_v37, -inf }
 0x61a   : > { %3712 = vmax.xlane.f32.xlu0 %v3711_v18  ;;  %v12450_v21 = vadd.f32 %v9351_v20, %v2195_v11  ;;  %v2231_v31 = vmax.f32 %v12445_v9, 0.0 }
 0x61b   : > { %v10421_v41 = vpop.f32.mrf.mxu0 }
 0x61c   : > { %v12443_v45 = vadd.f32 %v10421_v41, %v9351_v20  ;;  %3706 = vmax.xlane.f32.xlu1 %v3705_v44  ;;  %v2230_v39 = vmax.f32 %v12450_v21, 0.0  ;;  %v3720_v27 = vsel %vm3704_vm2, %v2231_v31, -inf  ;;  %v10441_v44 = vpop.f32.mrf.mxu1 }
 0x61d   : > { %v2205_v17 = vpop.f32.mrf.mxu0 }
 0x61e   : > { %v2233_v15 = vmax.f32 %v12443_v45, 0.0  ;;  %v12453_v6 = vadd.f32 %v9351_v20, %v2205_v17  ;;  %3709 = vmax.xlane.f32.xlu0 %v3708_v22 }
 0x61f   : > { %v10452_v43 = vpop.f32.mrf.mxu0 }
 0x620   : > { %v2232_v3 = vmax.f32 %v12453_v6, 0.0  ;;  %v2456_v46 = vadd.f32 %v10452_v43, %v10432_v35  ;;  %v3726_v51 = vsel %vm3704_vm2, %v2233_v15, -inf }
 0x621   : > { %v2416_v0 = vpop.f32.mrf.mxu0 }
 0x622   : > { %v2455_v52 = vadd.f32 %v2416_v0, %v2311_v60  ;;  %3727 = vmax.xlane.f32.xlu0 %v3726_v51  ;;  %v3723_v53 = vsel %vm3704_vm2, %v2232_v3, -inf  ;;  %v2468_v57 = vadd.f32 %v2466_v24, %v2456_v46  ;;  %v3717_v60 = vsel %vm3704_vm2, %v2230_v39, -inf }
 0x623   : > { %v10455_v1 = vpop.f32.mrf.mxu0  ;;  %3724 = vmax.xlane.f32.xlu1 %v3723_v53  ;;  %v2494_v53 = vrot.slane %v2244_v61, %v12210_v55 }
 0x624   : > { %v2458_v49 = vadd.f32 %v10455_v1, %v10435_v16  ;;  %v2467_v35 = vadd.f32 %v2466_v24, %v2455_v52  ;;  %v2476_v40 = vmul.f32 %v2468_v57, %v12195_v26 }
 0x625   : > { %v2426_v20 = vpop.f32.mrf.mxu0 }
 0x626   : > { %v2470_v29 = vadd.f32 %v2466_v24, %v2458_v49  ;;  %v2457_v13 = vadd.f32 %v2426_v20, %v2321_v7  ;;  %3721 = vmax.xlane.f32.xlu0 %v3720_v27  ;;  %v2475_v17 = vmul.f32 %v2467_v35, %v12197_v30  ;;  %v2484_v0 = vmax.f32 %v2476_v40, 0.0  ;;  %v2341_v49 = vpop.f32.mrf.mxu1 }
 0x627   : > { %v10458_v11 = vpop.f32.mrf.mxu0  ;;  %3718 = vmax.xlane.f32.xlu1 %v3717_v60 }
 0x628   : > { %v2478_v16 = vmul.f32 %v2470_v29, %v12207_v47  ;;  %v2469_v18 = vadd.f32 %v2466_v24, %v2457_v13  ;;  %v2460_v41 = vadd.f32 %v10458_v11, %v10438_v48  ;;  %v2483_v20 = vmax.f32 %v2475_v17, 0.0 }
 0x629   : > { %v2436_v22 = vpop.f32.mrf.mxu0  ;;  %v2506_v13 = vrot.slane %v2244_v61, %v12216_v12  ;;  %v2496_v40 = vmul.f32 %v2494_v53, %v2484_v0 }
 0x62a   : > { %v2486_v43 = vmax.f32 %v2478_v16, 0.0  ;;  %v2477_v7 = vmul.f32 %v2469_v18, %v12193_v25  ;;  %v2459_v46 = vadd.f32 %v2436_v22, %v2331_v62  ;;  %v2472_v51 = vadd.f32 %v2466_v24, %v2460_v41 }
 0x62b   : > { %v10461_v52 = vpop.f32.mrf.mxu0  ;;  %v2495_v22 = vmul.f32 %v2494_v53, %v2483_v20 }
 0x62c   : > { %v2485_v57 = vmax.f32 %v2477_v7, 0.0  ;;  %v2462_v1 = vadd.f32 %v10461_v52, %v10441_v44  ;;  %v2471_v27 = vadd.f32 %v2466_v24, %v2459_v46  ;;  %v2498_v48 = vmul.f32 %v2494_v53, %v2486_v43 }
 0x62d   : > { %v2446_v29 = vpop.f32.mrf.mxu0  ;;  %v2480_v11 = vmul.f32 %v2472_v51, %v12212_v56  ;;  %v12488_v46 = vadd.f32 %v2506_v13, %v2496_v40  ;;  %v2507_v52 = vadd.f32 %v2506_v13, %v2495_v22  ;;  %v2531_v40 = vld [vmem:[#allocation7 + $0x1b0] sm:$0xff]  ;;  %v2523_v22 = vld [vmem:[#allocation7 + $0x178] sm:$0xff] }
 0x62e   : > { %v2474_v35 = vadd.f32 %v2466_v24, %v2462_v1  ;;  %v2461_v60 = vadd.f32 %v2446_v29, %v2341_v49  ;;  %v12478_v16 = vadd.f32 %v2506_v13, %v2498_v48  ;;  %v2497_v62 = vmul.f32 %v2494_v53, %v2485_v57  ;;  %v12505_v48 = vld [vmem:[%s11986_s29 + $0x10] sm:$0xff]  ;;  %10490 = vmatprep.subr.mxu0 %v2523_v22 }
 0x62f   : > { %v2479_v44 = vmul.f32 %v2471_v27, %v12222_v54  ;;  %v2488_v7 = vmax.f32 %v2480_v11, 0.0  ;;  %v12498_v27 = vld [vmem:[%s11986_s29 + $0x8] sm:$0xff]  ;;  %v12517_v11 = vld [vmem:[%s11986_s29 + $0x20] sm:$0xff]  ;;  %10491 = vmatpush3.msra.mxu0 %v2523_v22 }
 0x630   : > { %v2482_v18 = vmul.f32 %v2474_v35, %v12202_v34  ;;  %v2473_v41 = vadd.f32 %v2466_v24, %v2461_v60  ;;  %10462 = vmatprep.subr.mxu1 %v12478_v16  ;;  %v12483_v17 = vadd.f32 %v2506_v13, %v2497_v62  ;;  %v12512_v60 = vld [vmem:[%s11986_s29 + $0x18] sm:$0xff] }
 0x631   : > { %10463 = vmatpush3.msra.mxu1 %v12478_v16  ;;  %v2487_v51 = vmax.f32 %v2479_v44, 0.0  ;;  %v2500_v49 = vmul.f32 %v2494_v53, %v2488_v7  ;;  %v2532_v62 = vld [vmem:[#allocation7 + $0x1b8] sm:$0xff]  ;;  %v2529_v44 = vld [vmem:[#allocation7 + $0x1a0] sm:$0xff]  ;;  %v2522_v7 = vld [vmem:[#allocation7 + $0x170] sm:$0xff] }
 0x632   : > { %v2490_v43 = vmax.f32 %v2482_v18, 0.0  ;;  %v2481_v61 = vmul.f32 %v2473_v41, %v12205_v42  ;;  %10464 = vmatprep.subr.mxu1 %v12483_v17  ;;  %v12522_v18 = vld [vmem:[%s11986_s29 + $0x28] sm:$0xff]  ;;  %v12527_v41 = vld [vmem:[%s11986_s29 + $0x30] sm:$0xff]  ;;  %10492 = vmatprep.subr.mxu0 %v2522_v7 }
 0x633   : > { %10465 = vmatpush3.msra.mxu1 %v12483_v17  ;;  %v2499_v29 = vmul.f32 %v2494_v53, %v2487_v51  ;;  %v2512_v35 = vadd.f32 %v2506_v13, %v2500_v49  ;;  %v2526_v51 = vld [vmem:[#allocation7 + $0x188] sm:$0xff]  ;;  %10493 = vmatpush3.msra.mxu0 %v2522_v7  ;;  %v2525_v49 = vld [vmem:[#allocation7 + $0x180] sm:$0xff] }
 0x634   : > { %v2489_v0 = vmax.f32 %v2481_v61, 0.0  ;;  %v2502_v24 = vmul.f32 %v2494_v53, %v2490_v43  ;;  %10466 = vmatprep.subr.mxu1 %v12488_v46  ;;  %v12532_v43 = vld [vmem:[%s11986_s29 + $0x38] sm:$0xff] }
 0x635   : > { %10467 = vmatpush3.msra.mxu1 %v12488_v46  ;;  %v2528_v61 = vld [vmem:[#allocation7 + $0x198] sm:$0xff] }
 0x636   : > { %v12493_v57 = vadd.f32 %v2506_v13, %v2502_v24  ;;  %v2501_v1 = vmul.f32 %v2494_v53, %v2489_v0  ;;  %10468 = vmatprep.subr.mxu1 %v2507_v52  ;;  %v2511_v53 = vadd.f32 %v2506_v13, %v2499_v29  ;;  %v2527_v0 = vld [vmem:[#allocation7 + $0x190] sm:$0xff]  ;;  %v2521_v24 = vld [vmem:[#allocation7 + $0x168] sm:$0xff] }
 0x637   : > { %10469 = vmatpush3.msra.mxu1 %v2507_v52  ;;  %10494 = vmatprep.subr.mxu0 %v2521_v24  ;;  %v2518_v29 = vld [vmem:[#allocation7 + $0x150] sm:$0xff] }
 0x638   : > { %v12495_v20 = vadd.f32 %v2506_v13, %v2501_v1  ;;  %10471 = vmatmul.mubr.msk.f32.vlgmr.msra.gmra.mxu1 %vm426_vm0, %v12498_v27  ;;  %10476 = vmatprep.subr.mxu1 %v12493_v57  ;;  %v2530_v13 = vld [vmem:[#allocation7 + $0x1a8] sm:$0xff]  ;;  %v2520_v1 = vld [vmem:[#allocation7 + $0x160] sm:$0xff] }
 0x639   : > { %10477 = vmatpush3.msra.mxu1 %v12493_v57  ;;  %10473 = vmatprep.mubr.msk.f32.mxu1 %vm426_vm0, %v12505_v48 }
 0x63a   : > { %10478 = vmatprep.subr.mxu1 %v12495_v20  ;;  %10495 = vmatpush3.msra.mxu0 %v2521_v24 }
 0x63b   : > { %10479 = vmatpush3.msra.mxu1 %v12495_v20  ;;  %10496 = vmatprep.subr.mxu0 %v2520_v1 }
 0x63c   : > { %10474 = vmatmul.mubr.msk.f32.gmra.mxu1 %vm426_vm0, %v12512_v60  ;;  %10480 = vmatprep.subr.mxu1 %v2512_v35 }
 0x63d   : > { %10481 = vmatpush3.msra.mxu1 %v2512_v35  ;;  %10484 = vmatprep.mubr.msk.f32.mxu1 %vm426_vm0, %v12517_v11 }
 0x63e   : > { %10482 = vmatprep.subr.mxu1 %v2511_v53  ;;  %10497 = vmatpush3.msra.mxu0 %v2520_v1 }
 0x63f   : > { %10483 = vmatpush3.msra.mxu1 %v2511_v53 }
 0x640   : > { %10485 = vmatmul.mubr.msk.f32.vlgmr.msra.gmra.mxu1 %vm426_vm0, %v12522_v18  ;;  %10518 = vmatprep.subr.mxu1 %v2532_v62 }
 0x641   : > { %10519 = vmatpush3.msra.mxu1 %v2532_v62  ;;  %10487 = vmatprep.mubr.msk.f32.mxu1 %vm426_vm0, %v12527_v41 }
 0x642   : > { %10520 = vmatprep.subr.mxu1 %v2531_v40 }
 0x643   : > { %10521 = vmatpush3.msra.mxu1 %v2531_v40 }
 0x644   : > { %10488 = vmatmul.mubr.msk.f32.gmra.mxu1 %vm426_vm0, %v12532_v43  ;;  %10522 = vmatprep.subr.mxu1 %v2530_v13 }
 0x645   : > { %10523 = vmatpush3.msra.mxu1 %v2530_v13  ;;  %10534 = vmatprep.mubr.msk.f32.mxu1 %vm1241_vm1, %v2507_v52  ;;  %v2519_v52 = vld [vmem:[#allocation7 + $0x158] sm:$0xff] }
 0x646   : > { %10524 = vmatprep.subr.mxu1 %v2529_v44  ;;  %10498 = vmatprep.subr.mxu0 %v2519_v52 }
 0x647   : > { %10525 = vmatpush3.msra.mxu1 %v2529_v44  ;;  %10499 = vmatpush3.msra.mxu0 %v2519_v52 }
 0x648   : > { %10526 = vmatprep.subr.mxu1 %v2528_v61  ;;  %10500 = vmatprep.subr.mxu0 %v2518_v29 }
 0x649   : > { %10527 = vmatpush3.msra.mxu1 %v2528_v61  ;;  %10501 = vmatpush3.msra.mxu0 %v2518_v29 }
 0x64a   : > { %10528 = vmatprep.subr.mxu1 %v2527_v0 }
 0x64b   : > { %10529 = vmatpush3.msra.mxu1 %v2527_v0 }
 0x64c   : > { %10530 = vmatprep.subr.mxu1 %v2526_v51 }
 0x64d   : > { %10531 = vmatpush3.msra.mxu1 %v2526_v51 }
 0x64e   : > { %10532 = vmatprep.subr.mxu1 %v2525_v49 }
 0x64f   : > { %10533 = vmatpush3.msra.mxu1 %v2525_v49 }
 0x650   : > { %10535 = vmatmul.mubr.msk.f32.vlgmr.msra.gmra.mxu1 %vm1241_vm1, %v12488_v46  ;;  %v2517_v46 = vld [vmem:[#allocation7 + $0x148] sm:$0xff] }
 0x651   : > { %10537 = vmatprep.mubr.msk.f32.mxu1 %vm1241_vm1, %v12483_v17  ;;  %10502 = vmatprep.subr.mxu0 %v2517_v46  ;;  %v2516_v17 = vld [vmem:[#allocation7 + $0x140] sm:$0xff] }
 0x652   : > { %10503 = vmatpush3.msra.mxu0 %v2517_v46 }
 0x653   : > { %10504 = vmatprep.subr.mxu0 %v2516_v17 }
 0x654   : > { %10538 = vmatmul.mubr.msk.f32.gmra.mxu1 %vm1241_vm1, %v12478_v16  ;;  %10505 = vmatpush3.msra.mxu0 %v2516_v17 }
 0x655   : > { %10540 = vmatprep.mubr.msk.f32.mxu1 %vm1241_vm1, %v2511_v53 }
 0x658   : > { %10541 = vmatmul.mubr.msk.f32.gmra.mxu1 %vm1241_vm1, %v2512_v35 }
 0x659   : > { %10543 = vmatprep.mubr.msk.f32.mxu1 %vm1241_vm1, %v12495_v20 }
 0x65c   : > { %10544 = vmatmul.mubr.msk.f32.gmra.mxu1 %vm1241_vm1, %v12493_v57 }
 0x6a1   : > { %v3716_v16 = vpop.xlane.xlu1 %3715 }
 0x6a2   : > { %v12551_v53 = vsub.f32 %v2229_v10, %v3716_v16 }
 0x6a3   : > { %v3713_v35 = vpop.xlane.xlu0 %3712 }
 0x6a4   : > { %13579 = vst [vmem:[#allocation15_spill] sm:$0xff] %v12551_v53  ;;  %v3743_v20 = vmul.f32 1.442695, %v12551_v53  ;;  %v12556_v57 = vsub.f32 %v2228_v37, %v3713_v35 }
 0x6a5   : > { %v3707_v62 = vpop.xlane.xlu1 %3706 }
 0x6a6   : > { %13580 = vst [vmem:[#allocation16_spill] sm:$0xff] %v12556_v57  ;;  %11505 = vpow2.f32 %v3743_v20  ;;  %v3741_v40 = vmul.f32 1.442695, %v12556_v57  ;;  %v12561_v13 = vsub.f32 %v2226_v36, %v3707_v62 }
 0x6a7   : > { %v3710_v44 = vpop.xlane.xlu0 %3709 }
 0x6a8   : > { %11507 = vpow2.f32 %v3741_v40  ;;  %v3737_v50 = vmul.f32 1.442695, %v12561_v13  ;;  %v12566_v10 = vsub.f32 %v2227_v32, %v3710_v44 }
 0x6aa   : > { %13581 = vst [vmem:[#allocation17_spill] sm:$0xff] %v12566_v10  ;;  %11509 = vpow2.f32 %v3737_v50  ;;  %v3739_v38 = vmul.f32 1.442695, %v12566_v10 }
 0x6ab   : > { %v3728_v37 = vpop.xlane.xlu0 %3727 }
 0x6ac   : > { %11511 = vpow2.f32 %v3739_v38  ;;  %v12571_v22 = vsub.f32 %v2233_v15, %v3728_v37  ;;  %v3725_v4 = vpop.xlane.xlu1 %3724 }
 0x6ad   : > { %v12575_v36 = vsub.f32 %v2232_v3, %v3725_v4 }
 0x6ae   : > { %13582 = vst [vmem:[#allocation18_spill] sm:$0xff] %v12571_v22  ;;  %v3751_v61 = vmul.f32 1.442695, %v12571_v22 }
 0x6af   : > { %13583 = vst [vmem:[#allocation19_spill] sm:$0xff] %v12575_v36  ;;  %v3749_v8 = vmul.f32 1.442695, %v12575_v36  ;;  %v3722_v32 = vpop.xlane.xlu0 %3721 }
 0x6b0   : > { %11513 = vpow2.f32 %v3751_v61  ;;  %v12581_v7 = vsub.f32 %v2231_v31, %v3722_v32  ;;  %v3719_v0 = vpop.xlane.xlu1 %3718 }
 0x6b1   : > { %11515 = vpow2.f32 %v3749_v8  ;;  %v12585_v45 = vsub.f32 %v2230_v39, %v3719_v0 }
 0x6b2   : > { %13584 = vst [vmem:[#allocation20_spill] sm:$0xff] %v12581_v7  ;;  %v3747_v15 = vmul.f32 1.442695, %v12581_v7 }
 0x6b3   : > { %13585 = vst [vmem:[#allocation21_spill] sm:$0xff] %v12585_v45  ;;  %v12588_v6 = vpop.eup %11505  ;;  %v3745_v3 = vmul.f32 1.442695, %v12585_v45 }
 0x6b4   : > { %11517 = vpow2.f32 %v3747_v15  ;;  %v3762_v24 = vsel %vm3704_vm2, %v12588_v6, 0.0 }
 0x6b5   : > { %v12593_v51 = vpop.eup %11507  ;;  %11519 = vpow2.f32 %v3745_v3  ;;  %3763 = vadd.xlane.f32.xlu0 %v3762_v24 }
 0x6b6   : > { %v3759_v9 = vsel %vm3704_vm2, %v12593_v51, 0.0 }
 0x6b7   : > { %v11510_v21 = vpop.eup %11509  ;;  %3760 = vadd.xlane.f32.xlu1 %v3759_v9 }
 0x6b8   : > { %v3753_v1 = vsel %vm3704_vm2, %v11510_v21, 0.0 }
 0x6b9   : > { %v12597_v31 = vpop.eup %11511 }
 0x6ba   : > { %v3756_v39 = vsel %vm3704_vm2, %v12597_v31, 0.0 }
 0x6bb   : > { %3757 = vadd.xlane.f32.xlu0 %v3756_v39  ;;  %3754 = vadd.xlane.f32.xlu1 %v3753_v1  ;;  %v12632_v1 = vld [vmem:[%s11986_s29] sm:$0xff] }
 0x6bd   : > { %v12602_v49 = vpop.eup %11513 }
 0x6be   : > { %v12604_v52 = vpop.eup %11515  ;;  %v3774_v29 = vsel %vm3704_vm2, %v12602_v49, 0.0 }
 0x6bf   : > { %3775 = vadd.xlane.f32.xlu0 %v3774_v29  ;;  %v3771_v46 = vsel %vm3704_vm2, %v12604_v52, 0.0 }
 0x6c0   : > { %3772 = vadd.xlane.f32.xlu1 %v3771_v46 }
 0x6c1   : > { %v12610_v17 = vpop.eup %11517 }
 0x6c2   : > { %v11520_v16 = vpop.eup %11519  ;;  %v3768_v35 = vsel %vm3704_vm2, %v12610_v17, 0.0 }
 0x6c3   : > { %3769 = vadd.xlane.f32.xlu0 %v3768_v35  ;;  %v3765_v20 = vsel %vm3704_vm2, %v11520_v16, 0.0 }
 0x6c4   : > { %3766 = vadd.xlane.f32.xlu1 %v3765_v20 }
 0x6f8   : > { %v10472_v62 = vpop.f32.mrf.mxu1 }
 0x6f9   : > { %v2705_v50 = vmul.f32 %v12135_v58, %v10472_v62 }
 0x6fa   : > { %v2600_v40 = vpop.f32.mrf.mxu1 }
 0x6fb   : > { %v2704_v44 = vmul.f32 %v12137_v59, %v2600_v40 }
 0x6fc   : > { %v10475_v38 = vpop.f32.mrf.mxu1 }
 0x6fd   : > { %10506 = vmatprep.mubr.msk.f32.mxu0 %vm1241_vm1, %v2704_v44  ;;  %v2707_v61 = vmul.f32 %v12147_v2, %v10475_v38 }
 0x6fe   : > { %v2610_v37 = vpop.f32.mrf.mxu1  ;;  %10507 = vmatmul.mubr.msk.f32.vlgmr.msra.gmra.mxu0 %vm1241_vm1, %v2705_v50 }
 0x6ff   : > { %v2706_v4 = vmul.f32 %v12151_v5, %v2610_v37 }
 0x700   : > { %v10486_v8 = vpop.f32.mrf.mxu1 }
 0x701   : > { %10509 = vmatprep.mubr.msk.f32.mxu0 %vm1241_vm1, %v2706_v4  ;;  %v2709_v15 = vmul.f32 %v12166_v19, %v10486_v8 }
 0x702   : > { %v2685_v32 = vpop.f32.mrf.mxu1  ;;  %10510 = vmatmul.mubr.msk.f32.gmra.mxu0 %vm1241_vm1, %v2707_v61 }
 0x703   : > { %v2708_v0 = vmul.f32 %v12142_v63, %v2685_v32 }
 0x704   : > { %v10489_v3 = vpop.f32.mrf.mxu1 }
 0x705   : > { %10512 = vmatprep.mubr.msk.f32.mxu0 %vm1241_vm1, %v2708_v0  ;;  %v2711_v39 = vmul.f32 %v12180_v23, %v10489_v3 }
 0x706   : > { %v2695_v24 = vpop.f32.mrf.mxu1  ;;  %10513 = vmatmul.mubr.msk.f32.gmra.mxu0 %vm1241_vm1, %v2709_v15 }
 0x707   : > { %v2710_v9 = vmul.f32 %v12161_v14, %v2695_v24 }
 0x709   : > { %10515 = vmatprep.mubr.msk.f32.mxu0 %vm1241_vm1, %v2710_v9 }
 0x70a   : > { %10516 = vmatmul.mubr.msk.f32.gmra.mxu0 %vm1241_vm1, %v2711_v39 }
 0x70b   : > { %10554 = vmatprep.mubr.msk.f32.mxu0 %vm426_vm0, %v12632_v1 }
 0x73e   : > { %v12636_v29 = vpop.xlane.xlu0 %3763 }
 0x73f   : > { %13586 = vst [vmem:[#allocation22_spill] sm:$0xff] %v12636_v29 }
 0x740   : > { %v12638_v46 = vpop.xlane.xlu1 %3760 }
 0x741   : > { %13587 = vst [vmem:[#allocation23_spill] sm:$0xff] %v12638_v46 }
 0x744   : > { %v12640_v35 = vpop.xlane.xlu0 %3757  ;;  %v12642_v20 = vpop.xlane.xlu1 %3754 }
 0x745   : > { %13588 = vst [vmem:[#allocation24_spill] sm:$0xff] %v12640_v35  ;;  %13589 = vst [vmem:[#allocation25_spill] sm:$0xff] %v12642_v20  ;;  %11521 = vrcp.f32 %v12640_v35 }
 0x746   : > { %11523 = vrcp.f32 %v12642_v20 }
 0x747   : > { %11525 = vrcp.f32 %v12638_v46 }
 0x748   : > { %v12646_v62 = vpop.xlane.xlu0 %3775  ;;  %11527 = vrcp.f32 %v12636_v29 }
 0x749   : > { %13590 = vst [vmem:[#allocation26_spill] sm:$0xff] %v12646_v62  ;;  %v12648_v40 = vpop.xlane.xlu1 %3772 }
 0x74a   : > { %13591 = vst [vmem:[#allocation27_spill] sm:$0xff] %v12648_v40 }
 0x74c   : > { %v12651_v44 = vpop.xlane.xlu0 %3769 }
 0x74d   : > { %13592 = vst [vmem:[#allocation28_spill] sm:$0xff] %v12651_v44  ;;  %v12654_v50 = vpop.xlane.xlu1 %3766  ;;  %11529 = vrcp.f32 %v12651_v44  ;;  %v10536_v44 = vpop.f32.mrf.mxu1 }
 0x74e   : > { %13593 = vst [vmem:[#allocation29_spill] sm:$0xff] %v12654_v50  ;;  %11531 = vrcp.f32 %v12654_v50  ;;  %v2533_v50 = vld [vmem:[#allocation8 + $0xd] sm:$0x7] }
 0x74f   : > { %11533 = vrcp.f32 %v12648_v40  ;;  %v2931_v40 = vpop.f32.mrf.mxu1  ;;  %v2981_v46 = vrot.slane %v2533_v50, %v12200_v33 }
 0x750   : > { %11535 = vrcp.f32 %v12646_v62  ;;  %v3035_v62 = vld [vmem:[#allocation7 + $0x1e0] sm:$0xff] }
 0x751   : > { %v10539_v29 = vpop.f32.mrf.mxu1 }
 0x752   : > { %v11522_v38 = vpop.eup %11521 }
 0x753   : > { %v11524_v37 = vpop.eup %11523  ;;  %v12667_v8 = vmul.f32 %v11522_v38, %v12597_v31  ;;  %v2941_v35 = vpop.f32.mrf.mxu1 }
 0x754   : > { %v12659_v4 = vmul.f32 %v11524_v37, %v11510_v21  ;;  %v11526_v32 = vpop.eup %11525 }
 0x755   : > { %13594 = vst [vmem:[#allocation30_spill] sm:$0xff] %v12667_v8  ;;  %v11528_v0 = vpop.eup %11527  ;;  %v12672_v3 = vmul.f32 %v12667_v8, %v12195_v26  ;;  %v12675_v21 = vmul.f32 %v11526_v32, %v12593_v51  ;;  %v10542_v20 = vpop.f32.mrf.mxu1 }
 0x756   : > { %v12664_v61 = vmul.f32 %v12659_v4, %v12197_v30  ;;  %v12689_v38 = vmul.f32 %v11528_v0, %v12588_v6 }
 0x757   : > { %13595 = vst [vmem:[#allocation31_spill] sm:$0xff] %v12675_v21  ;;  %v12682_v31 = vmul.f32 %v12675_v21, %v12193_v25  ;;  %v2951_v7 = vpop.f32.mrf.mxu1 }
 0x758   : > { %4134 = vxpose.xlu0.b32.start [1/4] (short) (narrow) %v12664_v61, 8  ;;  %13597 = vst [vmem:[#allocation33_spill] sm:$0xff] %v12689_v38 }
 0x759   : > { %v10545_v45 = vpop.f32.mrf.mxu1 }
 0x75a   : > { %v11530_v15 = vpop.eup %11529 }
 0x75b   : > { %v11532_v24 = vpop.eup %11531  ;;  %v12692_v37 = vmul.f32 %v11530_v15, %v12610_v17 }
 0x75c   : > { %4135 = vxpose.xlu0.b32.cont [2/4] (short) (narrow) %v12672_v3, 8  ;;  %v12678_v9 = vmul.f32 %v11532_v24, %v11520_v16  ;;  %v11534_v51 = vpop.eup %11533  ;;  %v12698_v16 = vmul.f32 %v12689_v38, %v12207_v47 }
 0x75d   : > { %13598 = vst [vmem:[#allocation34_spill] sm:$0xff] %v12692_v37  ;;  %v12702_v32 = vmul.f32 %v12692_v37, %v12212_v56  ;;  %v12705_v24 = vmul.f32 %v11534_v51, %v12604_v52  ;;  %v11536_v6 = vpop.eup %11535  ;;  %v3038_v52 = vld [vmem:[#allocation7 + $0x1f8] sm:$0xff]  ;;  %v3037_v51 = vld [vmem:[#allocation7 + $0x1f0] sm:$0xff] }
 0x75e   : > { %13596 = vst [vmem:[#allocation32_spill] sm:$0xff] %v12678_v9  ;;  %v12686_v39 = vmul.f32 %v12678_v9, %v12222_v54  ;;  %v12714_v0 = vmul.f32 %v11536_v6, %v12602_v49  ;;  %10574 = vmatprep.subr.mxu1 %v3038_v52  ;;  %v3034_v49 = vld [vmem:[#allocation7 + $0x1d8] sm:$0xff]  ;;  %v3033_v6 = vld [vmem:[#allocation7 + $0x1d0] sm:$0xff] }
 0x75f   : > { %13599 = vst [vmem:[#allocation35_spill] sm:$0xff] %v12705_v24  ;;  %v12711_v17 = vmul.f32 %v12705_v24, %v12205_v42  ;;  %10575 = vmatpush3.msra.mxu1 %v3038_v52 }
 0x760   : > { %4136 = vxpose.xlu0.b32.cont [3/4] (short) (narrow) %v12682_v31, 8  ;;  %4391 = vxpose.xlu1.b32.start [1/4] (short) (narrow) %v12686_v39, 8  ;;  %13600 = vst [vmem:[#allocation36_spill] sm:$0xff] %v12714_v0  ;;  %v12719_v15 = vmul.f32 %v12714_v0, %v12202_v34 }
 0x761   : > { %10576 = vmatprep.subr.mxu1 %v3037_v51 }
 0x762   : > { %10577 = vmatpush3.msra.mxu1 %v3037_v51 }
 0x763   : > { %10578 = vmatprep.subr.mxu1 %v3036_v28 }
 0x764   : > { %4137 = vxpose.xlu0.b32.end [4/4] (short) (narrow) %v12698_v16, 8  ;;  %4392 = vxpose.xlu1.b32.cont [2/4] (short) (narrow) %v12702_v32, 8 }
 0x765   : > { %10579 = vmatpush3.msra.mxu1 %v3036_v28 }
 0x766   : > { %10580 = vmatprep.subr.mxu1 %v3035_v62 }
 0x767   : > { %10581 = vmatpush3.msra.mxu1 %v3035_v62 }
 0x768   : > { %4393 = vxpose.xlu1.b32.cont [3/4] (short) (narrow) %v12711_v17, 8  ;;  %10582 = vmatprep.subr.mxu1 %v3034_v49 }
 0x769   : > { %10583 = vmatpush3.msra.mxu1 %v3034_v49 }
 0x76a   : > { %10584 = vmatprep.subr.mxu1 %v3033_v6 }
 0x76b   : > { %10585 = vmatpush3.msra.mxu1 %v3033_v6 }
 0x76c   : > { %4394 = vxpose.xlu1.b32.end [4/4] (short) (narrow) %v12719_v15, 8 }
 0x7be   : > { %v10508_v52 = vpop.f32.mrf.mxu0 }
 0x7bf   : > { %v2971_v51 = vadd.f32 %v10536_v44, %v10508_v52 }
 0x7c0   : > { %v2802_v0 = vpop.f32.mrf.mxu0 }
 0x7c1   : > { %v2970_v28 = vadd.f32 %v2931_v40, %v2802_v0  ;;  %v2983_v22 = vadd.f32 %v2981_v46, %v2971_v51 }
 0x7c2   : > { %v10511_v37 = vpop.f32.mrf.mxu0 }
 0x7c3   : > { %v2973_v62 = vadd.f32 %v10539_v29, %v10511_v37  ;;  %v2982_v38 = vadd.f32 %v2981_v46, %v2970_v28  ;;  %v2991_v8 = vmul.f32 %v2983_v22, %v12195_v26 }
 0x7c4   : > { %v2812_v49 = vpop.f32.mrf.mxu0 }
 0x7c5   : > { %v2985_v53 = vadd.f32 %v2981_v46, %v2973_v62  ;;  %v2972_v6 = vadd.f32 %v2941_v35, %v2812_v49  ;;  %v2990_v44 = vmul.f32 %v2982_v38, %v12197_v30  ;;  %v2999_v37 = vmax.f32 %v2991_v8, 0.0  ;;  %v2961_v49 = vpop.f32.mrf.mxu1 }
 0x7c6   : > { %v10514_v10 = vpop.f32.mrf.mxu0  ;;  %v3009_v35 = vrot.slane %v2533_v50, %v12210_v55 }
 0x7c7   : > { %v2993_v24 = vmul.f32 %v2985_v53, %v12207_v47  ;;  %v2984_v36 = vadd.f32 %v2981_v46, %v2972_v6  ;;  %v2975_v9 = vadd.f32 %v10542_v20, %v10514_v10  ;;  %v2998_v21 = vmax.f32 %v2990_v44, 0.0 }
 0x7c8   : > { %v2822_v52 = vpop.f32.mrf.mxu0  ;;  %v3021_v20 = vrot.slane %v2533_v50, %v12216_v12  ;;  %v3011_v8 = vmul.f32 %v3009_v35, %v2999_v37 }
 0x7c9   : > { %v3001_v40 = vmax.f32 %v2993_v24, 0.0  ;;  %v2992_v0 = vmul.f32 %v2984_v36, %v12193_v25  ;;  %v2974_v29 = vadd.f32 %v2951_v7, %v2822_v52  ;;  %v2987_v51 = vadd.f32 %v2981_v46, %v2975_v9 }
 0x7ca   : > { %v10517_v28 = vpop.f32.mrf.mxu0 }
 0x7cb   : > { %v3000_v62 = vmax.f32 %v2992_v0, 0.0  ;;  %v2977_v22 = vadd.f32 %v10545_v45, %v10517_v28  ;;  %v2986_v53 = vadd.f32 %v2981_v46, %v2974_v29  ;;  %v3013_v10 = vmul.f32 %v3009_v35, %v3001_v40 }
 0x7cc   : > { %v2832_v6 = vpop.f32.mrf.mxu0  ;;  %v2995_v24 = vmul.f32 %v2987_v51, %v12212_v56  ;;  %v3010_v40 = vmul.f32 %v3009_v35, %v2998_v21  ;;  %v3023_v51 = vadd.f32 %v3021_v20, %v3011_v8  ;;  %v3042_v8 = vld [vmem:[#allocation7 + $0x210] sm:$0xff] }
 0x7cd   : > { %v2989_v38 = vadd.f32 %v2981_v46, %v2977_v22  ;;  %v2976_v57 = vadd.f32 %v2961_v49, %v2832_v6  ;;  %v12730_v36 = vadd.f32 %v3021_v20, %v3013_v10  ;;  %v3012_v7 = vmul.f32 %v3009_v35, %v3000_v62 }
 0x7ce   : > { %v2994_v45 = vmul.f32 %v2986_v53, %v12222_v54  ;;  %v3003_v29 = vmax.f32 %v2995_v24, 0.0  ;;  %v3022_v28 = vadd.f32 %v3021_v20, %v3010_v40  ;;  %v3045_v24 = vld [vmem:[#allocation7 + $0x228] sm:$0xff] }
 0x7cf   : > { %v2997_v9 = vmul.f32 %v2989_v38, %v12202_v34  ;;  %v2988_v52 = vadd.f32 %v2981_v46, %v2976_v57  ;;  %10546 = vmatprep.subr.mxu0 %v12730_v36  ;;  %v12735_v44 = vadd.f32 %v3021_v20, %v3012_v7  ;;  %v3047_v38 = vld [vmem:[#allocation7 + $0x238] sm:$0xff] }
 0x7d0   : > { %10547 = vmatpush3.msra.mxu0 %v12730_v36  ;;  %v3002_v46 = vmax.f32 %v2994_v45, 0.0  ;;  %v3015_v22 = vmul.f32 %v3009_v35, %v3003_v29  ;;  %v3043_v7 = vld [vmem:[#allocation7 + $0x218] sm:$0xff]  ;;  %v3031_v45 = vld [vmem:[#allocation7 + $0x1c0] sm:$0xff] }
 0x7d1   : > { %v3005_v0 = vmax.f32 %v2997_v9, 0.0  ;;  %v2996_v50 = vmul.f32 %v2988_v52, %v12205_v42  ;;  %10548 = vmatprep.subr.mxu0 %v12735_v44  ;;  %v3041_v9 = vld [vmem:[#allocation7 + $0x208] sm:$0xff]  ;;  %v3040_v52 = vld [vmem:[#allocation7 + $0x200] sm:$0xff] }
 0x7d2   : > { %10549 = vmatpush3.msra.mxu0 %v12735_v44  ;;  %v3014_v53 = vmul.f32 %v3009_v35, %v3002_v46  ;;  %v3027_v6 = vadd.f32 %v3021_v20, %v3015_v22 }
 0x7d3   : > { %v3004_v37 = vmax.f32 %v2996_v50, 0.0  ;;  %v3017_v57 = vmul.f32 %v3009_v35, %v3005_v0  ;;  %10550 = vmatprep.subr.mxu0 %v3023_v51 }
 0x7d4   : > { %10551 = vmatpush3.msra.mxu0 %v3023_v51  ;;  %v3026_v10 = vadd.f32 %v3021_v20, %v3014_v53 }
 0x7d5   : > { %v12741_v62 = vadd.f32 %v3021_v20, %v3017_v57  ;;  %v3016_v21 = vmul.f32 %v3009_v35, %v3004_v37  ;;  %10552 = vmatprep.subr.mxu0 %v3022_v28  ;;  %v3046_v35 = vld [vmem:[#allocation7 + $0x230] sm:$0xff] }
 0x7d6   : > { %10553 = vmatpush3.msra.mxu0 %v3022_v28 }
 0x7d7   : > { %v3028_v49 = vadd.f32 %v3021_v20, %v3016_v21  ;;  %10555 = vmatmul.mubr.msk.f32.vlgmr.msra.gmra.mxu0 %vm426_vm0, %v12498_v27  ;;  %10560 = vmatprep.subr.mxu0 %v12741_v62  ;;  %v3044_v20 = vld [vmem:[#allocation7 + $0x220] sm:$0xff] }
 0x7d8   : > { %10561 = vmatpush3.msra.mxu0 %v12741_v62  ;;  %10557 = vmatprep.mubr.msk.f32.mxu0 %vm426_vm0, %v12505_v48 }
 0x7d9   : > { %10562 = vmatprep.subr.mxu0 %v3028_v49 }
 0x7da   : > { %10563 = vmatpush3.msra.mxu0 %v3028_v49 }
 0x7db   : > { %10558 = vmatmul.mubr.msk.f32.gmra.mxu0 %vm426_vm0, %v12512_v60  ;;  %10564 = vmatprep.subr.mxu0 %v3027_v6 }
 0x7dc   : > { %10565 = vmatpush3.msra.mxu0 %v3027_v6  ;;  %10568 = vmatprep.mubr.msk.f32.mxu0 %vm426_vm0, %v12517_v11 }
 0x7dd   : > { %10566 = vmatprep.subr.mxu0 %v3026_v10 }
 0x7de   : > { %10567 = vmatpush3.msra.mxu0 %v3026_v10 }
 0x7df   : > { %10569 = vmatmul.mubr.msk.f32.vlgmr.msra.gmra.mxu0 %vm426_vm0, %v12522_v18  ;;  %10602 = vmatprep.subr.mxu0 %v3047_v38 }
 0x7e0   : > { %10603 = vmatpush3.msra.mxu0 %v3047_v38  ;;  %10571 = vmatprep.mubr.msk.f32.mxu0 %vm426_vm0, %v12527_v41 }
 0x7e1   : > { %10604 = vmatprep.subr.mxu0 %v3046_v35 }
 0x7e2   : > { %10605 = vmatpush3.msra.mxu0 %v3046_v35 }
 0x7e3   : > { %10572 = vmatmul.mubr.msk.f32.gmra.mxu0 %vm426_vm0, %v12532_v43  ;;  %10606 = vmatprep.subr.mxu0 %v3045_v24 }
 0x7e4   : > { %10607 = vmatpush3.msra.mxu0 %v3045_v24  ;;  %10618 = vmatprep.mubr.msk.f32.mxu0 %vm1241_vm1, %v3022_v28  ;;  %v3549_v28 = vld [vmem:[#allocation7 + $0x258] sm:$0xff] }
 0x7e5   : > { %10608 = vmatprep.subr.mxu0 %v3044_v20 }
 0x7e6   : > { %10609 = vmatpush3.msra.mxu0 %v3044_v20 }
 0x7e7   : > { %10610 = vmatprep.subr.mxu0 %v3043_v7 }
 0x7e8   : > { %10611 = vmatpush3.msra.mxu0 %v3043_v7 }
 0x7e9   : > { %10612 = vmatprep.subr.mxu0 %v3042_v8 }
 0x7ea   : > { %10613 = vmatpush3.msra.mxu0 %v3042_v8 }
 0x7eb   : > { %10614 = vmatprep.subr.mxu0 %v3041_v9 }
 0x7ec   : > { %10615 = vmatpush3.msra.mxu0 %v3041_v9 }
 0x7ed   : > { %10616 = vmatprep.subr.mxu0 %v3040_v52 }
 0x7ee   : > { %10617 = vmatpush3.msra.mxu0 %v3040_v52 }
 0x7ef   : > { %10619 = vmatmul.mubr.msk.f32.vlgmr.msra.gmra.mxu0 %vm1241_vm1, %v3023_v51  ;;  %10658 = vmatprep.subr.mxu0 %v12698_v16  ;;  %v3551_v51 = vld [vmem:[#allocation7 + $0x268] sm:$0xff] }
 0x7f0   : > { %10621 = vmatprep.mubr.msk.f32.mxu0 %vm1241_vm1, %v12735_v44  ;;  %10659 = vmatpush3.msra.mxu0 %v12698_v16  ;;  %v3553_v44 = vld [vmem:[#allocation7 + $0x278] sm:$0xff] }
 0x7f1   : > { %10660 = vmatprep.subr.mxu0 %v12682_v31 }
 0x7f2   : > { %10661 = vmatpush3.msra.mxu0 %v12682_v31 }
 0x7f3   : > { %10622 = vmatmul.mubr.msk.f32.gmra.mxu0 %vm1241_vm1, %v12730_v36  ;;  %10662 = vmatprep.subr.mxu0 %v12672_v3  ;;  %v3032_v36 = vld [vmem:[#allocation7 + $0x1c8] sm:$0xff] }
 0x7f4   : > { %10624 = vmatprep.mubr.msk.f32.mxu0 %vm1241_vm1, %v3026_v10  ;;  %10663 = vmatpush3.msra.mxu0 %v12672_v3  ;;  %v3048_v10 = vld [vmem:[#allocation8 + $0x10] sm:$0x7] }
 0x7f5   : > { %10664 = vmatprep.subr.mxu0 %v12664_v61  ;;  %10586 = vmatprep.subr.mxu1 %v3032_v36 }
 0x7f6   : > { %10665 = vmatpush3.msra.mxu0 %v12664_v61  ;;  %10587 = vmatpush3.msra.mxu1 %v3032_v36 }
 0x7f7   : > { %10625 = vmatmul.mubr.msk.f32.gmra.mxu0 %vm1241_vm1, %v3027_v6  ;;  %10588 = vmatprep.subr.mxu1 %v3031_v45 }
 0x7f8   : > { %10627 = vmatprep.mubr.msk.f32.mxu0 %vm1241_vm1, %v3028_v49  ;;  %10589 = vmatpush3.msra.mxu1 %v3031_v45  ;;  %v3547_v49 = vld [vmem:[#allocation7 + $0x248] sm:$0xff] }
 0x7f9   : > { %10630 = vmatprep.subr.mxu1 %v3553_v44 }
 0x7fb   : > { %10628 = vmatmul.mubr.msk.f32.gmra.mxu0 %vm1241_vm1, %v12741_v62 }
 0x7fc   : > { %10666 = vmatprep.mubr.msk.f32.mxu0 %vm426_vm0, %v12632_v1 }
 0x7ff   : > { %10667 = vmatmul.mubr.msk.f32.vlgmr.msra.gmra.mxu0 %vm426_vm0, %v12498_v27 }
 0x800   : > { %10669 = vmatprep.mubr.msk.f32.mxu0 %vm426_vm0, %v12505_v48  ;;  %v3552_v48 = vld [vmem:[#allocation7 + $0x270] sm:$0xff] }
 0x803   : > { %10670 = vmatmul.mubr.msk.f32.gmra.mxu0 %vm426_vm0, %v12512_v60 }
 0x897   : > { %v10556_v40 = vpop.f32.mrf.mxu0 }
 0x898   : > { %v3220_v27 = vmul.f32 %v12135_v58, %v10556_v40 }
 0x899   : > { %v3115_v0 = vpop.f32.mrf.mxu0 }
 0x89a   : > { %v3219_v1 = vmul.f32 %v12137_v59, %v3115_v0  ;;  %v3550_v59 = vld [vmem:[#allocation7 + $0x260] sm:$0xff]  ;;  %v3524_v0 = vrot.slane %v3048_v10, %v12210_v55 }
 0x89b   : > { %v10559_v50 = vpop.f32.mrf.mxu0 }
 0x89c   : > { %10590 = vmatprep.mubr.msk.f32.mxu1 %vm1241_vm1, %v3219_v1  ;;  %v3222_v37 = vmul.f32 %v12147_v2, %v10559_v50  ;;  %v3548_v2 = vld [vmem:[#allocation7 + $0x250] sm:$0xff] }
 0x89d   : > { %v3125_v29 = vpop.f32.mrf.mxu0  ;;  %10591 = vmatmul.mubr.msk.f32.vlgmr.msra.gmra.mxu1 %vm1241_vm1, %v3220_v27 }
 0x89e   : > { %v3221_v60 = vmul.f32 %v12151_v5, %v3125_v29  ;;  %10631 = vmatpush3.msra.mxu1 %v3553_v44 }
 0x89f   : > { %10632 = vmatprep.subr.mxu1 %v3552_v48  ;;  %v10570_v57 = vpop.f32.mrf.mxu0 }
 0x8a0   : > { %10633 = vmatpush3.msra.mxu1 %v3552_v48  ;;  %10593 = vmatprep.mubr.msk.f32.mxu1 %vm1241_vm1, %v3221_v60  ;;  %v3224_v5 = vmul.f32 %v12166_v19, %v10570_v57  ;;  %v3546_v19 = vld [vmem:[#allocation7 + $0x240] sm:$0xff] }
 0x8a1   : > { %10634 = vmatprep.subr.mxu1 %v3551_v51  ;;  %v3200_v58 = vpop.f32.mrf.mxu0  ;;  %10594 = vmatmul.mubr.msk.f32.gmra.mxu1 %vm1241_vm1, %v3222_v37 }
 0x8a2   : > { %v3223_v46 = vmul.f32 %v12142_v63, %v3200_v58  ;;  %10635 = vmatpush3.msra.mxu1 %v3551_v51 }
 0x8a3   : > { %10636 = vmatprep.subr.mxu1 %v3550_v59  ;;  %v10573_v62 = vpop.f32.mrf.mxu0 }
 0x8a4   : > { %10637 = vmatpush3.msra.mxu1 %v3550_v59  ;;  %10596 = vmatprep.mubr.msk.f32.mxu1 %vm1241_vm1, %v3223_v46  ;;  %v3226_v63 = vmul.f32 %v12180_v23, %v10573_v62  ;;  %v3496_v23 = vrot.slane %v3048_v10, %v12200_v33  ;;  %v3536_v46 = vrot.slane %v3048_v10, %v12216_v12 }
 0x8a5   : > { %10638 = vmatprep.subr.mxu1 %v3549_v28  ;;  %v3210_v21 = vpop.f32.mrf.mxu0  ;;  %10597 = vmatmul.mubr.msk.f32.gmra.mxu1 %vm1241_vm1, %v3224_v5 }
 0x8a6   : > { %v3225_v22 = vmul.f32 %v12161_v14, %v3210_v21  ;;  %10639 = vmatpush3.msra.mxu1 %v3549_v28 }
 0x8a7   : > { %10640 = vmatprep.subr.mxu1 %v3548_v2 }
 0x8a8   : > { %10641 = vmatpush3.msra.mxu1 %v3548_v2  ;;  %10599 = vmatprep.mubr.msk.f32.mxu1 %vm1241_vm1, %v3225_v22 }
 0x8a9   : > { %10642 = vmatprep.subr.mxu1 %v3547_v49  ;;  %10600 = vmatmul.mubr.msk.f32.gmra.mxu1 %vm1241_vm1, %v3226_v63 }
 0x8aa   : > { %10643 = vmatpush3.msra.mxu1 %v3547_v49 }
 0x8ab   : > { %10644 = vmatprep.subr.mxu1 %v3546_v19 }
 0x8ac   : > { %10645 = vmatpush3.msra.mxu1 %v3546_v19 }
 0x8ad   : > { %10672 = vmatprep.subr.mxu1 %v12719_v15 }
 0x8af   : > { %v10620_v53 = vpop.f32.mrf.mxu0 }
 0x8b1   : > { %v3446_v6 = vpop.f32.mrf.mxu0 }
 0x8b3   : > { %v10623_v14 = vpop.f32.mrf.mxu0 }
 0x8b5   : > { %v3456_v38 = vpop.f32.mrf.mxu0 }
 0x8b7   : > { %v10626_v20 = vpop.f32.mrf.mxu0 }
 0x8b9   : > { %v3466_v40 = vpop.f32.mrf.mxu0 }
 0x8bb   : > { %v10629_v59 = vpop.f32.mrf.mxu0 }
 0x95d   : > { %v10592_v35 = vpop.f32.mrf.mxu1 }
 0x95e   : > { %v3486_v24 = vadd.f32 %v10620_v53, %v10592_v35 }
 0x95f   : > { %v3317_v7 = vpop.f32.mrf.mxu1 }
 0x960   : > { %v3498_v8 = vadd.f32 %v3496_v23, %v3486_v24  ;;  %v3485_v9 = vadd.f32 %v3446_v6, %v3317_v7 }
 0x961   : > { %v10595_v52 = vpop.f32.mrf.mxu1 }
 0x962   : > { %v3506_v36 = vmul.f32 %v3498_v8, %v12195_v26  ;;  %v3497_v45 = vadd.f32 %v3496_v23, %v3485_v9  ;;  %v3488_v44 = vadd.f32 %v10623_v14, %v10595_v52  ;;  %v3476_v14 = vpop.f32.mrf.mxu0 }
 0x963   : > { %v3327_v1 = vpop.f32.mrf.mxu1 }
 0x964   : > { %v3514_v27 = vmax.f32 %v3506_v36, 0.0  ;;  %v3505_v50 = vmul.f32 %v3497_v45, %v12197_v30  ;;  %v3500_v48 = vadd.f32 %v3496_v23, %v3488_v44  ;;  %v3487_v29 = vadd.f32 %v3456_v38, %v3327_v1 }
 0x965   : > { %v10598_v60 = vpop.f32.mrf.mxu1 }
 0x966   : > { %v3513_v51 = vmax.f32 %v3505_v50, 0.0  ;;  %v3508_v37 = vmul.f32 %v3500_v48, %v12207_v47  ;;  %v3499_v57 = vadd.f32 %v3496_v23, %v3487_v29  ;;  %v3526_v58 = vmul.f32 %v3524_v0, %v3514_v27 }
 0x967   : > { %v3490_v28 = vadd.f32 %v10626_v20, %v10598_v60  ;;  %v3337_v5 = vpop.f32.mrf.mxu1 }
 0x968   : > { %v3525_v62 = vmul.f32 %v3524_v0, %v3513_v51  ;;  %v3516_v2 = vmax.f32 %v3508_v37, 0.0  ;;  %v3507_v21 = vmul.f32 %v3499_v57, %v12193_v25  ;;  %v3489_v49 = vadd.f32 %v3466_v40, %v3337_v5 }
 0x969   : > { %v3502_v22 = vadd.f32 %v3496_v23, %v3490_v28  ;;  %v10601_v63 = vpop.f32.mrf.mxu1  ;;  %v3538_v38 = vadd.f32 %v3536_v46, %v3526_v58 }
 0x96a   : > { %v3515_v19 = vmax.f32 %v3507_v21, 0.0  ;;  %v3492_v53 = vadd.f32 %v10629_v59, %v10601_v63  ;;  %v3537_v6 = vadd.f32 %v3536_v46, %v3525_v62  ;;  %v3528_v35 = vmul.f32 %v3524_v0, %v3516_v2 }
 0x96b   : > { %v3510_v24 = vmul.f32 %v3502_v22, %v12212_v56  ;;  %v3501_v7 = vadd.f32 %v3496_v23, %v3489_v49  ;;  %v3347_v8 = vpop.f32.mrf.mxu1  ;;  %v11792_v2 = vmov 0.0  }
 0x96c   : > { %v3527_v10 = vmul.f32 %v3524_v0, %v3515_v19  ;;  %v3504_v20 = vadd.f32 %v3496_v23, %v3492_v53  ;;  %v3491_v9 = vadd.f32 %v3476_v14, %v3347_v8  ;;  %10646 = vmatprep.mubr.msk.f32.mxu1 %vm1241_vm1, %v3537_v6  ;;  %v3540_v27 = vadd.f32 %v3536_v46, %v3528_v35 }
 0x96d   : > { %v3518_v52 = vmax.f32 %v3510_v24, 0.0  ;;  %v3509_v36 = vmul.f32 %v3501_v7, %v12222_v54  ;;  %10647 = vmatmul.mubr.msk.f32.vlgmr.msra.gmra.mxu1 %vm1241_vm1, %v3538_v38  ;;  %10686 = vmatprep.subr.mxu0 %v11792_v2 }
 0x96e   : > { %v3512_v45 = vmul.f32 %v3504_v20, %v12202_v34  ;;  %v3503_v44 = vadd.f32 %v3496_v23, %v3491_v9  ;;  %10673 = vmatpush3.msra.mxu1 %v12719_v15  ;;  %v3539_v40 = vadd.f32 %v3536_v46, %v3527_v10  ;;  %10694 = vmatprep.mubr.msk.f32.mxu0 %vm11793_vm3, %v11792_v2 }
 0x96f   : > { %v3517_v1 = vmax.f32 %v3509_v36, 0.0  ;;  %10674 = vmatprep.subr.mxu1 %v12711_v17  ;;  %v3530_v50 = vmul.f32 %v3524_v0, %v3518_v52 }
 0x970   : > { %v3520_v48 = vmax.f32 %v3512_v45, 0.0  ;;  %v3511_v29 = vmul.f32 %v3503_v44, %v12205_v42  ;;  %10675 = vmatpush3.msra.mxu1 %v12711_v17  ;;  %10649 = vmatprep.mubr.msk.f32.mxu1 %vm1241_vm1, %v3539_v40 }
 0x971   : > { %v3529_v60 = vmul.f32 %v3524_v0, %v3517_v1  ;;  %10676 = vmatprep.subr.mxu1 %v12702_v32  ;;  %10650 = vmatmul.mubr.msk.f32.gmra.mxu1 %vm1241_vm1, %v3540_v27  ;;  %v3542_v59 = vadd.f32 %v3536_v46, %v3530_v50 }
 0x972   : > { %v3519_v23 = vmax.f32 %v3511_v29, 0.0  ;;  %10677 = vmatpush3.msra.mxu1 %v12702_v32  ;;  %v3532_v37 = vmul.f32 %v3524_v0, %v3520_v48 }
 0x973   : > { %10678 = vmatprep.subr.mxu1 %v12686_v39  ;;  %v3541_v51 = vadd.f32 %v3536_v46, %v3529_v60 }
 0x974   : > { %v3531_v57 = vmul.f32 %v3524_v0, %v3519_v23  ;;  %10679 = vmatpush3.msra.mxu1 %v12686_v39  ;;  %v3544_v28 = vadd.f32 %v3536_v46, %v3532_v37  ;;  %v10668_v0 = vpop.f32.mrf.mxu0 }
 0x975   : > { %10652 = vmatprep.mubr.msk.f32.mxu1 %vm1241_vm1, %v3541_v51  ;;  %10697 = vmatprep.subr.mxu1 %v11792_v2  ;;  %v4101_v8 = vmul.f32 %v10668_v0, %v12672_v3 }
 0x976   : > { %10653 = vmatmul.mubr.msk.f32.gmra.mxu1 %vm1241_vm1, %v3542_v59  ;;  %v3543_v58 = vadd.f32 %v3536_v46, %v3531_v57  ;;  %v3964_v5 = vpop.f32.mrf.mxu0 }
 0x977   : > { %v4100_v14 = vmul.f32 %v3964_v5, %v12664_v61 }
 0x978   : > { %10655 = vmatprep.mubr.msk.f32.mxu1 %vm1241_vm1, %v3543_v58  ;;  %v10671_v62 = vpop.f32.mrf.mxu0 }
 0x979   : > { %v4108_v36 = vsel %vm3704_vm2, %v4100_v14, 0.0 }
 0x97a   : > { %10656 = vmatmul.mubr.msk.f32.gmra.mxu1 %vm1241_vm1, %v3544_v28  ;;  %v3974_v46 = vpop.f32.mrf.mxu0 }
 0x97b   : > { %10680 = vmatprep.mubr.msk.f32.mxu1 %vm426_vm0, %v12517_v11  ;;  %v12843_v11 = vpop.trf.xlu0  ;;  %v4102_v10 = vmul.f32 %v3974_v46, %v12682_v31 }
 0x97d   : > { %v4111_v40 = vsel %vm3704_vm2, %v4102_v10, 0.0 }
 0x97e   : > { %10681 = vmatmul.mubr.msk.f32.vlgmr.msra.gmra.mxu1 %vm426_vm0, %v12522_v18 }
 0x97f   : > { %10683 = vmatprep.mubr.msk.f32.mxu1 %vm426_vm0, %v12527_v41  ;;  %10698 = vmatpush3.msra.mxu1 %v10671_v62  ;;  %v9424_v41 = vld [vmem:[#allocation8 + $0x13] ss:$0 sm:$0xff] }
 0x980   : > { %10699 = vmatprep.subr.mxu1 %v11792_v2 }
 0x981   : > { %10700 = vmatpush3.msra.mxu1 %v3974_v46 }
 0x982   : > { %10684 = vmatmul.mubr.msk.f32.gmra.mxu1 %vm426_vm0, %v12532_v43  ;;  %10701 = vmatprep.subr.mxu1 %v11792_v2 }
 0x983   : > { %10702 = vmatpush3.msra.mxu1 %v10668_v0  ;;  %10705 = vmatprep.mubr.msk.f32.mxu1 %vm11793_vm3, %v11792_v2 }
 0x984   : > { %10703 = vmatprep.subr.mxu1 %v11792_v2 }
 0x985   : > { %10704 = vmatpush3.msra.mxu1 %v3964_v5 }
 0x986   : > { %10719 = vmatprep.subr.mxu1 %v11792_v2  ;;  %10706 = vmatmul.mubr.msk.f32.vlgmr.msra.gmra.mxu1 %vm426_vm0, %v12843_v11 }
 0x987   : > { %10727 = vmatprep.mubr.msk.f32.mxu1 %vm11793_vm3, %v11792_v2 }
 0xa2d   : > { %v10648_v18 = vpop.f32.mrf.mxu1 }
 0xa2e   : > { %v3689_v22 = vadd.f32 %v10648_v18, %v9424_v41 }
 0xa2f   : > { %v3645_v43 = vpop.f32.mrf.mxu1 }
 0xa30   : > { %v3688_v19 = vadd.f32 %v9424_v41, %v3645_v43  ;;  %v3697_v38 = vmax.f32 %v3689_v22, 0.0 }
 0xa31   : > { %v10651_v21 = vpop.f32.mrf.mxu1 }
 0xa32   : > { %v3691_v49 = vadd.f32 %v10651_v21, %v9424_v41  ;;  %v3696_v20 = vmax.f32 %v3688_v19, 0.0  ;;  %v3850_v45 = vmul.f32 %v3697_v38, %v12195_v26 }
 0xa33   : > { %v3655_v63 = vpop.f32.mrf.mxu1 }
 0xa34   : > { %v3699_v53 = vmax.f32 %v3691_v49, 0.0  ;;  %v3690_v6 = vadd.f32 %v9424_v41, %v3655_v63  ;;  %v3849_v48 = vmul.f32 %v3696_v20, %v12197_v30  ;;  %v4675_v20 = vld [vmem:[#allocation7 + $0x2e8] sm:$0xff] }
 0xa36   : > { %v3852_v35 = vmul.f32 %v3699_v53, %v12207_v47  ;;  %v3698_v24 = vmax.f32 %v3690_v6, 0.0  ;;  %v10654_v7 = vpop.f32.mrf.mxu1  ;;  %v4109_v47 = vsel %vm3704_vm2, %v4101_v8, 0.0  ;;  %v4677_v6 = vld [vmem:[#allocation7 + $0x2f8] sm:$0xff] }
 0xa37   : > { %v3693_v1 = vadd.f32 %v10654_v7, %v9424_v41  ;;  %v4110_v50 = vadd.f32 %v4109_v47, %v4108_v36  ;;  %v4676_v7 = vld [vmem:[#allocation7 + $0x2f0] sm:$0xff]  ;;  %v4674_v36 = vld [vmem:[#allocation7 + $0x2e0] sm:$0xff]  ;;  %v4671_v47 = vld [vmem:[#allocation7 + $0x2c8] sm:$0xff] }
 0xa38   : > { %v3851_v9 = vmul.f32 %v3698_v24, %v12193_v25  ;;  %v3665_v52 = vpop.f32.mrf.mxu1  ;;  %10687 = vmatpush3.msra.mxu0 %v3852_v35  ;;  %v4103_v25 = vmul.f32 %v10671_v62, %v12698_v16 }
 0xa39   : > { %10688 = vmatprep.subr.mxu0 %v11792_v2  ;;  %v3692_v60 = vadd.f32 %v9424_v41, %v3665_v52  ;;  %v4112_v51 = vadd.f32 %v4111_v40, %v4110_v50  ;;  %v3701_v57 = vmax.f32 %v3693_v1, 0.0  ;;  %v4670_v40 = vld [vmem:[#allocation7 + $0x2c0] sm:$0xff]  ;;  %v4668_v1 = vld [vmem:[#allocation7 + $0x2b8] sm:$0xff]  ;;  %v4666_v50 = vld [vmem:[#allocation7 + $0x2a8] sm:$0xff] }
 0xa3a   : > { %v10657_v44 = vpop.f32.mrf.mxu1  ;;  %10689 = vmatpush3.msra.mxu0 %v3851_v9  ;;  %v4113_v30 = vsel %vm3704_vm2, %v4103_v25, 0.0  ;;  %v4665_v25 = vld [vmem:[#allocation7 + $0x2a0] sm:$0xff] }
 0xa3b   : > { %v3695_v27 = vadd.f32 %v10657_v44, %v9424_v41  ;;  %10690 = vmatprep.subr.mxu0 %v11792_v2  ;;  %v3700_v0 = vmax.f32 %v3692_v60, 0.0  ;;  %v4114_v46 = vadd.f32 %v4113_v30, %v4112_v51  ;;  %v4672_v44 = vld [vmem:[#allocation7 + $0x2d0] sm:$0xff]  ;;  %v4662_v60 = vld [vmem:[#allocation7 + $0x288] sm:$0xff] }
 0xa3c   : > { %v3675_v29 = vpop.f32.mrf.mxu1  ;;  %10691 = vmatpush3.msra.mxu0 %v3850_v45  ;;  %v4673_v45 = vld [vmem:[#allocation7 + $0x2d8] sm:$0xff] }
 0xa3d   : > { %v3703_v23 = vmax.f32 %v3695_v27, 0.0  ;;  %v3694_v26 = vadd.f32 %v9424_v41, %v3675_v29  ;;  %10692 = vmatprep.subr.mxu0 %v11792_v2  ;;  %v3853_v21 = vmul.f32 %v3700_v0, %v12222_v54  ;;  %v4667_v27 = vld [vmem:[#allocation7 + $0x2b0] sm:$0xff] }
 0xa3e   : > { %v10682_v37 = vpop.f32.mrf.mxu1  ;;  %10693 = vmatpush3.msra.mxu0 %v3849_v48  ;;  %v4664_v48 = vld [vmem:[#allocation7 + $0x298] sm:$0xff]  ;;  %v4663_v29 = vld [vmem:[#allocation7 + $0x290] sm:$0xff] }
 0xa3f   : > { %v3856_v59 = vmul.f32 %v3703_v23, %v12202_v34  ;;  %v3702_v58 = vmax.f32 %v3694_v26, 0.0  ;;  %10695 = vmatmul.mubr.msk.f32.vlgmr.msra.gmra.mxu0 %vm426_vm0, %v12843_v11  ;;  %10708 = vmatprep.subr.mxu0 %v11792_v2  ;;  %v4105_v62 = vmul.f32 %v10682_v37, %v12702_v32  ;;  %v4661_v23 = vld [vmem:[#allocation7 + $0x280] sm:$0xff] }
 0xa40   : > { %v4049_v28 = vpop.f32.mrf.mxu1  ;;  %10709 = vmatpush3.msra.mxu0 %v12698_v16  ;;  %10716 = vmatprep.mubr.msk.f32.mxu0 %vm11793_vm3, %v11792_v2  ;;  %v3854_v16 = vmul.f32 %v3701_v57, %v12212_v56  ;;  %v4407_v56 = vpop.trf.xlu1 }
 0xa41   : > { %v3855_v5 = vmul.f32 %v3702_v58, %v12205_v42  ;;  %v4104_v34 = vmul.f32 %v4049_v28, %v12686_v39  ;;  %10720 = vmatpush3.msra.mxu1 %v3856_v59  ;;  %10710 = vmatprep.subr.mxu0 %v11792_v2  ;;  %v4117_v22 = vsel %vm3704_vm2, %v4105_v62, 0.0 }
 0xa42   : > { %v10685_v18 = vpop.f32.mrf.mxu1  ;;  %10721 = vmatprep.subr.mxu1 %v11792_v2  ;;  %10711 = vmatpush3.msra.mxu0 %v12682_v31 }
 0xa43   : > { %v4115_v41 = vsel %vm3704_vm2, %v4104_v34, 0.0  ;;  %10722 = vmatpush3.msra.mxu1 %v3855_v5  ;;  %10712 = vmatprep.subr.mxu0 %v11792_v2  ;;  %v4107_v49 = vmul.f32 %v10685_v18, %v12719_v15 }
 0xa44   : > { %v4116_v42 = vadd.f32 %v4115_v41, %v4114_v46  ;;  %v4059_v43 = vpop.f32.mrf.mxu1  ;;  %10723 = vmatprep.subr.mxu1 %v11792_v2  ;;  %10713 = vmatpush3.msra.mxu0 %v12672_v3  ;;  %v4678_v46 = vld [vmem:[#allocation8 + $0x14] sm:$0x7] }
 0xa45   : > { %v4106_v31 = vmul.f32 %v4059_v43, %v12711_v17  ;;  %10724 = vmatpush3.msra.mxu1 %v3854_v16  ;;  %10714 = vmatprep.subr.mxu0 %v11792_v2  ;;  %v4121_v3 = vsel %vm3704_vm2, %v4107_v49, 0.0  ;;  %v4994_v16 = vrot.slane %v4678_v46, %v12200_v33  ;;  %v5002_v49 = vrot.slane %v4678_v46, %v12210_v55 }
 0xa46   : > { %10725 = vmatprep.subr.mxu1 %v11792_v2  ;;  %10715 = vmatpush3.msra.mxu0 %v12664_v61  ;;  %v4118_v63 = vadd.f32 %v4117_v22, %v4116_v42 }
 0xa47   : > { %v4119_v19 = vsel %vm3704_vm2, %v4106_v31, 0.0  ;;  %10726 = vmatpush3.msra.mxu1 %v3853_v21  ;;  %10717 = vmatmul.mubr.msk.f32.vlgmr.msra.gmra.mxu0 %vm426_vm0, %v12843_v11 }
 0xa48   : > { %10730 = vmatprep.subr.mxu0 %v11792_v2  ;;  %10741 = vmatprep.subr.mxu1 %v11792_v2  ;;  %v4120_v54 = vadd.f32 %v4119_v19, %v4118_v63  ;;  %v5008_v63 = vrot.slane %v4678_v46, %v12216_v12 }
 0xa49   : > { %10728 = vmatmul.mubr.msk.f32.vlgmr.msra.gmra.mxu1 %vm426_vm0, %v4407_v56  ;;  %10731 = vmatpush3.msra.mxu0 %v10685_v18 }
 0xa4a   : > { %10742 = vmatpush3.msra.mxu1 %v12719_v15  ;;  %10732 = vmatprep.subr.mxu0 %v11792_v2  ;;  %v12902_v61 = vadd.f32 %v4121_v3, %v4120_v54 }
 0xa4b   : > { %10743 = vmatprep.subr.mxu1 %v11792_v2  ;;  %10733 = vmatpush3.msra.mxu0 %v4059_v43 }
 0xa4c   : > { %10744 = vmatpush3.msra.mxu1 %v12711_v17  ;;  %10734 = vmatprep.subr.mxu0 %v11792_v2 }
 0xa4d   : > { %10745 = vmatprep.subr.mxu1 %v11792_v2  ;;  %10735 = vmatpush3.msra.mxu0 %v10682_v37 }
 0xa4e   : > { %10746 = vmatpush3.msra.mxu1 %v12702_v32  ;;  %10736 = vmatprep.subr.mxu0 %v11792_v2  ;;  %v12924_v32 = vpop.f32.mrf.mxu1 }
 0xa4f   : > { %10747 = vmatprep.subr.mxu1 %v11792_v2  ;;  %10737 = vmatpush3.msra.mxu0 %v4049_v28  ;;  %v4648_v17 = vsel %vm3704_vm2, %v12924_v32, 0.0 }
 0xa50   : > { %10738 = vmatprep.mubr.msk.f32.mxu0 %vm11793_vm3, %v11792_v2  ;;  %10748 = vmatpush3.msra.mxu1 %v12686_v39  ;;  %v10707_v39 = vpop.f32.mrf.mxu1 }
 0xa51   : > { %10739 = vmatmul.mubr.msk.f32.vlgmr.msra.gmra.mxu0 %vm426_vm0, %v4407_v56  ;;  %10749 = vmatprep.mubr.msk.f32.mxu1 %vm11793_vm3, %v11792_v2 }
 0xa52   : > { %10750 = vmatmul.mubr.msk.f32.vlgmr.msra.gmra.mxu1 %vm426_vm0, %v4407_v56  ;;  %10752 = vmatprep.subr.mxu0 %v11792_v2 }
 0xa53   : > { %10754 = vmatprep.mubr.msk.f32.mxu0 %vm11793_vm3, %v11792_v2  ;;  %10757 = vmatprep.subr.mxu1 %v11792_v2 }
 0xa54   : > { %10759 = vmatprep.mubr.msk.f32.mxu1 %vm11793_vm3, %v11792_v2  ;;  %4649 = vadd.xlane.f32.xlu0 %v4648_v17 }
 0xadd   : > { %v4650_v26 = vpop.xlane.xlu0 %4649 }
 0xade   : > { %v4654_v51 = vmax.f32 %v4650_v26, 1.0 }
 0xae0   : > { %11537 = vrcp.f32 %v4654_v51  ;;  %v5029_v51 = vld [vmem:[#allocation8 + $0x17] sm:$0x7] }
 0xaed   : > { %v12954_v57 = vpop.eup %11537 }
 0xaff   : > { %v12928_v15 = vpop.f32.mrf.mxu0 }
 0xb00   : > { %10753 = vmatpush3.msra.mxu0 %v12928_v15 }
 0xb01   : > { %10755 = vmatmul.mubr.msk.f32.vlgmr.msra.gmra.mxu0 %vm3704_vm2, %v12924_v32  ;;  %v10696_v11 = vpop.f32.mrf.mxu0  ;;  %10762 = vmatprep.subr.mxu0 %v4668_v1 }
 0xb02   : > { %10763 = vmatpush3.msra.mxu0 %v4668_v1  ;;  %v5028_v11 = vld [vmem:[#allocation7 + $0x378] sm:$0xff]  ;;  %v5014_v1 = vld [vmem:[#allocation7 + $0x310] sm:$0xff] }
 0xb03   : > { %10764 = vmatprep.subr.mxu0 %v4667_v27 }
 0xb04   : > { %10765 = vmatpush3.msra.mxu0 %v4667_v27  ;;  %v5013_v27 = vld [vmem:[#allocation7 + $0x308] sm:$0xff] }
 0xb05   : > { %10766 = vmatprep.subr.mxu0 %v4666_v50 }
 0xb06   : > { %10767 = vmatpush3.msra.mxu0 %v4666_v50  ;;  %v5012_v50 = vld [vmem:[#allocation7 + $0x300] sm:$0xff] }
 0xb07   : > { %v12933_v53 = vpop.f32.mrf.mxu0  ;;  %10768 = vmatprep.subr.mxu0 %v4665_v25 }
 0xb08   : > { %10769 = vmatpush3.msra.mxu0 %v4665_v25 }
 0xb09   : > { %v10718_v14 = vpop.f32.mrf.mxu0  ;;  %v12935_v38 = vpop.f32.mrf.mxu1  ;;  %10770 = vmatprep.subr.mxu0 %v4664_v48 }
 0xb0a   : > { %10758 = vmatpush3.msra.mxu1 %v12935_v38  ;;  %10771 = vmatpush3.msra.mxu0 %v4664_v48  ;;  %v5027_v14 = vld [vmem:[#allocation7 + $0x370] sm:$0xff] }
 0xb0b   : > { %10781 = vmatprep.subr.mxu1 %v4677_v6  ;;  %v10729_v35 = vpop.f32.mrf.mxu1  ;;  %10772 = vmatprep.subr.mxu0 %v4663_v29 }
 0xb0c   : > { %10773 = vmatpush3.msra.mxu0 %v4663_v29  ;;  %v5019_v35 = vld [vmem:[#allocation7 + $0x338] sm:$0xff] }
 0xb0d   : > { %10774 = vmatprep.subr.mxu0 %v4662_v60 }
 0xb0e   : > { %10775 = vmatpush3.msra.mxu0 %v4662_v60 }
 0xb0f   : > { %10776 = vmatprep.subr.mxu0 %v4661_v23 }
 0xb10   : > { %10777 = vmatpush3.msra.mxu0 %v4661_v23 }
 0xb11   : > { %v12938_v24 = vpop.f32.mrf.mxu0  ;;  %10800 = vmatprep.subr.mxu0 %v11792_v2 }
 0xb12   : > { %10760 = vmatmul.mubr.msk.f32.vlgmr.msra.gmra.mxu1 %vm3704_vm2, %v12938_v24  ;;  %v12942_v8 = vpop.f32.mrf.mxu1  ;;  %v4651_v10 = vsel %vm3704_vm2, %v12938_v24, 0.0 }
 0xb13   : > { %10782 = vmatpush3.msra.mxu1 %v4677_v6  ;;  %10797 = vmatprep.mubr.msk.f32.mxu1 %vm1241_vm1, %v12928_v15  ;;  %v10740_v9 = vpop.f32.mrf.mxu0 }
 0xb14   : > { %10783 = vmatprep.subr.mxu1 %v4676_v7  ;;  %v10751_v52 = vpop.f32.mrf.mxu1  ;;  %4652 = vadd.xlane.f32.xlu1 %v4651_v10  ;;  %v5018_v10 = vld [vmem:[#allocation7 + $0x330] sm:$0xff]  ;;  %v5017_v9 = vld [vmem:[#allocation7 + $0x328] sm:$0xff] }
 0xb15   : > { %10784 = vmatpush3.msra.mxu1 %v4676_v7  ;;  %v5026_v7 = vld [vmem:[#allocation7 + $0x368] sm:$0xff]  ;;  %v5024_v52 = vld [vmem:[#allocation7 + $0x358] sm:$0xff] }
 0xb16   : > { %10785 = vmatprep.subr.mxu1 %v4675_v20 }
 0xb17   : > { %10786 = vmatpush3.msra.mxu1 %v4675_v20  ;;  %v5025_v20 = vld [vmem:[#allocation7 + $0x360] sm:$0xff] }
 0xb18   : > { %10787 = vmatprep.subr.mxu1 %v4674_v36 }
 0xb19   : > { %10788 = vmatpush3.msra.mxu1 %v4674_v36  ;;  %v5016_v36 = vld [vmem:[#allocation7 + $0x320] sm:$0xff] }
 0xb1a   : > { %10789 = vmatprep.subr.mxu1 %v4673_v45 }
 0xb1b   : > { %10790 = vmatpush3.msra.mxu1 %v4673_v45  ;;  %v5023_v45 = vld [vmem:[#allocation7 + $0x350] sm:$0xff] }
 0xb1c   : > { %10791 = vmatprep.subr.mxu1 %v4672_v44 }
 0xb1d   : > { %10792 = vmatpush3.msra.mxu1 %v4672_v44  ;;  %v5015_v44 = vld [vmem:[#allocation7 + $0x318] sm:$0xff] }
 0xb1e   : > { %10793 = vmatprep.subr.mxu1 %v4671_v47 }
 0xb1f   : > { %10794 = vmatpush3.msra.mxu1 %v4671_v47  ;;  %v5022_v47 = vld [vmem:[#allocation7 + $0x348] sm:$0xff] }
 0xb20   : > { %10795 = vmatprep.subr.mxu1 %v4670_v40 }
 0xb21   : > { %10796 = vmatpush3.msra.mxu1 %v4670_v40  ;;  %v5021_v40 = vld [vmem:[#allocation7 + $0x340] sm:$0xff] }
 0xb22   : > { %10798 = vmatmul.mubr.msk.f32.vlgmr.msra.gmra.mxu1 %vm1241_vm1, %v12935_v38  ;;  %10805 = vmatprep.subr.mxu1 %v11792_v2 }
 0xb23   : > { %10807 = vmatprep.mubr.msk.f32.mxu1 %vm11793_vm3, %v11792_v2 }
 0xb9d   : > { %v4653_v37 = vpop.xlane.xlu1 %4652 }
 0xb9e   : > { %v4655_v59 = vmax.f32 %v4653_v37, 1.0 }
 0xba0   : > { %11539 = vrcp.f32 %v4655_v59  ;;  %v5339_v59 = vrot.slane %v5029_v51, %v12200_v33 }
 0xbad   : > { %v12961_v0 = vpop.eup %11539 }
 0xbc1   : > { %v4748_v58 = vpop.f32.mrf.mxu0 }
 0xbc2   : > { %v12957_v30 = vmul.f32 %v12954_v57, %v4748_v58 }
 0xbc3   : > { %v10756_v28 = vpop.f32.mrf.mxu0 }
 0xbc4   : > { %10778 = vmatprep.mubr.msk.f32.mxu0 %vm1241_vm1, %v12957_v30 }
 0xbd2   : > { %v4821_v5 = vpop.f32.mrf.mxu1 }
 0xbd3   : > { %v12964_v62 = vmul.f32 %v12961_v0, %v4821_v5 }
 0xbd4   : > { %v10761_v34 = vpop.f32.mrf.mxu1 }
 0xbd5   : > { %10779 = vmatmul.mubr.msk.f32.vlgmr.msra.gmra.mxu0 %vm1241_vm1, %v12964_v62 }
 0xbd6   : > { %10802 = vmatprep.mubr.msk.f32.mxu0 %vm11793_vm3, %v11792_v2 }
 0xbe2   : > { %v10799_v18 = vpop.f32.mrf.mxu1 }
 0xbe4   : > { %v4980_v43 = vpop.f32.mrf.mxu1 }
 0xc95   : > { %v10780_v41 = vpop.f32.mrf.mxu0 }
 0xc96   : > { %v4990_v42 = vadd.f32 %v10799_v18, %v10780_v41  ;;  %v5347_v18 = vrot.slane %v5029_v51, %v12210_v55 }
 0xc97   : > { %v4899_v21 = vpop.f32.mrf.mxu0 }
 0xc98   : > { %v4996_v22 = vadd.f32 %v4994_v16, %v4990_v42  ;;  %v4989_v31 = vadd.f32 %v4980_v43, %v4899_v21  ;;  %v5353_v42 = vrot.slane %v5029_v51, %v12216_v12  ;;  %v5708_v51 = vld [vmem:[#allocation7 + $0x430] sm:$0xff] }
 0xc9a   : > { %v4998_v56 = vmax.f32 %v4996_v22, 0.0  ;;  %v4995_v19 = vadd.f32 %v4994_v16, %v4989_v31 }
 0xc9c   : > { %v5004_v54 = vmul.f32 %v5002_v49, %v4998_v56  ;;  %v4997_v3 = vmax.f32 %v4995_v19, 0.0  ;;  %v5373_v56 = vld [vmem:[#allocation7 + $0x3f8] sm:$0xff]  ;;  %v5372_v19 = vld [vmem:[#allocation7 + $0x3f0] sm:$0xff] }
 0xc9e   : > { %v5010_v39 = vadd.f32 %v5008_v63, %v5004_v54  ;;  %v5003_v17 = vmul.f32 %v5002_v49, %v4997_v3  ;;  %v5364_v54 = vld [vmem:[#allocation7 + $0x3b8] sm:$0xff]  ;;  %v5371_v3 = vld [vmem:[#allocation7 + $0x3e8] sm:$0xff] }
 0xca0   : > { %v5009_v6 = vadd.f32 %v5008_v63, %v5003_v17  ;;  %10806 = vmatpush3.msra.mxu1 %v5010_v39  ;;  %v5370_v17 = vld [vmem:[#allocation7 + $0x3e0] sm:$0xff] }
 0xca1   : > { %10808 = vmatmul.mubr.msk.f32.vlgmr.msra.gmra.mxu1 %vm3704_vm2, %v12938_v24  ;;  %10829 = vmatprep.subr.mxu1 %v5028_v11 }
 0xca2   : > { %10801 = vmatpush3.msra.mxu0 %v5009_v6  ;;  %10830 = vmatpush3.msra.mxu1 %v5028_v11  ;;  %v5362_v11 = vld [vmem:[#allocation7 + $0x3a8] sm:$0xff] }
 0xca3   : > { %10845 = vmatprep.mubr.msk.f32.mxu1 %vm1241_vm1, %v5009_v6  ;;  %10803 = vmatmul.mubr.msk.f32.vlgmr.msra.gmra.mxu0 %vm3704_vm2, %v12924_v32  ;;  %v5369_v6 = vld [vmem:[#allocation7 + $0x3d8] sm:$0xff] }
 0xca4   : > { %10831 = vmatprep.subr.mxu1 %v5027_v14  ;;  %10810 = vmatprep.subr.mxu0 %v5019_v35 }
 0xca5   : > { %10832 = vmatpush3.msra.mxu1 %v5027_v14  ;;  %10811 = vmatpush3.msra.mxu0 %v5019_v35  ;;  %v5361_v14 = vld [vmem:[#allocation7 + $0x3a0] sm:$0xff]  ;;  %v5368_v35 = vld [vmem:[#allocation7 + $0x3d0] sm:$0xff] }
 0xca6   : > { %10833 = vmatprep.subr.mxu1 %v5026_v7  ;;  %10812 = vmatprep.subr.mxu0 %v5018_v10 }
 0xca7   : > { %10834 = vmatpush3.msra.mxu1 %v5026_v7  ;;  %10813 = vmatpush3.msra.mxu0 %v5018_v10  ;;  %v5360_v7 = vld [vmem:[#allocation7 + $0x398] sm:$0xff]  ;;  %v5367_v10 = vld [vmem:[#allocation7 + $0x3c8] sm:$0xff] }
 0xca8   : > { %10835 = vmatprep.subr.mxu1 %v5025_v20  ;;  %10814 = vmatprep.subr.mxu0 %v5017_v9 }
 0xca9   : > { %10836 = vmatpush3.msra.mxu1 %v5025_v20  ;;  %10815 = vmatpush3.msra.mxu0 %v5017_v9  ;;  %v5366_v20 = vld [vmem:[#allocation7 + $0x3c0] sm:$0xff]  ;;  %v5808_v9 = vld [vmem:[#allocation7 + $0x478] sm:$0xff] }
 0xcaa   : > { %10837 = vmatprep.subr.mxu1 %v5024_v52  ;;  %10816 = vmatprep.subr.mxu0 %v5016_v36 }
 0xcab   : > { %10838 = vmatpush3.msra.mxu1 %v5024_v52  ;;  %10817 = vmatpush3.msra.mxu0 %v5016_v36  ;;  %v5807_v52 = vld [vmem:[#allocation7 + $0x470] sm:$0xff]  ;;  %v5806_v36 = vld [vmem:[#allocation7 + $0x468] sm:$0xff] }
 0xcac   : > { %10839 = vmatprep.subr.mxu1 %v5023_v45  ;;  %10818 = vmatprep.subr.mxu0 %v5015_v44 }
 0xcad   : > { %10840 = vmatpush3.msra.mxu1 %v5023_v45  ;;  %10819 = vmatpush3.msra.mxu0 %v5015_v44  ;;  %v5805_v45 = vld [vmem:[#allocation7 + $0x460] sm:$0xff]  ;;  %v5804_v44 = vld [vmem:[#allocation7 + $0x458] sm:$0xff] }
 0xcae   : > { %10841 = vmatprep.subr.mxu1 %v5022_v47  ;;  %10820 = vmatprep.subr.mxu0 %v5014_v1 }
 0xcaf   : > { %10842 = vmatpush3.msra.mxu1 %v5022_v47  ;;  %10821 = vmatpush3.msra.mxu0 %v5014_v1  ;;  %v5803_v47 = vld [vmem:[#allocation7 + $0x450] sm:$0xff]  ;;  %v5801_v1 = vld [vmem:[#allocation7 + $0x440] sm:$0xff] }
 0xcb0   : > { %10843 = vmatprep.subr.mxu1 %v5021_v40  ;;  %10822 = vmatprep.subr.mxu0 %v5013_v27 }
 0xcb1   : > { %10844 = vmatpush3.msra.mxu1 %v5021_v40  ;;  %10823 = vmatpush3.msra.mxu0 %v5013_v27  ;;  %v5802_v40 = vld [vmem:[#allocation7 + $0x448] sm:$0xff] }
 0xcb2   : > { %10846 = vmatmul.mubr.msk.f32.vlgmr.msra.gmra.mxu1 %vm1241_vm1, %v5010_v39  ;;  %10853 = vmatprep.subr.mxu1 %v11792_v2  ;;  %v5363_v39 = vld [vmem:[#allocation7 + $0x3b0] sm:$0xff]  ;;  %v5358_v27 = vld [vmem:[#allocation7 + $0x388] sm:$0xff] }
 0xcb3   : > { %10855 = vmatprep.mubr.msk.f32.mxu1 %vm11793_vm3, %v11792_v2  ;;  %10824 = vmatprep.subr.mxu0 %v5012_v50 }
 0xcb4   : > { %10825 = vmatpush3.msra.mxu0 %v5012_v50  ;;  %v5357_v50 = vld [vmem:[#allocation7 + $0x380] sm:$0xff] }
 0xcb5   : > { %10848 = vmatprep.subr.mxu0 %v11792_v2 }
 0xd61   : > { %v5166_v25 = vpop.f32.mrf.mxu1 }
 0xd62   : > { %v5171_v23 = vmul.f32 %v12961_v0, %v5166_v25  ;;  %v5709_v25 = vld [vmem:[#allocation7 + $0x438] sm:$0xff] }
 0xd63   : > { %v5096_v48 = vpop.f32.mrf.mxu0  ;;  %v10809_v29 = vpop.f32.mrf.mxu1 }
 0xd64   : > { %v5170_v60 = vmul.f32 %v12954_v57, %v5096_v48 }
 0xd65   : > { %v10804_v26 = vpop.f32.mrf.mxu0 }
 0xd66   : > { %10826 = vmatprep.mubr.msk.f32.mxu0 %vm1241_vm1, %v5170_v60 }
 0xd67   : > { %10827 = vmatmul.mubr.msk.f32.vlgmr.msra.gmra.mxu0 %vm1241_vm1, %v5171_v23 }
 0xd68   : > { %10850 = vmatprep.mubr.msk.f32.mxu0 %vm11793_vm3, %v11792_v2 }
 0xd72   : > { %v10847_v37 = vpop.f32.mrf.mxu1 }
 0xd74   : > { %v5325_v5 = vpop.f32.mrf.mxu1 }
 0xe27   : > { %v10828_v58 = vpop.f32.mrf.mxu0 }
 0xe28   : > { %v5335_v28 = vadd.f32 %v10847_v37, %v10828_v58  ;;  %v5707_v37 = vld [vmem:[#allocation7 + $0x428] sm:$0xff]  ;;  %v5705_v58 = vld [vmem:[#allocation7 + $0x418] sm:$0xff] }
 0xe29   : > { %v5244_v34 = vpop.f32.mrf.mxu0 }
 0xe2a   : > { %v5341_v46 = vadd.f32 %v5339_v59, %v5335_v28  ;;  %v5334_v16 = vadd.f32 %v5325_v5, %v5244_v34  ;;  %v5704_v28 = vld [vmem:[#allocation7 + $0x410] sm:$0xff]  ;;  %v5703_v5 = vld [vmem:[#allocation7 + $0x408] sm:$0xff]  ;;  %v5702_v34 = vld [vmem:[#allocation7 + $0x400] sm:$0xff] }
 0xe2c   : > { %v5343_v41 = vmax.f32 %v5341_v46, 0.0  ;;  %v5340_v43 = vadd.f32 %v5339_v59, %v5334_v16  ;;  %v5706_v59 = vld [vmem:[#allocation7 + $0x420] sm:$0xff]  ;;  %v5817_v46 = vld [vmem:[#allocation7 + $0x4b8] sm:$0xff] }
 0xe2e   : > { %v5349_v21 = vmul.f32 %v5347_v18, %v5343_v41  ;;  %v5342_v22 = vmax.f32 %v5340_v43, 0.0 }
 0xe30   : > { %v5355_v49 = vadd.f32 %v5353_v42, %v5349_v21  ;;  %v5348_v31 = vmul.f32 %v5347_v18, %v5342_v22  ;;  %v5374_v18 = vld [vmem:[#allocation8 + $0x1a] sm:$0x7] }
 0xe31   : > { %v5684_v41 = vrot.slane %v5374_v18, %v12200_v33 }
 0xe32   : > { %v5354_v63 = vadd.f32 %v5353_v42, %v5348_v31  ;;  %10854 = vmatpush3.msra.mxu1 %v5355_v49 }
 0xe33   : > { %10856 = vmatmul.mubr.msk.f32.vlgmr.msra.gmra.mxu1 %vm3704_vm2, %v12938_v24  ;;  %10877 = vmatprep.subr.mxu1 %v5373_v56 }
 0xe34   : > { %10849 = vmatpush3.msra.mxu0 %v5354_v63  ;;  %10878 = vmatpush3.msra.mxu1 %v5373_v56  ;;  %v5692_v56 = vrot.slane %v5374_v18, %v12210_v55 }
 0xe35   : > { %10893 = vmatprep.mubr.msk.f32.mxu1 %vm1241_vm1, %v5354_v63  ;;  %10851 = vmatmul.mubr.msk.f32.vlgmr.msra.gmra.mxu0 %vm3704_vm2, %v12924_v32 }
 0xe36   : > { %10879 = vmatprep.subr.mxu1 %v5372_v19  ;;  %10858 = vmatprep.subr.mxu0 %v5364_v54 }
 0xe37   : > { %10880 = vmatpush3.msra.mxu1 %v5372_v19  ;;  %10859 = vmatpush3.msra.mxu0 %v5364_v54 }
 0xe38   : > { %10881 = vmatprep.subr.mxu1 %v5371_v3  ;;  %10860 = vmatprep.subr.mxu0 %v5363_v39 }
 0xe39   : > { %10882 = vmatpush3.msra.mxu1 %v5371_v3  ;;  %10861 = vmatpush3.msra.mxu0 %v5363_v39  ;;  %v5698_v39 = vrot.slane %v5374_v18, %v12216_v12 }
 0xe3a   : > { %10883 = vmatprep.subr.mxu1 %v5370_v17  ;;  %10862 = vmatprep.subr.mxu0 %v5362_v11 }
 0xe3b   : > { %10884 = vmatpush3.msra.mxu1 %v5370_v17  ;;  %10863 = vmatpush3.msra.mxu0 %v5362_v11 }
 0xe3c   : > { %10885 = vmatprep.subr.mxu1 %v5369_v6  ;;  %10864 = vmatprep.subr.mxu0 %v5361_v14 }
 0xe3d   : > { %10886 = vmatpush3.msra.mxu1 %v5369_v6  ;;  %10865 = vmatpush3.msra.mxu0 %v5361_v14  ;;  %v5816_v14 = vld [vmem:[#allocation7 + $0x4b0] sm:$0xff] }
 0xe3e   : > { %10887 = vmatprep.subr.mxu1 %v5368_v35  ;;  %10866 = vmatprep.subr.mxu0 %v5360_v7 }
 0xe3f   : > { %10888 = vmatpush3.msra.mxu1 %v5368_v35  ;;  %10867 = vmatpush3.msra.mxu0 %v5360_v7  ;;  %v5815_v35 = vld [vmem:[#allocation7 + $0x4a8] sm:$0xff]  ;;  %v5814_v7 = vld [vmem:[#allocation7 + $0x4a0] sm:$0xff] }
 0xe40   : > { %10889 = vmatprep.subr.mxu1 %v5367_v10 }
 0xe41   : > { %10890 = vmatpush3.msra.mxu1 %v5367_v10  ;;  %v5813_v10 = vld [vmem:[#allocation7 + $0x498] sm:$0xff] }
 0xe42   : > { %10891 = vmatprep.subr.mxu1 %v5366_v20 }
 0xe43   : > { %10892 = vmatpush3.msra.mxu1 %v5366_v20  ;;  %v5812_v20 = vld [vmem:[#allocation7 + $0x490] sm:$0xff] }
 0xe44   : > { %10894 = vmatmul.mubr.msk.f32.vlgmr.msra.gmra.mxu1 %vm1241_vm1, %v5355_v49  ;;  %10915 = vmatprep.subr.mxu1 %v5808_v9 }
 0xe45   : > { %10916 = vmatpush3.msra.mxu1 %v5808_v9  ;;  %10931 = vmatprep.mubr.msk.f32.mxu1 %vm1241_vm1, %v12957_v30  ;;  %v5359_v30 = vld [vmem:[#allocation7 + $0x390] sm:$0xff]  ;;  %v5811_v9 = vld [vmem:[#allocation7 + $0x488] sm:$0xff] }
 0xe46   : > { %10917 = vmatprep.subr.mxu1 %v5807_v52  ;;  %10868 = vmatprep.subr.mxu0 %v5359_v30 }
 0xe47   : > { %10918 = vmatpush3.msra.mxu1 %v5807_v52  ;;  %10869 = vmatpush3.msra.mxu0 %v5359_v30  ;;  %v5810_v52 = vld [vmem:[#allocation7 + $0x480] sm:$0xff]  ;;  %v9459_v30 = vld [vmem:[#allocation8 + $0x1d] ss:$0 sm:$0xff] }
 0xe48   : > { %10919 = vmatprep.subr.mxu1 %v5806_v36  ;;  %10870 = vmatprep.subr.mxu0 %v5358_v27 }
 0xe49   : > { %10920 = vmatpush3.msra.mxu1 %v5806_v36  ;;  %10871 = vmatpush3.msra.mxu0 %v5358_v27  ;;  %v6007_v36 = vld [vmem:[#allocation7 + $0x530] sm:$0xff] }
 0xe4a   : > { %10921 = vmatprep.subr.mxu1 %v5805_v45  ;;  %10872 = vmatprep.subr.mxu0 %v5357_v50 }
 0xe4b   : > { %10922 = vmatpush3.msra.mxu1 %v5805_v45  ;;  %10873 = vmatpush3.msra.mxu0 %v5357_v50  ;;  %v6006_v45 = vld [vmem:[#allocation7 + $0x528] sm:$0xff] }
 0xe4c   : > { %10923 = vmatprep.subr.mxu1 %v5804_v44  ;;  %10896 = vmatprep.subr.mxu0 %v5709_v25 }
 0xe4d   : > { %10924 = vmatpush3.msra.mxu1 %v5804_v44  ;;  %v6005_v44 = vld [vmem:[#allocation7 + $0x520] sm:$0xff] }
 0xe4e   : > { %10925 = vmatprep.subr.mxu1 %v5803_v47 }
 0xe4f   : > { %10926 = vmatpush3.msra.mxu1 %v5803_v47  ;;  %v6004_v47 = vld [vmem:[#allocation7 + $0x518] sm:$0xff] }
 0xe50   : > { %10927 = vmatprep.subr.mxu1 %v5802_v40 }
 0xe51   : > { %10928 = vmatpush3.msra.mxu1 %v5802_v40  ;;  %v6003_v40 = vld [vmem:[#allocation7 + $0x510] sm:$0xff] }
 0xe52   : > { %10929 = vmatprep.subr.mxu1 %v5801_v1 }
 0xe53   : > { %10930 = vmatpush3.msra.mxu1 %v5801_v1  ;;  %v6002_v1 = vld [vmem:[#allocation7 + $0x508] sm:$0xff] }
 0xe54   : > { %10932 = vmatmul.mubr.msk.f32.vlgmr.msra.gmra.mxu1 %vm1241_vm1, %v12964_v62  ;;  %10953 = vmatprep.subr.mxu1 %v11792_v2 }
 0xe55   : > { %10955 = vmatprep.mubr.msk.f32.mxu1 %vm11793_vm3, %v11792_v2 }
 0xef3   : > { %v5511_v48 = vpop.f32.mrf.mxu1 }
 0xef4   : > { %v5516_v23 = vmul.f32 %v12961_v0, %v5511_v48 }
 0xef5   : > { %v5441_v29 = vpop.f32.mrf.mxu0  ;;  %v10857_v60 = vpop.f32.mrf.mxu1 }
 0xef6   : > { %v5515_v62 = vmul.f32 %v12954_v57, %v5441_v29 }
 0xef7   : > { %v10852_v26 = vpop.f32.mrf.mxu0 }
 0xef8   : > { %10874 = vmatprep.mubr.msk.f32.mxu0 %vm1241_vm1, %v5515_v62  ;;  %v5818_v26 = vld [vmem:[#allocation8 + $0x1e] sm:$0x7] }
 0xef9   : > { %10875 = vmatmul.mubr.msk.f32.vlgmr.msra.gmra.mxu0 %vm1241_vm1, %v5516_v23 }
 0xefa   : > { %10897 = vmatpush3.msra.mxu0 %v5709_v25 }
 0xefb   : > { %10898 = vmatprep.subr.mxu0 %v5708_v51 }
 0xefc   : > { %10899 = vmatpush3.msra.mxu0 %v5708_v51 }
 0xefd   : > { %10900 = vmatprep.subr.mxu0 %v5707_v37 }
 0xefe   : > { %10901 = vmatpush3.msra.mxu0 %v5707_v37  ;;  %v5974_v37 = vrot.slane %v5818_v26, %v12200_v33 }
 0xeff   : > { %10902 = vmatprep.subr.mxu0 %v5706_v59 }
 0xf00   : > { %10903 = vmatpush3.msra.mxu0 %v5706_v59 }
 0xf01   : > { %10904 = vmatprep.subr.mxu0 %v5705_v58 }
 0xf02   : > { %10905 = vmatpush3.msra.mxu0 %v5705_v58 }
 0xf03   : > { %10906 = vmatprep.subr.mxu0 %v5704_v28 }
 0xf04   : > { %10907 = vmatpush3.msra.mxu0 %v5704_v28  ;;  %v10895_v16 = vpop.f32.mrf.mxu1 }
 0xf05   : > { %10908 = vmatprep.subr.mxu0 %v5703_v5 }
 0xf06   : > { %10909 = vmatpush3.msra.mxu0 %v5703_v5  ;;  %v5670_v21 = vpop.f32.mrf.mxu1 }
 0xf07   : > { %10910 = vmatprep.subr.mxu0 %v5702_v34 }
 0xf08   : > { %10911 = vmatpush3.msra.mxu0 %v5702_v34 }
 0xf09   : > { %10934 = vmatprep.subr.mxu0 %v5817_v46 }
 0xf14   : > { %v10933_v51 = vpop.f32.mrf.mxu1 }
 0xf16   : > { %v5885_v28 = vpop.f32.mrf.mxu1 }
 0xfb9   : > { %v10876_v42 = vpop.f32.mrf.mxu0 }
 0xfba   : > { %v5680_v43 = vadd.f32 %v10895_v16, %v10876_v42  ;;  %v5982_v16 = vrot.slane %v5818_v26, %v12210_v55 }
 0xfbb   : > { %v5589_v22 = vpop.f32.mrf.mxu0 }
 0xfbc   : > { %v5686_v49 = vadd.f32 %v5684_v41, %v5680_v43  ;;  %v5679_v31 = vadd.f32 %v5670_v21, %v5589_v22  ;;  %v5988_v21 = vrot.slane %v5818_v26, %v12216_v12  ;;  %v6341_v26 = vld [vmem:[#allocation7 + $0x560] sm:$0xff] }
 0xfbe   : > { %v5688_v63 = vmax.f32 %v5686_v49, 0.0  ;;  %v5685_v19 = vadd.f32 %v5684_v41, %v5679_v31 }
 0xfc0   : > { %v5687_v54 = vmax.f32 %v5685_v19, 0.0  ;;  %v5694_v3 = vmul.f32 %v5692_v56, %v5688_v63  ;;  %v5998_v63 = vld [vmem:[#allocation7 + $0x4f0] sm:$0xff]  ;;  %v5997_v19 = vld [vmem:[#allocation7 + $0x4e8] sm:$0xff] }
 0xfc2   : > { %v5693_v17 = vmul.f32 %v5692_v56, %v5687_v54  ;;  %v5700_v6 = vadd.f32 %v5698_v39, %v5694_v3  ;;  %v5999_v56 = vld [vmem:[#allocation7 + $0x4f8] sm:$0xff]  ;;  %v5996_v54 = vld [vmem:[#allocation7 + $0x4e0] sm:$0xff] }
 0xfc3   : > { %v5995_v3 = vld [vmem:[#allocation7 + $0x4d8] sm:$0xff] }
 0xfc4   : > { %v5699_v11 = vadd.f32 %v5698_v39, %v5693_v17  ;;  %v5994_v39 = vld [vmem:[#allocation7 + $0x4d0] sm:$0xff]  ;;  %v5993_v17 = vld [vmem:[#allocation7 + $0x4c8] sm:$0xff] }
 0xfc6   : > { %10912 = vmatprep.mubr.msk.f32.mxu0 %vm1241_vm1, %v5699_v11  ;;  %v5992_v11 = vld [vmem:[#allocation7 + $0x4c0] sm:$0xff] }
 0xfc7   : > { %10913 = vmatmul.mubr.msk.f32.vlgmr.msra.gmra.mxu0 %vm1241_vm1, %v5700_v6 }
 0xfc8   : > { %10935 = vmatpush3.msra.mxu0 %v5817_v46  ;;  %10950 = vmatprep.mubr.msk.f32.mxu0 %vm1241_vm1, %v12928_v15  ;;  %v6008_v15 = vld [vmem:[#allocation7 + $0x538] sm:$0xff] }
 0xfc9   : > { %10936 = vmatprep.subr.mxu0 %v5816_v14 }
 0xfca   : > { %10937 = vmatpush3.msra.mxu0 %v5816_v14 }
 0xfcb   : > { %10938 = vmatprep.subr.mxu0 %v5815_v35 }
 0xfcc   : > { %10939 = vmatpush3.msra.mxu0 %v5815_v35 }
 0xfcd   : > { %10940 = vmatprep.subr.mxu0 %v5814_v7 }
 0xfce   : > { %10941 = vmatpush3.msra.mxu0 %v5814_v7 }
 0xfcf   : > { %10942 = vmatprep.subr.mxu0 %v5813_v10 }
 0xfd0   : > { %10943 = vmatpush3.msra.mxu0 %v5813_v10 }
 0xfd1   : > { %10944 = vmatprep.subr.mxu0 %v5812_v20 }
 0xfd2   : > { %10945 = vmatpush3.msra.mxu0 %v5812_v20 }
 0xfd3   : > { %10946 = vmatprep.subr.mxu0 %v5811_v9 }
 0xfd4   : > { %10947 = vmatpush3.msra.mxu0 %v5811_v9 }
 0xfd5   : > { %10948 = vmatprep.subr.mxu0 %v5810_v52 }
 0xfd6   : > { %10949 = vmatpush3.msra.mxu0 %v5810_v52 }
 0xfd7   : > { %10951 = vmatmul.mubr.msk.f32.vlgmr.msra.gmra.mxu0 %vm1241_vm1, %v12935_v38  ;;  %10982 = vmatprep.subr.mxu0 %v6008_v15  ;;  %v6001_v38 = vld [vmem:[#allocation7 + $0x500] sm:$0xff] }
 0xfd8   : > { %10983 = vmatpush3.msra.mxu0 %v6008_v15 }
 0xfd9   : > { %10984 = vmatprep.subr.mxu0 %v6007_v36 }
 0xfda   : > { %10985 = vmatpush3.msra.mxu0 %v6007_v36 }
 0xfdb   : > { %10986 = vmatprep.subr.mxu0 %v6006_v45 }
 0xfdc   : > { %10987 = vmatpush3.msra.mxu0 %v6006_v45 }
 0xfdd   : > { %10988 = vmatprep.subr.mxu0 %v6005_v44 }
 0xfde   : > { %10989 = vmatpush3.msra.mxu0 %v6005_v44 }
 0xfdf   : > { %10990 = vmatprep.subr.mxu0 %v6004_v47 }
 0xfe0   : > { %10991 = vmatpush3.msra.mxu0 %v6004_v47 }
 0xfe1   : > { %10992 = vmatprep.subr.mxu0 %v6003_v40 }
 0xfe2   : > { %10993 = vmatpush3.msra.mxu0 %v6003_v40 }
 0xfe3   : > { %10994 = vmatprep.subr.mxu0 %v6002_v1 }
 0xfe4   : > { %10995 = vmatpush3.msra.mxu0 %v6002_v1 }
 0xfe5   : > { %10996 = vmatprep.subr.mxu0 %v6001_v38 }
 0xfe6   : > { %10997 = vmatpush3.msra.mxu0 %v6001_v38 }
0x1087   : > { %v10914_v27 = vpop.f32.mrf.mxu0 }
0x1088   : > { %v13018_v50 = vadd.f32 %v10914_v27, %v9459_v30 }
0x1089   : > { %v5783_v25 = vpop.f32.mrf.mxu0 }
0x108a   : > { %v5799_v48 = vmax.f32 %v13018_v50, 0.0  ;;  %v5796_v29 = vadd.f32 %v9459_v30, %v5783_v25 }
0x108c   : > { %v5798_v60 = vmax.f32 %v5796_v29, 0.0  ;;  %v6685_v62 = vsel %vm6681_vm4, %v5799_v48, -inf }
0x108d   : > { %6686 = vmax.xlane.f32.xlu1 %v6685_v62  ;;  %v6343_v62 = vld [vmem:[#allocation7 + $0x570] sm:$0xff] }
0x108e   : > { %v6682_v23 = vsel %vm6681_vm4, %v5798_v60, -inf }
0x108f   : > { %6683 = vmax.xlane.f32.xlu0 %v6682_v23  ;;  %v6342_v23 = vld [vmem:[#allocation7 + $0x568] sm:$0xff] }
0x1097   : > { %v10952_v59 = vpop.f32.mrf.mxu0 }
0x1098   : > { %v5970_v58 = vadd.f32 %v10952_v59, %v10933_v51  ;;  %v6340_v51 = vld [vmem:[#allocation7 + $0x558] sm:$0xff] }
0x1099   : > { %v5960_v5 = vpop.f32.mrf.mxu0 }
0x109a   : > { %v5976_v34 = vadd.f32 %v5974_v37, %v5970_v58  ;;  %v5969_v46 = vadd.f32 %v5960_v5, %v5885_v28 }
0x109c   : > { %v5978_v18 = vmax.f32 %v5976_v34, 0.0  ;;  %v5975_v41 = vadd.f32 %v5974_v37, %v5969_v46  ;;  %v6009_v37 = vld [vmem:[#allocation8 + $0x21] sm:$0x7] }
0x109d   : > { %v6319_v58 = vrot.slane %v6009_v37, %v12200_v33 }
0x109e   : > { %v5977_v42 = vmax.f32 %v5975_v41, 0.0  ;;  %v5984_v43 = vmul.f32 %v5982_v16, %v5978_v18 }
0x10a0   : > { %v5983_v22 = vmul.f32 %v5982_v16, %v5977_v42  ;;  %v5990_v31 = vadd.f32 %v5988_v21, %v5984_v43  ;;  %v6327_v42 = vrot.slane %v6009_v37, %v12210_v55 }
0x10a2   : > { %v5989_v49 = vadd.f32 %v5988_v21, %v5983_v22 }
0x10a4   : > { %10954 = vmatpush3.msra.mxu1 %v5989_v49  ;;  %10998 = vmatprep.mubr.msk.f32.mxu0 %vm1241_vm1, %v5989_v49  ;;  %v6333_v49 = vrot.slane %v6009_v37, %v12216_v12 }
0x10a5   : > { %10956 = vmatmul.mubr.msk.f32.vlgmr.msra.gmra.mxu1 %vm3704_vm2, %v12924_v32  ;;  %10958 = vmatprep.subr.mxu1 %v11792_v2 }
0x10a6   : > { %10999 = vmatmul.mubr.msk.f32.vlgmr.msra.gmra.mxu0 %vm1241_vm1, %v5990_v31  ;;  %10959 = vmatpush3.msra.mxu1 %v5990_v31 }
0x10a7   : > { %10960 = vmatprep.mubr.msk.f32.mxu1 %vm11793_vm3, %v11792_v2  ;;  %10963 = vmatprep.subr.mxu1 %v5999_v56 }
0x10a9   : > { %10961 = vmatmul.mubr.msk.f32.vlgmr.msra.gmra.mxu1 %vm3704_vm2, %v12938_v24 }
0x10aa   : > { %10964 = vmatpush3.msra.mxu1 %v5999_v56 }
0x10ab   : > { %10965 = vmatprep.subr.mxu1 %v5998_v63 }
0x10ac   : > { %10966 = vmatpush3.msra.mxu1 %v5998_v63 }
0x10ad   : > { %10967 = vmatprep.subr.mxu1 %v5997_v19 }
0x10ae   : > { %10968 = vmatpush3.msra.mxu1 %v5997_v19  ;;  %v6353_v19 = vld [vmem:[#allocation7 + $0x5b8] sm:$0xff] }
0x10af   : > { %10969 = vmatprep.subr.mxu1 %v5996_v54 }
0x10b0   : > { %10970 = vmatpush3.msra.mxu1 %v5996_v54  ;;  %v6352_v54 = vld [vmem:[#allocation7 + $0x5b0] sm:$0xff] }
0x10b1   : > { %10971 = vmatprep.subr.mxu1 %v5995_v3 }
0x10b2   : > { %10972 = vmatpush3.msra.mxu1 %v5995_v3  ;;  %v6351_v3 = vld [vmem:[#allocation7 + $0x5a8] sm:$0xff] }
0x10b3   : > { %10973 = vmatprep.subr.mxu1 %v5994_v39 }
0x10b4   : > { %10974 = vmatpush3.msra.mxu1 %v5994_v39  ;;  %v6350_v39 = vld [vmem:[#allocation7 + $0x5a0] sm:$0xff] }
0x10b5   : > { %10975 = vmatprep.subr.mxu1 %v5993_v17 }
0x10b6   : > { %10976 = vmatpush3.msra.mxu1 %v5993_v17  ;;  %v6349_v17 = vld [vmem:[#allocation7 + $0x598] sm:$0xff] }
0x10b7   : > { %10977 = vmatprep.subr.mxu1 %v5992_v11 }
0x10b8   : > { %10978 = vmatpush3.msra.mxu1 %v5992_v11  ;;  %v6348_v11 = vld [vmem:[#allocation7 + $0x590] sm:$0xff] }
0x10b9   : > { %11001 = vmatprep.subr.mxu1 %v11792_v2 }
0x1116   : > { %v6687_v6 = vpop.xlane.xlu1 %6686 }
0x1117   : > { %v13036_v14 = vsub.f32 %v5799_v48, %v6687_v6  ;;  %v6347_v6 = vld [vmem:[#allocation7 + $0x588] sm:$0xff] }
0x1118   : > { %v6684_v35 = vpop.xlane.xlu0 %6683 }
0x1119   : > { %v6692_v7 = vmul.f32 1.442695, %v13036_v14  ;;  %v13039_v10 = vsub.f32 %v5798_v60, %v6684_v35  ;;  %v6344_v60 = vld [vmem:[#allocation7 + $0x578] sm:$0xff]  ;;  %v6346_v35 = vld [vmem:[#allocation7 + $0x580] sm:$0xff] }
0x111a   : > { %11011 = vmatprep.subr.mxu0 %v6344_v60 }
0x111b   : > { %11541 = vpow2.f32 %v6692_v7  ;;  %v6690_v20 = vmul.f32 1.442695, %v13039_v10  ;;  %11012 = vmatpush3.msra.mxu0 %v6344_v60  ;;  %v6339_v7 = vld [vmem:[#allocation7 + $0x550] sm:$0xff] }
0x111c   : > { %11013 = vmatprep.subr.mxu0 %v6343_v62 }
0x111d   : > { %11543 = vpow2.f32 %v6690_v20  ;;  %11014 = vmatpush3.msra.mxu0 %v6343_v62  ;;  %v6338_v20 = vld [vmem:[#allocation7 + $0x548] sm:$0xff] }
0x111e   : > { %11015 = vmatprep.subr.mxu0 %v6342_v23 }
0x111f   : > { %11016 = vmatpush3.msra.mxu0 %v6342_v23 }
0x1120   : > { %11017 = vmatprep.subr.mxu0 %v6341_v26 }
0x1121   : > { %11018 = vmatpush3.msra.mxu0 %v6341_v26 }
0x1122   : > { %11019 = vmatprep.subr.mxu0 %v6340_v51 }
0x1123   : > { %11020 = vmatpush3.msra.mxu0 %v6340_v51 }
0x1124   : > { %11021 = vmatprep.subr.mxu0 %v6339_v7 }
0x1125   : > { %11022 = vmatpush3.msra.mxu0 %v6339_v7  ;;  %v13603_v7 = vld [vmem:[#allocation21_spill] sm:$0xff] }
0x1126   : > { %11023 = vmatprep.subr.mxu0 %v6338_v20 }
0x1127   : > { %11024 = vmatpush3.msra.mxu0 %v6338_v20  ;;  %v13604_v20 = vld [vmem:[#allocation32_spill] sm:$0xff] }
0x1128   : > { %v11542_v9 = vpop.eup %11541 }
0x1129   : > { %v6697_v52 = vsel %vm6681_vm4, %v11542_v9, 0.0 }
0x112a   : > { %v11544_v15 = vpop.eup %11543  ;;  %6698 = vadd.xlane.f32.xlu1 %v6697_v52 }
0x112b   : > { %v6694_v36 = vsel %vm6681_vm4, %v11544_v15, 0.0 }
0x112c   : > { %6695 = vadd.xlane.f32.xlu0 %v6694_v36 }
0x1165   : > { %v6076_v45 = vpop.f32.mrf.mxu1 }
0x1166   : > { %v6150_v44 = vmul.f32 %v12954_v57, %v6076_v45  ;;  %v11000_v59 = vpop.f32.mrf.mxu0 }
0x1167   : > { %v10957_v47 = vpop.f32.mrf.mxu1 }
0x1168   : > { %10979 = vmatprep.mubr.msk.f32.mxu1 %vm1241_vm1, %v6150_v44  ;;  %v6305_v34 = vpop.f32.mrf.mxu0 }
0x1169   : > { %v6146_v40 = vpop.f32.mrf.mxu1 }
0x116a   : > { %v6151_v1 = vmul.f32 %v12961_v0, %v6146_v40 }
0x116b   : > { %v10962_v38 = vpop.f32.mrf.mxu1 }
0x116c   : > { %10980 = vmatmul.mubr.msk.f32.vlgmr.msra.gmra.mxu1 %vm1241_vm1, %v6151_v1  ;;  %v6354_v38 = vld [vmem:[#allocation8 + $0x24] sm:$0x7] }
0x116d   : > { %11003 = vmatprep.mubr.msk.f32.mxu1 %vm11793_vm3, %v11792_v2  ;;  %v6672_v26 = vrot.slane %v6354_v38, %v12210_v55 }
0x11b3   : > { %v13050_v30 = vpop.xlane.xlu1 %6698 }
0x11b4   : > { %11545 = vrcp.f32 %v13050_v30 }
0x11b5   : > { %v13053_v27 = vpop.xlane.xlu0 %6695 }
0x11b6   : > { %11547 = vrcp.f32 %v13053_v27 }
0x11c1   : > { %v11546_v50 = vpop.eup %11545 }
0x11c2   : > { %v13056_v25 = vmul.f32 %v11546_v50, %v11542_v9  ;;  %v6337_v9 = vld [vmem:[#allocation7 + $0x540] sm:$0xff]  ;;  %v6664_v50 = vrot.slane %v6354_v38, %v12200_v33 }
0x11c3   : > { %v11548_v48 = vpop.eup %11547  ;;  %11025 = vmatprep.subr.mxu0 %v6337_v9 }
0x11c4   : > { %7158 = vxpose.xlu1.b32.start.end [1/1] (short) (narrow) %v13056_v25, 8  ;;  %v13059_v29 = vmul.f32 %v11548_v48, %v11544_v15  ;;  %11026 = vmatpush3.msra.mxu0 %v6337_v9  ;;  %v3813_v9 = vmul.f32 %v13604_v20, %v13603_v7  ;;  %v13611_v20 = vld [vmem:[#allocation20_spill] sm:$0xff] }
0x11c5   : > { %11049 = vmatprep.subr.mxu0 %v11792_v2 }
0x11c6   : > { %6900 = vxpose.xlu0.b32.start.end [1/1] (short) (narrow) %v13059_v29, 8 }
0x122c   : > { %v10981_v28 = vpop.f32.mrf.mxu1 }
0x122d   : > { %v6315_v5 = vadd.f32 %v11000_v59, %v10981_v28  ;;  %v6678_v28 = vrot.slane %v6354_v38, %v12216_v12  ;;  %v3829_v38 = vsel %vm3704_vm2, %v3813_v9, 0.0  ;;  %v13612_v9 = vld [vmem:[#allocation34_spill] sm:$0xff] }
0x122e   : > { %v6224_v46 = vpop.f32.mrf.mxu1 }
0x122f   : > { %v6321_v18 = vadd.f32 %v6319_v58, %v6315_v5  ;;  %v6314_v16 = vadd.f32 %v6305_v34, %v6224_v46 }
0x1231   : > { %v6323_v41 = vmax.f32 %v6321_v18, 0.0  ;;  %v6320_v43 = vadd.f32 %v6319_v58, %v6314_v16 }
0x1233   : > { %v6322_v21 = vmax.f32 %v6320_v43, 0.0  ;;  %v6329_v22 = vmul.f32 %v6327_v42, %v6323_v41 }
0x1235   : > { %v6328_v31 = vmul.f32 %v6327_v42, %v6322_v21  ;;  %v6335_v63 = vadd.f32 %v6333_v49, %v6329_v22 }
0x1237   : > { %v6334_v56 = vadd.f32 %v6333_v49, %v6328_v31  ;;  %v3809_v49 = vmul.f32 %v12659_v4, %v12561_v13 }
0x1239   : > { %11002 = vmatpush3.msra.mxu1 %v6334_v56 }
0x123a   : > { %11004 = vmatmul.mubr.msk.f32.vlgmr.msra.gmra.mxu1 %vm3704_vm2, %v12924_v32  ;;  %11006 = vmatprep.subr.mxu1 %v11792_v2 }
0x123b   : > { %11007 = vmatpush3.msra.mxu1 %v6335_v63  ;;  %11008 = vmatprep.mubr.msk.f32.mxu1 %vm11793_vm3, %v11792_v2 }
0x123c   : > { %11030 = vmatprep.subr.mxu1 %v6353_v19 }
0x123e   : > { %11009 = vmatmul.mubr.msk.f32.vlgmr.msra.gmra.mxu1 %vm3704_vm2, %v12938_v24 }
0x123f   : > { %11031 = vmatpush3.msra.mxu1 %v6353_v19  ;;  %11046 = vmatprep.mubr.msk.f32.mxu1 %vm1241_vm1, %v6334_v56  ;;  %v3817_v56 = vsel %vm3704_vm2, %v3809_v49, 0.0  ;;  %v13602_v19 = vld [vmem:[#allocation31_spill] sm:$0xff] }
0x1240   : > { %11032 = vmatprep.subr.mxu1 %v6352_v54  ;;  %v7174_v42 = vpop.trf.xlu1 }
0x1241   : > { %11033 = vmatpush3.msra.mxu1 %v6352_v54 }
0x1242   : > { %11034 = vmatprep.subr.mxu1 %v6351_v3  ;;  %v6916_v37 = vpop.trf.xlu0 }
0x1243   : > { %11035 = vmatpush3.msra.mxu1 %v6351_v3 }
0x1244   : > { %11036 = vmatprep.subr.mxu1 %v6350_v39 }
0x1245   : > { %11037 = vmatpush3.msra.mxu1 %v6350_v39  ;;  %v11589_v39 = vld [vmem:[%s11986_s29] sm:$0xff] }
0x1246   : > { %11038 = vmatprep.subr.mxu1 %v6349_v17 }
0x1247   : > { %11039 = vmatpush3.msra.mxu1 %v6349_v17  ;;  %v4068_v17 = vmul.f32 %v11589_v39, %v11589_v39  ;;  %v13609_v39 = vld [vmem:[#allocation15_spill] sm:$0xff] }
0x1248   : > { %11040 = vmatprep.subr.mxu1 %v6348_v11 }
0x1249   : > { %11041 = vmatpush3.msra.mxu1 %v6348_v11  ;;  %v11590_v11 = vld [vmem:[%s11986_s29 + $0x8] sm:$0xff] }
0x124a   : > { %11042 = vmatprep.subr.mxu1 %v6347_v6 }
0x124b   : > { %11043 = vmatpush3.msra.mxu1 %v6347_v6  ;;  %v4069_v6 = vmul.f32 %v11590_v11, %v11590_v11 }
0x124c   : > { %11044 = vmatprep.subr.mxu1 %v6346_v35 }
0x124d   : > { %11045 = vmatpush3.msra.mxu1 %v6346_v35 }
0x124e   : > { %11047 = vmatmul.mubr.msk.f32.vlgmr.msra.gmra.mxu1 %vm1241_vm1, %v6335_v63  ;;  %11054 = vmatprep.subr.mxu1 %v11792_v2  ;;  %v13601_v63 = vld [vmem:[#allocation16_spill] sm:$0xff] }
0x124f   : > { %11055 = vmatpush3.msra.mxu1 %v13056_v25  ;;  %11056 = vmatprep.mubr.msk.f32.mxu1 %vm11793_vm3, %v11792_v2  ;;  %v3811_v54 = vmul.f32 %v13602_v19, %v13601_v63 }
0x1250   : > { %11064 = vmatprep.subr.mxu1 %v11792_v2 }
0x1251   : > { %v3823_v35 = vsel %vm3704_vm2, %v3811_v54, 0.0 }
0x1252   : > { %11057 = vmatmul.mubr.msk.f32.vlgmr.msra.gmra.mxu1 %vm3704_vm2, %v12938_v24 }
0x1253   : > { %11066 = vmatprep.mubr.msk.f32.mxu1 %vm11793_vm3, %v11792_v2 }
0x12fa   : > { %v6421_v52 = vpop.f32.mrf.mxu1 }
0x12fb   : > { %v6495_v15 = vmul.f32 %v12954_v57, %v6421_v52 }
0x12fc   : > { %v11005_v36 = vpop.f32.mrf.mxu1 }
0x12fd   : > { %11027 = vmatprep.mubr.msk.f32.mxu0 %vm1241_vm1, %v6495_v15  ;;  %v11591_v36 = vld [vmem:[%s11986_s29 + $0x10] sm:$0xff] }
0x12fe   : > { %v6491_v45 = vpop.f32.mrf.mxu1 }
0x12ff   : > { %v6496_v44 = vmul.f32 %v12961_v0, %v6491_v45  ;;  %v4070_v45 = vmul.f32 %v11591_v36, %v11591_v36  ;;  %v11595_v36 = vld [vmem:[%s11986_s29 + $0x30] sm:$0xff] }
0x1300   : > { %v11010_v47 = vpop.f32.mrf.mxu1 }
0x1301   : > { %11028 = vmatmul.mubr.msk.f32.vlgmr.msra.gmra.mxu0 %vm1241_vm1, %v6496_v44  ;;  %v4076_v44 = vsel %vm426_vm0, %v4068_v17, 0.0  ;;  %v4077_v47 = vsel %vm426_vm0, %v4069_v6, 0.0  ;;  %v13610_v17 = vld [vmem:[#allocation33_spill] sm:$0xff] }
0x1302   : > { %11050 = vmatpush3.msra.mxu0 %v13059_v29  ;;  %11051 = vmatprep.mubr.msk.f32.mxu0 %vm11793_vm3, %v11792_v2  ;;  %v3812_v11 = vmul.f32 %v13610_v17, %v13609_v39  ;;  %v11594_v6 = vld [vmem:[%s11986_s29 + $0x28] sm:$0xff]  ;;  %v13619_v17 = vld [vmem:[#allocation22_spill] sm:$0xff] }
0x1303   : > { %11059 = vmatprep.subr.mxu0 %v11792_v2 }
0x1304   : > { %v3826_v7 = vsel %vm3704_vm2, %v3812_v11, 0.0  ;;  %v13620_v11 = vld [vmem:[#allocation27_spill] sm:$0xff] }
0x1305   : > { %11052 = vmatmul.mubr.msk.f32.vlgmr.msra.gmra.mxu0 %vm3704_vm2, %v12924_v32 }
0x1306   : > { %11061 = vmatprep.mubr.msk.f32.mxu0 %vm11793_vm3, %v11792_v2 }
0x130e   : > { %v11048_v57 = vpop.f32.mrf.mxu1 }
0x1310   : > { %v6650_v40 = vpop.f32.mrf.mxu1 }
0x1312   : > { %v13096_v1 = vpop.f32.mrf.mxu1 }
0x1314   : > { %v11058_v0 = vpop.f32.mrf.mxu1 }
0x13c1   : > { %v11029_v48 = vpop.f32.mrf.mxu0 }
0x13c2   : > { %v6660_v60 = vadd.f32 %v11048_v57, %v11029_v48  ;;  %v13606_v48 = vld [vmem:[#allocation35_spill] sm:$0xff] }
0x13c3   : > { %v6569_v62 = vpop.f32.mrf.mxu0 }
0x13c4   : > { %v6666_v23 = vadd.f32 %v6664_v50, %v6660_v60  ;;  %v6659_v51 = vadd.f32 %v6650_v40, %v6569_v62 }
0x13c5   : > { %v13100_v59 = vpop.f32.mrf.mxu0 }
0x13c6   : > { %v6668_v58 = vmax.f32 %v6666_v23, 0.0  ;;  %v6665_v5 = vadd.f32 %v6664_v50, %v6659_v51  ;;  %11065 = vmatpush3.msra.mxu1 %v13100_v59  ;;  %v13605_v50 = vld [vmem:[#allocation19_spill] sm:$0xff] }
0x13c7   : > { %v11053_v34 = vpop.f32.mrf.mxu0  ;;  %11067 = vmatmul.mubr.msk.f32.vlgmr.msra.gmra.mxu1 %vm3704_vm2, %v6916_v37  ;;  %11074 = vmatprep.subr.mxu1 %v11792_v2  ;;  %v3815_v60 = vmul.f32 %v13606_v48, %v13605_v50  ;;  %v11596_v50 = vld [vmem:[%s11986_s29 + $0x38] sm:$0xff] }
0x13c8   : > { %v6674_v46 = vmul.f32 %v6672_v26, %v6668_v58  ;;  %v6667_v18 = vmax.f32 %v6665_v5, 0.0  ;;  %11076 = vmatprep.mubr.msk.f32.mxu1 %vm11793_vm3, %v11792_v2  ;;  %v4075_v48 = vmul.f32 %v11596_v50, %v11596_v50 }
0x13ca   : > { %v6680_v16 = vadd.f32 %v6678_v28, %v6674_v46  ;;  %v6673_v41 = vmul.f32 %v6672_v26, %v6667_v18  ;;  %v4078_v26 = vadd.f32 %v4077_v47, %v4076_v44  ;;  %v3835_v18 = vsel %vm3704_vm2, %v3815_v60, 0.0 }
0x13cc   : > { %v6679_v43 = vadd.f32 %v6678_v28, %v6673_v41  ;;  %11075 = vmatpush3.msra.mxu1 %v6680_v16  ;;  %v4079_v28 = vsel %vm426_vm0, %v4070_v45, 0.0  ;;  %v13607_v16 = vld [vmem:[#allocation17_spill] sm:$0xff]  ;;  %v13608_v41 = vld [vmem:[#allocation30_spill] sm:$0xff]  ;;  %v4074_v45 = vmul.f32 %v11595_v36, %v11595_v36 }
0x13cd   : > { %11084 = vmatprep.subr.mxu1 %v11792_v2  ;;  %11077 = vmatmul.mubr.msk.f32.vlgmr.msra.gmra.mxu1 %vm3704_vm2, %v7174_v42  ;;  %v4080_v49 = vadd.f32 %v4079_v28, %v4078_v26 }
0x13ce   : > { %11060 = vmatpush3.msra.mxu0 %v6679_v43  ;;  %11085 = vmatpush3.msra.mxu1 %v13056_v25  ;;  %v6708_v43 = vmul.f32 %v13059_v29, %v13039_v10  ;;  %v4087_v60 = vsel %vm426_vm0, %v4074_v45, 0.0 }
0x13cf   : > { %11062 = vmatmul.mubr.msk.f32.vlgmr.msra.gmra.mxu0 %vm3704_vm2, %v6916_v37  ;;  %11069 = vmatprep.subr.mxu0 %v11792_v2 }
0x13d0   : > { %11070 = vmatpush3.msra.mxu0 %v13059_v29  ;;  %11071 = vmatprep.mubr.msk.f32.mxu0 %vm11793_vm3, %v11792_v2  ;;  %v6710_v54 = vsel %vm6681_vm4, %v6708_v43, 0.0  ;;  %v7430_v43 = vld [vmem:[#allocation7 + $0x5d0] sm:$0xff] }
0x13d1   : > { %11079 = vmatprep.subr.mxu0 %v11792_v2  ;;  %11086 = vmatprep.mubr.msk.f32.mxu1 %vm11793_vm3, %v11792_v2 }
0x13d2   : > { %11087 = vmatmul.mubr.msk.f32.vlgmr.msra.gmra.mxu1 %vm3704_vm2, %v7174_v42  ;;  %11094 = vmatprep.subr.mxu1 %v11792_v2 }
0x13d3   : > { %11072 = vmatmul.mubr.msk.f32.vlgmr.msra.gmra.mxu0 %vm3704_vm2, %v6916_v37  ;;  %11096 = vmatprep.mubr.msk.f32.mxu1 %vm11793_vm3, %v11792_v2  ;;  %v11592_v37 = vld [vmem:[%s11986_s29 + $0x18] sm:$0xff] }
0x13d4   : > { %11080 = vmatpush3.msra.mxu0 %v13096_v1  ;;  %11081 = vmatprep.mubr.msk.f32.mxu0 %vm11793_vm3, %v11792_v2  ;;  %v4071_v58 = vmul.f32 %v11592_v37, %v11592_v37  ;;  %v4089_v37 = vsel %vm426_vm0, %v4075_v48, 0.0 }
0x13d5   : > { %11089 = vmatprep.subr.mxu0 %v11792_v2 }
0x13d6   : > { %v4081_v63 = vsel %vm426_vm0, %v4071_v58, 0.0 }
0x13d7   : > { %11082 = vmatmul.mubr.msk.f32.vlgmr.msra.gmra.mxu0 %vm3704_vm2, %v7174_v42  ;;  %v3810_v42 = vmul.f32 %v13608_v41, %v13607_v16  ;;  %v4082_v10 = vadd.f32 %v4081_v63, %v4080_v49  ;;  %v7435_v16 = vld [vmem:[#allocation7 + $0x5f8] sm:$0xff]  ;;  %v7434_v41 = vld [vmem:[#allocation7 + $0x5f0] sm:$0xff]  ;;  %v7428_v49 = vld [vmem:[#allocation7 + $0x5c0] sm:$0xff] }
0x13d8   : > { %11091 = vmatprep.mubr.msk.f32.mxu0 %vm11793_vm3, %v11792_v2  ;;  %v13616_v63 = vld [vmem:[#allocation23_spill] sm:$0xff] }
0x13d9   : > { %v3820_v19 = vsel %vm3704_vm2, %v3810_v42, 0.0  ;;  %v7432_v42 = vld [vmem:[#allocation7 + $0x5e0] sm:$0xff] }
0x1487   : > { %v13131_v21 = vpop.f32.mrf.mxu1 }
0x1488   : > { %v7415_v22 = vsel %vm7146_vm5, %v13131_v21, 0.0 }
0x1489   : > { %7416 = vadd.xlane.f32.xlu0 %v7415_v22  ;;  %v11068_v31 = vpop.f32.mrf.mxu1 }
0x148a   : > { %v11593_v31 = vld [vmem:[%s11986_s29 + $0x20] sm:$0xff] }
0x148d   : > { %3818 = vadd.xlane.f32.xlu0 %v3817_v56  ;;  %v13140_v3 = vpop.f32.mrf.mxu1  ;;  %v4072_v56 = vmul.f32 %v11593_v31, %v11593_v31  ;;  %v13615_v31 = vld [vmem:[#allocation25_spill] sm:$0xff] }
0x148e   : > { %11095 = vmatpush3.msk.msra.mxu1 %vm7449_vm6, %v13140_v3  ;;  %11549 = vlog2.f32 %v13615_v31 }
0x148f   : > { %v13146_v13 = vpop.f32.mrf.mxu0  ;;  %v11078_v4 = vpop.f32.mrf.mxu1  ;;  %11118 = vmatprep.subr.mxu1 %v11792_v2  ;;  %11551 = vlog2.f32 %v13616_v63 }
0x1490   : > { %11090 = vmatpush3.msk.msra.mxu0 %vm7449_vm6, %v13146_v13  ;;  %v4073_v4 = vmul.f32 %v11594_v6, %v11594_v6 }
0x1491   : > { %3824 = vadd.xlane.f32.xlu0 %v3823_v35  ;;  %v11063_v52 = vpop.f32.mrf.mxu0  ;;  %11092 = vmatmul.mubr.msk.f32.vlgmr.msra.gmra.mxu0 %vm6681_vm4, %v13131_v21  ;;  %v4083_v35 = vsel %vm426_vm0, %v4072_v56, 0.0 }
0x1492   : > { %v7399_v15 = vpop.f32.mrf.mxu1  ;;  %11099 = vmatprep.subr.mxu0 %v11792_v2  ;;  %11115 = vmatprep.mubr.msk.f32.mxu0 %vm11793_vm3, %v11792_v2  ;;  %v3814_v52 = vmul.f32 %v13612_v9, %v13611_v20  ;;  %v4085_v44 = vsel %vm426_vm0, %v4073_v4, 0.0 }
0x1493   : > { %v7141_v57 = vpop.f32.mrf.mxu0  ;;  %v7403_v40 = vmul.f32 %v7399_v15, %v7399_v15  ;;  %v4084_v15 = vadd.f32 %v4083_v35, %v4082_v10  ;;  %11100 = vmatpush3.msra.mxu0 %v7435_v16  ;;  %v13621_v10 = vld [vmem:[#allocation28_spill] sm:$0xff] }
0x1494   : > { %v7145_v0 = vmul.f32 %v7141_v57, %v7141_v57  ;;  %v11088_v62 = vpop.f32.mrf.mxu1  ;;  %v3832_v47 = vsel %vm3704_vm2, %v3814_v52, 0.0  ;;  %v13613_v57 = vld [vmem:[#allocation18_spill] sm:$0xff]  ;;  %11101 = vmatprep.subr.mxu0 %v11792_v2 }
0x1495   : > { %v11073_v23 = vpop.f32.mrf.mxu0  ;;  %3830 = vadd.xlane.f32.xlu0 %v3829_v38  ;;  %v13166_v51 = vsel %vm7146_vm5, %v7403_v40, 0.0  ;;  %v13614_v40 = vld [vmem:[#allocation36_spill] sm:$0xff]  ;;  %v4086_v38 = vadd.f32 %v4085_v44, %v4084_v15  ;;  %11102 = vmatpush3.msra.mxu0 %v7434_v41 }
0x1496   : > { %v13171_v5 = vsel %vm7146_vm5, %v7145_v0, 0.0  ;;  %v3816_v0 = vmul.f32 %v13614_v40, %v13613_v57  ;;  %v6709_v23 = vmul.f32 %v13056_v25, %v13036_v14  ;;  %v7433_v14 = vld [vmem:[#allocation7 + $0x5e8] sm:$0xff]  ;;  %11103 = vmatprep.subr.mxu0 %v11792_v2 }
0x1497   : > { %v13173_v34 = vpop.f32.mrf.mxu0  ;;  %v4088_v26 = vadd.f32 %v4087_v60, %v4086_v38  ;;  %11104 = vmatpush3.msra.mxu0 %v7433_v14  ;;  %v11597_v38 = vld [vmem:[%s12125_s21] sm:$0xff] }
0x1498   : > { %11097 = vmatmul.mubr.msk.f32.vlgmr.msra.gmra.mxu1 %vm6681_vm4, %v13173_v34  ;;  %v7418_v46 = vsel %vm7146_vm5, %v13173_v34, 0.0  ;;  %v3838_v62 = vsel %vm3704_vm2, %v3816_v0, 0.0  ;;  %v6713_v58 = vsel %vm6681_vm4, %v6709_v23, 0.0  ;;  %11105 = vmatprep.subr.mxu0 %v11792_v2 }
0x1499   : > { %7419 = vadd.xlane.f32.xlu1 %v7418_v46  ;;  %3836 = vadd.xlane.f32.xlu0 %v3835_v18  ;;  %v11083_v22 = vpop.f32.mrf.mxu0  ;;  %v4090_v28 = vadd.f32 %v4089_v37, %v4088_v26  ;;  %v4379_v46 = vmul.f32 %v12933_v53, %v12933_v53  ;;  %v7431_v53 = vld [vmem:[#allocation7 + $0x5d8] sm:$0xff] }
0x149a   : > { %11134 = vmatprep.mubr.msk.f32.mxu1 %vm11793_vm3, %v11792_v2  ;;  %11119 = vmatpush3.msra.mxu1 %v7435_v16  ;;  %v7429_v22 = vld [vmem:[#allocation7 + $0x5c8] sm:$0xff] }
0x149b   : > { %v4380_v18 = vsel %vm3704_vm2, %v4379_v46, 0.0  ;;  %11120 = vmatprep.subr.mxu1 %v11792_v2  ;;  %11106 = vmatpush3.msra.mxu0 %v7432_v42  ;;  %v11550_v6 = vpop.eup %11549 }
0x149c   : > { %11121 = vmatpush3.msra.mxu1 %v7434_v41  ;;  %11107 = vmatprep.subr.mxu0 %v11792_v2  ;;  %v11552_v35 = vpop.eup %11551  ;;  %v3794_v20 = vmul.f32 0.6931472, %v11550_v6 }
0x149d   : > { %3821 = vadd.xlane.f32.xlu1 %v3820_v19  ;;  %6711 = vadd.xlane.f32.xlu0 %v6710_v54  ;;  %v13617_v19 = vld [vmem:[#allocation24_spill] sm:$0xff]  ;;  %v13618_v54 = vld [vmem:[#allocation29_spill] sm:$0xff]  ;;  %v3798_v36 = vmul.f32 0.6931472, %v11552_v35 }
0x149e   : > { %11122 = vmatprep.subr.mxu1 %v11792_v2  ;;  %11108 = vmatpush3.msra.mxu0 %v7431_v53  ;;  %11553 = vlog2.f32 %v13617_v19  ;;  %v11601_v19 = vld [vmem:[%s12125_s21 + $0x18] sm:$0xff] }
0x149f   : > { %11123 = vmatpush3.msra.mxu1 %v7433_v14  ;;  %11109 = vmatprep.subr.mxu0 %v11792_v2  ;;  %11555 = vlog2.f32 %v13618_v54 }
0x14a0   : > { %11124 = vmatprep.subr.mxu1 %v11792_v2  ;;  %11110 = vmatpush3.msra.mxu0 %v7430_v43  ;;  %11557 = vlog2.f32 %v13619_v17 }
0x14a1   : > { %3827 = vadd.xlane.f32.xlu1 %v3826_v7  ;;  %11125 = vmatpush3.msra.mxu1 %v7432_v42  ;;  %11559 = vlog2.f32 %v13620_v11  ;;  %v13622_v7 = vld [vmem:[#allocation26_spill] sm:$0xff] }
0x14a2   : > { %11126 = vmatprep.subr.mxu1 %v11792_v2  ;;  %11111 = vmatprep.subr.mxu0 %v11792_v2  ;;  %11561 = vlog2.f32 %v13621_v10 }
0x14a3   : > { %11127 = vmatpush3.msra.mxu1 %v7431_v53  ;;  %11112 = vmatpush3.msra.mxu0 %v7429_v22  ;;  %11563 = vlog2.f32 %v13622_v7 }
0x14a4   : > { %11128 = vmatprep.subr.mxu1 %v11792_v2  ;;  %11113 = vmatprep.subr.mxu0 %v11792_v2  ;;  %11565 = vlog2.f32 %v13053_v27  ;;  %v11598_v27 = vld [vmem:[%s12125_s21 + $0x10] sm:$0xff] }
0x14a5   : > { %3833 = vadd.xlane.f32.xlu1 %v3832_v47  ;;  %11129 = vmatpush3.msra.mxu1 %v7430_v43  ;;  %11567 = vlog2.f32 %v13050_v30 }
0x14a6   : > { %11130 = vmatprep.subr.mxu1 %v11792_v2  ;;  %11114 = vmatpush3.msra.mxu0 %v7428_v49 }
0x14a7   : > { %11131 = vmatpush3.msra.mxu1 %v7429_v22  ;;  %11137 = vmatprep.subr.mxu0 %v11792_v2 }
0x14a8   : > { %11132 = vmatprep.subr.mxu1 %v11792_v2 }
0x14a9   : > { %3839 = vadd.xlane.f32.xlu1 %v3838_v62  ;;  %11133 = vmatpush3.msra.mxu1 %v7428_v49  ;;  %v11600_v49 = vld [vmem:[%s12125_s21 + $0x20] sm:$0xff] }
0x14aa   : > { %11156 = vmatprep.subr.mxu1 %v11792_v2 }
0x14ab   : > { %v11554_v9 = vpop.eup %11553 }
0x14ac   : > { %v11556_v45 = vpop.eup %11555  ;;  %v3796_v57 = vmul.f32 0.6931472, %v11554_v9 }
0x14ad   : > { %6714 = vadd.xlane.f32.xlu1 %v6713_v58  ;;  %v11558_v40 = vpop.eup %11557  ;;  %v3802_v48 = vmul.f32 0.6931472, %v11556_v45  ;;  %v11599_v58 = vld [vmem:[%s12125_s21 + $0x8] sm:$0xff] }
0x14ae   : > { %v11560_v62 = vpop.eup %11559  ;;  %v3800_v46 = vmul.f32 0.6931472, %v11558_v40 }
0x14af   : > { %v11562_v23 = vpop.eup %11561  ;;  %v3806_v41 = vmul.f32 0.6931472, %v11560_v62  ;;  %v11604_v62 = vld [vmem:[%s12125_s21 + $0x38] sm:$0xff] }
0x14b0   : > { %v3804_v43 = vmul.f32 0.6931472, %v11562_v23 }
0x14b1   : > { %4091 = vadd.xlane.f32.xlu1 %v4090_v28 }
0x14b5   : > { %4381 = vadd.xlane.f32.xlu1 %v4380_v18 }
0x1512   : > { %v13229_v56 = vpop.xlane.xlu0 %7416 }
0x1516   : > { %v3819_v39 = vpop.xlane.xlu0 %3818 }
0x1517   : > { %v3841_v15 = vsub.f32 %v3794_v20, %v3819_v39  ;;  %v11564_v39 = vpop.eup %11563  ;;  %v11602_v20 = vld [vmem:[%s12125_s21 + $0x30] sm:$0xff] }
0x1518   : > { %v3808_v45 = vmul.f32 0.6931472, %v11564_v39  ;;  %v7443_v39 = vld [vmem:[#allocation7 + $0x630] sm:$0xff] }
0x1519   : > { %v3865_v50 = vmul.f32 %v11597_v38, %v3841_v15  ;;  %v11603_v15 = vld [vmem:[%s12125_s21 + $0x28] sm:$0xff] }
0x151a   : > { %v3825_v4 = vpop.xlane.xlu0 %3824 }
0x151b   : > { %v3843_v47 = vsub.f32 %v3798_v36, %v3825_v4  ;;  %v3874_v16 = vsel %vm3873_vm7, %v3865_v50, 0.0  ;;  %v11566_v4 = vpop.eup %11565 }
0x151d   : > { %v3867_v26 = vmul.f32 %v11598_v27, %v3843_v47 }
0x151e   : > { %v3831_v44 = vpop.xlane.xlu0 %3830 }
0x151f   : > { %v3845_v37 = vsub.f32 %v3802_v48, %v3831_v44  ;;  %v3877_v22 = vsel %vm3873_vm7, %v3867_v26, 0.0  ;;  %v11568_v44 = vpop.eup %11567 }
0x1520   : > { %v6707_v27 = vmul.f32 0.6931472, %v11568_v44 }
0x1521   : > { %v3869_v31 = vmul.f32 %v11600_v49, %v3845_v37 }
0x1522   : > { %v13238_v52 = vpop.xlane.xlu1 %7419  ;;  %v3837_v30 = vpop.xlane.xlu0 %3836 }
0x1523   : > { %v3847_v63 = vsub.f32 %v3806_v41, %v3837_v30  ;;  %v3881_v7 = vsel %vm3873_vm7, %v3869_v31, 0.0 }
0x1525   : > { %v3871_v9 = vmul.f32 %v11602_v20, %v3847_v63 }
0x1526   : > { %v3822_v0 = vpop.xlane.xlu1 %3821  ;;  %v6712_v47 = vpop.xlane.xlu0 %6711 }
0x1527   : > { %v3842_v60 = vsub.f32 %v3796_v57, %v3822_v0  ;;  %v6705_v0 = vmul.f32 0.6931472, %v11566_v4  ;;  %v3885_v26 = vsel %vm3873_vm7, %v3871_v9, 0.0  ;;  %v7439_v4 = vld [vmem:[#allocation7 + $0x610] sm:$0xff] }
0x1529   : > { %v3866_v28 = vmul.f32 %v11599_v58, %v3842_v60  ;;  %v6716_v60 = vsub.f32 %v6705_v0, %v6712_v47 }
0x152a   : > { %v3828_v18 = vpop.xlane.xlu1 %3827 }
0x152b   : > { %v3875_v14 = vsel %vm3873_vm7, %v3866_v28, 0.0  ;;  %v3844_v42 = vsub.f32 %v3800_v46, %v3828_v18  ;;  %v6884_v28 = vmul.f32 %v13100_v59, %v13059_v29  ;;  %v6718_v41 = vsel %vm3873_vm7, %v6716_v60, 0.0 }
0x152c   : > { %v3876_v53 = vadd.f32 %v3875_v14, %v3874_v16  ;;  %v6885_v16 = vmul.f32 %v13096_v1, %v13056_v25  ;;  %v6871_v59 = vmul.f32 %v12938_v24, %v12938_v24  ;;  %v6870_v1 = vmul.f32 %v12924_v32, %v12924_v32 }
0x152d   : > { %v3868_v54 = vmul.f32 %v11601_v19, %v3844_v42  ;;  %v7444_v19 = vld [vmem:[#allocation7 + $0x638] sm:$0xff] }
0x152e   : > { %v3878_v17 = vadd.f32 %v3877_v22, %v3876_v53  ;;  %v3834_v11 = vpop.xlane.xlu1 %3833  ;;  %v6886_v53 = vsel %vm6681_vm4, %v6884_v28, 0.0  ;;  %v6887_v29 = vsel %vm6681_vm4, %v6885_v16, 0.0  ;;  %v7421_v22 = vmax.f32 %v13229_v56, 1.0 }
0x152f   : > { %v3879_v10 = vsel %vm3873_vm7, %v3868_v54, 0.0  ;;  %v3846_v6 = vsub.f32 %v3804_v43, %v3834_v11  ;;  %v4636_v43 = vmul.f32 %v12942_v8, %v12942_v8  ;;  %v6888_v25 = vadd.f32 %v6887_v29, %v6886_v53 }
0x1530   : > { %v3880_v35 = vadd.f32 %v3879_v10, %v3878_v17  ;;  %v6873_v31 = vsel %vm3704_vm2, %v6871_v59, 0.0  ;;  %v6872_v8 = vsel %vm3704_vm2, %v6870_v1, 0.0  ;;  %11569 = vrcp.f32 %v7421_v22  ;;  %v7441_v17 = vld [vmem:[#allocation7 + $0x620] sm:$0xff]  ;;  %v7440_v10 = vld [vmem:[#allocation7 + $0x618] sm:$0xff] }
0x1531   : > { %v3870_v36 = vmul.f32 %v11603_v15, %v3846_v6  ;;  %v4637_v49 = vsel %vm3704_vm2, %v4636_v43, 0.0  ;;  %v6874_v24 = vadd.f32 %v6873_v31, %v6872_v8 }
0x1532   : > { %v3840_v57 = vpop.xlane.xlu1 %3839  ;;  %v3882_v40 = vadd.f32 %v3881_v7, %v3880_v35  ;;  %v7438_v35 = vld [vmem:[#allocation7 + $0x608] sm:$0xff]  ;;  %v7437_v7 = vld [vmem:[#allocation7 + $0x600] sm:$0xff] }
0x1533   : > { %v3883_v38 = vsel %vm3873_vm7, %v3870_v36, 0.0  ;;  %v3848_v50 = vsub.f32 %v3808_v45, %v3840_v57 }
0x1534   : > { %v3884_v48 = vadd.f32 %v3883_v38, %v3882_v40 }
0x1535   : > { %v3872_v23 = vmul.f32 %v11604_v62, %v3848_v50 }
0x1536   : > { %v6715_v37 = vpop.xlane.xlu1 %6714  ;;  %v3886_v58 = vadd.f32 %v3885_v26, %v3884_v48 }
0x1537   : > { %v6717_v46 = vsub.f32 %v6707_v27, %v6715_v37  ;;  %v3887_v30 = vsel %vm3873_vm7, %v3872_v23, 0.0 }
0x1538   : > { %v3888_v18 = vadd.f32 %v3887_v30, %v3886_v58 }
0x1539   : > { %v6719_v14 = vsel %vm3873_vm7, %v6717_v46, 0.0 }
0x153a   : > { %3889 = vadd.xlane.f32.xlu0 %v3888_v18  ;;  %v6720_v42 = vadd.f32 %v6719_v14, %v6718_v41 }
0x153c   : > { %6721 = vadd.xlane.f32.xlu1 %v6720_v42 }
0x153d   : > { %v13280_v32 = vpop.eup %11569 }
0x153e   : > { %4123 = vadd.xlane.f32.xlu0 %v12902_v61  ;;  %v7422_v61 = vmax.f32 %v13238_v52, 1.0 }
0x1540   : > { %6889 = vadd.xlane.f32.xlu1 %v6888_v25  ;;  %11571 = vrcp.f32 %v7422_v61 }
0x1542   : > { %4638 = vadd.xlane.f32.xlu0 %v4637_v49 }
0x1544   : > { %7405 = vadd.xlane.f32.xlu1 %v13166_v51  ;;  %v7442_v51 = vld [vmem:[#allocation7 + $0x628] sm:$0xff] }
0x1546   : > { %6875 = vadd.xlane.f32.xlu0 %v6874_v24 }
0x154a   : > { %7148 = vadd.xlane.f32.xlu0 %v13171_v5 }
0x154d   : > { %v13287_v5 = vpop.eup %11571 }
0x1551   : > { %v7519_v56 = vpop.f32.mrf.mxu0 }
0x1552   : > { %v7599_v63 = vmul.f32 %v13280_v32, %v7519_v56 }
0x1553   : > { %v11093_v54 = vpop.f32.mrf.mxu0 }
0x1554   : > { %11116 = vmatmul.mubr.msk.f32.vlgmr.msra.gmra.mxu0 %vm1241_vm1, %v7599_v63 }
0x1555   : > { %11138 = vmatpush3.msra.mxu0 %v7444_v19  ;;  %11153 = vmatprep.mubr.msk.f32.mxu0 %vm11793_vm3, %v11792_v2 }
0x1556   : > { %11139 = vmatprep.subr.mxu0 %v11792_v2 }
0x1557   : > { %11140 = vmatpush3.msra.mxu0 %v7443_v39 }
0x1558   : > { %11141 = vmatprep.subr.mxu0 %v11792_v2  ;;  %v7595_v52 = vpop.f32.mrf.mxu1 }
0x1559   : > { %v7600_v11 = vmul.f32 %v13287_v5, %v7595_v52  ;;  %11142 = vmatpush3.msra.mxu0 %v7442_v51 }
0x155a   : > { %11143 = vmatprep.subr.mxu0 %v11792_v2  ;;  %v11098_v6 = vpop.f32.mrf.mxu1 }
0x155b   : > { %11144 = vmatpush3.msra.mxu0 %v7441_v17  ;;  %11135 = vmatmul.mubr.msk.f32.vlgmr.msra.gmra.mxu1 %vm1241_vm1, %v7600_v11 }
0x155c   : > { %11145 = vmatprep.subr.mxu0 %v11792_v2  ;;  %11157 = vmatpush3.msra.mxu1 %v7444_v19 }
0x155d   : > { %11146 = vmatpush3.msra.mxu0 %v7440_v10  ;;  %11158 = vmatprep.subr.mxu1 %v11792_v2 }
0x155e   : > { %11147 = vmatprep.subr.mxu0 %v11792_v2  ;;  %11159 = vmatpush3.msra.mxu1 %v7443_v39 }
0x155f   : > { %11148 = vmatpush3.msra.mxu0 %v7439_v4  ;;  %11160 = vmatprep.subr.mxu1 %v11792_v2 }
0x1560   : > { %11149 = vmatprep.subr.mxu0 %v11792_v2  ;;  %11161 = vmatpush3.msra.mxu1 %v7442_v51 }
0x1561   : > { %11150 = vmatpush3.msra.mxu0 %v7438_v35  ;;  %11162 = vmatprep.subr.mxu1 %v11792_v2 }
0x1562   : > { %11151 = vmatprep.subr.mxu0 %v11792_v2  ;;  %11163 = vmatpush3.msra.mxu1 %v7441_v17 }
0x1563   : > { %11152 = vmatpush3.msra.mxu0 %v7437_v7  ;;  %11164 = vmatprep.subr.mxu1 %v11792_v2 }
0x1564   : > { %11154 = vmatmul.mubr.msk.f32.vlgmr.msra.gmra.mxu0 %vm1241_vm1, %v13146_v13  ;;  %11165 = vmatpush3.msra.mxu1 %v7440_v10  ;;  %v4092_v13 = vpop.xlane.xlu1 %4091 }
0x1565   : > { %11166 = vmatprep.subr.mxu1 %v11792_v2  ;;  %11172 = vmatprep.mubr.msk.f32.mxu1 %vm11793_vm3, %v11792_v2  ;;  %v4093_v20 = vrot.slane %v4092_v13, 4 }
0x1566   : > { %11167 = vmatpush3.msra.mxu1 %v7439_v4  ;;  %11175 = vmatprep.subr.mxu0 %v11792_v2 }
0x1567   : > { %11168 = vmatprep.subr.mxu1 %v11792_v2  ;;  %11177 = vmatprep.mubr.msk.f32.mxu0 %vm11793_vm3, %v11792_v2  ;;  %v4094_v15 = vadd.f32 %v4093_v20, %v4092_v13 }
0x1568   : > { %11169 = vmatpush3.msra.mxu1 %v7438_v35  ;;  %v4382_v9 = vpop.xlane.xlu1 %4381 }
0x1569   : > { %11170 = vmatprep.subr.mxu1 %v11792_v2  ;;  %v4383_v36 = vrot.slane %v4382_v9, 4  ;;  %v4095_v45 = vrot.slane %v4094_v15, 2 }
0x156a   : > { %11171 = vmatpush3.msra.mxu1 %v7437_v7 }
0x156b   : > { %11173 = vmatmul.mubr.msk.f32.vlgmr.msra.gmra.mxu1 %vm1241_vm1, %v13140_v3  ;;  %11180 = vmatprep.subr.mxu1 %v11792_v2  ;;  %v4384_v44 = vadd.f32 %v4383_v36, %v4382_v9  ;;  %v4096_v0 = vadd.f32 %v4095_v45, %v4094_v15 }
0x156c   : > { %11182 = vmatprep.mubr.msk.f32.mxu1 %vm11793_vm3, %v11792_v2 }
0x156d   : > { %v4385_v48 = vrot.slane %v4384_v44, 2  ;;  %v4097_v26 = vrot.slane %v4096_v0, 1 }
0x156f   : > { %v4386_v18 = vadd.f32 %v4385_v48, %v4384_v44  ;;  %v4098_v43 = vadd.f32 %v4097_v26, %v4096_v0 }
0x1571   : > { %v4387_v56 = vrot.slane %v4386_v18, 1 }
0x1573   : > { %v4388_v4 = vadd.f32 %v4387_v56, %v4386_v18 }
0x15c3   : > { %v3890_v47 = vpop.xlane.xlu0 %3889 }
0x15c4   : > { %v3891_v57 = vrot.slane %v3890_v47, 4 }
0x15c5   : > { %v6722_v40 = vpop.xlane.xlu1 %6721 }
0x15c6   : > { %v3892_v38 = vadd.f32 %v3891_v57, %v3890_v47  ;;  %v6723_v50 = vrot.slane %v6722_v40, 4 }
0x15c7   : > { %v4124_v3 = vpop.xlane.xlu0 %4123 }
0x15c8   : > { %v3893_v60 = vrot.slane %v3892_v38, 2  ;;  %v6724_v62 = vadd.f32 %v6723_v50, %v6722_v40  ;;  %v4125_v23 = vrot.slane %v4124_v3, 4 }
0x15c9   : > { %v6890_v27 = vpop.xlane.xlu1 %6889 }
0x15ca   : > { %v4126_v37 = vadd.f32 %v4125_v23, %v4124_v3  ;;  %v6891_v58 = vrot.slane %v6890_v27, 4  ;;  %v3894_v28 = vadd.f32 %v3893_v60, %v3892_v38  ;;  %v6725_v46 = vrot.slane %v6724_v62, 2 }
0x15cb   : > { %v4639_v30 = vpop.xlane.xlu0 %4638  ;;  %v13623_v3 = vlaneseq }
0x15cc   : > { %v4127_v16 = vrot.slane %v4126_v37, 2  ;;  %v6892_v41 = vadd.f32 %v6891_v58, %v6890_v27  ;;  %v4640_v14 = vrot.slane %v4639_v30, 4  ;;  %v3895_v42 = vrot.slane %v3894_v28, 1 }
0x15cd   : > { %v7406_v53 = vpop.xlane.xlu1 %7405  ;;  %v6726_v31 = vadd.f32 %v6725_v46, %v6724_v62  ;;  %v9069_v60 = vand.u32 127, %v13623_v3  ;;  %v7923_v3 = vld [vmem:[#allocation7 + $0x680] sm:$0xff] }
0x15ce   : > { %v4641_v29 = vadd.f32 %v4640_v14, %v4639_v30  ;;  %v7407_v59 = vrot.slane %v7406_v53, 4  ;;  %v3896_v25 = vadd.f32 %v3895_v42, %v3894_v28  ;;  %v6893_v1 = vrot.slane %v6892_v41, 2 }
0x15cf   : > { %v6876_v22 = vpop.xlane.xlu0 %6875  ;;  %v4128_v49 = vadd.f32 %v4127_v16, %v4126_v37  ;;  %v6727_v17 = vrot.slane %v6726_v31, 1  ;;  %vm9070_vm8 = vcmp.eq.s32.totalorder %v9069_v60, 0  ;;  %vm9073_vm9 = vcmp.eq.s32.totalorder %v9069_v60, 1 }
0x15d0   : > { %v4642_v8 = vrot.slane %v4641_v29, 2  ;;  %v7408_v24 = vadd.f32 %v7407_v59, %v7406_v53  ;;  %v6877_v61 = vrot.slane %v6876_v22, 4  ;;  %11385 = vpush %v3896_v25  ;;  %v6894_v11 = vadd.f32 %v6893_v1, %v6892_v41 }
0x15d1   : > { %11387 = vpush %v4098_v43  ;;  %v4129_v63 = vrot.slane %v4128_v49, 1  ;;  %v6728_v15 = vadd.f32 %v6727_v17, %v6726_v31  ;;  %vm9077_vm10 = vcmp.eq.s32.totalorder %v9069_v60, 2  ;;  %vm9081_vm11 = vcmp.eq.s32.totalorder %v9069_v60, 3  ;;  %v7445_v43 = vld [vmem:[#allocation8 + $0x27] sm:$0x7] }
0x15d2   : > { %v6878_v19 = vadd.f32 %v6877_v61, %v6876_v22  ;;  %v4643_v54 = vadd.f32 %v4642_v8, %v4641_v29  ;;  %v7409_v39 = vrot.slane %v7408_v24, 2  ;;  %v6895_v36 = vrot.slane %v6894_v11, 1 }
0x15d3   : > { %v7149_v51 = vpop.xlane.xlu0 %7148  ;;  %v4130_v52 = vadd.f32 %v4129_v63, %v4128_v49  ;;  %v7896_v29 = vrot.slane %v7445_v43, %v12200_v33  ;;  %v7904_v49 = vrot.slane %v7445_v43, %v12210_v55  ;;  %v7910_v8 = vrot.slane %v7445_v43, %v12216_v12 }
0x15d4   : > { %v6879_v10 = vrot.slane %v6878_v19, 2  ;;  %v7150_v6 = vrot.slane %v7149_v51, 4  ;;  %v4644_v35 = vrot.slane %v4643_v54, 1  ;;  %v7410_v9 = vadd.f32 %v7409_v39, %v7408_v24  ;;  %v7921_v39 = vld [vmem:[#allocation7 + $0x678] sm:$0xff] }
0x15d5   : > { %11389 = vpush %v4130_v52  ;;  %v6896_v40 = vadd.f32 %v6895_v36, %v6894_v11  ;;  %v7920_v52 = vld [vmem:[#allocation7 + $0x670] sm:$0xff]  ;;  %v7919_v11 = vld [vmem:[#allocation7 + $0x668] sm:$0xff] }
0x15d6   : > { %v7151_v7 = vadd.f32 %v7150_v6, %v7149_v51  ;;  %11391 = vpush %v4388_v4  ;;  %v4645_v13 = vadd.f32 %v4644_v35, %v4643_v54  ;;  %v6880_v20 = vadd.f32 %v6879_v10, %v6878_v19  ;;  %v7411_v0 = vrot.slane %v7410_v9, 1  ;;  %v7918_v6 = vld [vmem:[#allocation7 + $0x660] sm:$0xff]  ;;  %v7917_v4 = vld [vmem:[#allocation7 + $0x658] sm:$0xff]  ;;  %v7916_v35 = vld [vmem:[#allocation7 + $0x650] sm:$0xff] }
0x15d8   : > { %v7152_v45 = vrot.slane %v7151_v7, 2  ;;  %11393 = vpush %v4645_v13  ;;  %v6881_v44 = vrot.slane %v6880_v20, 1  ;;  %v7412_v48 = vadd.f32 %v7411_v0, %v7410_v9  ;;  %v7914_v13 = vld [vmem:[#allocation7 + $0x640] sm:$0xff] }
0x15d9   : > { %11395 = vpush %v6728_v15  ;;  %v7930_v15 = vld [vmem:[#allocation7 + $0x6b8] sm:$0xff] }
0x15da   : > { %v7153_v47 = vadd.f32 %v7152_v45, %v7151_v7  ;;  %v6882_v57 = vadd.f32 %v6881_v44, %v6880_v20  ;;  %v7915_v7 = vld [vmem:[#allocation7 + $0x648] sm:$0xff]  ;;  %v7929_v45 = vld [vmem:[#allocation7 + $0x6b0] sm:$0xff] }
0x15db   : > { %v7928_v44 = vld [vmem:[#allocation7 + $0x6a8] sm:$0xff] }
0x15dc   : > { %11397 = vpush %v6882_v57  ;;  %v7154_v38 = vrot.slane %v7153_v47, 1  ;;  %v7927_v57 = vld [vmem:[#allocation7 + $0x6a0] sm:$0xff] }
0x15dd   : > { %11399 = vpush %v6896_v40 }
0x15de   : > { %v7155_v50 = vadd.f32 %v7154_v38, %v7153_v47  ;;  %v7926_v38 = vld [vmem:[#allocation7 + $0x698] sm:$0xff] }
0x15e0   : > { %11401 = vpush %v7155_v50  ;;  %v7925_v50 = vld [vmem:[#allocation7 + $0x690] sm:$0xff] }
0x15e1   : > { %11403 = vpush %v7412_v48  ;;  %v7924_v48 = vld [vmem:[#allocation7 + $0x688] sm:$0xff] }
0x1601   : > { %s11386_s22 = spop %11385 }
0x1602   : > { %s11388_s18 = spop %11387  ;;  %v9074_v23 = vstv %s11386_s22 }
0x1603   : > { %v9075_v37 = vsel %vm9073_vm9, %v9074_v23, 0.0 }
0x1606   : > { %s11390_s23 = spop %11389 }
0x1607   : > { %s4132_s3 = smul.f32 2.0, %s11390_s23  ;;  %s11392_s29 = spop %11391 }
0x1609   : > { %s4133_s16 = ssub.f32 %s11388_s18, %s4132_s3  ;;  %s11394_s9 = spop %11393 }
0x160a   : > { %s11396_s10 = spop %11395 }
0x160b   : > { %s4390_s30 = sadd.f32 %s11392_s29, %s4133_s16  ;;  %v9082_v46 = vstv %s11396_s10 }
0x160c   : > { %s400_s16 = scalar_select %p399_p1, %s11856_s28, 1  ;;  %v9083_v41 = vsel %vm9081_vm11, %v9082_v46, 0.0 }
0x160d   : > { %s4647_s13 = sadd.f32 %s11394_s9, %s4390_s30  ;;  %s11398_s12 = spop %11397 }
0x160e   : > { %s11400_s15 = spop %11399  ;;  %s401_s22 = scalar_lea.vmem %s13531_s7, %s400_s16 }
0x160f   : > { %s6898_s11 = smul.f32 2.0, %s11400_s15  ;;  %v9071_v62 = vstv %s4647_s13  ;;  %s9513_s30 = sshll.u32 %s11856_s28, 5 }
0x1610   : > { %v9072_v27 = vsel %vm9070_vm8, %v9071_v62, 0.0  ;;  %s11794_s28 = smov [#allocation10]  }
0x1611   : > { %s6899_s21 = ssub.f32 %s11398_s12, %s6898_s11  ;;  %s11402_s0 = spop %11401  ;;  %v9076_v28 = vadd.f32 %v9075_v37, %v9072_v27 }
0x1612   : > { %s11404_s18 = spop %11403  ;;  %s13486_s11 = scalar_lea.hbm %s13530_s6, %s9513_s30 }
0x1613   : > { %s7157_s23 = sadd.f32 %s11402_s0, %s6899_s21  ;;  %s9264_s0 = sshll.u32 %s11982_s19, 1 }
0x1614   : > { %v7670_v26 = vpop.f32.mrf.mxu0  ;;  %s378_s10 = scalar_lea.vmem [#allocation10], %s9264_s0  ;;  %s9088_s21 = scalar_lea.sflag [#allocation4], %s11982_s19 }
0x1615   : > { %s7414_s3 = sadd.f32 %s11404_s18, %s7157_s23  ;;  %s9104_s13 = sshll.u32 %s378_s10, 4  ;;  %s9105_s13 = int_to_ptr.vmem [resolvable:$true] %s9104_s13 }
0x1616   : > { %v11117_v58 = vpop.f32.mrf.mxu0  ;;  %s11711_s23 = scalar_lea.vmem %s9105_s13, 32  ;;  %s11715_s18 = sshll.u32 %s11794_s28, 4  ;;  %s11716_s18 = int_to_ptr.vmem [resolvable:$false] %s11715_s18 }
0x1617   : > { %v9078_v30 = vstv %s7414_s3  ;;  %p11712_p12 = scmp.ne.s32.totalorder %s9105_s13, %s11711_s23  ;;  %s11717_s3 = scalar_lea.vmem %s11716_s18, 64 }
0x1618   : > { %v9079_v18 = vsel %vm9077_vm10, %v9078_v30, 0.0  ;;  %p11718_p2 = scmp.lt.s32.totalorder %s9105_s13, %s11716_s18  ;;  %p11719_p10 = scmp.lt.s32.totalorder %s11717_s3, %s11711_s23 }
0x1619   : > { %v9080_v16 = vadd.f32 %v9079_v18, %v9076_v28  ;;  %p11713_p13 = pnand %p11712_p12, %p13624_p9 }
0x161a   : > { %p11720_p6 = por %p11719_p10, %p11718_p2 }
0x161b   : > { %v9084_v14 = vadd.f32 %v9083_v41, %v9080_v16  ;;  %v7743_v42 = vpop.f32.mrf.mxu1  ;;  %p11714_p0 = pneg %p11713_p13 }
0x161d   : > { %9086 = vst.msk [vmem:[%s401_s22] sm:$0x1] %vm9085_vm12, %v9084_v14  ;;  %v11136_v53 = vpop.f32.mrf.mxu1  ;;  %p11721_p4 = pnand %p11720_p6, %p11714_p0 }
0x1624   : > { %v7815_v59 = vpop.f32.mrf.mxu0 }
0x1625   : > { %v7891_v25 = vadd.f32 %v7815_v59, %v7670_v26  ;;  %v7931_v26 = vld [vmem:[#allocation8 + $0x2a] sm:$0x7] }
0x1626   : > { %v11155_v1 = vpop.f32.mrf.mxu0  ;;  %v8375_v37 = vrot.slane %v7931_v26, %v12200_v33  ;;  %v8383_v18 = vrot.slane %v7931_v26, %v12210_v55  ;;  %v8389_v41 = vrot.slane %v7931_v26, %v12216_v12 }
0x1627   : > { %v7897_v22 = vadd.f32 %v7896_v29, %v7891_v25  ;;  %v8400_v25 = vld [vmem:[#allocation7 + $0x6f8] sm:$0xff] }
0x1629   : > { %v7899_v31 = vmax.f32 %v7897_v22, 0.0  ;;  %v8399_v22 = vld [vmem:[#allocation7 + $0x6f0] sm:$0xff] }
0x162b   : > { %v7905_v24 = vmul.f32 %v7904_v49, %v7899_v31  ;;  %v7887_v61 = vpop.f32.mrf.mxu1  ;;  %v8398_v31 = vld [vmem:[#allocation7 + $0x6e8] sm:$0xff] }
0x162c   : > { %v7892_v56 = vadd.f32 %v7887_v61, %v7743_v42  ;;  %v8395_v61 = vld [vmem:[#allocation7 + $0x6d0] sm:$0xff] }
0x162d   : > { %v13325_v63 = vadd.f32 %v7910_v8, %v7905_v24  ;;  %v11174_v19 = vpop.f32.mrf.mxu1  ;;  %v8397_v24 = vld [vmem:[#allocation7 + $0x6e0] sm:$0xff] }
0x162e   : > { %v7898_v54 = vadd.f32 %v7896_v29, %v7892_v56  ;;  %v8394_v56 = vld [vmem:[#allocation7 + $0x6c8] sm:$0xff] }
0x162f   : > { %11176 = vmatpush3.msk.msra.mxu0 %vm7449_vm6, %v13325_v63 }
0x1630   : > { %v7900_v51 = vmax.f32 %v7898_v54, 0.0  ;;  %11178 = vmatmul.mubr.msk.f32.vlgmr.msra.gmra.mxu0 %vm6681_vm4, %v13131_v21  ;;  %11185 = vmatprep.subr.mxu0 %v11792_v2  ;;  %v8409_v54 = vld [vmem:[#allocation7 + $0x738] sm:$0xff] }
0x1631   : > { %11186 = vmatpush3.msra.mxu0 %v7921_v39  ;;  %11201 = vmatprep.mubr.msk.f32.mxu0 %vm11793_vm3, %v11792_v2 }
0x1632   : > { %v7906_v17 = vmul.f32 %v7904_v49, %v7900_v51  ;;  %11187 = vmatprep.subr.mxu0 %v11792_v2  ;;  %v8408_v51 = vld [vmem:[#allocation7 + $0x730] sm:$0xff] }
0x1633   : > { %11188 = vmatpush3.msra.mxu0 %v7920_v52 }
0x1634   : > { %v13335_v10 = vadd.f32 %v7910_v8, %v7906_v17  ;;  %11189 = vmatprep.subr.mxu0 %v11792_v2 }
0x1635   : > { %11190 = vmatpush3.msra.mxu0 %v7919_v11 }
0x1636   : > { %11181 = vmatpush3.msk.msra.mxu1 %vm7449_vm6, %v13335_v10  ;;  %11191 = vmatprep.subr.mxu0 %v11792_v2 }
0x1637   : > { %11183 = vmatmul.mubr.msk.f32.vlgmr.msra.gmra.mxu1 %vm6681_vm4, %v13173_v34  ;;  %11192 = vmatpush3.msra.mxu0 %v7918_v6 }
0x1638   : > { %11204 = vmatprep.subr.mxu1 %v11792_v2  ;;  %11193 = vmatprep.subr.mxu0 %v11792_v2 }
0x1639   : > { %11205 = vmatpush3.msra.mxu1 %v7921_v39  ;;  %11194 = vmatpush3.msra.mxu0 %v7917_v4 }
0x163a   : > { %11206 = vmatprep.subr.mxu1 %v11792_v2  ;;  %11195 = vmatprep.subr.mxu0 %v11792_v2 }
0x163b   : > { %11207 = vmatpush3.msra.mxu1 %v7920_v52  ;;  %11196 = vmatpush3.msra.mxu0 %v7916_v35  ;;  %v8407_v52 = vld [vmem:[#allocation7 + $0x728] sm:$0xff] }
0x163c   : > { %11208 = vmatprep.subr.mxu1 %v11792_v2  ;;  %11197 = vmatprep.subr.mxu0 %v11792_v2 }
0x163d   : > { %11209 = vmatpush3.msra.mxu1 %v7919_v11  ;;  %11198 = vmatpush3.msra.mxu0 %v7915_v7  ;;  %v8406_v11 = vld [vmem:[#allocation7 + $0x720] sm:$0xff] }
0x163e   : > { %11210 = vmatprep.subr.mxu1 %v11792_v2  ;;  %11199 = vmatprep.subr.mxu0 %v11792_v2 }
0x163f   : > { %11211 = vmatpush3.msra.mxu1 %v7918_v6  ;;  %11220 = vmatprep.mubr.msk.f32.mxu1 %vm11793_vm3, %v11792_v2  ;;  %v8405_v6 = vld [vmem:[#allocation7 + $0x718] sm:$0xff] }
0x1640   : > { %11212 = vmatprep.subr.mxu1 %v11792_v2  ;;  %11200 = vmatpush3.msra.mxu0 %v7914_v13 }
0x1641   : > { %11213 = vmatpush3.msra.mxu1 %v7917_v4  ;;  %11223 = vmatprep.subr.mxu0 %v11792_v2  ;;  %v8404_v4 = vld [vmem:[#allocation7 + $0x710] sm:$0xff] }
0x1642   : > { %11214 = vmatprep.subr.mxu1 %v11792_v2 }
0x1643   : > { %11215 = vmatpush3.msra.mxu1 %v7916_v35  ;;  %v8403_v35 = vld [vmem:[#allocation7 + $0x708] sm:$0xff] }
0x1644   : > { %11216 = vmatprep.subr.mxu1 %v11792_v2 }
0x1645   : > { %11217 = vmatpush3.msra.mxu1 %v7915_v7  ;;  %v8897_v7 = vld [vmem:[#allocation7 + $0x778] sm:$0xff] }
0x1646   : > { %11218 = vmatprep.subr.mxu1 %v11792_v2 }
0x1647   : > { %11219 = vmatpush3.msra.mxu1 %v7914_v13  ;;  %v8896_v13 = vld [vmem:[#allocation7 + $0x770] sm:$0xff] }
0x1648   : > { %11242 = vmatprep.subr.mxu1 %v11792_v2 }
0x16f0   : > { %v8001_v20 = vpop.f32.mrf.mxu0 }
0x16f1   : > { %v8078_v9 = vmul.f32 %v13280_v32, %v8001_v20  ;;  %v8895_v20 = vld [vmem:[#allocation7 + $0x768] sm:$0xff] }
0x16f2   : > { %v11179_v36 = vpop.f32.mrf.mxu0 }
0x16f3   : > { %11202 = vmatmul.mubr.msk.f32.vlgmr.msra.gmra.mxu0 %vm1241_vm1, %v8078_v9  ;;  %v8894_v9 = vld [vmem:[#allocation7 + $0x760] sm:$0xff]  ;;  %v8892_v36 = vld [vmem:[#allocation7 + $0x750] sm:$0xff] }
0x16f4   : > { %11224 = vmatpush3.msra.mxu0 %v7930_v15  ;;  %11239 = vmatprep.mubr.msk.f32.mxu0 %vm11793_vm3, %v11792_v2 }
0x16f5   : > { %11225 = vmatprep.subr.mxu0 %v11792_v2 }
0x16f6   : > { %11226 = vmatpush3.msra.mxu0 %v7929_v45 }
0x16f7   : > { %11227 = vmatprep.subr.mxu0 %v11792_v2  ;;  %v8074_v47 = vpop.f32.mrf.mxu1 }
0x16f8   : > { %v8079_v40 = vmul.f32 %v13287_v5, %v8074_v47  ;;  %11228 = vmatpush3.msra.mxu0 %v7928_v44  ;;  %v8988_v47 = vld [vmem:[#allocation7 + $0x7b8] sm:$0xff] }
0x16f9   : > { %11229 = vmatprep.subr.mxu0 %v11792_v2  ;;  %v11184_v0 = vpop.f32.mrf.mxu1 }
0x16fa   : > { %11230 = vmatpush3.msra.mxu0 %v7927_v57  ;;  %11221 = vmatmul.mubr.msk.f32.vlgmr.msra.gmra.mxu1 %vm1241_vm1, %v8079_v40  ;;  %v8986_v40 = vld [vmem:[#allocation7 + $0x7a8] sm:$0xff]  ;;  %v8985_v0 = vld [vmem:[#allocation7 + $0x7a0] sm:$0xff] }
0x16fb   : > { %11231 = vmatprep.subr.mxu0 %v11792_v2  ;;  %11243 = vmatpush3.msra.mxu1 %v7930_v15  ;;  %v8893_v15 = vld [vmem:[#allocation7 + $0x758] sm:$0xff] }
0x16fc   : > { %11232 = vmatpush3.msra.mxu0 %v7926_v38  ;;  %11244 = vmatprep.subr.mxu1 %v11792_v2 }
0x16fd   : > { %11233 = vmatprep.subr.mxu0 %v11792_v2  ;;  %11245 = vmatpush3.msra.mxu1 %v7929_v45  ;;  %v8891_v45 = vld [vmem:[#allocation7 + $0x748] sm:$0xff] }
0x16fe   : > { %11234 = vmatpush3.msra.mxu0 %v7925_v50  ;;  %11246 = vmatprep.subr.mxu1 %v11792_v2 }
0x16ff   : > { %11235 = vmatprep.subr.mxu0 %v11792_v2  ;;  %11247 = vmatpush3.msra.mxu1 %v7928_v44  ;;  %v8890_v44 = vld [vmem:[#allocation7 + $0x740] sm:$0xff] }
0x1700   : > { %11236 = vmatpush3.msra.mxu0 %v7924_v48  ;;  %11248 = vmatprep.subr.mxu1 %v11792_v2 }
0x1701   : > { %11237 = vmatprep.subr.mxu0 %v11792_v2  ;;  %11249 = vmatpush3.msra.mxu1 %v7927_v57  ;;  %v8987_v57 = vld [vmem:[#allocation7 + $0x7b0] sm:$0xff] }
0x1702   : > { %11238 = vmatpush3.msra.mxu0 %v7923_v3  ;;  %11250 = vmatprep.subr.mxu1 %v11792_v2 }
0x1703   : > { %11240 = vmatmul.mubr.msk.f32.vlgmr.msra.gmra.mxu0 %vm1241_vm1, %v13325_v63  ;;  %11251 = vmatpush3.msra.mxu1 %v7926_v38  ;;  %v8984_v38 = vld [vmem:[#allocation7 + $0x798] sm:$0xff] }
0x1704   : > { %11252 = vmatprep.subr.mxu1 %v11792_v2  ;;  %11258 = vmatprep.mubr.msk.f32.mxu1 %vm11793_vm3, %v11792_v2 }
0x1705   : > { %11253 = vmatpush3.msra.mxu1 %v7925_v50  ;;  %11261 = vmatprep.subr.mxu0 %v11792_v2 }
0x1706   : > { %11254 = vmatprep.subr.mxu1 %v11792_v2  ;;  %11263 = vmatprep.mubr.msk.f32.mxu0 %vm11793_vm3, %v11792_v2 }
0x1707   : > { %11255 = vmatpush3.msra.mxu1 %v7924_v48 }
0x1708   : > { %11256 = vmatprep.subr.mxu1 %v11792_v2 }
0x1709   : > { %11257 = vmatpush3.msra.mxu1 %v7923_v3 }
0x170a   : > { %11259 = vmatmul.mubr.msk.f32.vlgmr.msra.gmra.mxu1 %vm1241_vm1, %v13335_v10  ;;  %11266 = vmatprep.subr.mxu1 %v11792_v2 }
0x170b   : > { %11268 = vmatprep.mubr.msk.f32.mxu1 %vm11793_vm3, %v11792_v2 }
0x17b3   : > { %v8149_v60 = vpop.f32.mrf.mxu0 }
0x17b5   : > { %v11203_v62 = vpop.f32.mrf.mxu0 }
0x17b6   : > { %v8410_v62 = vld [vmem:[#allocation8 + $0x2d] sm:$0x7] }
0x17ba   : > { %v8222_v23 = vpop.f32.mrf.mxu1 }
0x17bc   : > { %v11222_v27 = vpop.f32.mrf.mxu1 }
0x17c3   : > { %v8294_v58 = vpop.f32.mrf.mxu0 }
0x17c4   : > { %v8370_v28 = vadd.f32 %v8294_v58, %v8149_v60 }
0x17c5   : > { %v11241_v46 = vpop.f32.mrf.mxu0 }
0x17c6   : > { %v8376_v30 = vadd.f32 %v8375_v37, %v8370_v28  ;;  %v8862_v28 = vrot.slane %v8410_v62, %v12210_v55 }
0x17c8   : > { %v8378_v16 = vmax.f32 %v8376_v30, 0.0  ;;  %v8868_v30 = vrot.slane %v8410_v62, %v12216_v12 }
0x17ca   : > { %v8384_v14 = vmul.f32 %v8383_v18, %v8378_v16  ;;  %v8366_v42 = vpop.f32.mrf.mxu1 }
0x17cb   : > { %v8371_v53 = vadd.f32 %v8366_v42, %v8222_v23  ;;  %v8854_v23 = vrot.slane %v8410_v62, %v12200_v33 }
0x17cc   : > { %v13394_v43 = vadd.f32 %v8389_v41, %v8384_v14  ;;  %v11260_v29 = vpop.f32.mrf.mxu1 }
0x17cd   : > { %v8377_v59 = vadd.f32 %v8375_v37, %v8371_v53 }
0x17ce   : > { %11262 = vmatpush3.msk.msra.mxu0 %vm7449_vm6, %v13394_v43 }
0x17cf   : > { %v8379_v1 = vmax.f32 %v8377_v59, 0.0  ;;  %11264 = vmatmul.mubr.msk.f32.vlgmr.msra.gmra.mxu0 %vm6681_vm4, %v13131_v21  ;;  %11271 = vmatprep.subr.mxu0 %v11792_v2  ;;  %v8396_v21 = vld [vmem:[#allocation7 + $0x6d8] sm:$0xff] }
0x17d0   : > { %11272 = vmatpush3.msra.mxu0 %v8400_v25  ;;  %11287 = vmatprep.mubr.msk.f32.mxu0 %vm11793_vm3, %v11792_v2 }
0x17d1   : > { %v8385_v49 = vmul.f32 %v8383_v18, %v8379_v1  ;;  %11273 = vmatprep.subr.mxu0 %v11792_v2 }
0x17d2   : > { %11274 = vmatpush3.msra.mxu0 %v8399_v22 }
0x17d3   : > { %v13404_v8 = vadd.f32 %v8389_v41, %v8385_v49  ;;  %11275 = vmatprep.subr.mxu0 %v11792_v2 }
0x17d4   : > { %11276 = vmatpush3.msra.mxu0 %v8398_v31 }
0x17d5   : > { %11267 = vmatpush3.msk.msra.mxu1 %vm7449_vm6, %v13404_v8  ;;  %11277 = vmatprep.subr.mxu0 %v11792_v2 }
0x17d6   : > { %11269 = vmatmul.mubr.msk.f32.vlgmr.msra.gmra.mxu1 %vm6681_vm4, %v13173_v34  ;;  %11278 = vmatpush3.msra.mxu0 %v8397_v24  ;;  %v8393_v34 = vld [vmem:[#allocation7 + $0x6c0] sm:$0xff] }
0x17d7   : > { %11290 = vmatprep.subr.mxu1 %v11792_v2  ;;  %11279 = vmatprep.subr.mxu0 %v11792_v2 }
0x17d8   : > { %11291 = vmatpush3.msra.mxu1 %v8400_v25  ;;  %11280 = vmatpush3.msra.mxu0 %v8396_v21 }
0x17d9   : > { %11292 = vmatprep.subr.mxu1 %v11792_v2  ;;  %11281 = vmatprep.subr.mxu0 %v11792_v2 }
0x17da   : > { %11293 = vmatpush3.msra.mxu1 %v8399_v22  ;;  %11282 = vmatpush3.msra.mxu0 %v8395_v61 }
0x17db   : > { %11294 = vmatprep.subr.mxu1 %v11792_v2  ;;  %11283 = vmatprep.subr.mxu0 %v11792_v2 }
0x17dc   : > { %11295 = vmatpush3.msra.mxu1 %v8398_v31  ;;  %11284 = vmatpush3.msra.mxu0 %v8394_v56 }
0x17dd   : > { %11296 = vmatprep.subr.mxu1 %v11792_v2  ;;  %11285 = vmatprep.subr.mxu0 %v11792_v2 }
0x17de   : > { %11297 = vmatpush3.msra.mxu1 %v8397_v24  ;;  %11306 = vmatprep.mubr.msk.f32.mxu1 %vm11793_vm3, %v11792_v2 }
0x17df   : > { %11298 = vmatprep.subr.mxu1 %v11792_v2  ;;  %11286 = vmatpush3.msra.mxu0 %v8393_v34 }
0x17e0   : > { %11299 = vmatpush3.msra.mxu1 %v8396_v21  ;;  %11309 = vmatprep.subr.mxu0 %v11792_v2 }
0x17e1   : > { %11300 = vmatprep.subr.mxu1 %v11792_v2 }
0x17e2   : > { %11301 = vmatpush3.msra.mxu1 %v8395_v61 }
0x17e3   : > { %11302 = vmatprep.subr.mxu1 %v11792_v2 }
0x17e4   : > { %11303 = vmatpush3.msra.mxu1 %v8394_v56 }
0x17e5   : > { %11304 = vmatprep.subr.mxu1 %v11792_v2 }
0x17e6   : > { %11305 = vmatpush3.msra.mxu1 %v8393_v34 }
0x17e7   : > { %11328 = vmatprep.subr.mxu1 %v11792_v2 }
0x188f   : > { %v8480_v63 = vpop.f32.mrf.mxu0 }
0x1890   : > { %v8557_v19 = vmul.f32 %v13280_v32, %v8480_v63 }
0x1891   : > { %v11265_v39 = vpop.f32.mrf.mxu0 }
0x1892   : > { %11288 = vmatmul.mubr.msk.f32.vlgmr.msra.gmra.mxu0 %vm1241_vm1, %v8557_v19  ;;  %v8983_v39 = vld [vmem:[#allocation7 + $0x790] sm:$0xff] }
0x1893   : > { %11310 = vmatpush3.msra.mxu0 %v8409_v54  ;;  %11325 = vmatprep.mubr.msk.f32.mxu0 %vm11793_vm3, %v11792_v2 }
0x1894   : > { %11311 = vmatprep.subr.mxu0 %v11792_v2 }
0x1895   : > { %11312 = vmatpush3.msra.mxu0 %v8408_v51 }
0x1896   : > { %11313 = vmatprep.subr.mxu0 %v11792_v2  ;;  %v8553_v17 = vpop.f32.mrf.mxu1 }
0x1897   : > { %v8558_v10 = vmul.f32 %v13287_v5, %v8553_v17  ;;  %11314 = vmatpush3.msra.mxu0 %v8407_v52  ;;  %v8402_v5 = vld [vmem:[#allocation7 + $0x700] sm:$0xff]  ;;  %v9508_v17 = vld [vmem:[#allocation8 + $0x30] ss:$0 sm:$0xff] }
0x1898   : > { %11315 = vmatprep.subr.mxu0 %v11792_v2  ;;  %v11270_v32 = vpop.f32.mrf.mxu1 }
0x1899   : > { %11316 = vmatpush3.msra.mxu0 %v8406_v11  ;;  %11307 = vmatmul.mubr.msk.f32.vlgmr.msra.gmra.mxu1 %vm1241_vm1, %v8558_v10 }
0x189a   : > { %11317 = vmatprep.subr.mxu0 %v11792_v2  ;;  %11329 = vmatpush3.msra.mxu1 %v8409_v54 }
0x189b   : > { %11318 = vmatpush3.msra.mxu0 %v8405_v6  ;;  %11330 = vmatprep.subr.mxu1 %v11792_v2 }
0x189c   : > { %11319 = vmatprep.subr.mxu0 %v11792_v2  ;;  %11331 = vmatpush3.msra.mxu1 %v8408_v51  ;;  %v8982_v51 = vld [vmem:[#allocation7 + $0x788] sm:$0xff] }
0x189d   : > { %11320 = vmatpush3.msra.mxu0 %v8404_v4  ;;  %11332 = vmatprep.subr.mxu1 %v11792_v2 }
0x189e   : > { %11321 = vmatprep.subr.mxu0 %v11792_v2  ;;  %11333 = vmatpush3.msra.mxu1 %v8407_v52  ;;  %v8981_v52 = vld [vmem:[#allocation7 + $0x780] sm:$0xff] }
0x189f   : > { %11322 = vmatpush3.msra.mxu0 %v8403_v35  ;;  %11334 = vmatprep.subr.mxu1 %v11792_v2 }
0x18a0   : > { %11323 = vmatprep.subr.mxu0 %v11792_v2  ;;  %11335 = vmatpush3.msra.mxu1 %v8406_v11 }
0x18a1   : > { %11324 = vmatpush3.msra.mxu0 %v8402_v5  ;;  %11336 = vmatprep.subr.mxu1 %v11792_v2 }
0x18a2   : > { %11326 = vmatmul.mubr.msk.f32.vlgmr.msra.gmra.mxu0 %vm1241_vm1, %v13394_v43  ;;  %11337 = vmatpush3.msra.mxu1 %v8405_v6 }
0x18a3   : > { %11338 = vmatprep.subr.mxu1 %v11792_v2  ;;  %11344 = vmatprep.mubr.msk.f32.mxu1 %vm11793_vm3, %v11792_v2 }
0x18a4   : > { %11339 = vmatpush3.msra.mxu1 %v8404_v4  ;;  %11347 = vmatprep.subr.mxu0 %v11792_v2  ;;  %v9510_v4 = vld [vmem:[#allocation8 + $0x31] ss:$0 sm:$0xff] }
0x18a5   : > { %11340 = vmatprep.subr.mxu1 %v11792_v2  ;;  %11363 = vmatprep.mubr.msk.f32.mxu0 %vm11793_vm3, %v11792_v2 }
0x18a6   : > { %11341 = vmatpush3.msra.mxu1 %v8403_v35  ;;  %11348 = vmatpush3.msra.mxu0 %v8897_v7 }
0x18a7   : > { %11342 = vmatprep.subr.mxu1 %v11792_v2  ;;  %11349 = vmatprep.subr.mxu0 %v11792_v2 }
0x18a8   : > { %11343 = vmatpush3.msra.mxu1 %v8402_v5  ;;  %11350 = vmatpush3.msra.mxu0 %v8896_v13 }
0x18a9   : > { %11345 = vmatmul.mubr.msk.f32.vlgmr.msra.gmra.mxu1 %vm1241_vm1, %v13404_v8  ;;  %11366 = vmatprep.subr.mxu1 %v11792_v2 }
0x18aa   : > { %11382 = vmatprep.mubr.msk.f32.mxu1 %vm11793_vm3, %v11792_v2  ;;  %11351 = vmatprep.subr.mxu0 %v11792_v2 }
0x18ab   : > { %11352 = vmatpush3.msra.mxu0 %v8895_v20  ;;  %11367 = vmatpush3.msra.mxu1 %v8988_v47 }
0x18ac   : > { %11353 = vmatprep.subr.mxu0 %v11792_v2  ;;  %11368 = vmatprep.subr.mxu1 %v11792_v2 }
0x18ad   : > { %11354 = vmatpush3.msra.mxu0 %v8894_v9  ;;  %11369 = vmatpush3.msra.mxu1 %v8987_v57 }
0x18ae   : > { %11355 = vmatprep.subr.mxu0 %v11792_v2  ;;  %11370 = vmatprep.subr.mxu1 %v11792_v2 }
0x18af   : > { %11356 = vmatpush3.msra.mxu0 %v8893_v15  ;;  %11371 = vmatpush3.msra.mxu1 %v8986_v40 }
0x18b0   : > { %11357 = vmatprep.subr.mxu0 %v11792_v2  ;;  %11372 = vmatprep.subr.mxu1 %v11792_v2 }
0x18b1   : > { %11358 = vmatpush3.msra.mxu0 %v8892_v36  ;;  %11373 = vmatpush3.msra.mxu1 %v8985_v0 }
0x18b2   : > { %11359 = vmatprep.subr.mxu0 %v11792_v2  ;;  %11374 = vmatprep.subr.mxu1 %v11792_v2 }
0x18b3   : > { %11360 = vmatpush3.msra.mxu0 %v8891_v45  ;;  %11375 = vmatpush3.msra.mxu1 %v8984_v38 }
0x18b4   : > { %11361 = vmatprep.subr.mxu0 %v11792_v2  ;;  %11376 = vmatprep.subr.mxu1 %v11792_v2 }
0x18b5   : > { %11362 = vmatpush3.msra.mxu0 %v8890_v44  ;;  %11377 = vmatpush3.msra.mxu1 %v8983_v39 }
0x18b6   : > { %11378 = vmatprep.subr.mxu1 %v11792_v2 }
0x18b7   : > { %11379 = vmatpush3.msra.mxu1 %v8982_v51 }
0x18b8   : > { %11380 = vmatprep.subr.mxu1 %v11792_v2 }
0x18b9   : > { %11381 = vmatpush3.msra.mxu1 %v8981_v52 }
0x1952   : > { %v8628_v50 = vpop.f32.mrf.mxu0 }
0x1954   : > { %v11289_v48 = vpop.f32.mrf.mxu0 }
0x1959   : > { %v8701_v3 = vpop.f32.mrf.mxu1 }
0x195b   : > { %v11308_v60 = vpop.f32.mrf.mxu1 }
0x1962   : > { %v8773_v27 = vpop.f32.mrf.mxu0 }
0x1963   : > { %v8849_v26 = vadd.f32 %v8773_v27, %v8628_v50 }
0x1964   : > { %v11327_v37 = vpop.f32.mrf.mxu0 }
0x1965   : > { %v8855_v58 = vadd.f32 %v8854_v23, %v8849_v26 }
0x1967   : > { %v8857_v46 = vmax.f32 %v8855_v58, 0.0 }
0x1969   : > { %v8863_v18 = vmul.f32 %v8862_v28, %v8857_v46  ;;  %v8845_v16 = vpop.f32.mrf.mxu1 }
0x196a   : > { %v8850_v41 = vadd.f32 %v8845_v16, %v8701_v3 }
0x196b   : > { %v8869_v14 = vadd.f32 %v8868_v30, %v8863_v18  ;;  %v11346_v42 = vpop.f32.mrf.mxu1 }
0x196c   : > { %v8856_v53 = vadd.f32 %v8854_v23, %v8850_v41 }
0x196d   : > { %v8872_v43 = vsel %vm8871_vm13, %v8869_v14, 0.0 }
0x196e   : > { %v8873_v29 = vrot.slane %v8872_v43, 4  ;;  %v8858_v33 = vmax.f32 %v8856_v53, 0.0 }
0x1970   : > { %v8874_v59 = vadd.f32 %v8873_v29, %v8872_v43  ;;  %v8864_v25 = vmul.f32 %v8862_v28, %v8858_v33 }
0x1972   : > { %v8875_v1 = vrot.slane %v8874_v59, 2  ;;  %v8870_v22 = vadd.f32 %v8868_v30, %v8864_v25 }
0x1974   : > { %v8879_v55 = vsel %vm8871_vm13, %v8870_v22, 0.0  ;;  %v8876_v49 = vadd.f32 %v8875_v1, %v8874_v59 }
0x1975   : > { %v8880_v31 = vrot.slane %v8879_v55, 4 }
0x1976   : > { %v8877_v8 = vrot.slane %v8876_v49, 1 }
0x1977   : > { %v8881_v12 = vadd.f32 %v8880_v31, %v8879_v55 }
0x1978   : > { %v8878_v56 = vadd.f32 %v8877_v8, %v8876_v49 }
0x1979   : > { %v8882_v24 = vrot.slane %v8881_v12, 2 }
0x197a   : > { %v8887_v63 = vmul.f32 0.5, %v8878_v56 }
0x197b   : > { %v8883_v21 = vadd.f32 %v8882_v24, %v8881_v12 }
0x197d   : > { %v8884_v61 = vrot.slane %v8883_v21, 1 }
0x197f   : > { %v8885_v34 = vadd.f32 %v8884_v61, %v8883_v21 }
0x1981   : > { %v8888_v19 = vmul.f32 0.5, %v8885_v34 }
0x1983   : > { %v8906_v54 = vsel %vm8905_vm14, %v8888_v19, %v8887_v63 }
0x1984   : > { %11364 = vmatmul.mubr.msk.f32.vlgmr.msra.gmra.mxu0 %vm1241_vm1, %v8906_v54 }
0x1a44   : > { %v8975_v11 = vpop.f32.mrf.mxu0 }
0x1a45   : > { %v8976_v10 = vadd.f32 %v9508_v17, %v8975_v11 }
0x1a46   : > { %v11365_v32 = vpop.f32.mrf.mxu0 }
0x1a47   : > { %v8979_v6 = vmax.f32 %v8976_v10, 0.0 }
0x1a49   : > { %11383 = vmatmul.mubr.msk.f32.vlgmr.msra.gmra.mxu1 %vm1241_vm1, %v8979_v6 }
0x1b09   : > { %v9063_v35 = vpop.f32.mrf.mxu1 }
0x1b0a   : > { %v9064_v5 = vadd.f32 %v9510_v4, %v9063_v35 }
0x1b0b   : > { %v11384_v2 = vpop.f32.mrf.mxu1 }
0x1b0c   : > { %9067 = vst.msk [vmem:[%s378_s10] sm:$0x3] %vm8871_vm13, %v9064_v5 }
0x1b0d   : > { %11724 = shalt.err (!%p11721_p4)
}
0x1b0e   : > { %s11725_s16 = scalar_lea.hbm %s13486_s11, 32  ;;  %s11729_s9 = scalar_lea.hbm %s13530_s6, 64 }
0x1b0f   : > { %p11726_p8 = scmp.ne.s32.totalorder %s13486_s11, %s11725_s16  ;;  %p11730_p5 = scmp.lt.s32.totalorder %s13486_s11, %s13530_s6 }
0x1b10   : > { %p11731_p7 = scmp.lt.s32.totalorder %s11729_s9, %s11725_s16 }
0x1b11   : > { %p11727_p3 = pnand %p11726_p8, %p13624_p9 }
0x1b12   : > { %p11732_p1 = por %p11731_p7, %p11730_p5 }
0x1b13   : > { %p11728_p11 = pneg %p11727_p3 }
0x1b15   : > { %p11733_p12 = pnand %p11732_p1, %p11728_p11 }
0x1b17   : > { %11736 = shalt.err (!%p11733_p12)
}
0x1b18   : > { %11419 = dma.vmem_to_hbm [thread:$0]  (%p13624_p9), %s9105_s13, 32, %s13486_s11, %s9088_s21  }
0x1b19 PF: > { %s9119_s30 = sand.u32 1, %s11771_s24   ;;  %p13625_p13 = scmp.ne.s32.totalorder %s13564_s8, 0 }
0x1b1a   : > { %p13626_p0 = scmp.ge.s32.totalorder %s11783_s27, 2  ;;  %s9120_s10 = scalar_lea.sflag [#allocation4], %s9119_s30 }
0x1b1c   : > { %p11436_p2 = pnand %p13626_p0, %p13625_p13 }
0x1b1e   : > { %p11437_p10 = pneg %p11436_p2 }
0x1b20   : > { %11766 = dma.done.wait (%p11437_p10), %s9120_s10, 32  }
0x1b21   : > { %11768 = vsyncadd (%p11437_p10), %s9120_s10, 4294967264  ;;  %p23_p6 = scmp.ge.s32.totalorder %s11924_s14, 4   ;;  %s13627_s24 = smov %s11775_s25 }
0x1b22   : > { %s13628_s25 = smov %s11779_s26  ;;  %s13629_s26 = smov %s11934_s17 }
0x1b23   : > { %s13630_s27 = smov %s11924_s14  ;;  %25 = sbr.rel (!%p23_p6) target bundleno = 10 (0xa), region = 152 }
0x1b28   :  { %9131 = vsyncpa [#allocation3], 1 }
0x1b29   :  { %9133 = vsyncpa [#allocation3 + $0x1], 1 }
0x1b2a   :  { %9134 = vsyncpa [#allocation6], 1 }
0x1b2b   :  { %9135 = vsyncpa [#allocation9], 1 }
0x1b2c   :  { %9136 = vsyncpa [#allocation4], 1 }
0x1b2d   :  { %9138 = vsyncpa [#allocation4 + $0x1], 1 }

</bundles_post_ra>
